<compile_context>
chip_gen: v6e
topology: v6e:2x2x1
jax: 0.10.0
libtpu: 0.0.40
codegen_flags: <defaults>
</compile_context>

<pallas_src>
import functools

import jax
import jax.numpy as jnp
from jax.experimental import pallas as pl
from jax.experimental.pallas import tpu as pltpu

POSE = 8      # packed pose lanes: 0:3 rot, 3:6 cam_t/wp, 6 radian, 7 pad
OUT_LANES = 16  # output lanes: 0:8 pose, 8:11 cam_t/wp.init, rest zero


def _obj_hmr_kernel(
    feat_ref,                       # (Bp, C) pooled features, f32
    w1_ref, b1_ref,                 # cam_init Linear(C, 512)          bf16 / f32
    w2_ref, b2_ref,                 # cam_init Linear(512, 512)        bf16 / f32
    w3p_ref, b3p_ref,               # cam_init Linear(512, POSE) packed, f32
    b0_ref, br1_ref, bdp_ref,       # refine / decoder biases, f32
    w0p_ref,                        # refine W0 pose rows (POSE, mid), f32
    wdp_ref,                        # merged decoder (mid, POSE), f32
    w0f_hbm, wr1_hbm,               # big refine weights in HBM (ANY), bf16
    out_ref,                        # (Bp, OUT_LANES) packed output, f32
    w0f_v, wr1_v,                   # VMEM scratch for the big weights
    sem,                            # DMA semaphores (2,)
    *, n_iter,
):
    f32 = jnp.float32
    bf16 = jnp.bfloat16

    # Kick off the big-weight DMAs immediately; they overlap the cam_init MLP.
    cp_w0f = pltpu.make_async_copy(w0f_hbm, w0f_v, sem.at[0])
    cp_wr1 = pltpu.make_async_copy(wr1_hbm, wr1_v, sem.at[1])
    cp_w0f.start()
    cp_wr1.start()

    feat = feat_ref[...]                       # (Bp, C) f32 (pool done outside)
    feat_bf = feat.astype(bf16)

    # cam_init MLP: Linear -> ReLU -> Linear -> ReLU -> Linear (packed 8-lane head).
    h = jnp.maximum(
        jnp.dot(feat_bf, w1_ref[...], preferred_element_type=f32) + b1_ref[...], 0.0)
    h = jnp.maximum(
        jnp.dot(h.astype(bf16), w2_ref[...], preferred_element_type=f32) + b2_ref[...], 0.0)
    # pose lanes: 0:3 rot (=0), 3:6 cam_t/wp, 6 radian (=0), 7 pad (=0).
    pose = jnp.dot(h, w3p_ref[...], preferred_element_type=f32) + b3p_ref[...]   # (Bp, POSE)
    cam_init = pose[:, 3:6]                    # keep init camera in a register

    # Small loop-invariant operands (already in VMEM via auto-copy).
    w0p = w0p_ref[...]
    wdp = wdp_ref[...]
    br1 = br1_ref[...]
    bdp = bdp_ref[...]

    # Staggered wait #1: feat-side projection needs w0f only.
    cp_w0f.wait()
    feat_proj = jnp.dot(feat_bf, w0f_v[...], preferred_element_type=f32) + b0_ref[...]

    # ---- HMRLayer iteration 1, peeled so the wr1 wait lands as late as possible.
    state = feat_proj + jnp.dot(pose, w0p, preferred_element_type=f32)
    h1 = jnp.maximum(state, 0.0)
    cp_wr1.wait()                               # staggered wait #2: first use of wr1
    wr1 = wr1_v[...]
    h2 = jnp.maximum(
        jnp.dot(h1.astype(bf16), wr1, preferred_element_type=f32) + br1, 0.0)
    pose = pose + jnp.dot(h2, wdp, preferred_element_type=f32) + bdp

    # ---- Remaining iterations (Dropout = identity in eval mode).
    for _ in range(n_iter - 1):
        state = feat_proj + jnp.dot(pose, w0p, preferred_element_type=f32)
        h1 = jnp.maximum(state, 0.0)
        h2 = jnp.maximum(
            jnp.dot(h1.astype(bf16), wr1, preferred_element_type=f32) + br1, 0.0)
        pose = pose + jnp.dot(h2, wdp, preferred_element_type=f32) + bdp

    # Single dense store: lanes 0:8 final pose, 8:11 cam_t/wp.init, 11:16 zero.
    zeros_tail = jnp.zeros((pose.shape[0], OUT_LANES - POSE - 3), f32)
    out_ref[...] = jnp.concatenate([pose, cam_init, zeros_tail], axis=1)


# ------------------------- parameter setup (plain JAX glue) -------------------------

def make_params(key, feat_dim, mid_dim=1024):
    """Deterministic synthetic parameters with the same shapes as the PyTorch module."""
    ks = jax.random.split(key, 16)

    def w(k, shape, scale=0.02):
        return jax.random.normal(k, shape, jnp.float32) * scale

    hmr_dim = feat_dim + 3 + 3 + 1   # feat + rot + cam_t/wp + radian
    p = {}
    # cam_init = Linear(feat_dim,512) -> ReLU -> Linear(512,512) -> ReLU -> Linear(512,3)
    p["w1"] = w(ks[0], (feat_dim, 512)); p["b1"] = w(ks[1], (512,), 0.01)
    p["w2"] = w(ks[2], (512, 512));      p["b2"] = w(ks[3], (512,), 0.01)
    p["w3"] = w(ks[4], (512, 3));        p["b3"] = w(ks[5], (3,), 0.01)
    # HMRLayer.refine = Linear(hmr_dim,1024) -> ReLU -> Dropout -> Linear(1024,1024) -> ReLU -> Dropout
    p["w0"]  = w(ks[6], (hmr_dim, mid_dim)); p["b0"]  = w(ks[7], (mid_dim,), 0.01)
    p["wr1"] = w(ks[8], (mid_dim, mid_dim)); p["br1"] = w(ks[9], (mid_dim,), 0.01)
    # decoders
    p["wdrot"] = w(ks[10], (mid_dim, 3)); p["bdrot"] = w(ks[11], (3,), 0.01)
    p["wdcam"] = w(ks[12], (mid_dim, 3)); p["bdcam"] = w(ks[13], (3,), 0.01)
    p["wdrad"] = w(ks[14], (mid_dim, 1)); p["bdrad"] = w(ks[15], (1,), 0.01)
    return p


def _row(b):
    return jnp.asarray(b, jnp.float32).reshape(1, -1)


def prepare_params(p, feat_dim, mid_dim=1024):
    """One-time weight packing / casting (hoisted out of the forward path)."""
    f32, bf16 = jnp.float32, jnp.bfloat16
    C = feat_dim

    # cam_init head packed into the pose layout (cols 3:6 = cam_t/wp).
    w3p = jnp.zeros((512, POSE), f32).at[:, 3:6].set(p["w3"])
    b3p = jnp.zeros((1, POSE), f32).at[:, 3:6].set(_row(p["b3"]))

    # Refine first Linear, row-split: feat rows (C, mid) + pose rows (POSE, mid).
    w0 = p["w0"]
    w0f = w0[:C].astype(bf16)
    w0p = jnp.zeros((POSE, mid_dim), f32).at[0:7, :].set(w0[C:C + 7])

    # Merged decoder: cols 0:3 rot, 3:6 cam_t/wp, 6 radian, 7 zero.
    wdp = (jnp.zeros((mid_dim, POSE), f32)
           .at[:, 0:3].set(p["wdrot"]).at[:, 3:6].set(p["wdcam"]).at[:, 6:7].set(p["wdrad"]))
    bdp = (jnp.zeros((1, POSE), f32)
           .at[:, 0:3].set(_row(p["bdrot"])).at[:, 3:6].set(_row(p["bdcam"]))
           .at[:, 6:7].set(_row(p["bdrad"])))

    return {
        "w1": p["w1"].astype(bf16), "b1": _row(p["b1"]),
        "w2": p["w2"].astype(bf16), "b2": _row(p["b2"]),
        "w3p": w3p, "b3p": b3p,
        "b0": _row(p["b0"]), "br1": _row(p["br1"]), "bdp": bdp,
        "w0p": w0p, "wdp": wdp,
        "w0f": w0f, "wr1": p["wr1"].astype(bf16),
    }


# ------------------------------- forward wrappers -----------------------------------

def object_hmr_forward(features, pk, n_iter):
    """Pallas ObjectHMR.forward(features, use_pool=True). features: NCHW float32.

    `pk` must come from prepare_params() (pre-packed, pre-cast weights)."""
    assert n_iter >= 1
    B, C, H, W = features.shape
    mid = pk["wr1"].shape[0]
    Bp = ((B + 7) // 8) * 8                     # pad batch (sublane) dim to 8

    # AdaptiveAvgPool2d(1) + view(B, -1) in plain XLA; kernel stays weight-bound.
    feat = features.reshape(B, C, H * W).astype(jnp.float32).mean(-1)   # (B, C)
    feat = jnp.pad(feat, ((0, Bp - B), (0, 0)))                         # (Bp, C)

    # Advisory cost estimate so XLA schedules neighbours around this short call.
    weight_bytes = sum(int(v.size) * v.dtype.itemsize for v in pk.values())
    flops = 2 * Bp * (C * 512 + 512 * 512 + 512 * POSE + C * mid
                      + n_iter * (POSE * mid + mid * mid + mid * POSE))
    cost = pl.CostEstimate(
        flops=int(flops), transcendentals=0,
        bytes_accessed=int(weight_bytes + feat.size * 4 + Bp * OUT_LANES * 4))

    vmem_spec = pl.BlockSpec(memory_space=pltpu.MemorySpace.VMEM)
    any_spec = pl.BlockSpec(memory_space=pl.ANY)
    in_specs = [vmem_spec] * 12 + [any_spec] * 2

    out = pl.pallas_call(
        functools.partial(_obj_hmr_kernel, n_iter=n_iter),
        out_shape=jax.ShapeDtypeStruct((Bp, OUT_LANES), jnp.float32),
        in_specs=in_specs,
        out_specs=vmem_spec,
        scratch_shapes=[
            pltpu.VMEM((C, mid), jnp.bfloat16),      # w0 feat rows
            pltpu.VMEM((mid, mid), jnp.bfloat16),    # wr1
            pltpu.SemaphoreType.DMA((2,)),
        ],
        compiler_params=pltpu.CompilerParams(vmem_limit_bytes=32 << 20),
        cost_estimate=cost,
    )(feat,
      pk["w1"], pk["b1"], pk["w2"], pk["b2"], pk["w3p"], pk["b3p"],
      pk["b0"], pk["br1"], pk["bdp"], pk["w0p"], pk["wdp"],
      pk["w0f"], pk["wr1"])

    return {
        "rot": out[:B, 0:3],
        "cam_t.wp": out[:B, 3:6],
        "radian": out[:B, 6:7],
        "cam_t.wp.init": out[:B, 8:11],
    }


def object_hmr_reference(features, p, n_iter):
    """Pure-JAX reference matching the PyTorch forward (eval mode), full f32."""
    B, C, H, W = features.shape
    feat = features.reshape(B, C, H * W).mean(-1)
    h = jax.nn.relu(feat @ p["w1"] + p["b1"])
    h = jax.nn.relu(h @ p["w2"] + p["b2"])
    cam = h @ p["w3"] + p["b3"]
    cam_init = cam
    rot = jnp.zeros((B, 3), jnp.float32)
    rad = jnp.zeros((B, 1), jnp.float32)
    for _ in range(n_iter):
        state = jnp.concatenate([feat, rot, cam, rad], axis=1)
        h1 = jax.nn.relu(state @ p["w0"] + p["b0"])
        h2 = jax.nn.relu(h1 @ p["wr1"] + p["br1"])
        rot = rot + h2 @ p["wdrot"] + p["bdrot"]
        cam = cam + h2 @ p["wdcam"] + p["bdcam"]
        rad = rad + h2 @ p["wdrad"] + p["bdrad"]
    return {"rot": rot, "cam_t.wp": cam, "radian": rad, "cam_t.wp.init": cam_init}


if __name__ == "__main__":
    key = jax.random.PRNGKey(0)
    kx, kp = jax.random.split(key)

    B, C, H, W = 2, 64, 16, 16    # feat_dim = 64
    n_iter = 3

    features = jax.random.normal(kx, (B, C, H, W), jnp.float32)
    params = make_params(kp, C)
    packed = prepare_params(params, C)          # one-time packing, outside forward

    out = object_hmr_forward(features, packed, n_iter)
    jax.block_until_ready(out)

    ref = object_hmr_reference(features, params, n_iter)
    for k in out:
        assert out[k].shape == ref[k].shape, (k, out[k].shape, ref[k].shape)
        assert jnp.allclose(out[k], ref[k], rtol=2e-2, atol=2e-2), k

    print("KERNEL_OK")
</pallas_src>

<mosaic_0001>
module attributes {stable_mosaic.version = 11 : i64} {
  func.func @_obj_hmr_kernel(%arg0: memref<8x64xf32, #tpu.memory_space<vmem>>, %arg1: memref<64x512xbf16, #tpu.memory_space<vmem>>, %arg2: memref<1x512xf32, #tpu.memory_space<vmem>>, %arg3: memref<512x512xbf16, #tpu.memory_space<vmem>>, %arg4: memref<1x512xf32, #tpu.memory_space<vmem>>, %arg5: memref<512x8xf32, #tpu.memory_space<vmem>>, %arg6: memref<1x8xf32, #tpu.memory_space<vmem>>, %arg7: memref<1x1024xf32, #tpu.memory_space<vmem>>, %arg8: memref<1x1024xf32, #tpu.memory_space<vmem>>, %arg9: memref<1x8xf32, #tpu.memory_space<vmem>>, %arg10: memref<8x1024xf32, #tpu.memory_space<vmem>>, %arg11: memref<1024x8xf32, #tpu.memory_space<vmem>>, %arg12: memref<64x1024xbf16, #tpu.memory_space<any>>, %arg13: memref<1024x1024xbf16, #tpu.memory_space<any>>, %arg14: memref<8x16xf32, #tpu.memory_space<vmem>>, %arg15: memref<64x1024xbf16, #tpu.memory_space<vmem>>, %arg16: memref<1024x1024xbf16, #tpu.memory_space<vmem>>, %arg17: memref<2x!tpu.dma_semaphore, #tpu.memory_space<semaphore_mem>>) attributes {dimension_semantics = [], scalar_prefetch = 0 : i64, scratch_operands = 3 : i64, tpu.core_type = #tpu.core_type<tc>} {
    %c0_i32 = arith.constant 0 : i32
    %0 = tpu.memref_slice %arg17[%c0_i32] : memref<2x!tpu.dma_semaphore, #tpu.memory_space<semaphore_mem>> -> memref<1x!tpu.dma_semaphore, #tpu.memory_space<semaphore_mem>>
    %1 = tpu.memref_squeeze %0 : memref<1x!tpu.dma_semaphore, #tpu.memory_space<semaphore_mem>> -> memref<!tpu.dma_semaphore, #tpu.memory_space<semaphore_mem>>
    tpu.enqueue_dma source(%arg12 : memref<64x1024xbf16, #tpu.memory_space<any>>) target(%arg15 : memref<64x1024xbf16, #tpu.memory_space<vmem>>) target_semaphore(%1 : memref<!tpu.dma_semaphore, #tpu.memory_space<semaphore_mem>>)
    %c1_i32 = arith.constant 1 : i32
    %2 = tpu.memref_slice %arg17[%c1_i32] : memref<2x!tpu.dma_semaphore, #tpu.memory_space<semaphore_mem>> -> memref<1x!tpu.dma_semaphore, #tpu.memory_space<semaphore_mem>>
    %3 = tpu.memref_squeeze %2 : memref<1x!tpu.dma_semaphore, #tpu.memory_space<semaphore_mem>> -> memref<!tpu.dma_semaphore, #tpu.memory_space<semaphore_mem>>
    tpu.enqueue_dma source(%arg13 : memref<1024x1024xbf16, #tpu.memory_space<any>>) target(%arg16 : memref<1024x1024xbf16, #tpu.memory_space<vmem>>) target_semaphore(%3 : memref<!tpu.dma_semaphore, #tpu.memory_space<semaphore_mem>>)
    %c0 = arith.constant 0 : index
    %c0_0 = arith.constant 0 : index
    %4 = vector.load %arg0[%c0, %c0_0] : memref<8x64xf32, #tpu.memory_space<vmem>>, vector<8x64xf32>
    %5 = arith.truncf %4 : vector<8x64xf32> to vector<8x64xbf16>
    %c0_1 = arith.constant 0 : index
    %c0_2 = arith.constant 0 : index
    %6 = vector.load %arg1[%c0_1, %c0_2] : memref<64x512xbf16, #tpu.memory_space<vmem>>, vector<64x512xbf16>
    %cst = arith.constant dense<0.000000e+00> : vector<8x512xf32>
    %7 = tpu.matmul %5, %6, %cst {dimension_numbers = #tpu.dot_dimension_numbers<[1], [0], [0], [1], [0, 0, 1, 1], [], []>} : vector<8x64xbf16>, vector<64x512xbf16>, vector<8x512xf32> -> vector<8x512xf32>
    %c0_3 = arith.constant 0 : index
    %c0_4 = arith.constant 0 : index
    %8 = vector.load %arg2[%c0_3, %c0_4] : memref<1x512xf32, #tpu.memory_space<vmem>>, vector<1x512xf32>
    %9 = vector.broadcast %8 : vector<1x512xf32> to vector<8x512xf32>
    %10 = arith.addf %7, %9 : vector<8x512xf32>
    %cst_5 = arith.constant 0.000000e+00 : f32
    %11 = vector.broadcast %cst_5 : f32 to vector<8x512xf32>
    %12 = arith.maximumf %10, %11 : vector<8x512xf32>
    %13 = arith.truncf %12 : vector<8x512xf32> to vector<8x512xbf16>
    %c0_6 = arith.constant 0 : index
    %c0_7 = arith.constant 0 : index
    %14 = vector.load %arg3[%c0_6, %c0_7] : memref<512x512xbf16, #tpu.memory_space<vmem>>, vector<512x512xbf16>
    %cst_8 = arith.constant dense<0.000000e+00> : vector<8x512xf32>
    %15 = tpu.matmul %13, %14, %cst_8 {dimension_numbers = #tpu.dot_dimension_numbers<[1], [0], [0], [1], [0, 0, 1, 1], [], []>} : vector<8x512xbf16>, vector<512x512xbf16>, vector<8x512xf32> -> vector<8x512xf32>
    %c0_9 = arith.constant 0 : index
    %c0_10 = arith.constant 0 : index
    %16 = vector.load %arg4[%c0_9, %c0_10] : memref<1x512xf32, #tpu.memory_space<vmem>>, vector<1x512xf32>
    %17 = vector.broadcast %16 : vector<1x512xf32> to vector<8x512xf32>
    %18 = arith.addf %15, %17 : vector<8x512xf32>
    %cst_11 = arith.constant 0.000000e+00 : f32
    %19 = vector.broadcast %cst_11 : f32 to vector<8x512xf32>
    %20 = arith.maximumf %18, %19 : vector<8x512xf32>
    %c0_12 = arith.constant 0 : index
    %c0_13 = arith.constant 0 : index
    %21 = vector.load %arg5[%c0_12, %c0_13] : memref<512x8xf32, #tpu.memory_space<vmem>>, vector<512x8xf32>
    %cst_14 = arith.constant dense<0.000000e+00> : vector<8x8xf32>
    %22 = tpu.matmul %20, %21, %cst_14 {dimension_numbers = #tpu.dot_dimension_numbers<[1], [0], [0], [1], [0, 0, 1, 1], [], []>} : vector<8x512xf32>, vector<512x8xf32>, vector<8x8xf32> -> vector<8x8xf32>
    %c0_15 = arith.constant 0 : index
    %c0_16 = arith.constant 0 : index
    %23 = vector.load %arg6[%c0_15, %c0_16] : memref<1x8xf32, #tpu.memory_space<vmem>>, vector<1x8xf32>
    %24 = vector.broadcast %23 : vector<1x8xf32> to vector<8x8xf32>
    %25 = arith.addf %22, %24 : vector<8x8xf32>
    %26 = vector.extract_strided_slice %25 {offsets = [0, 3], sizes = [8, 3], strides = [1, 1]} : vector<8x8xf32> to vector<8x3xf32>
    %c0_17 = arith.constant 0 : index
    %c0_18 = arith.constant 0 : index
    %27 = vector.load %arg10[%c0_17, %c0_18] : memref<8x1024xf32, #tpu.memory_space<vmem>>, vector<8x1024xf32>
    %c0_19 = arith.constant 0 : index
    %c0_20 = arith.constant 0 : index
    %28 = vector.load %arg11[%c0_19, %c0_20] : memref<1024x8xf32, #tpu.memory_space<vmem>>, vector<1024x8xf32>
    %c0_21 = arith.constant 0 : index
    %c0_22 = arith.constant 0 : index
    %29 = vector.load %arg8[%c0_21, %c0_22] : memref<1x1024xf32, #tpu.memory_space<vmem>>, vector<1x1024xf32>
    %c0_23 = arith.constant 0 : index
    %c0_24 = arith.constant 0 : index
    %30 = vector.load %arg9[%c0_23, %c0_24] : memref<1x8xf32, #tpu.memory_space<vmem>>, vector<1x8xf32>
    %c0_i32_25 = arith.constant 0 : i32
    %31 = tpu.memref_slice %arg17[%c0_i32_25] : memref<2x!tpu.dma_semaphore, #tpu.memory_space<semaphore_mem>> -> memref<1x!tpu.dma_semaphore, #tpu.memory_space<semaphore_mem>>
    %32 = tpu.memref_squeeze %31 : memref<1x!tpu.dma_semaphore, #tpu.memory_space<semaphore_mem>> -> memref<!tpu.dma_semaphore, #tpu.memory_space<semaphore_mem>>
    tpu.wait_dma2 semaphore(%32 : memref<!tpu.dma_semaphore, #tpu.memory_space<semaphore_mem>>) src(%arg12 : memref<64x1024xbf16, #tpu.memory_space<any>>) dst(%arg15 : memref<64x1024xbf16, #tpu.memory_space<vmem>>)
    %c0_26 = arith.constant 0 : index
    %c0_27 = arith.constant 0 : index
    %33 = vector.load %arg15[%c0_26, %c0_27] : memref<64x1024xbf16, #tpu.memory_space<vmem>>, vector<64x1024xbf16>
    %cst_28 = arith.constant dense<0.000000e+00> : vector<8x1024xf32>
    %34 = tpu.matmul %5, %33, %cst_28 {dimension_numbers = #tpu.dot_dimension_numbers<[1], [0], [0], [1], [0, 0, 1, 1], [], []>} : vector<8x64xbf16>, vector<64x1024xbf16>, vector<8x1024xf32> -> vector<8x1024xf32>
    %c0_29 = arith.constant 0 : index
    %c0_30 = arith.constant 0 : index
    %35 = vector.load %arg7[%c0_29, %c0_30] : memref<1x1024xf32, #tpu.memory_space<vmem>>, vector<1x1024xf32>
    %36 = vector.broadcast %35 : vector<1x1024xf32> to vector<8x1024xf32>
    %37 = arith.addf %34, %36 : vector<8x1024xf32>
    %cst_31 = arith.constant dense<0.000000e+00> : vector<8x1024xf32>
    %38 = tpu.matmul %25, %27, %cst_31 {dimension_numbers = #tpu.dot_dimension_numbers<[1], [0], [0], [1], [0, 0, 1, 1], [], []>} : vector<8x8xf32>, vector<8x1024xf32>, vector<8x1024xf32> -> vector<8x1024xf32>
    %39 = arith.addf %37, %38 : vector<8x1024xf32>
    %cst_32 = arith.constant 0.000000e+00 : f32
    %40 = vector.broadcast %cst_32 : f32 to vector<8x1024xf32>
    %41 = arith.maximumf %39, %40 : vector<8x1024xf32>
    %c1_i32_33 = arith.constant 1 : i32
    %42 = tpu.memref_slice %arg17[%c1_i32_33] : memref<2x!tpu.dma_semaphore, #tpu.memory_space<semaphore_mem>> -> memref<1x!tpu.dma_semaphore, #tpu.memory_space<semaphore_mem>>
    %43 = tpu.memref_squeeze %42 : memref<1x!tpu.dma_semaphore, #tpu.memory_space<semaphore_mem>> -> memref<!tpu.dma_semaphore, #tpu.memory_space<semaphore_mem>>
    tpu.wait_dma2 semaphore(%43 : memref<!tpu.dma_semaphore, #tpu.memory_space<semaphore_mem>>) src(%arg13 : memref<1024x1024xbf16, #tpu.memory_space<any>>) dst(%arg16 : memref<1024x1024xbf16, #tpu.memory_space<vmem>>)
    %c0_34 = arith.constant 0 : index
    %c0_35 = arith.constant 0 : index
    %44 = vector.load %arg16[%c0_34, %c0_35] : memref<1024x1024xbf16, #tpu.memory_space<vmem>>, vector<1024x1024xbf16>
    %45 = arith.truncf %41 : vector<8x1024xf32> to vector<8x1024xbf16>
    %cst_36 = arith.constant dense<0.000000e+00> : vector<8x1024xf32>
    %46 = tpu.matmul %45, %44, %cst_36 {dimension_numbers = #tpu.dot_dimension_numbers<[1], [0], [0], [1], [0, 0, 1, 1], [], []>} : vector<8x1024xbf16>, vector<1024x1024xbf16>, vector<8x1024xf32> -> vector<8x1024xf32>
    %47 = vector.broadcast %29 : vector<1x1024xf32> to vector<8x1024xf32>
    %48 = arith.addf %46, %47 : vector<8x1024xf32>
    %cst_37 = arith.constant 0.000000e+00 : f32
    %49 = vector.broadcast %cst_37 : f32 to vector<8x1024xf32>
    %50 = arith.maximumf %48, %49 : vector<8x1024xf32>
    %cst_38 = arith.constant dense<0.000000e+00> : vector<8x8xf32>
    %51 = tpu.matmul %50, %28, %cst_38 {dimension_numbers = #tpu.dot_dimension_numbers<[1], [0], [0], [1], [0, 0, 1, 1], [], []>} : vector<8x1024xf32>, vector<1024x8xf32>, vector<8x8xf32> -> vector<8x8xf32>
    %52 = arith.addf %25, %51 : vector<8x8xf32>
    %53 = vector.broadcast %30 : vector<1x8xf32> to vector<8x8xf32>
    %54 = arith.addf %52, %53 : vector<8x8xf32>
    %cst_39 = arith.constant dense<0.000000e+00> : vector<8x1024xf32>
    %55 = tpu.matmul %54, %27, %cst_39 {dimension_numbers = #tpu.dot_dimension_numbers<[1], [0], [0], [1], [0, 0, 1, 1], [], []>} : vector<8x8xf32>, vector<8x1024xf32>, vector<8x1024xf32> -> vector<8x1024xf32>
    %56 = arith.addf %37, %55 : vector<8x1024xf32>
    %cst_40 = arith.constant 0.000000e+00 : f32
    %57 = vector.broadcast %cst_40 : f32 to vector<8x1024xf32>
    %58 = arith.maximumf %56, %57 : vector<8x1024xf32>
    %59 = arith.truncf %58 : vector<8x1024xf32> to vector<8x1024xbf16>
    %cst_41 = arith.constant dense<0.000000e+00> : vector<8x1024xf32>
    %60 = tpu.matmul %59, %44, %cst_41 {dimension_numbers = #tpu.dot_dimension_numbers<[1], [0], [0], [1], [0, 0, 1, 1], [], []>} : vector<8x1024xbf16>, vector<1024x1024xbf16>, vector<8x1024xf32> -> vector<8x1024xf32>
    %61 = vector.broadcast %29 : vector<1x1024xf32> to vector<8x1024xf32>
    %62 = arith.addf %60, %61 : vector<8x1024xf32>
    %cst_42 = arith.constant 0.000000e+00 : f32
    %63 = vector.broadcast %cst_42 : f32 to vector<8x1024xf32>
    %64 = arith.maximumf %62, %63 : vector<8x1024xf32>
    %cst_43 = arith.constant dense<0.000000e+00> : vector<8x8xf32>
    %65 = tpu.matmul %64, %28, %cst_43 {dimension_numbers = #tpu.dot_dimension_numbers<[1], [0], [0], [1], [0, 0, 1, 1], [], []>} : vector<8x1024xf32>, vector<1024x8xf32>, vector<8x8xf32> -> vector<8x8xf32>
    %66 = arith.addf %54, %65 : vector<8x8xf32>
    %67 = vector.broadcast %30 : vector<1x8xf32> to vector<8x8xf32>
    %68 = arith.addf %66, %67 : vector<8x8xf32>
    %cst_44 = arith.constant dense<0.000000e+00> : vector<8x1024xf32>
    %69 = tpu.matmul %68, %27, %cst_44 {dimension_numbers = #tpu.dot_dimension_numbers<[1], [0], [0], [1], [0, 0, 1, 1], [], []>} : vector<8x8xf32>, vector<8x1024xf32>, vector<8x1024xf32> -> vector<8x1024xf32>
    %70 = arith.addf %37, %69 : vector<8x1024xf32>
    %cst_45 = arith.constant 0.000000e+00 : f32
    %71 = vector.broadcast %cst_45 : f32 to vector<8x1024xf32>
    %72 = arith.maximumf %70, %71 : vector<8x1024xf32>
    %73 = arith.truncf %72 : vector<8x1024xf32> to vector<8x1024xbf16>
    %cst_46 = arith.constant dense<0.000000e+00> : vector<8x1024xf32>
    %74 = tpu.matmul %73, %44, %cst_46 {dimension_numbers = #tpu.dot_dimension_numbers<[1], [0], [0], [1], [0, 0, 1, 1], [], []>} : vector<8x1024xbf16>, vector<1024x1024xbf16>, vector<8x1024xf32> -> vector<8x1024xf32>
    %75 = vector.broadcast %29 : vector<1x1024xf32> to vector<8x1024xf32>
    %76 = arith.addf %74, %75 : vector<8x1024xf32>
    %cst_47 = arith.constant 0.000000e+00 : f32
    %77 = vector.broadcast %cst_47 : f32 to vector<8x1024xf32>
    %78 = arith.maximumf %76, %77 : vector<8x1024xf32>
    %cst_48 = arith.constant dense<0.000000e+00> : vector<8x8xf32>
    %79 = tpu.matmul %78, %28, %cst_48 {dimension_numbers = #tpu.dot_dimension_numbers<[1], [0], [0], [1], [0, 0, 1, 1], [], []>} : vector<8x1024xf32>, vector<1024x8xf32>, vector<8x8xf32> -> vector<8x8xf32>
    %80 = arith.addf %68, %79 : vector<8x8xf32>
    %81 = vector.broadcast %30 : vector<1x8xf32> to vector<8x8xf32>
    %82 = arith.addf %80, %81 : vector<8x8xf32>
    %cst_49 = arith.constant 0.000000e+00 : f32
    %83 = vector.broadcast %cst_49 : f32 to vector<8x5xf32>
    %84 = tpu.concatenate %82, %26, %83 in 1 : vector<8x8xf32>, vector<8x3xf32>, vector<8x5xf32> -> vector<8x16xf32>
    %c0_50 = arith.constant 0 : index
    %c0_51 = arith.constant 0 : index
    %85 = vector.load %arg14[%c0_50, %c0_51] : memref<8x16xf32, #tpu.memory_space<vmem>>, vector<8x16xf32>
    tpu.vector_store %arg14[%c0_50, %c0_51], %84 {strides = array<i32>} : memref<8x16xf32, #tpu.memory_space<vmem>>, vector<8x16xf32>,
    return
  }
}

</mosaic_0001>

<bundles_post_ra>
// kernel: tpu_custom_call.1
= control target key start
LH: loop header
LB: loop body
LE: loop exit
PB: predicated region body
PF: predicated region fallthrough
CT: control target
= control target key end

     0   :  { %19 = vsyncpa [#allocation6], 0  ;;  %s15233_s0 = inlined_call_operand.hbm [shape: f32[8,64], index: 0, kind: input, shape index: {}]   ;;  %s15234_s1 = inlined_call_operand.hbm [shape: bf16[64,512], index: 1, kind: input, shape index: {}]   ;;  %s15235_s2 = inlined_call_operand.hbm [shape: f32[1,512], index: 2, kind: input, shape index: {}]   ;;  %s15236_s3 = inlined_call_operand.hbm [shape: bf16[512,512], index: 3, kind: input, shape index: {}]   ;;  %s15237_s4 = inlined_call_operand.hbm [shape: f32[1,512], index: 4, kind: input, shape index: {}]   ;;  %s15238_s5 = inlined_call_operand.vmem [shape: f32[512,8], index: 5, kind: input, shape index: {}]   ;;  %s15239_s6 = inlined_call_operand.hbm [shape: f32[1,8], index: 6, kind: input, shape index: {}]   ;;  %s15240_s7 = inlined_call_operand.hbm [shape: f32[1,1024], index: 7, kind: input, shape index: {}]   ;;  %s15241_s8 = inlined_call_operand.hbm [shape: f32[1,1024], index: 8, kind: input, shape index: {}]   ;;  %s15242_s9 = inlined_call_operand.hbm [shape: f32[1,8], index: 9, kind: input, shape index: {}]   ;;  %s15243_s10 = inlined_call_operand.hbm [shape: f32[8,1024], index: 10, kind: input, shape index: {}]   ;;  %s15244_s11 = inlined_call_operand.vmem [shape: f32[1024,8], index: 11, kind: input, shape index: {}]   ;;  %s15245_s12 = inlined_call_operand.hbm [shape: bf16[64,1024], index: 12, kind: input, shape index: {}]   ;;  %s15246_s13 = inlined_call_operand.hbm [shape: bf16[1024,1024], index: 13, kind: input, shape index: {}]   ;;  %s15247_s14 = inlined_call_operand.hbm [shape: f32[8,16], index: 14, kind: output, shape index: {}]  }
   0x1   :  { %20 = vsyncpa [#allocation9], 0 }
   0x2   :  { %21 = vsyncpa [#allocation12], 0 }
   0x3   :  { %22 = vsyncpa [#allocation15], 0 }
   0x4   :  { %23 = vsyncpa [#allocation18], 0 }
   0x5   :  { %24 = vsyncpa [#allocation21], 0 }
   0x6   :  { %25 = vsyncpa [#allocation7], 0  ;;  %s10759_s29 = smov [#allocation8]  }
   0x7   :  { %s41_s30 = sshll.u32 %s10759_s29, 4  ;;  %s42_s30 = int_to_ptr.vmem [resolvable:$true] %s41_s30 }
   0x8   :  { %s10489_s15 = scalar_lea.vmem %s42_s30, 2048  ;;  %p10494_p1 = scmp.lt.s32.totalorder %s42_s30, %s42_s30 }
   0x9   :  { %p10490_p0 = scmp.ne.s32.totalorder %s42_s30, %s10489_s15  ;;  %p10495_p2 = scmp.lt.s32.totalorder %s10489_s15, %s10489_s15 }
   0xb   :  { %p10496_p3 = por %p10495_p2, %p10494_p1 }
   0xd   :  { %p10497_p4 = pnand %p10496_p3, %p10490_p0 }
   0xf   :  { %10500 = shalt.err (!%p10497_p4)
}
  0x10   :  { %s10760_s16 = smov 256   ;;  %s10761_s17 = smov 16  }
  0x11   :  { %47 = dma.hbm_to_vmem [thread:$0]  %s15234_s1, 2048, %s42_s30, [#allocation9], %s10760_s16, %s10760_s16, %s10761_s17  }
  0x12   :  { %s10762_s20 = smov [#allocation11]   ;;  %s10763_s22 = smov [#allocation14]  }
  0x13   :  { %s63_s21 = sshll.u32 %s10762_s20, 4  ;;  %s88_s23 = sshll.u32 %s10763_s22, 4  ;;  %s64_s21 = int_to_ptr.vmem [resolvable:$true] %s63_s21  ;;  %s89_s23 = int_to_ptr.vmem [resolvable:$true] %s88_s23 }
  0x14   :  { %s10509_s24 = scalar_lea.vmem %s64_s21, 16384  ;;  %p10514_p6 = scmp.lt.s32.totalorder %s64_s21, %s64_s21 }
  0x15   :  { %p10510_p5 = scmp.ne.s32.totalorder %s64_s21, %s10509_s24  ;;  %p10515_p7 = scmp.lt.s32.totalorder %s10509_s24, %s10509_s24 }
  0x17   :  { %p10516_p8 = por %p10515_p7, %p10514_p6 }
  0x19   :  { %p10517_p9 = pnand %p10516_p8, %p10510_p5 }
  0x1b   :  { %10520 = shalt.err (!%p10517_p9)
}
  0x1c   :  { %69 = dma.hbm_to_vmem [thread:$0]  %s15236_s3, 16384, %s64_s21, [#allocation12], %s10760_s16, %s10760_s16, %s10761_s17  }
  0x1d   :  { %s10529_s27 = scalar_lea.vmem %s89_s23, 16  ;;  %s10533_s1 = scalar_lea.vmem %s89_s23, 32 }
  0x1e   :  { %p10530_p10 = scmp.ne.s32.totalorder %s89_s23, %s10529_s27  ;;  %p10534_p11 = scmp.lt.s32.totalorder %s89_s23, %s89_s23 }
  0x1f   :  { %p10535_p12 = scmp.lt.s32.totalorder %s10533_s1, %s10529_s27 }
  0x21   :  { %p10536_p13 = por %p10535_p12, %p10534_p11 }
  0x23   :  { %p10537_p0 = pnand %p10536_p13, %p10530_p10 }
  0x25   :  { %10540 = shalt.err (!%p10537_p0)
}
  0x26   :  { %91 = dma.hbm_to_vmem [thread:$0]  %s15239_s6, 16, %s89_s23, [#allocation15]  }
  0x27   :  { %s10764_s30 = smov [#allocation17]   ;;  %s10765_s18 = smov [#allocation5]  }
  0x28   :  { %s108_s15 = sshll.u32 %s10764_s30, 4  ;;  %s32_s19 = sshll.u32 %s10765_s18, 4  ;;  %s109_s15 = int_to_ptr.vmem [resolvable:$true] %s108_s15  ;;  %s33_s19 = int_to_ptr.vmem [resolvable:$true] %s32_s19 }
  0x29   :  { %s10549_s20 = scalar_lea.vmem %s109_s15, 128  ;;  %p10554_p2 = scmp.lt.s32.totalorder %s109_s15, %s109_s15 }
  0x2a   :  { %p10550_p1 = scmp.ne.s32.totalorder %s109_s15, %s10549_s20  ;;  %p10555_p3 = scmp.lt.s32.totalorder %s10549_s20, %s10549_s20 }
  0x2c   :  { %p10556_p4 = por %p10555_p3, %p10554_p2 }
  0x2e   :  { %p10557_p5 = pnand %p10556_p4, %p10550_p1 }
  0x30   :  { %10560 = shalt.err (!%p10557_p5)
}
  0x31   :  { %111 = dma.hbm_to_vmem [thread:$0]  %s15241_s8, 128, %s109_s15, [#allocation18]  }
  0x32   :  { %s10569_s17 = scalar_lea.vmem %s33_s19, 128  ;;  %p10574_p7 = scmp.lt.s32.totalorder %s33_s19, %s33_s19 }
  0x33   :  { %p10570_p6 = scmp.ne.s32.totalorder %s33_s19, %s10569_s17  ;;  %p10575_p8 = scmp.lt.s32.totalorder %s10569_s17, %s10569_s17 }
  0x35   :  { %p10576_p9 = por %p10575_p8, %p10574_p7 }
  0x37   :  { %p10577_p10 = pnand %p10576_p9, %p10570_p6 }
  0x39   :  { %10580 = shalt.err (!%p10577_p10)
}
  0x3a   :  { %35 = dma.hbm_to_vmem [thread:$0]  %s15233_s0, 128, %s33_s19, [#allocation6]  }
  0x3b   :  { %s10766_s22 = smov [#allocation10]   ;;  %s10767_s24 = smov [#allocation13]  }
  0x3c   :  { %s54_s23 = sshll.u32 %s10766_s22, 4  ;;  %s76_s25 = sshll.u32 %s10767_s24, 4  ;;  %s55_s23 = int_to_ptr.vmem [resolvable:$true] %s54_s23  ;;  %s77_s25 = int_to_ptr.vmem [resolvable:$true] %s76_s25 }
  0x3d   :  { %s10589_s26 = scalar_lea.vmem %s55_s23, 64  ;;  %p10594_p12 = scmp.lt.s32.totalorder %s55_s23, %s55_s23 }
  0x3e   :  { %p10590_p11 = scmp.ne.s32.totalorder %s55_s23, %s10589_s26  ;;  %p10595_p13 = scmp.lt.s32.totalorder %s10589_s26, %s10589_s26 }
  0x40   :  { %p10596_p0 = por %p10595_p13, %p10594_p12 }
  0x42   :  { %p10597_p1 = pnand %p10596_p0, %p10590_p11 }
  0x44   :  { %10600 = shalt.err (!%p10597_p1)
}
  0x45   :  { %57 = dma.hbm_to_vmem [thread:$0]  %s15235_s2, 64, %s55_s23, [#allocation9]  }
  0x46   :  { %s10609_s1 = scalar_lea.vmem %s77_s25, 64  ;;  %p10614_p3 = scmp.lt.s32.totalorder %s77_s25, %s77_s25 }
  0x47   :  { %p10610_p2 = scmp.ne.s32.totalorder %s77_s25, %s10609_s1  ;;  %p10615_p4 = scmp.lt.s32.totalorder %s10609_s1, %s10609_s1 }
  0x49   :  { %p10616_p5 = por %p10615_p4, %p10614_p3 }
  0x4b   :  { %p10617_p6 = pnand %p10616_p5, %p10610_p2 }
  0x4d   :  { %10620 = shalt.err (!%p10617_p6)
}
  0x4e   :  { %79 = dma.hbm_to_vmem [thread:$0]  %s15237_s4, 64, %s77_s25, [#allocation12]  }
  0x4f   :  { %s10768_s29 = smov [#allocation16]   ;;  %s10769_s15 = smov [#allocation19]  }
  0x50   :  { %s98_s30 = sshll.u32 %s10768_s29, 4  ;;  %s118_s18 = sshll.u32 %s10769_s15, 4  ;;  %s99_s30 = int_to_ptr.vmem [resolvable:$true] %s98_s30  ;;  %s119_s18 = int_to_ptr.vmem [resolvable:$true] %s118_s18 }
  0x51   :  { %s10629_s19 = scalar_lea.vmem %s99_s30, 128  ;;  %p10634_p8 = scmp.lt.s32.totalorder %s99_s30, %s99_s30 }
  0x52   :  { %p10630_p7 = scmp.ne.s32.totalorder %s99_s30, %s10629_s19  ;;  %p10635_p9 = scmp.lt.s32.totalorder %s10629_s19, %s10629_s19 }
  0x54   :  { %p10636_p10 = por %p10635_p9, %p10634_p8 }
  0x56   :  { %p10637_p11 = pnand %p10636_p10, %p10630_p7 }
  0x58   :  { %10640 = shalt.err (!%p10637_p11)
}
  0x59   :  { %101 = dma.hbm_to_vmem [thread:$0]  %s15240_s7, 128, %s99_s30, [#allocation15]  }
  0x5a   :  { %s10649_s3 = scalar_lea.vmem %s119_s18, 16  ;;  %s10653_s4 = scalar_lea.vmem %s119_s18, 32 }
  0x5b   :  { %p10650_p12 = scmp.ne.s32.totalorder %s119_s18, %s10649_s3  ;;  %p10654_p13 = scmp.lt.s32.totalorder %s119_s18, %s119_s18 }
  0x5c   :  { %p10655_p0 = scmp.lt.s32.totalorder %s10653_s4, %s10649_s3 }
  0x5e   :  { %p10656_p1 = por %p10655_p0, %p10654_p13 }
  0x60   :  { %p10657_p2 = pnand %p10656_p1, %p10650_p12 }
  0x62   :  { %10660 = shalt.err (!%p10657_p2)
}
  0x63   :  { %121 = dma.hbm_to_vmem [thread:$0]  %s15242_s9, 16, %s119_s18, [#allocation18]  }
  0x64   :  { %s10770_s6 = smov [#allocation20]  }
  0x65   :  { %s128_s21 = sshll.u32 %s10770_s6, 4  ;;  %s129_s21 = int_to_ptr.vmem [resolvable:$true] %s128_s21 }
  0x66   :  { %s10669_s22 = scalar_lea.vmem %s129_s21, 1024  ;;  %p10674_p4 = scmp.lt.s32.totalorder %s129_s21, %s129_s21 }
  0x67   :  { %p10670_p3 = scmp.ne.s32.totalorder %s129_s21, %s10669_s22  ;;  %p10675_p5 = scmp.lt.s32.totalorder %s10669_s22, %s10669_s22 }
  0x69   :  { %p10676_p6 = por %p10675_p5, %p10674_p4 }
  0x6b   :  { %p10677_p7 = pnand %p10676_p6, %p10670_p3 }
  0x6d   :  { %10680 = shalt.err (!%p10677_p7)
}
  0x6e   :  { %131 = dma.hbm_to_vmem [thread:$0]  %s15243_s10, 1024, %s129_s21, [#allocation21]  }
  0x6f   :  { %10741 = dma.done.wait [#allocation6], 128  }
  0x70   :  { %10742 = vsyncadd [#allocation6], 4294967168 }
  0x71   :  { %10743 = dma.done.wait [#allocation9], 2112  }
  0x72   :  { %10744 = vsyncadd [#allocation9], 4294965184 }
  0x73   :  { %10745 = dma.done.wait [#allocation12], 16448  }
  0x74   :  { %10746 = vsyncadd [#allocation12], 4294950848 }
  0x75   :  { %10747 = dma.done.wait [#allocation15], 144  }
  0x76   :  { %10748 = vsyncadd [#allocation15], 4294967152 }
  0x77   :  { %10749 = dma.done.wait [#allocation18], 144  }
  0x78   :  { %10750 = vsyncadd [#allocation18], 4294967152 }
  0x79   :  { %10751 = dma.done.wait [#allocation21], 1024  }
  0x7a   :  { %10752 = vsyncadd [#allocation21], 4294966272  ;;  %v15248_v0 = vmov 0   ;;  %v10884_v1 = vld [vmem:[#allocation20] sm:$0xff]  ;;  %v10886_v2 = vld [vmem:[#allocation20 + $0x8] sm:$0xff]  ;;  %vm308_vm0 = vcmask 523264  }
  0x7b   :  { %344 = vmatprep.mubr.bf16.mxu0 %v15248_v0  ;;  %385 = vmatprep.mubr.bf16.mxu1 %v15248_v0  ;;  %16418 = vst [vmem:[#allocation38_spill] sm:$0xff] %v10884_v1  ;;  %16419 = vst [vmem:[#allocation39_spill] sm:$0xff] %v10886_v2  ;;  %v10888_v3 = vld [vmem:[#allocation20 + $0x10] sm:$0xff]  ;;  %v10890_v4 = vld [vmem:[#allocation20 + $0x18] sm:$0xff]  ;;  %s10773_s20 = smov [#allocation3]  }
  0x7c   :  { %16420 = vst [vmem:[#allocation40_spill] sm:$0xff] %v10888_v3  ;;  %16421 = vst [vmem:[#allocation41_spill] sm:$0xff] %v10890_v4  ;;  %v10892_v5 = vld [vmem:[#allocation20 + $0x20] sm:$0xff]  ;;  %v10894_v6 = vld [vmem:[#allocation20 + $0x28] sm:$0xff]  ;;  %s184_s3 = sshll.u32 %s10773_s20, 4  ;;  %s185_s3 = int_to_ptr.vmem [resolvable:$true] %s184_s3 }
  0x7d   :  { %16422 = vst [vmem:[#allocation42_spill] sm:$0xff] %v10892_v5  ;;  %16423 = vst [vmem:[#allocation43_spill] sm:$0xff] %v10894_v6  ;;  %v10896_v7 = vld [vmem:[#allocation20 + $0x30] sm:$0xff]  ;;  %v10898_v8 = vld [vmem:[#allocation20 + $0x38] sm:$0xff] }
  0x7e   :  { %16424 = vst [vmem:[#allocation44_spill] sm:$0xff] %v10896_v7  ;;  %16425 = vst [vmem:[#allocation45_spill] sm:$0xff] %v10898_v8  ;;  %v10903_v9 = vld [vmem:[%s15244_s11] sm:$0xff]  ;;  %v10908_v10 = vld [vmem:[%s15244_s11 + $0x8] sm:$0xff] }
  0x7f   :  { %16426 = vst [vmem:[#allocation46_spill] sm:$0xff] %v10903_v9  ;;  %16427 = vst [vmem:[#allocation47_spill] sm:$0xff] %v10908_v10  ;;  %v10913_v11 = vld [vmem:[%s15244_s11 + $0x10] sm:$0xff]  ;;  %v10918_v12 = vld [vmem:[%s15244_s11 + $0x18] sm:$0xff] }
  0x80   :  { %16428 = vst [vmem:[#allocation48_spill] sm:$0xff] %v10913_v11  ;;  %16429 = vst [vmem:[#allocation49_spill] sm:$0xff] %v10918_v12  ;;  %v10923_v13 = vld [vmem:[%s15244_s11 + $0x20] sm:$0xff]  ;;  %v10928_v14 = vld [vmem:[%s15244_s11 + $0x28] sm:$0xff] }
  0x81   :  { %16430 = vst [vmem:[#allocation50_spill] sm:$0xff] %v10923_v13  ;;  %16431 = vst [vmem:[#allocation51_spill] sm:$0xff] %v10928_v14  ;;  %v10933_v15 = vld [vmem:[%s15244_s11 + $0x30] sm:$0xff]  ;;  %v10938_v16 = vld [vmem:[%s15244_s11 + $0x38] sm:$0xff] }
  0x82   :  { %16432 = vst [vmem:[#allocation52_spill] sm:$0xff] %v10933_v15  ;;  %16433 = vst [vmem:[#allocation53_spill] sm:$0xff] %v10938_v16  ;;  %v10943_v17 = vld [vmem:[%s15244_s11 + $0x40] sm:$0xff]  ;;  %v10948_v18 = vld [vmem:[%s15244_s11 + $0x48] sm:$0xff] }
  0x83   :  { %16434 = vst [vmem:[#allocation54_spill] sm:$0xff] %v10943_v17  ;;  %16435 = vst [vmem:[#allocation55_spill] sm:$0xff] %v10948_v18  ;;  %v10953_v19 = vld [vmem:[%s15244_s11 + $0x50] sm:$0xff]  ;;  %v10958_v20 = vld [vmem:[%s15244_s11 + $0x58] sm:$0xff] }
  0x84   :  { %16436 = vst [vmem:[#allocation56_spill] sm:$0xff] %v10953_v19  ;;  %16437 = vst [vmem:[#allocation57_spill] sm:$0xff] %v10958_v20  ;;  %v10963_v21 = vld [vmem:[%s15244_s11 + $0x60] sm:$0xff]  ;;  %v10968_v22 = vld [vmem:[%s15244_s11 + $0x68] sm:$0xff] }
  0x85   :  { %16438 = vst [vmem:[#allocation58_spill] sm:$0xff] %v10963_v21  ;;  %16439 = vst [vmem:[#allocation59_spill] sm:$0xff] %v10968_v22  ;;  %v10973_v23 = vld [vmem:[%s15244_s11 + $0x70] sm:$0xff]  ;;  %v10978_v24 = vld [vmem:[%s15244_s11 + $0x78] sm:$0xff] }
  0x86   :  { %v10983_v25 = vld [vmem:[%s15244_s11 + $0x80] sm:$0xff]  ;;  %v10988_v26 = vld [vmem:[%s15244_s11 + $0x88] sm:$0xff]  ;;  %v10993_v27 = vld [vmem:[%s15244_s11 + $0x90] sm:$0xff] }
  0x87   :  { %16440 = vst [vmem:[#allocation60_spill] sm:$0xff] %v10983_v25  ;;  %16441 = vst [vmem:[#allocation61_spill] sm:$0xff] %v10988_v26  ;;  %v10998_v28 = vld [vmem:[%s15244_s11 + $0x98] sm:$0xff]  ;;  %v11003_v29 = vld [vmem:[%s15244_s11 + $0xa0] sm:$0xff] }
  0x88   :  { %16442 = vst [vmem:[#allocation62_spill] sm:$0xff] %v10993_v27  ;;  %16443 = vst [vmem:[#allocation63_spill] sm:$0xff] %v10998_v28  ;;  %v11008_v30 = vld [vmem:[%s15244_s11 + $0xa8] sm:$0xff]  ;;  %v11013_v31 = vld [vmem:[%s15244_s11 + $0xb0] sm:$0xff] }
  0x89   :  { %16444 = vst [vmem:[#allocation64_spill] sm:$0xff] %v11003_v29  ;;  %16445 = vst [vmem:[#allocation65_spill] sm:$0xff] %v11008_v30  ;;  %v11018_v32 = vld [vmem:[%s15244_s11 + $0xb8] sm:$0xff]  ;;  %v11023_v33 = vld [vmem:[%s15244_s11 + $0xc0] sm:$0xff] }
  0x8a   :  { %16446 = vst [vmem:[#allocation66_spill] sm:$0xff] %v11013_v31  ;;  %16447 = vst [vmem:[#allocation67_spill] sm:$0xff] %v11018_v32  ;;  %v11028_v34 = vld [vmem:[%s15244_s11 + $0xc8] sm:$0xff]  ;;  %v11033_v35 = vld [vmem:[%s15244_s11 + $0xd0] sm:$0xff] }
  0x8b   :  { %16448 = vst [vmem:[#allocation68_spill] sm:$0xff] %v11023_v33  ;;  %16449 = vst [vmem:[#allocation69_spill] sm:$0xff] %v11028_v34  ;;  %v11038_v36 = vld [vmem:[%s15244_s11 + $0xd8] sm:$0xff]  ;;  %v11043_v37 = vld [vmem:[%s15244_s11 + $0xe0] sm:$0xff] }
  0x8c   :  { %16450 = vst [vmem:[#allocation70_spill] sm:$0xff] %v11033_v35  ;;  %16451 = vst [vmem:[#allocation71_spill] sm:$0xff] %v11038_v36  ;;  %v11048_v38 = vld [vmem:[%s15244_s11 + $0xe8] sm:$0xff]  ;;  %v11053_v39 = vld [vmem:[%s15244_s11 + $0xf0] sm:$0xff] }
  0x8d   :  { %16452 = vst [vmem:[#allocation72_spill] sm:$0xff] %v11043_v37  ;;  %16453 = vst [vmem:[#allocation73_spill] sm:$0xff] %v11048_v38  ;;  %v11058_v40 = vld [vmem:[%s15244_s11 + $0xf8] sm:$0xff]  ;;  %v11063_v41 = vld [vmem:[%s15244_s11 + $0x100] sm:$0xff] }
  0x8e   :  { %16454 = vst [vmem:[#allocation74_spill] sm:$0xff] %v11063_v41  ;;  %v11068_v42 = vld [vmem:[%s15244_s11 + $0x108] sm:$0xff]  ;;  %v11073_v43 = vld [vmem:[%s15244_s11 + $0x110] sm:$0xff]  ;;  %v11078_v44 = vld [vmem:[%s15244_s11 + $0x118] sm:$0xff] }
  0x8f   :  { %16455 = vst [vmem:[#allocation75_spill] sm:$0xff] %v11068_v42  ;;  %16456 = vst [vmem:[#allocation76_spill] sm:$0xff] %v11073_v43  ;;  %v11083_v45 = vld [vmem:[%s15244_s11 + $0x120] sm:$0xff]  ;;  %v11088_v46 = vld [vmem:[%s15244_s11 + $0x128] sm:$0xff] }
  0x90   :  { %16457 = vst [vmem:[#allocation77_spill] sm:$0xff] %v11078_v44  ;;  %16458 = vst [vmem:[#allocation78_spill] sm:$0xff] %v11083_v45  ;;  %v11093_v47 = vld [vmem:[%s15244_s11 + $0x130] sm:$0xff]  ;;  %v11098_v48 = vld [vmem:[%s15244_s11 + $0x138] sm:$0xff] }
  0x91   :  { %16459 = vst [vmem:[#allocation79_spill] sm:$0xff] %v11088_v46  ;;  %16460 = vst [vmem:[#allocation80_spill] sm:$0xff] %v11093_v47  ;;  %v11103_v49 = vld [vmem:[%s15244_s11 + $0x140] sm:$0xff]  ;;  %v11108_v50 = vld [vmem:[%s15244_s11 + $0x148] sm:$0xff] }
  0x92   :  { %16461 = vst [vmem:[#allocation81_spill] sm:$0xff] %v11098_v48  ;;  %16462 = vst [vmem:[#allocation82_spill] sm:$0xff] %v11103_v49  ;;  %v11113_v51 = vld [vmem:[%s15244_s11 + $0x150] sm:$0xff]  ;;  %v11118_v52 = vld [vmem:[%s15244_s11 + $0x158] sm:$0xff] }
  0x93   :  { %16463 = vst [vmem:[#allocation83_spill] sm:$0xff] %v11108_v50  ;;  %16464 = vst [vmem:[#allocation84_spill] sm:$0xff] %v11113_v51  ;;  %v11123_v53 = vld [vmem:[%s15244_s11 + $0x160] sm:$0xff]  ;;  %v11128_v54 = vld [vmem:[%s15244_s11 + $0x168] sm:$0xff] }
  0x94   :  { %16465 = vst [vmem:[#allocation85_spill] sm:$0xff] %v11118_v52  ;;  %16466 = vst [vmem:[#allocation86_spill] sm:$0xff] %v11123_v53  ;;  %v11133_v55 = vld [vmem:[%s15244_s11 + $0x170] sm:$0xff]  ;;  %v11138_v56 = vld [vmem:[%s15244_s11 + $0x178] sm:$0xff] }
  0x95   :  { %16467 = vst [vmem:[#allocation87_spill] sm:$0xff] %v11128_v54  ;;  %v11143_v57 = vld [vmem:[%s15244_s11 + $0x180] sm:$0xff]  ;;  %v11148_v58 = vld [vmem:[%s15244_s11 + $0x188] sm:$0xff]  ;;  %v11153_v59 = vld [vmem:[%s15244_s11 + $0x190] sm:$0xff] }
  0x96   :  { %16468 = vst [vmem:[#allocation88_spill] sm:$0xff] %v11143_v57  ;;  %16469 = vst [vmem:[#allocation89_spill] sm:$0xff] %v11148_v58  ;;  %v11158_v60 = vld [vmem:[%s15244_s11 + $0x198] sm:$0xff]  ;;  %v11163_v61 = vld [vmem:[%s15244_s11 + $0x1a0] sm:$0xff] }
  0x97   :  { %16470 = vst [vmem:[#allocation90_spill] sm:$0xff] %v11153_v59  ;;  %16471 = vst [vmem:[#allocation91_spill] sm:$0xff] %v11158_v60  ;;  %v11168_v62 = vld [vmem:[%s15244_s11 + $0x1a8] sm:$0xff]  ;;  %v11173_v63 = vld [vmem:[%s15244_s11 + $0x1b0] sm:$0xff] }
  0x98   :  { %16472 = vst [vmem:[#allocation92_spill] sm:$0xff] %v11163_v61  ;;  %16473 = vst [vmem:[#allocation93_spill] sm:$0xff] %v11168_v62  ;;  %v11178_v0 = vld [vmem:[%s15244_s11 + $0x1b8] sm:$0xff]  ;;  %v11183_v41 = vld [vmem:[%s15244_s11 + $0x1c0] sm:$0xff] }
  0x99   :  { %16474 = vst [vmem:[#allocation94_spill] sm:$0xff] %v11173_v63  ;;  %16475 = vst [vmem:[#allocation95_spill] sm:$0xff] %v11178_v0  ;;  %v11188_v9 = vld [vmem:[%s15244_s11 + $0x1c8] sm:$0xff]  ;;  %v11193_v57 = vld [vmem:[%s15244_s11 + $0x1d0] sm:$0xff] }
  0x9a   :  { %16476 = vst [vmem:[#allocation96_spill] sm:$0xff] %v11183_v41  ;;  %16477 = vst [vmem:[#allocation97_spill] sm:$0xff] %v11188_v9  ;;  %v11198_v25 = vld [vmem:[%s15244_s11 + $0x1d8] sm:$0xff]  ;;  %v11203_v42 = vld [vmem:[%s15244_s11 + $0x1e0] sm:$0xff] }
  0x9b   :  { %16478 = vst [vmem:[#allocation98_spill] sm:$0xff] %v11193_v57  ;;  %16479 = vst [vmem:[#allocation99_spill] sm:$0xff] %v11198_v25  ;;  %v11208_v10 = vld [vmem:[%s15244_s11 + $0x1e8] sm:$0xff]  ;;  %v11213_v58 = vld [vmem:[%s15244_s11 + $0x1f0] sm:$0xff] }
  0x9c   :  { %16480 = vst [vmem:[#allocation100_spill] sm:$0xff] %v11203_v42  ;;  %16481 = vst [vmem:[#allocation101_spill] sm:$0xff] %v11208_v10  ;;  %v11218_v26 = vld [vmem:[%s15244_s11 + $0x1f8] sm:$0xff]  ;;  %v11223_v43 = vld [vmem:[%s15244_s11 + $0x200] sm:$0xff] }
  0x9d   :  { %16482 = vst [vmem:[#allocation102_spill] sm:$0xff] %v11223_v43  ;;  %v11228_v11 = vld [vmem:[%s15244_s11 + $0x208] sm:$0xff]  ;;  %v11233_v59 = vld [vmem:[%s15244_s11 + $0x210] sm:$0xff]  ;;  %v11238_v27 = vld [vmem:[%s15244_s11 + $0x218] sm:$0xff] }
  0x9e   :  { %16483 = vst [vmem:[#allocation103_spill] sm:$0xff] %v11228_v11  ;;  %16484 = vst [vmem:[#allocation104_spill] sm:$0xff] %v11233_v59  ;;  %v11243_v44 = vld [vmem:[%s15244_s11 + $0x220] sm:$0xff]  ;;  %v11248_v43 = vld [vmem:[%s15244_s11 + $0x228] sm:$0xff] }
  0x9f   :  { %16485 = vst [vmem:[#allocation105_spill] sm:$0xff] %v11238_v27  ;;  %16486 = vst [vmem:[#allocation106_spill] sm:$0xff] %v11243_v44  ;;  %v11253_v11 = vld [vmem:[%s15244_s11 + $0x230] sm:$0xff]  ;;  %v11258_v59 = vld [vmem:[%s15244_s11 + $0x238] sm:$0xff] }
  0xa0   :  { %16487 = vst [vmem:[#allocation107_spill] sm:$0xff] %v11248_v43  ;;  %16488 = vst [vmem:[#allocation108_spill] sm:$0xff] %v11253_v11  ;;  %v11263_v27 = vld [vmem:[%s15244_s11 + $0x240] sm:$0xff]  ;;  %v11268_v44 = vld [vmem:[%s15244_s11 + $0x248] sm:$0xff] }
  0xa1   :  { %16489 = vst [vmem:[#allocation109_spill] sm:$0xff] %v11258_v59  ;;  %16490 = vst [vmem:[#allocation110_spill] sm:$0xff] %v11263_v27  ;;  %v11273_v43 = vld [vmem:[%s15244_s11 + $0x250] sm:$0xff]  ;;  %v11278_v11 = vld [vmem:[%s15244_s11 + $0x258] sm:$0xff] }
  0xa2   :  { %16491 = vst [vmem:[#allocation111_spill] sm:$0xff] %v11268_v44  ;;  %16492 = vst [vmem:[#allocation112_spill] sm:$0xff] %v11273_v43  ;;  %v11283_v59 = vld [vmem:[%s15244_s11 + $0x260] sm:$0xff]  ;;  %v11288_v27 = vld [vmem:[%s15244_s11 + $0x268] sm:$0xff] }
  0xa3   :  { %16493 = vst [vmem:[#allocation113_spill] sm:$0xff] %v11278_v11  ;;  %16494 = vst [vmem:[#allocation114_spill] sm:$0xff] %v11283_v59  ;;  %v11293_v44 = vld [vmem:[%s15244_s11 + $0x270] sm:$0xff]  ;;  %v11298_v43 = vld [vmem:[%s15244_s11 + $0x278] sm:$0xff] }
  0xa4   :  { %16495 = vst [vmem:[#allocation115_spill] sm:$0xff] %v11288_v27  ;;  %16496 = vst [vmem:[#allocation116_spill] sm:$0xff] %v11293_v44  ;;  %v11303_v11 = vld [vmem:[%s15244_s11 + $0x280] sm:$0xff]  ;;  %v11308_v59 = vld [vmem:[%s15244_s11 + $0x288] sm:$0xff] }
  0xa5   :  { %16497 = vst [vmem:[#allocation117_spill] sm:$0xff] %v11298_v43  ;;  %16498 = vst [vmem:[#allocation118_spill] sm:$0xff] %v11303_v11  ;;  %v11313_v27 = vld [vmem:[%s15244_s11 + $0x290] sm:$0xff]  ;;  %v11318_v44 = vld [vmem:[%s15244_s11 + $0x298] sm:$0xff] }
  0xa6   :  { %16499 = vst [vmem:[#allocation119_spill] sm:$0xff] %v11308_v59  ;;  %16500 = vst [vmem:[#allocation120_spill] sm:$0xff] %v11313_v27  ;;  %v11323_v43 = vld [vmem:[%s15244_s11 + $0x2a0] sm:$0xff]  ;;  %v11328_v11 = vld [vmem:[%s15244_s11 + $0x2a8] sm:$0xff] }
  0xa7   :  { %16501 = vst [vmem:[#allocation121_spill] sm:$0xff] %v11318_v44  ;;  %16502 = vst [vmem:[#allocation122_spill] sm:$0xff] %v11323_v43  ;;  %v11333_v59 = vld [vmem:[%s15244_s11 + $0x2b0] sm:$0xff]  ;;  %v11338_v27 = vld [vmem:[%s15244_s11 + $0x2b8] sm:$0xff] }
  0xa8   :  { %16503 = vst [vmem:[#allocation123_spill] sm:$0xff] %v11328_v11  ;;  %16504 = vst [vmem:[#allocation124_spill] sm:$0xff] %v11333_v59  ;;  %v11343_v44 = vld [vmem:[%s15244_s11 + $0x2c0] sm:$0xff]  ;;  %v11348_v43 = vld [vmem:[%s15244_s11 + $0x2c8] sm:$0xff] }
  0xa9   :  { %16505 = vst [vmem:[#allocation125_spill] sm:$0xff] %v11338_v27  ;;  %16506 = vst [vmem:[#allocation126_spill] sm:$0xff] %v11343_v44  ;;  %v11353_v11 = vld [vmem:[%s15244_s11 + $0x2d0] sm:$0xff]  ;;  %v11358_v59 = vld [vmem:[%s15244_s11 + $0x2d8] sm:$0xff] }
  0xaa   :  { %16507 = vst [vmem:[#allocation127_spill] sm:$0xff] %v11348_v43  ;;  %16508 = vst [vmem:[#allocation128_spill] sm:$0xff] %v11353_v11  ;;  %v11363_v27 = vld [vmem:[%s15244_s11 + $0x2e0] sm:$0xff]  ;;  %v11368_v44 = vld [vmem:[%s15244_s11 + $0x2e8] sm:$0xff] }
  0xab   :  { %16509 = vst [vmem:[#allocation129_spill] sm:$0xff] %v11358_v59  ;;  %16510 = vst [vmem:[#allocation130_spill] sm:$0xff] %v11363_v27  ;;  %v11373_v43 = vld [vmem:[%s15244_s11 + $0x2f0] sm:$0xff]  ;;  %v11378_v11 = vld [vmem:[%s15244_s11 + $0x2f8] sm:$0xff] }
  0xac   :  { %16511 = vst [vmem:[#allocation131_spill] sm:$0xff] %v11368_v44  ;;  %16512 = vst [vmem:[#allocation132_spill] sm:$0xff] %v11373_v43  ;;  %v11383_v59 = vld [vmem:[%s15244_s11 + $0x300] sm:$0xff]  ;;  %v11388_v27 = vld [vmem:[%s15244_s11 + $0x308] sm:$0xff] }
  0xad   :  { %16513 = vst [vmem:[#allocation133_spill] sm:$0xff] %v11378_v11  ;;  %16514 = vst [vmem:[#allocation134_spill] sm:$0xff] %v11383_v59  ;;  %v11393_v44 = vld [vmem:[%s15244_s11 + $0x310] sm:$0xff]  ;;  %v11398_v43 = vld [vmem:[%s15244_s11 + $0x318] sm:$0xff] }
  0xae   :  { %16515 = vst [vmem:[#allocation135_spill] sm:$0xff] %v11388_v27  ;;  %16516 = vst [vmem:[#allocation136_spill] sm:$0xff] %v11393_v44  ;;  %v11403_v11 = vld [vmem:[%s15244_s11 + $0x320] sm:$0xff]  ;;  %v11408_v59 = vld [vmem:[%s15244_s11 + $0x328] sm:$0xff] }
  0xaf   :  { %16517 = vst [vmem:[#allocation137_spill] sm:$0xff] %v11398_v43  ;;  %16518 = vst [vmem:[#allocation138_spill] sm:$0xff] %v11403_v11  ;;  %v11413_v27 = vld [vmem:[%s15244_s11 + $0x330] sm:$0xff]  ;;  %v11418_v44 = vld [vmem:[%s15244_s11 + $0x338] sm:$0xff] }
  0xb0   :  { %16519 = vst [vmem:[#allocation139_spill] sm:$0xff] %v11408_v59  ;;  %16520 = vst [vmem:[#allocation140_spill] sm:$0xff] %v11413_v27  ;;  %v11423_v43 = vld [vmem:[%s15244_s11 + $0x340] sm:$0xff]  ;;  %v11428_v11 = vld [vmem:[%s15244_s11 + $0x348] sm:$0xff] }
  0xb1   :  { %16521 = vst [vmem:[#allocation141_spill] sm:$0xff] %v11418_v44  ;;  %16522 = vst [vmem:[#allocation142_spill] sm:$0xff] %v11423_v43  ;;  %v11433_v59 = vld [vmem:[%s15244_s11 + $0x350] sm:$0xff]  ;;  %v11438_v27 = vld [vmem:[%s15244_s11 + $0x358] sm:$0xff] }
  0xb2   :  { %16523 = vst [vmem:[#allocation143_spill] sm:$0xff] %v11428_v11  ;;  %16524 = vst [vmem:[#allocation144_spill] sm:$0xff] %v11433_v59  ;;  %v11443_v44 = vld [vmem:[%s15244_s11 + $0x360] sm:$0xff]  ;;  %v11448_v43 = vld [vmem:[%s15244_s11 + $0x368] sm:$0xff] }
  0xb3   :  { %16525 = vst [vmem:[#allocation145_spill] sm:$0xff] %v11438_v27  ;;  %16526 = vst [vmem:[#allocation146_spill] sm:$0xff] %v11443_v44  ;;  %v11453_v11 = vld [vmem:[%s15244_s11 + $0x370] sm:$0xff]  ;;  %v11458_v59 = vld [vmem:[%s15244_s11 + $0x378] sm:$0xff] }
  0xb4   :  { %16527 = vst [vmem:[#allocation147_spill] sm:$0xff] %v11448_v43  ;;  %16528 = vst [vmem:[#allocation148_spill] sm:$0xff] %v11453_v11  ;;  %v11463_v27 = vld [vmem:[%s15244_s11 + $0x380] sm:$0xff]  ;;  %v11468_v44 = vld [vmem:[%s15244_s11 + $0x388] sm:$0xff] }
  0xb5   :  { %16529 = vst [vmem:[#allocation149_spill] sm:$0xff] %v11458_v59  ;;  %16530 = vst [vmem:[#allocation150_spill] sm:$0xff] %v11463_v27  ;;  %v11473_v43 = vld [vmem:[%s15244_s11 + $0x390] sm:$0xff]  ;;  %v11478_v11 = vld [vmem:[%s15244_s11 + $0x398] sm:$0xff] }
  0xb6   :  { %16531 = vst [vmem:[#allocation151_spill] sm:$0xff] %v11468_v44  ;;  %16532 = vst [vmem:[#allocation152_spill] sm:$0xff] %v11473_v43  ;;  %v11483_v59 = vld [vmem:[%s15244_s11 + $0x3a0] sm:$0xff]  ;;  %v11488_v27 = vld [vmem:[%s15244_s11 + $0x3a8] sm:$0xff] }
  0xb7   :  { %16533 = vst [vmem:[#allocation153_spill] sm:$0xff] %v11478_v11  ;;  %16534 = vst [vmem:[#allocation154_spill] sm:$0xff] %v11483_v59  ;;  %v11493_v44 = vld [vmem:[%s15244_s11 + $0x3b0] sm:$0xff]  ;;  %v11498_v43 = vld [vmem:[%s15244_s11 + $0x3b8] sm:$0xff] }
  0xb8   :  { %16535 = vst [vmem:[#allocation155_spill] sm:$0xff] %v11488_v27  ;;  %16536 = vst [vmem:[#allocation156_spill] sm:$0xff] %v11493_v44  ;;  %v11503_v11 = vld [vmem:[%s15244_s11 + $0x3c0] sm:$0xff]  ;;  %v11508_v59 = vld [vmem:[%s15244_s11 + $0x3c8] sm:$0xff] }
  0xb9   :  { %16537 = vst [vmem:[#allocation157_spill] sm:$0xff] %v11498_v43  ;;  %16538 = vst [vmem:[#allocation158_spill] sm:$0xff] %v11503_v11  ;;  %v11513_v27 = vld [vmem:[%s15244_s11 + $0x3d0] sm:$0xff]  ;;  %v11518_v44 = vld [vmem:[%s15244_s11 + $0x3d8] sm:$0xff] }
  0xba   :  { %16539 = vst [vmem:[#allocation159_spill] sm:$0xff] %v11508_v59  ;;  %16540 = vst [vmem:[#allocation160_spill] sm:$0xff] %v11513_v27  ;;  %v11523_v43 = vld [vmem:[%s15244_s11 + $0x3e0] sm:$0xff]  ;;  %v11528_v11 = vld [vmem:[%s15244_s11 + $0x3e8] sm:$0xff] }
  0xbb   :  { %16541 = vst [vmem:[#allocation161_spill] sm:$0xff] %v11518_v44  ;;  %16542 = vst [vmem:[#allocation162_spill] sm:$0xff] %v11523_v43  ;;  %v11533_v59 = vld [vmem:[%s15244_s11 + $0x3f0] sm:$0xff]  ;;  %v11538_v27 = vld [vmem:[%s15244_s11 + $0x3f8] sm:$0xff] }
  0xbc   :  { %16543 = vst [vmem:[#allocation163_spill] sm:$0xff] %v11528_v11  ;;  %16544 = vst [vmem:[#allocation164_spill] sm:$0xff] %v11533_v59  ;;  %v11540_v44 = vld [vmem:[#allocation17] sm:$0xff]  ;;  %v11542_v12 = vld [vmem:[#allocation19] ss:$0 sm:$0xff] }
  0xbd   :  { %16545 = vst [vmem:[#allocation165_spill] sm:$0xff] %v11538_v27  ;;  %16546 = vst [vmem:[#allocation166_spill] sm:$0xff] %v11542_v12  ;;  %v10265_v43 = vld [vmem:[#allocation8 + $0x64] ss:$16 sps:$4 sm:$0xff]   ;;  %v10267_v60 = vld [vmem:[#allocation8 + $0x6c] ss:$16 sps:$4 sm:$0xff]  }
  0xbe   :  { %320 = vmatprep.subr.bf16.mxu0 %v10265_v43  ;;  %v10269_v28 = vld [vmem:[#allocation8 + $0x60] ss:$16 sps:$4 sm:$0xff]   ;;  %v10270_v45 = vld [vmem:[#allocation8 + $0x68] ss:$16 sps:$4 sm:$0xff]   ;;  %361 = vmatprep.subr.bf16.mxu1 %v10267_v60  ;;  %v10271_v11 = vld [vmem:[#allocation8 + $0x44] ss:$16 sps:$4 sm:$0xff]  }
  0xbf   :  { %321 = vmatpush1.bf16.msra.mxu0 %v10269_v28  ;;  %362 = vmatpush1.bf16.msra.mxu1 %v10270_v45  ;;  %v10273_v13 = vld [vmem:[#allocation8 + $0x4c] ss:$16 sps:$4 sm:$0xff]   ;;  %v10275_v59 = vld [vmem:[#allocation8 + $0x40] ss:$16 sps:$4 sm:$0xff]   ;;  %v10276_v61 = vld [vmem:[#allocation8 + $0x48] ss:$16 sps:$4 sm:$0xff]  }
  0xc0   :  { %322 = vmatprep.subr.bf16.mxu0 %v10271_v11  ;;  %363 = vmatprep.subr.bf16.mxu1 %v10273_v13  ;;  %v10277_v29 = vld [vmem:[#allocation8 + $0x24] ss:$16 sps:$4 sm:$0xff]   ;;  %v10279_v27 = vld [vmem:[#allocation8 + $0x2c] ss:$16 sps:$4 sm:$0xff]   ;;  %v10281_v46 = vld [vmem:[#allocation8 + $0x20] ss:$16 sps:$4 sm:$0xff]  }
  0xc1   :  { %v10282_v14 = vld [vmem:[#allocation8 + $0x28] ss:$16 sps:$4 sm:$0xff]   ;;  %v10283_v12 = vld [vmem:[#allocation8 + $0x4] ss:$16 sps:$4 sm:$0xff]   ;;  %v10285_v43 = vld [vmem:[#allocation8 + $0xc] ss:$16 sps:$4 sm:$0xff]  }
  0xc2   :  { %v10287_v62 = vld [vmem:[#allocation8] ss:$16 sps:$4 sm:$0xff]   ;;  %v10288_v60 = vld [vmem:[#allocation8 + $0x8] ss:$16 sps:$4 sm:$0xff]   ;;  %v10289_v30 = vld [vmem:[#allocation11 + $0xe0] ss:$16 sps:$4 sm:$0xff]  }
  0xc3   :  { %323 = vmatpush1.bf16.msra.mxu0 %v10275_v59  ;;  %364 = vmatpush1.bf16.msra.mxu1 %v10276_v61  ;;  %v188_v28 = vld [vmem:[#allocation5] sm:$0xff]  ;;  %v10292_v59 = vld [vmem:[#allocation11 + $0x2e0] ss:$16 sps:$4 sm:$0xff]  }
  0xc4   :  { %324 = vmatprep.subr.bf16.mxu0 %v10277_v29  ;;  %365 = vmatprep.subr.bf16.mxu1 %v10279_v27  ;;  %v10291_v11 = vld [vmem:[#allocation11 + $0xe4] ss:$16 sps:$4 sm:$0xff]   ;;  %v11544_v13 = vpack.c.bf16 %v188_v28, %v188_v28  ;;  %v10385_v9 = vld [vmem:[#allocation11 + $0xe8] ss:$16 sps:$4 sm:$0xff]  }
  0xc5   :  { %v10294_v45 = vld [vmem:[#allocation11 + $0x2e4] ss:$16 sps:$4 sm:$0xff]   ;;  %v10388_v34 = vld [vmem:[#allocation11 + $0x2e8] ss:$16 sps:$4 sm:$0xff]  }
  0xc6   :  { %v10297_v27 = vld [vmem:[#allocation11 + $0xc4] ss:$16 sps:$4 sm:$0xff]  }
  0xc7   :  { %325 = vmatpush1.bf16.msra.mxu0 %v10281_v46  ;;  %366 = vmatpush1.bf16.msra.mxu1 %v10282_v14  ;;  %v10300_v29 = vld [vmem:[#allocation11 + $0x2c4] ss:$16 sps:$4 sm:$0xff]   ;;  %v10298_v14 = vld [vmem:[#allocation11 + $0x2c0] ss:$16 sps:$4 sm:$0xff]  }
  0xc8   :  { %326 = vmatprep.subr.bf16.mxu0 %v10283_v12  ;;  %367 = vmatprep.subr.bf16.mxu1 %v10285_v43  ;;  %v10295_v12 = vld [vmem:[#allocation11 + $0xc0] ss:$16 sps:$4 sm:$0xff]   ;;  %v10303_v46 = vld [vmem:[#allocation11 + $0xa4] ss:$16 sps:$4 sm:$0xff]  }
  0xc9   :  { %v10306_v61 = vld [vmem:[#allocation11 + $0x2a4] ss:$16 sps:$4 sm:$0xff]   ;;  %v10304_v43 = vld [vmem:[#allocation11 + $0x2a0] ss:$16 sps:$4 sm:$0xff]  }
  0xca   :  { %v10312_v28 = vld [vmem:[#allocation11 + $0x284] ss:$16 sps:$4 sm:$0xff]  }
  0xcb   :  { %327 = vmatpush1.bf16.msra.mxu0 %v10287_v62  ;;  %368 = vmatpush1.bf16.msra.mxu1 %v10288_v60  ;;  %v10301_v62 = vld [vmem:[#allocation11 + $0xa0] ss:$16 sps:$4 sm:$0xff]   ;;  %v10309_v60 = vld [vmem:[#allocation11 + $0x84] ss:$16 sps:$4 sm:$0xff]  }
  0xcc   :  { %1192 = vmatprep.subr.bf16.mxu0 %v10291_v11  ;;  %1233 = vmatprep.subr.bf16.mxu1 %v10294_v45  ;;  %v10307_v11 = vld [vmem:[#allocation11 + $0x80] ss:$16 sps:$4 sm:$0xff]   ;;  %v10345_v47 = vld [vmem:[#allocation11 + $0x1c4] ss:$16 sps:$4 sm:$0xff]  }
  0xcd   :  { %v10310_v45 = vld [vmem:[#allocation11 + $0x280] ss:$16 sps:$4 sm:$0xff]   ;;  %v10354_v15 = vld [vmem:[#allocation11 + $0x3a4] ss:$16 sps:$4 sm:$0xff]  }
  0xce   :  { %9063 = vmatmul.mubr.msk.bf16.vlgmr.msra.gmra.mxu0 %vm308_vm0, %v11544_v13  ;;  %9064 = vmatmul.mubr.msk.bf16.vlgmr.msra.gmra.mxu1 %vm308_vm0, %v11544_v13 }
  0xcf   :  { %1193 = vmatpush1.bf16.msra.mxu0 %v10289_v30  ;;  %1234 = vmatpush1.bf16.msra.mxu1 %v10292_v59  ;;  %v10315_v30 = vld [vmem:[#allocation11 + $0x64] ss:$16 sps:$4 sm:$0xff]  }
  0xd0   :  { %1194 = vmatprep.subr.bf16.mxu0 %v10297_v27  ;;  %1235 = vmatprep.subr.bf16.mxu1 %v10300_v29  ;;  %v10318_v59 = vld [vmem:[#allocation11 + $0x264] ss:$16 sps:$4 sm:$0xff]   ;;  %v10313_v27 = vld [vmem:[#allocation11 + $0x60] ss:$16 sps:$4 sm:$0xff]  }
  0xd1   :  { %v10316_v29 = vld [vmem:[#allocation11 + $0x260] ss:$16 sps:$4 sm:$0xff]  }
  0xd3   :  { %1195 = vmatpush1.bf16.msra.mxu0 %v10295_v12  ;;  %1236 = vmatpush1.bf16.msra.mxu1 %v10298_v14  ;;  %v10321_v12 = vld [vmem:[#allocation11 + $0x44] ss:$16 sps:$4 sm:$0xff]  }
  0xd4   :  { %1196 = vmatprep.subr.bf16.mxu0 %v10303_v46  ;;  %1237 = vmatprep.subr.bf16.mxu1 %v10306_v61  ;;  %v10324_v14 = vld [vmem:[#allocation11 + $0x244] ss:$16 sps:$4 sm:$0xff]   ;;  %v10319_v46 = vld [vmem:[#allocation11 + $0x40] ss:$16 sps:$4 sm:$0xff]  }
  0xd5   :  { %v10322_v61 = vld [vmem:[#allocation11 + $0x240] ss:$16 sps:$4 sm:$0xff]  }
  0xd7   :  { %1197 = vmatpush1.bf16.msra.mxu0 %v10301_v62  ;;  %1238 = vmatpush1.bf16.msra.mxu1 %v10304_v43  ;;  %v10327_v62 = vld [vmem:[#allocation11 + $0x24] ss:$16 sps:$4 sm:$0xff]  }
  0xd8   :  { %1198 = vmatprep.subr.bf16.mxu0 %v10309_v60  ;;  %1239 = vmatprep.subr.bf16.mxu1 %v10312_v28  ;;  %v10330_v43 = vld [vmem:[#allocation11 + $0x224] ss:$16 sps:$4 sm:$0xff]   ;;  %v10325_v60 = vld [vmem:[#allocation11 + $0x20] ss:$16 sps:$4 sm:$0xff]  }
  0xd9   :  { %v10328_v28 = vld [vmem:[#allocation11 + $0x220] ss:$16 sps:$4 sm:$0xff]  }
  0xdb   :  { %1199 = vmatpush1.bf16.msra.mxu0 %v10307_v11  ;;  %1240 = vmatpush1.bf16.msra.mxu1 %v10310_v45  ;;  %v10333_v11 = vld [vmem:[#allocation11 + $0x4] ss:$16 sps:$4 sm:$0xff]  }
  0xdc   :  { %1200 = vmatprep.subr.bf16.mxu0 %v10315_v30  ;;  %1241 = vmatprep.subr.bf16.mxu1 %v10318_v59  ;;  %v10336_v45 = vld [vmem:[#allocation11 + $0x204] ss:$16 sps:$4 sm:$0xff]   ;;  %v10331_v30 = vld [vmem:[#allocation11] ss:$16 sps:$4 sm:$0xff]  }
  0xdd   :  { %v10334_v59 = vld [vmem:[#allocation11 + $0x200] ss:$16 sps:$4 sm:$0xff]  }
  0xdf   :  { %1201 = vmatpush1.bf16.msra.mxu0 %v10313_v27  ;;  %1242 = vmatpush1.bf16.msra.mxu1 %v10316_v29  ;;  %v10339_v27 = vld [vmem:[#allocation11 + $0x1e4] ss:$16 sps:$4 sm:$0xff]  }
  0xe0   :  { %1202 = vmatprep.subr.bf16.mxu0 %v10321_v12  ;;  %1243 = vmatprep.subr.bf16.mxu1 %v10324_v14  ;;  %v10342_v29 = vld [vmem:[#allocation11 + $0x3e4] ss:$16 sps:$4 sm:$0xff]   ;;  %v10337_v12 = vld [vmem:[#allocation11 + $0x1e0] ss:$16 sps:$4 sm:$0xff]  }
  0xe1   :  { %v10340_v14 = vld [vmem:[#allocation11 + $0x3e0] ss:$16 sps:$4 sm:$0xff]  }
  0xe3   :  { %1203 = vmatpush1.bf16.msra.mxu0 %v10319_v46  ;;  %1244 = vmatpush1.bf16.msra.mxu1 %v10322_v61  ;;  %v10348_v46 = vld [vmem:[#allocation11 + $0x3c4] ss:$16 sps:$4 sm:$0xff]   ;;  %v10343_v61 = vld [vmem:[#allocation11 + $0x1c0] ss:$16 sps:$4 sm:$0xff]  }
  0xe4   :  { %1204 = vmatprep.subr.bf16.mxu0 %v10327_v62  ;;  %1245 = vmatprep.subr.bf16.mxu1 %v10330_v43  ;;  %v10346_v62 = vld [vmem:[#allocation11 + $0x3c0] ss:$16 sps:$4 sm:$0xff]   ;;  %v10351_v43 = vld [vmem:[#allocation11 + $0x1a4] ss:$16 sps:$4 sm:$0xff]  }
  0xe7   :  { %1205 = vmatpush1.bf16.msra.mxu0 %v10325_v60  ;;  %1246 = vmatpush1.bf16.msra.mxu1 %v10328_v28  ;;  %v10349_v60 = vld [vmem:[#allocation11 + $0x1a0] ss:$16 sps:$4 sm:$0xff]  }
  0xe8   :  { %1206 = vmatprep.subr.bf16.mxu0 %v10333_v11  ;;  %1247 = vmatprep.subr.bf16.mxu1 %v10336_v45  ;;  %v10352_v28 = vld [vmem:[#allocation11 + $0x3a0] ss:$16 sps:$4 sm:$0xff]   ;;  %v10357_v11 = vld [vmem:[#allocation11 + $0x184] ss:$16 sps:$4 sm:$0xff]  }
  0xe9   :  { %v10360_v45 = vld [vmem:[#allocation11 + $0x384] ss:$16 sps:$4 sm:$0xff]  }
  0xeb   :  { %1207 = vmatpush1.bf16.msra.mxu0 %v10331_v30  ;;  %1248 = vmatpush1.bf16.msra.mxu1 %v10334_v59  ;;  %v10355_v30 = vld [vmem:[#allocation11 + $0x180] ss:$16 sps:$4 sm:$0xff]  }
  0xec   :  { %1208 = vmatprep.subr.bf16.mxu0 %v10339_v27  ;;  %1249 = vmatprep.subr.bf16.mxu1 %v10342_v29  ;;  %v10358_v59 = vld [vmem:[#allocation11 + $0x380] ss:$16 sps:$4 sm:$0xff]   ;;  %v10363_v27 = vld [vmem:[#allocation11 + $0x164] ss:$16 sps:$4 sm:$0xff]  }
  0xed   :  { %v10366_v29 = vld [vmem:[#allocation11 + $0x364] ss:$16 sps:$4 sm:$0xff]  }
  0xef   :  { %1209 = vmatpush2.bf16.msra.mxu0 %v10337_v12  ;;  %1250 = vmatpush2.bf16.msra.mxu1 %v10340_v14  ;;  %v10361_v12 = vld [vmem:[#allocation11 + $0x160] ss:$16 sps:$4 sm:$0xff]  }
  0xf0   :  { %1210 = vmatprep.subr.bf16.mxu0 %v10345_v47  ;;  %1251 = vmatprep.subr.bf16.mxu1 %v10348_v46  ;;  %v10364_v14 = vld [vmem:[#allocation11 + $0x360] ss:$16 sps:$4 sm:$0xff]   ;;  %v10369_v47 = vld [vmem:[#allocation11 + $0x144] ss:$16 sps:$4 sm:$0xff]  }
  0xf1   :  { %v10372_v46 = vld [vmem:[#allocation11 + $0x344] ss:$16 sps:$4 sm:$0xff]  }
  0xf3   :  { %1211 = vmatpush2.bf16.msra.mxu0 %v10343_v61  ;;  %1252 = vmatpush2.bf16.msra.mxu1 %v10346_v62  ;;  %v10367_v61 = vld [vmem:[#allocation11 + $0x140] ss:$16 sps:$4 sm:$0xff]  }
  0xf4   :  { %1212 = vmatprep.subr.bf16.mxu0 %v10351_v43  ;;  %1253 = vmatprep.subr.bf16.mxu1 %v10354_v15  ;;  %v10370_v62 = vld [vmem:[#allocation11 + $0x340] ss:$16 sps:$4 sm:$0xff]   ;;  %v10375_v15 = vld [vmem:[#allocation11 + $0x124] ss:$16 sps:$4 sm:$0xff]  }
  0xf5   :  { %v10378_v43 = vld [vmem:[#allocation11 + $0x324] ss:$16 sps:$4 sm:$0xff]  }
  0xf7   :  { %1213 = vmatpush2.bf16.msra.mxu0 %v10349_v60  ;;  %1254 = vmatpush2.bf16.msra.mxu1 %v10352_v28  ;;  %v10373_v60 = vld [vmem:[#allocation11 + $0x120] ss:$16 sps:$4 sm:$0xff]  }
  0xf8   :  { %1214 = vmatprep.subr.bf16.mxu0 %v10357_v11  ;;  %1255 = vmatprep.subr.bf16.mxu1 %v10360_v45  ;;  %v10376_v28 = vld [vmem:[#allocation11 + $0x320] ss:$16 sps:$4 sm:$0xff]   ;;  %v10381_v11 = vld [vmem:[#allocation11 + $0x104] ss:$16 sps:$4 sm:$0xff]  }
  0xf9   :  { %v10384_v45 = vld [vmem:[#allocation11 + $0x304] ss:$16 sps:$4 sm:$0xff]  }
  0xfb   :  { %1215 = vmatpush2.bf16.msra.mxu0 %v10355_v30  ;;  %1256 = vmatpush2.bf16.msra.mxu1 %v10358_v59  ;;  %v10379_v30 = vld [vmem:[#allocation11 + $0x100] ss:$16 sps:$4 sm:$0xff]  }
  0xfc   :  { %1216 = vmatprep.subr.bf16.mxu0 %v10363_v27  ;;  %1257 = vmatprep.subr.bf16.mxu1 %v10366_v29  ;;  %v10382_v59 = vld [vmem:[#allocation11 + $0x300] ss:$16 sps:$4 sm:$0xff]   ;;  %v10387_v27 = vld [vmem:[#allocation11 + $0xec] ss:$16 sps:$4 sm:$0xff]  }
  0xfd   :  { %v10390_v29 = vld [vmem:[#allocation11 + $0x2ec] ss:$16 sps:$4 sm:$0xff]  }
  0xff   :  { %1217 = vmatpush2.bf16.msra.mxu0 %v10361_v12  ;;  %1258 = vmatpush2.bf16.msra.mxu1 %v10364_v14  ;;  %v208_v12 = vlaneseq }
 0x100   :  { %1218 = vmatprep.subr.bf16.mxu0 %v10369_v47  ;;  %1259 = vmatprep.subr.bf16.mxu1 %v10372_v46 }
 0x101   :  { %v11550_v14 = vshrl.u32 %v208_v12, 7 }
 0x103   :  { %1219 = vmatpush2.bf16.msra.mxu0 %v10367_v61  ;;  %1260 = vmatpush2.bf16.msra.mxu1 %v10370_v62  ;;  %v11553_v47 = vsub.s32 0, %v11550_v14  ;;  %v11556_v46 = vsub.s32 2, %v11550_v14  ;;  %v206_v61 = vld [vmem:[#allocation10] sm:$0xf]  ;;  %v11559_v62 = vsub.s32 1, %v11550_v14 }
 0x104   :  { %1220 = vmatprep.subr.bf16.mxu0 %v10375_v15  ;;  %1261 = vmatprep.subr.bf16.mxu1 %v10378_v43  ;;  %v11562_v15 = vsub.s32 3, %v11550_v14 }
 0x105   :  { %v211_v43 = vrot.slane %v206_v61, %v11553_v47 }
 0x107   :  { %1221 = vmatpush2.bf16.msra.mxu0 %v10373_v60  ;;  %1262 = vmatpush2.bf16.msra.mxu1 %v10376_v28  ;;  %v219_v60 = vrot.slane %v206_v61, %v11556_v46  ;;  %v215_v28 = vrot.slane %v206_v61, %v11559_v62 }
 0x108   :  { %1222 = vmatprep.subr.bf16.mxu0 %v10381_v11  ;;  %1263 = vmatprep.subr.bf16.mxu1 %v10384_v45  ;;  %v223_v11 = vrot.slane %v206_v61, %v11562_v15 }
 0x10b   :  { %1223 = vmatpush2.bf16.msra.mxu0 %v10379_v30  ;;  %1264 = vmatpush2.bf16.msra.mxu1 %v10382_v59 }
 0x10c   :  { %1274 = vmatprep.subr.bf16.mxu0 %v10387_v27  ;;  %1315 = vmatprep.subr.bf16.mxu1 %v10390_v29 }
 0x18e   :  { %v346_v45 = vpop.f32.mrf.mxu0  ;;  %v387_v30 = vpop.f32.mrf.mxu1 }
 0x18f   :  { %v347_v59 = vadd.f32 %v346_v45, %v211_v43  ;;  %v388_v27 = vadd.f32 %v387_v30, %v219_v60  ;;  %v10393_v60 = vld [vmem:[#allocation11 + $0xcc] ss:$16 sps:$4 sm:$0xff]  }
 0x190   :  { %v348_v29 = vpop.f32.mrf.mxu0  ;;  %v389_v12 = vpop.f32.mrf.mxu1  ;;  %v10417_v45 = vld [vmem:[#allocation11 + $0x4c] ss:$16 sps:$4 sm:$0xff]  }
 0x191   :  { %v396_v63 = vmax.f32 %v388_v27, 0.0  ;;  %v349_v31 = vadd.f32 %v348_v29, %v215_v28  ;;  %v390_v48 = vadd.f32 %v389_v12, %v223_v11  ;;  %v394_v16 = vmax.f32 %v347_v59, 0.0  ;;  %v10396_v28 = vld [vmem:[#allocation11 + $0x2cc] ss:$16 sps:$4 sm:$0xff]   ;;  %v10412_v11 = vld [vmem:[#allocation11 + $0x268] ss:$16 sps:$4 sm:$0xff]  }
 0x192   :  { %v350_v0 = vpop.f32.mrf.mxu0  ;;  %v391_v32 = vpop.f32.mrf.mxu1  ;;  %v10420_v30 = vld [vmem:[#allocation11 + $0x24c] ss:$16 sps:$4 sm:$0xff]   ;;  %v10415_v59 = vld [vmem:[#allocation11 + $0x48] ss:$16 sps:$4 sm:$0xff]  }
 0x193   :  { %v395_v49 = vmax.f32 %v349_v31, 0.0  ;;  %v397_v17 = vmax.f32 %v390_v48, 0.0  ;;  %v11568_v41 = vpack.c.bf16 %v396_v63, %v396_v63  ;;  %v11570_v43 = vpack.c.bf16 %v394_v16, %v394_v16  ;;  %v10391_v0 = vld [vmem:[#allocation11 + $0xc8] ss:$16 sps:$4 sm:$0xff]   ;;  %v10399_v32 = vld [vmem:[#allocation11 + $0xac] ss:$16 sps:$4 sm:$0xff]  }
 0x194   :  { %v351_v33 = vpop.f32.mrf.mxu0  ;;  %v392_v50 = vpop.f32.mrf.mxu1  ;;  %v10394_v31 = vld [vmem:[#allocation11 + $0x2c8] ss:$16 sps:$4 sm:$0xff]   ;;  %v10405_v48 = vld [vmem:[#allocation11 + $0x8c] ss:$16 sps:$4 sm:$0xff]  }
 0x195   :  { %v399_v18 = vpack.c.bf16 %v395_v49, %v395_v49  ;;  %v401_v61 = vpack.c.bf16 %v397_v17, %v397_v17  ;;  %v10402_v17 = vld [vmem:[#allocation11 + $0x2ac] ss:$16 sps:$4 sm:$0xff]   ;;  %v10397_v16 = vld [vmem:[#allocation11 + $0xa8] ss:$16 sps:$4 sm:$0xff]  }
 0x196   :  { %v10400_v33 = vld [vmem:[#allocation11 + $0x2a8] ss:$16 sps:$4 sm:$0xff]   ;;  %v10408_v49 = vld [vmem:[#allocation11 + $0x28c] ss:$16 sps:$4 sm:$0xff]  }
 0x197   :  { %1224 = vmatprep.mubr.bf16.mxu0 %v399_v18  ;;  %1265 = vmatprep.mubr.bf16.mxu1 %v401_v61  ;;  %v10414_v50 = vld [vmem:[#allocation11 + $0x26c] ss:$16 sps:$4 sm:$0xff]   ;;  %v10409_v63 = vld [vmem:[#allocation11 + $0x68] ss:$16 sps:$4 sm:$0xff]  }
 0x198   :  { %1225 = vmatmul.mubr.bf16.vlgmr.msra.gmra.mxu0 %v11570_v43  ;;  %1266 = vmatmul.mubr.bf16.vlgmr.msra.gmra.mxu1 %v11568_v41  ;;  %v10418_v27 = vld [vmem:[#allocation11 + $0x248] ss:$16 sps:$4 sm:$0xff]   ;;  %v10423_v29 = vld [vmem:[#allocation11 + $0x2c] ss:$16 sps:$4 sm:$0xff]  }
 0x199   :  { %1275 = vmatpush1.bf16.msra.mxu0 %v10385_v9  ;;  %1316 = vmatpush1.bf16.msra.mxu1 %v10388_v34  ;;  %v10403_v9 = vld [vmem:[#allocation11 + $0x88] ss:$16 sps:$4 sm:$0xff]   ;;  %v10426_v12 = vld [vmem:[#allocation11 + $0x22c] ss:$16 sps:$4 sm:$0xff]  }
 0x19a   :  { %1306 = vmatprep.mubr.bf16.mxu0 %v399_v18  ;;  %1347 = vmatprep.mubr.bf16.mxu1 %v401_v61  ;;  %v10406_v34 = vld [vmem:[#allocation11 + $0x288] ss:$16 sps:$4 sm:$0xff]   ;;  %v10411_v18 = vld [vmem:[#allocation11 + $0x6c] ss:$16 sps:$4 sm:$0xff]  }
 0x19b   :  { %1276 = vmatprep.subr.bf16.mxu0 %v10393_v60  ;;  %1317 = vmatprep.subr.bf16.mxu1 %v10396_v28  ;;  %v10421_v61 = vld [vmem:[#allocation11 + $0x28] ss:$16 sps:$4 sm:$0xff]   ;;  %v10429_v28 = vld [vmem:[#allocation11 + $0xc] ss:$16 sps:$4 sm:$0xff]  }
 0x19c   :  { %v10424_v60 = vld [vmem:[#allocation11 + $0x228] ss:$16 sps:$4 sm:$0xff]  }
 0x19d   :  { %1277 = vmatpush1.bf16.msra.mxu0 %v10391_v0  ;;  %1318 = vmatpush1.bf16.msra.mxu1 %v10394_v31  ;;  %v10432_v0 = vld [vmem:[#allocation11 + $0x20c] ss:$16 sps:$4 sm:$0xff]   ;;  %v10427_v31 = vld [vmem:[#allocation11 + $0x8] ss:$16 sps:$4 sm:$0xff]  }
 0x19e   :  { %1278 = vmatprep.subr.bf16.mxu0 %v10399_v32  ;;  %1319 = vmatprep.subr.bf16.mxu1 %v10402_v17  ;;  %v10430_v32 = vld [vmem:[#allocation11 + $0x208] ss:$16 sps:$4 sm:$0xff]   ;;  %v10435_v17 = vld [vmem:[#allocation11 + $0x1ec] ss:$16 sps:$4 sm:$0xff]  }
 0x1a1   :  { %1279 = vmatpush1.bf16.msra.mxu0 %v10397_v16  ;;  %1320 = vmatpush1.bf16.msra.mxu1 %v10400_v33  ;;  %v10438_v16 = vld [vmem:[#allocation11 + $0x3ec] ss:$16 sps:$4 sm:$0xff]   ;;  %v10433_v33 = vld [vmem:[#allocation11 + $0x1e8] ss:$16 sps:$4 sm:$0xff]  }
 0x1a2   :  { %1280 = vmatprep.subr.bf16.mxu0 %v10405_v48  ;;  %1321 = vmatprep.subr.bf16.mxu1 %v10408_v49  ;;  %v10436_v48 = vld [vmem:[#allocation11 + $0x3e8] ss:$16 sps:$4 sm:$0xff]   ;;  %v10441_v49 = vld [vmem:[#allocation11 + $0x1cc] ss:$16 sps:$4 sm:$0xff]  }
 0x1a5   :  { %1281 = vmatpush1.bf16.msra.mxu0 %v10403_v9  ;;  %1322 = vmatpush1.bf16.msra.mxu1 %v10406_v34  ;;  %v10444_v9 = vld [vmem:[#allocation11 + $0x3cc] ss:$16 sps:$4 sm:$0xff]   ;;  %v10439_v34 = vld [vmem:[#allocation11 + $0x1c8] ss:$16 sps:$4 sm:$0xff]  }
 0x1a6   :  { %1282 = vmatprep.subr.bf16.mxu0 %v10411_v18  ;;  %1323 = vmatprep.subr.bf16.mxu1 %v10414_v50  ;;  %v10442_v18 = vld [vmem:[#allocation11 + $0x3c8] ss:$16 sps:$4 sm:$0xff]   ;;  %v10447_v50 = vld [vmem:[#allocation11 + $0x1ac] ss:$16 sps:$4 sm:$0xff]  }
 0x1a9   :  { %1283 = vmatpush1.bf16.msra.mxu0 %v10409_v63  ;;  %1324 = vmatpush1.bf16.msra.mxu1 %v10412_v11  ;;  %v10450_v63 = vld [vmem:[#allocation11 + $0x3ac] ss:$16 sps:$4 sm:$0xff]   ;;  %v10445_v11 = vld [vmem:[#allocation11 + $0x1a8] ss:$16 sps:$4 sm:$0xff]  }
 0x1aa   :  { %1284 = vmatprep.subr.bf16.mxu0 %v10417_v45  ;;  %1325 = vmatprep.subr.bf16.mxu1 %v10420_v30  ;;  %v10448_v45 = vld [vmem:[#allocation11 + $0x3a8] ss:$16 sps:$4 sm:$0xff]   ;;  %v10453_v30 = vld [vmem:[#allocation11 + $0x18c] ss:$16 sps:$4 sm:$0xff]  }
 0x1ad   :  { %1285 = vmatpush1.bf16.msra.mxu0 %v10415_v59  ;;  %1326 = vmatpush1.bf16.msra.mxu1 %v10418_v27  ;;  %v10456_v59 = vld [vmem:[#allocation11 + $0x38c] ss:$16 sps:$4 sm:$0xff]   ;;  %v10451_v27 = vld [vmem:[#allocation11 + $0x188] ss:$16 sps:$4 sm:$0xff]  }
 0x1ae   :  { %1286 = vmatprep.subr.bf16.mxu0 %v10423_v29  ;;  %1327 = vmatprep.subr.bf16.mxu1 %v10426_v12  ;;  %v10454_v29 = vld [vmem:[#allocation11 + $0x388] ss:$16 sps:$4 sm:$0xff]   ;;  %v10459_v12 = vld [vmem:[#allocation11 + $0x16c] ss:$16 sps:$4 sm:$0xff]  }
 0x1b1   :  { %1287 = vmatpush1.bf16.msra.mxu0 %v10421_v61  ;;  %1328 = vmatpush1.bf16.msra.mxu1 %v10424_v60  ;;  %v10462_v61 = vld [vmem:[#allocation11 + $0x36c] ss:$16 sps:$4 sm:$0xff]   ;;  %v10457_v60 = vld [vmem:[#allocation11 + $0x168] ss:$16 sps:$4 sm:$0xff]  }
 0x1b2   :  { %1288 = vmatprep.subr.bf16.mxu0 %v10429_v28  ;;  %1329 = vmatprep.subr.bf16.mxu1 %v10432_v0  ;;  %v10460_v28 = vld [vmem:[#allocation11 + $0x368] ss:$16 sps:$4 sm:$0xff]   ;;  %v10465_v0 = vld [vmem:[#allocation11 + $0x14c] ss:$16 sps:$4 sm:$0xff]  }
 0x1b5   :  { %1289 = vmatpush1.bf16.msra.mxu0 %v10427_v31  ;;  %1330 = vmatpush1.bf16.msra.mxu1 %v10430_v32  ;;  %v10468_v31 = vld [vmem:[#allocation11 + $0x34c] ss:$16 sps:$4 sm:$0xff]   ;;  %v10463_v32 = vld [vmem:[#allocation11 + $0x148] ss:$16 sps:$4 sm:$0xff]  }
 0x1b6   :  { %1290 = vmatprep.subr.bf16.mxu0 %v10435_v17  ;;  %1331 = vmatprep.subr.bf16.mxu1 %v10438_v16  ;;  %v10466_v17 = vld [vmem:[#allocation11 + $0x348] ss:$16 sps:$4 sm:$0xff]   ;;  %v10471_v16 = vld [vmem:[#allocation11 + $0x12c] ss:$16 sps:$4 sm:$0xff]  }
 0x1b9   :  { %1291 = vmatpush2.bf16.msra.mxu0 %v10433_v33  ;;  %1332 = vmatpush2.bf16.msra.mxu1 %v10436_v48  ;;  %v10474_v33 = vld [vmem:[#allocation11 + $0x32c] ss:$16 sps:$4 sm:$0xff]   ;;  %v10469_v48 = vld [vmem:[#allocation11 + $0x128] ss:$16 sps:$4 sm:$0xff]  }
 0x1ba   :  { %1292 = vmatprep.subr.bf16.mxu0 %v10441_v49  ;;  %1333 = vmatprep.subr.bf16.mxu1 %v10444_v9  ;;  %v10472_v49 = vld [vmem:[#allocation11 + $0x328] ss:$16 sps:$4 sm:$0xff]   ;;  %v10477_v9 = vld [vmem:[#allocation11 + $0x10c] ss:$16 sps:$4 sm:$0xff]  }
 0x1bd   :  { %1293 = vmatpush2.bf16.msra.mxu0 %v10439_v34  ;;  %1334 = vmatpush2.bf16.msra.mxu1 %v10442_v18  ;;  %v10480_v34 = vld [vmem:[#allocation11 + $0x30c] ss:$16 sps:$4 sm:$0xff]   ;;  %v10475_v18 = vld [vmem:[#allocation11 + $0x108] ss:$16 sps:$4 sm:$0xff]  }
 0x1be   :  { %1294 = vmatprep.subr.bf16.mxu0 %v10447_v50  ;;  %1335 = vmatprep.subr.bf16.mxu1 %v10450_v63  ;;  %v10478_v50 = vld [vmem:[#allocation11 + $0x308] ss:$16 sps:$4 sm:$0xff]   ;;  %v1391_v63 = vld [vmem:[%s15238_s5 + $0xf8] sm:$0xff] }
 0x1c1   :  { %1295 = vmatpush2.bf16.msra.mxu0 %v10445_v11  ;;  %1336 = vmatpush2.bf16.msra.mxu1 %v10448_v45  ;;  %v1375_v11 = vld [vmem:[%s15238_s5 + $0x78] sm:$0xff]  ;;  %v1390_v45 = vld [vmem:[%s15238_s5 + $0xf0] sm:$0xff] }
 0x1c2   :  { %1296 = vmatprep.subr.bf16.mxu0 %v10453_v30  ;;  %1337 = vmatprep.subr.bf16.mxu1 %v10456_v59  ;;  %v1374_v30 = vld [vmem:[%s15238_s5 + $0x70] sm:$0xff]  ;;  %v1389_v59 = vld [vmem:[%s15238_s5 + $0xe8] sm:$0xff] }
 0x1c5   :  { %1297 = vmatpush2.bf16.msra.mxu0 %v10451_v27  ;;  %1338 = vmatpush2.bf16.msra.mxu1 %v10454_v29  ;;  %v1373_v27 = vld [vmem:[%s15238_s5 + $0x68] sm:$0xff]  ;;  %v1387_v29 = vld [vmem:[%s15238_s5 + $0xd8] sm:$0xff] }
 0x1c6   :  { %1298 = vmatprep.subr.bf16.mxu0 %v10459_v12  ;;  %1339 = vmatprep.subr.bf16.mxu1 %v10462_v61  ;;  %v1371_v12 = vld [vmem:[%s15238_s5 + $0x58] sm:$0xff]  ;;  %v1386_v61 = vld [vmem:[%s15238_s5 + $0xd0] sm:$0xff] }
 0x1c9   :  { %1299 = vmatpush2.bf16.msra.mxu0 %v10457_v60  ;;  %1340 = vmatpush2.bf16.msra.mxu1 %v10460_v28  ;;  %v1370_v60 = vld [vmem:[%s15238_s5 + $0x50] sm:$0xff]  ;;  %v1385_v28 = vld [vmem:[%s15238_s5 + $0xc8] sm:$0xff] }
 0x1ca   :  { %1300 = vmatprep.subr.bf16.mxu0 %v10465_v0  ;;  %1341 = vmatprep.subr.bf16.mxu1 %v10468_v31  ;;  %v1369_v0 = vld [vmem:[%s15238_s5 + $0x48] sm:$0xff]  ;;  %v1423_v31 = vld [vmem:[%s15238_s5 + $0x1f8] sm:$0xff] }
 0x1cd   :  { %1301 = vmatpush2.bf16.msra.mxu0 %v10463_v32  ;;  %1342 = vmatpush2.bf16.msra.mxu1 %v10466_v17  ;;  %v1407_v32 = vld [vmem:[%s15238_s5 + $0x178] sm:$0xff]  ;;  %v1422_v17 = vld [vmem:[%s15238_s5 + $0x1f0] sm:$0xff] }
 0x1ce   :  { %1302 = vmatprep.subr.bf16.mxu0 %v10471_v16  ;;  %1343 = vmatprep.subr.bf16.mxu1 %v10474_v33  ;;  %v1384_v16 = vld [vmem:[%s15238_s5 + $0xc0] sm:$0xff]  ;;  %v1406_v33 = vld [vmem:[%s15238_s5 + $0x170] sm:$0xff] }
 0x1d1   :  { %1303 = vmatpush2.bf16.msra.mxu0 %v10469_v48  ;;  %1344 = vmatpush2.bf16.msra.mxu1 %v10472_v49  ;;  %v1368_v48 = vld [vmem:[%s15238_s5 + $0x40] sm:$0xff]  ;;  %v1421_v49 = vld [vmem:[%s15238_s5 + $0x1e8] sm:$0xff] }
 0x1d2   :  { %1304 = vmatprep.subr.bf16.mxu0 %v10477_v9  ;;  %1345 = vmatprep.subr.bf16.mxu1 %v10480_v34  ;;  %v1383_v9 = vld [vmem:[%s15238_s5 + $0xb8] sm:$0xff]  ;;  %v1405_v34 = vld [vmem:[%s15238_s5 + $0x168] sm:$0xff] }
 0x1d5   :  { %1305 = vmatpush2.bf16.msra.mxu0 %v10475_v18  ;;  %1346 = vmatpush2.bf16.msra.mxu1 %v10478_v50  ;;  %v1367_v18 = vld [vmem:[%s15238_s5 + $0x38] sm:$0xff]  ;;  %v1420_v50 = vld [vmem:[%s15238_s5 + $0x1e0] sm:$0xff] }
 0x1d6   :  { %9757 = vmatprep.subr.mxu0 %v1391_v63  ;;  %9792 = vmatprep.subr.mxu1 %v1423_v31  ;;  %v1382_v63 = vld [vmem:[%s15238_s5 + $0xb0] sm:$0xff]  ;;  %v1363_v31 = vld [vmem:[%s15238_s5 + $0x18] sm:$0xff] }
 0x1d8   :  { %1307 = vmatmul.mubr.bf16.vlgmr.msra.gmra.mxu0 %v11570_v43  ;;  %1348 = vmatmul.mubr.bf16.vlgmr.msra.gmra.mxu1 %v11568_v41  ;;  %v1388_v43 = vld [vmem:[%s15238_s5 + $0xe0] sm:$0xff] }
 0x1d9   :  { %9758 = vmatpush3.msra.mxu0 %v1375_v11  ;;  %v1372_v41 = vld [vmem:[%s15238_s5 + $0x60] sm:$0xff]  ;;  %9793 = vmatpush3.msra.mxu1 %v1407_v32 }
 0x1da   :  { %9759 = vmatprep.subr.mxu0 %v1390_v45  ;;  %9794 = vmatprep.subr.mxu1 %v1422_v17  ;;  %v1404_v11 = vld [vmem:[%s15238_s5 + $0x160] sm:$0xff]  ;;  %v1366_v45 = vld [vmem:[%s15238_s5 + $0x30] sm:$0xff] }
 0x1db   :  { %9760 = vmatpush3.msra.mxu0 %v1374_v30  ;;  %9795 = vmatpush3.msra.mxu1 %v1406_v33  ;;  %v1419_v30 = vld [vmem:[%s15238_s5 + $0x1d8] sm:$0xff]  ;;  %v1416_v32 = vld [vmem:[%s15238_s5 + $0x1c0] sm:$0xff]  ;;  %v1378_v17 = vld [vmem:[%s15238_s5 + $0x90] sm:$0xff] }
 0x1dc   :  { %9761 = vmatprep.subr.mxu0 %v1389_v59  ;;  %9796 = vmatprep.subr.mxu1 %v1421_v49  ;;  %v1381_v59 = vld [vmem:[%s15238_s5 + $0xa8] sm:$0xff]  ;;  %v1362_v33 = vld [vmem:[%s15238_s5 + $0x10] sm:$0xff] }
 0x1dd   :  { %9762 = vmatpush3.msra.mxu0 %v1373_v27  ;;  %9797 = vmatpush3.msra.mxu1 %v1405_v34  ;;  %v1403_v27 = vld [vmem:[%s15238_s5 + $0x158] sm:$0xff]  ;;  %v1377_v49 = vld [vmem:[%s15238_s5 + $0x88] sm:$0xff] }
 0x1de   :  { %9763 = vmatprep.subr.mxu0 %v1388_v43  ;;  %9798 = vmatprep.subr.mxu1 %v1420_v50  ;;  %v1365_v43 = vld [vmem:[%s15238_s5 + $0x28] sm:$0xff]  ;;  %v1376_v50 = vld [vmem:[%s15238_s5 + $0x80] sm:$0xff] }
 0x1df   :  { %9764 = vmatpush3.msra.mxu0 %v1372_v41  ;;  %9799 = vmatpush3.msra.mxu1 %v1404_v11  ;;  %v1418_v41 = vld [vmem:[%s15238_s5 + $0x1d0] sm:$0xff]  ;;  %v1361_v34 = vld [vmem:[%s15238_s5 + $0x8] sm:$0xff]  ;;  %v1360_v11 = vld [vmem:[%s15238_s5] sm:$0xff] }
 0x1e0   :  { %9765 = vmatprep.subr.mxu0 %v1387_v29  ;;  %v1380_v29 = vld [vmem:[%s15238_s5 + $0xa0] sm:$0xff]  ;;  %9800 = vmatprep.subr.mxu1 %v1419_v30  ;;  %v1397_v30 = vld [vmem:[%s15238_s5 + $0x128] sm:$0xff] }
 0x1e1   :  { %9766 = vmatpush3.msra.mxu0 %v1371_v12  ;;  %v1402_v12 = vld [vmem:[%s15238_s5 + $0x150] sm:$0xff]  ;;  %9801 = vmatpush3.msra.mxu1 %v1403_v27  ;;  %v1396_v27 = vld [vmem:[%s15238_s5 + $0x120] sm:$0xff] }
 0x1e2   :  { %9767 = vmatprep.subr.mxu0 %v1386_v61  ;;  %v1364_v61 = vld [vmem:[%s15238_s5 + $0x20] sm:$0xff]  ;;  %9802 = vmatprep.subr.mxu1 %v1418_v41  ;;  %v1395_v41 = vld [vmem:[%s15238_s5 + $0x118] sm:$0xff] }
 0x1e3   :  { %9768 = vmatpush3.msra.mxu0 %v1370_v60  ;;  %v1417_v60 = vld [vmem:[%s15238_s5 + $0x1c8] sm:$0xff]  ;;  %9803 = vmatpush3.msra.mxu1 %v1402_v12  ;;  %v1394_v12 = vld [vmem:[%s15238_s5 + $0x110] sm:$0xff] }
 0x1e4   :  { %9769 = vmatprep.subr.mxu0 %v1385_v28  ;;  %v1379_v28 = vld [vmem:[%s15238_s5 + $0x98] sm:$0xff]  ;;  %9804 = vmatprep.subr.mxu1 %v1417_v60  ;;  %v1393_v60 = vld [vmem:[%s15238_s5 + $0x108] sm:$0xff] }
 0x1e5   :  { %9770 = vmatpush3.msra.mxu0 %v1369_v0  ;;  %v1401_v0 = vld [vmem:[%s15238_s5 + $0x148] sm:$0xff] }
 0x1e6   :  { %9771 = vmatprep.subr.mxu0 %v1384_v16  ;;  %v1400_v16 = vld [vmem:[%s15238_s5 + $0x140] sm:$0xff]  ;;  %9805 = vmatpush3.msra.mxu1 %v1401_v0 }
 0x1e7   :  { %9772 = vmatpush3.msra.mxu0 %v1368_v48  ;;  %v1415_v48 = vld [vmem:[%s15238_s5 + $0x1b8] sm:$0xff]  ;;  %9806 = vmatprep.subr.mxu1 %v1416_v32  ;;  %v1392_v0 = vld [vmem:[%s15238_s5 + $0x100] sm:$0xff] }
 0x1e8   :  { %9773 = vmatprep.subr.mxu0 %v1383_v9  ;;  %v1399_v9 = vld [vmem:[%s15238_s5 + $0x138] sm:$0xff]  ;;  %9807 = vmatpush3.msra.mxu1 %v1400_v16 }
 0x1e9   :  { %9774 = vmatpush3.msra.mxu0 %v1367_v18  ;;  %v1414_v18 = vld [vmem:[%s15238_s5 + $0x1b0] sm:$0xff]  ;;  %9808 = vmatprep.subr.mxu1 %v1415_v48 }
 0x1ea   :  { %9775 = vmatprep.subr.mxu0 %v1382_v63  ;;  %v1398_v63 = vld [vmem:[%s15238_s5 + $0x130] sm:$0xff]  ;;  %9809 = vmatpush3.msra.mxu1 %v1399_v9 }
 0x1eb   :  { %9776 = vmatpush3.msra.mxu0 %v1366_v45  ;;  %v1413_v45 = vld [vmem:[%s15238_s5 + $0x1a8] sm:$0xff]  ;;  %9810 = vmatprep.subr.mxu1 %v1414_v18 }
 0x1ec   :  { %9777 = vmatprep.subr.mxu0 %v1381_v59  ;;  %9811 = vmatpush3.msra.mxu1 %v1398_v63  ;;  %v1412_v59 = vld [vmem:[%s15238_s5 + $0x1a0] sm:$0xff] }
 0x1ed   :  { %9778 = vmatpush3.msra.mxu0 %v1365_v43  ;;  %9812 = vmatprep.subr.mxu1 %v1413_v45  ;;  %v1411_v43 = vld [vmem:[%s15238_s5 + $0x198] sm:$0xff] }
 0x1ee   :  { %9779 = vmatprep.subr.mxu0 %v1380_v29  ;;  %9813 = vmatpush3.msra.mxu1 %v1397_v30  ;;  %v1410_v29 = vld [vmem:[%s15238_s5 + $0x190] sm:$0xff] }
 0x1ef   :  { %9780 = vmatpush3.msra.mxu0 %v1364_v61  ;;  %9814 = vmatprep.subr.mxu1 %v1412_v59  ;;  %v1409_v61 = vld [vmem:[%s15238_s5 + $0x188] sm:$0xff] }
 0x1f0   :  { %9781 = vmatprep.subr.mxu0 %v1379_v28  ;;  %9815 = vmatpush3.msra.mxu1 %v1396_v27  ;;  %v1408_v28 = vld [vmem:[%s15238_s5 + $0x180] sm:$0xff]  ;;  %s10772_s5 = smov [#allocation2]  }
 0x1f1   :  { %9782 = vmatpush3.msra.mxu0 %v1363_v31  ;;  %9816 = vmatprep.subr.mxu1 %v1411_v43  ;;  %v530_v31 = vld [vmem:[#allocation13] sm:$0xf]  ;;  %s172_s2 = sshll.u32 %s10772_s5, 4  ;;  %s173_s2 = int_to_ptr.vmem [resolvable:$true] %s172_s2 }
 0x1f2   :  { %9783 = vmatprep.subr.mxu0 %v1378_v17  ;;  %9817 = vmatpush3.msra.mxu1 %v1395_v41  ;;  %v535_v32 = vrot.slane %v530_v31, %v11553_v47  ;;  %v539_v17 = vrot.slane %v530_v31, %v11559_v62  ;;  %v543_v43 = vrot.slane %v530_v31, %v11556_v46  ;;  %s10689_s4 = scalar_lea.vmem %s173_s2, 4096  ;;  %p10694_p9 = scmp.lt.s32.totalorder %s173_s2, %s173_s2 }
 0x1f3   :  { %9784 = vmatpush3.msra.mxu0 %v1362_v33  ;;  %9818 = vmatprep.subr.mxu1 %v1410_v29  ;;  %v547_v41 = vrot.slane %v530_v31, %v11562_v15  ;;  %p10690_p8 = scmp.ne.s32.totalorder %s173_s2, %s10689_s4  ;;  %p10695_p10 = scmp.lt.s32.totalorder %s10689_s4, %s10689_s4 }
 0x1f4   :  { %9785 = vmatprep.subr.mxu0 %v1377_v49  ;;  %9819 = vmatpush3.msra.mxu1 %v1394_v12 }
 0x1f5   :  { %9786 = vmatpush3.msra.mxu0 %v1361_v34  ;;  %9820 = vmatprep.subr.mxu1 %v1409_v61  ;;  %p10696_p11 = por %p10695_p10, %p10694_p9 }
 0x1f6   :  { %9787 = vmatprep.subr.mxu0 %v1376_v50  ;;  %9821 = vmatpush3.msra.mxu1 %v1393_v60 }
 0x1f7   :  { %9788 = vmatpush3.msra.mxu0 %v1360_v11  ;;  %9822 = vmatprep.subr.mxu1 %v1408_v28  ;;  %p10697_p12 = pnand %p10696_p11, %p10690_p8 }
 0x1f8   :  { %9823 = vmatpush3.msra.mxu1 %v1392_v0 }
 0x258   :  { %v1226_v16 = vpop.f32.mrf.mxu0  ;;  %v1267_v33 = vpop.f32.mrf.mxu1 }
 0x259   :  { %v1227_v48 = vadd.f32 %v1226_v16, %v535_v32 }
 0x25a   :  { %v1228_v49 = vpop.f32.mrf.mxu0  ;;  %v1269_v9 = vpop.f32.mrf.mxu1 }
 0x25b   :  { %v1229_v34 = vadd.f32 %v1228_v49, %v539_v17  ;;  %v1268_v18 = vadd.f32 %v1267_v33, %v1227_v48 }
 0x25c   :  { %v1230_v50 = vpop.f32.mrf.mxu0  ;;  %v1271_v63 = vpop.f32.mrf.mxu1 }
 0x25d   :  { %v1270_v11 = vadd.f32 %v1269_v9, %v1229_v34  ;;  %v1356_v27 = vmax.f32 %v1268_v18, 0.0 }
 0x25e   :  { %v1231_v45 = vpop.f32.mrf.mxu0  ;;  %v1272_v30 = vpop.f32.mrf.mxu1 }
 0x25f   :  { %v1357_v59 = vmax.f32 %v1270_v11, 0.0 }
 0x261   :  { %1495 = vmatprep.mubr.f32.mxu0 %v1357_v59 }
 0x262   :  { %1496 = vmatmul.mubr.f32.vlgmr.msra.gmra.mxu0 %v1356_v27 }
 0x298   :  { %v1308_v29 = vpop.f32.mrf.mxu0  ;;  %v1349_v12 = vpop.f32.mrf.mxu1 }
 0x299   :  { %v1309_v61 = vadd.f32 %v1308_v29, %v543_v43 }
 0x29a   :  { %v1310_v60 = vpop.f32.mrf.mxu0  ;;  %v1351_v28 = vpop.f32.mrf.mxu1 }
 0x29b   :  { %v1311_v0 = vadd.f32 %v1310_v60, %v547_v41  ;;  %v1350_v32 = vadd.f32 %v1349_v12, %v1309_v61 }
 0x29c   :  { %v1312_v17 = vpop.f32.mrf.mxu0  ;;  %v1353_v16 = vpop.f32.mrf.mxu1 }
 0x29d   :  { %v1352_v33 = vadd.f32 %v1351_v28, %v1311_v0  ;;  %v1358_v34 = vmax.f32 %v1350_v32, 0.0 }
 0x29e   :  { %v1313_v48 = vpop.f32.mrf.mxu0  ;;  %v1354_v49 = vpop.f32.mrf.mxu1 }
 0x29f   :  { %v1359_v9 = vmax.f32 %v1352_v33, 0.0 }
 0x2a1   :  { %1565 = vmatprep.mubr.f32.mxu1 %v1359_v9 }
 0x2a2   :  { %1566 = vmatmul.mubr.f32.vlgmr.msra.gmra.mxu1 %v1358_v34 }
 0x2a3   :  { %10700 = shalt.err (!%p10697_p12)  }
 0x2a4   :  { %175 = dma.hbm_to_vmem [thread:$0]  %s15245_s12, 4096, %s173_s2, [#allocation4] }
 0x2a5   :  { %s10709_s6 = scalar_lea.vmem %s185_s3, 65536  ;;  %p10714_p0 = scmp.lt.s32.totalorder %s185_s3, %s185_s3 }
 0x2a6   :  { %p10710_p13 = scmp.ne.s32.totalorder %s185_s3, %s10709_s6  ;;  %p10715_p1 = scmp.lt.s32.totalorder %s10709_s6, %s10709_s6 }
 0x2a8   :  { %p10716_p2 = por %p10715_p1, %p10714_p0 }
 0x2aa   :  { %p10717_p3 = pnand %p10716_p2, %p10710_p13 }
 0x2ac   :  { %10720 = shalt.err (!%p10717_p3)  }
 0x2ad   :  { %187 = dma.hbm_to_vmem [thread:$0]  %s15246_s13, 65536, %s185_s3, [#allocation4 + $0x1]  ;;  %v9193_v63 = vld [vmem:[#allocation14] ss:$0 sm:$0xff] }
 0x322   :  { %v9789_v31 = vpop.f32.mrf.mxu0 }
 0x324   :  { %v9790_v18 = vpop.f32.mrf.mxu0 }
 0x325   :  { %v9791_v50 = vadd.f32 %v9790_v18, %v9789_v31 }
 0x327   :  { %v1498_v30 = vadd.f32 %v9791_v50, %v9193_v63 }
 0x362   :  { %v9824_v11 = vpop.f32.mrf.mxu1 }
 0x364   :  { %v9825_v45 = vpop.f32.mrf.mxu1 }
 0x365   :  { %v9826_v59 = vadd.f32 %v9825_v45, %v9824_v11 }
 0x367   :  { %v11778_v27 = vadd.f32 %v9826_v59, %v1498_v30 }
 0x369   :  { %16547 = vst [vmem:[#allocation167_spill] sm:$0xff] %v11778_v27 }
 0x36a   :  { %10753 = dma.done.wait [#allocation4], 4096 }
 0x36b   :  { %10754 = vsyncadd [#allocation4], 4294963200  ;;  %v16548_v43 = vmov 0   ;;  %v1737_v41 = vld [vmem:[#allocation2 + $0xc0] sm:$0xff]  ;;  %v1738_v12 = vld [vmem:[#allocation2 + $0xc8] sm:$0xff]  ;;  %vm2111_vm1 = vcmask 64512  }
 0x36c   :  { %1979 = vmatprep.mubr.bf16.mxu0 %v16548_v43  ;;  %2020 = vmatprep.mubr.bf16.mxu1 %v16548_v43  ;;  %v1741_v29 = vld [vmem:[#allocation2 + $0xe0] sm:$0xff]  ;;  %v1742_v60 = vld [vmem:[#allocation2 + $0xe8] sm:$0xff] }
 0x36d   :  { %v9219_v61 = vcombine.high %v1737_v41, %v1741_v29  ;;  %v9218_v28 = vcombine.low %v1737_v41, %v1741_v29  ;;  %v1729_v0 = vld [vmem:[#allocation2 + $0x80] sm:$0xff]  ;;  %v9221_v17 = vcombine.high %v1738_v12, %v1742_v60  ;;  %v9220_v16 = vcombine.low %v1738_v12, %v1742_v60  ;;  %v1730_v48 = vld [vmem:[#allocation2 + $0x88] sm:$0xff] }
 0x36e   :  { %v1733_v32 = vld [vmem:[#allocation2 + $0xa0] sm:$0xff]  ;;  %v1734_v49 = vld [vmem:[#allocation2 + $0xa8] sm:$0xff] }
 0x36f   :  { %v9211_v33 = vcombine.high %v1729_v0, %v1733_v32  ;;  %v1721_v9 = vld [vmem:[#allocation2 + $0x40] sm:$0xff]  ;;  %1955 = vmatprep.subr.bf16.mxu0 %v9219_v61  ;;  %v9213_v34 = vcombine.high %v1730_v48, %v1734_v49  ;;  %v1722_v18 = vld [vmem:[#allocation2 + $0x48] sm:$0xff]  ;;  %1996 = vmatprep.subr.bf16.mxu1 %v9221_v17  ;;  %v9210_v63 = vcombine.low %v1729_v0, %v1733_v32  ;;  %v1743_v0 = vld [vmem:[#allocation2 + $0xf0] sm:$0xff] }
 0x370   :  { %v1725_v31 = vld [vmem:[#allocation2 + $0x60] sm:$0xff]  ;;  %v1726_v50 = vld [vmem:[#allocation2 + $0x68] sm:$0xff]  ;;  %1956 = vmatpush1.bf16.msra.mxu0 %v9218_v28  ;;  %1997 = vmatpush1.bf16.msra.mxu1 %v9220_v16  ;;  %v9212_v11 = vcombine.low %v1730_v48, %v1734_v49  ;;  %v1739_v28 = vld [vmem:[#allocation2 + $0xd0] sm:$0xff] }
 0x371   :  { %1957 = vmatprep.subr.bf16.mxu0 %v9211_v33  ;;  %v9203_v45 = vcombine.high %v1721_v9, %v1725_v31  ;;  %1998 = vmatprep.subr.bf16.mxu1 %v9213_v34  ;;  %v9205_v30 = vcombine.high %v1722_v18, %v1726_v50  ;;  %v1713_v59 = vld [vmem:[#allocation2] sm:$0xff]  ;;  %v1714_v29 = vld [vmem:[#allocation2 + $0x8] sm:$0xff]  ;;  %v9202_v60 = vcombine.low %v1721_v9, %v1725_v31  ;;  %v1740_v32 = vld [vmem:[#allocation2 + $0xd8] sm:$0xff] }
 0x372   :  { %v1717_v41 = vld [vmem:[#allocation2 + $0x20] sm:$0xff]  ;;  %v1718_v12 = vld [vmem:[#allocation2 + $0x28] sm:$0xff]  ;;  %v9204_v61 = vcombine.low %v1722_v18, %v1726_v50  ;;  %v1744_v16 = vld [vmem:[#allocation2 + $0xf8] sm:$0xff]  ;;  %v9223_v49 = vcombine.high %v1739_v28, %v1743_v0  ;;  %v9222_v18 = vcombine.low %v1739_v28, %v1743_v0 }
 0x373   :  { %v9195_v51 = vcombine.high %v1713_v59, %v1717_v41  ;;  %v9197_v17 = vcombine.high %v1714_v29, %v1718_v12  ;;  %v9194_v33 = vcombine.low %v1713_v59, %v1717_v41  ;;  %v9196_v48 = vcombine.low %v1714_v29, %v1718_v12  ;;  %v1735_v9 = vld [vmem:[#allocation2 + $0xb0] sm:$0xff]  ;;  %v1732_v31 = vld [vmem:[#allocation2 + $0x98] sm:$0xff] }
 0x374   :  { %1958 = vmatpush1.bf16.msra.mxu0 %v9210_v63  ;;  %1999 = vmatpush1.bf16.msra.mxu1 %v9212_v11  ;;  %v9225_v34 = vcombine.high %v1740_v32, %v1744_v16  ;;  %v1731_v63 = vld [vmem:[#allocation2 + $0x90] sm:$0xff]  ;;  %v1736_v11 = vld [vmem:[#allocation2 + $0xb8] sm:$0xff]  ;;  %v9224_v50 = vcombine.low %v1740_v32, %v1744_v16 }
 0x375   :  { %1959 = vmatprep.subr.bf16.mxu0 %v9203_v45  ;;  %2000 = vmatprep.subr.bf16.mxu1 %v9205_v30  ;;  %v9215_v45 = vcombine.high %v1731_v63, %v1735_v9  ;;  %v9217_v30 = vcombine.high %v1732_v31, %v1736_v11  ;;  %v1727_v59 = vld [vmem:[#allocation2 + $0x70] sm:$0xff]  ;;  %v1728_v41 = vld [vmem:[#allocation2 + $0x78] sm:$0xff]  ;;  %v9214_v29 = vcombine.low %v1731_v63, %v1735_v9 }
 0x376   :  { %v9216_v12 = vcombine.low %v1732_v31, %v1736_v11  ;;  %v1715_v28 = vld [vmem:[#allocation2 + $0x10] sm:$0xff]  ;;  %v1716_v32 = vld [vmem:[#allocation2 + $0x18] sm:$0xff] }
 0x377   :  { %v1719_v0 = vld [vmem:[#allocation2 + $0x30] sm:$0xff]  ;;  %v1720_v16 = vld [vmem:[#allocation2 + $0x38] sm:$0xff] }
 0x378   :  { %1960 = vmatpush1.bf16.msra.mxu0 %v9202_v60  ;;  %2001 = vmatpush1.bf16.msra.mxu1 %v9204_v61  ;;  %v1723_v60 = vld [vmem:[#allocation2 + $0x50] sm:$0xff]  ;;  %v9198_v63 = vcombine.low %v1715_v28, %v1719_v0  ;;  %v9200_v9 = vcombine.low %v1716_v32, %v1720_v16 }
 0x379   :  { %1961 = vmatprep.subr.bf16.mxu0 %v9195_v51  ;;  %2002 = vmatprep.subr.bf16.mxu1 %v9197_v17  ;;  %v1724_v51 = vld [vmem:[#allocation2 + $0x58] sm:$0xff]  ;;  %v9207_v61 = vcombine.high %v1723_v60, %v1727_v59 }
 0x37a   :  { %v9209_v17 = vcombine.high %v1724_v51, %v1728_v41 }
 0x37c   :  { %1962 = vmatpush1.bf16.msra.mxu0 %v9194_v33  ;;  %2003 = vmatpush1.bf16.msra.mxu1 %v9196_v48  ;;  %v9206_v33 = vcombine.low %v1723_v60, %v1727_v59  ;;  %v9208_v48 = vcombine.low %v1724_v51, %v1728_v41  ;;  %v1745_v59 = vld [vmem:[#allocation16] sm:$0xff] }
 0x37d   :  { %2037 = vmatprep.subr.bf16.mxu0 %v9223_v49  ;;  %2078 = vmatprep.subr.bf16.mxu1 %v9225_v34  ;;  %v9199_v49 = vcombine.high %v1715_v28, %v1719_v0  ;;  %v9201_v34 = vcombine.high %v1716_v32, %v1720_v16  ;;  %v1758_v28 = vrot.slane %v1745_v59, %v11556_v46  ;;  %v15358_v0 = vsub.s32 6, %v11550_v14 }
 0x37e   :  { %v1754_v16 = vrot.slane %v1745_v59, %v11559_v62 }
 0x37f   :  { %9226 = vmatmul.mubr.msk.bf16.vlgmr.msra.gmra.mxu0 %vm308_vm0, %v11544_v13  ;;  %9227 = vmatmul.mubr.msk.bf16.vlgmr.msra.gmra.mxu1 %vm308_vm0, %v11544_v13 }
 0x380   :  { %2038 = vmatpush1.bf16.msra.mxu0 %v9222_v18  ;;  %2079 = vmatpush1.bf16.msra.mxu1 %v9224_v50 }
 0x381   :  { %2039 = vmatprep.subr.bf16.mxu0 %v9215_v45  ;;  %2080 = vmatprep.subr.bf16.mxu1 %v9217_v30 }
 0x382   :  { %2061 = vmatprep.mubr.bf16.mxu0 %v16548_v43  ;;  %2102 = vmatprep.mubr.bf16.mxu1 %v16548_v43  ;;  %v15356_v43 = vmov 0.0  }
 0x384   :  { %2040 = vmatpush1.bf16.msra.mxu0 %v9214_v29  ;;  %2081 = vmatpush1.bf16.msra.mxu1 %v9216_v12  ;;  %v1750_v12 = vrot.slane %v1745_v59, %v11553_v47 }
 0x385   :  { %2041 = vmatprep.subr.bf16.mxu0 %v9207_v61  ;;  %2082 = vmatprep.subr.bf16.mxu1 %v9209_v17  ;;  %v15360_v61 = vsub.s32 4, %v11550_v14 }
 0x388   :  { %2042 = vmatpush1.bf16.msra.mxu0 %v9206_v33  ;;  %2083 = vmatpush1.bf16.msra.mxu1 %v9208_v48  ;;  %v15359_v33 = vsub.s32 5, %v11550_v14 }
 0x389   :  { %2043 = vmatprep.subr.bf16.mxu0 %v9199_v49  ;;  %2084 = vmatprep.subr.bf16.mxu1 %v9201_v34  ;;  %v1762_v49 = vrot.slane %v1745_v59, %v11562_v15 }
 0x38c   :  { %2044 = vmatpush1.bf16.msra.mxu0 %v9198_v63  ;;  %2085 = vmatpush1.bf16.msra.mxu1 %v9200_v9 }
 0x38d   :  { %2145 = vmatprep.subr.mxu0 %v10886_v2  ;;  %2216 = vmatprep.subr.mxu1 %v10890_v4 }
 0x38f   :  { %9228 = vmatmul.mubr.msk.bf16.vlgmr.msra.gmra.mxu0 %vm308_vm0, %v11544_v13  ;;  %9229 = vmatmul.mubr.msk.bf16.vlgmr.msra.gmra.mxu1 %vm308_vm0, %v11544_v13 }
 0x390   :  { %2146 = vmatpush1.msra.mxu0 %v10884_v1  ;;  %2217 = vmatpush1.msra.mxu1 %v10888_v3 }
 0x391   :  { %2179 = vmatprep.mubr.f32.mxu0 %v15356_v43  ;;  %2250 = vmatprep.mubr.f32.mxu1 %v15356_v43 }
 0x392   :  { %2287 = vmatprep.subr.mxu0 %v10894_v6  ;;  %2358 = vmatprep.subr.mxu1 %v10898_v8 }
 0x397   :  { %9230 = vmatmul.mubr.msk.f32.vlgmr.msra.gmra.mxu0 %vm2111_vm1, %v11778_v27  ;;  %9231 = vmatmul.mubr.msk.f32.vlgmr.msra.gmra.mxu1 %vm2111_vm1, %v11778_v27 }
 0x398   :  { %2288 = vmatpush1.msra.mxu0 %v10892_v5  ;;  %2359 = vmatpush1.msra.mxu1 %v10896_v7 }
 0x399   :  { %2321 = vmatprep.mubr.f32.mxu0 %v15356_v43  ;;  %2392 = vmatprep.mubr.f32.mxu1 %v15356_v43 }
 0x39b   :  { %9232 = vmatmul.mubr.msk.f32.vlgmr.msra.gmra.mxu0 %vm2111_vm1, %v11778_v27  ;;  %9233 = vmatmul.mubr.msk.f32.vlgmr.msra.gmra.mxu1 %vm2111_vm1, %v11778_v27 }
 0x43f   :  { %v1981_v13 = vpop.f32.mrf.mxu0  ;;  %v2022_v31 = vpop.f32.mrf.mxu1 }
 0x440   :  { %v11820_v9 = vadd.f32 %v1981_v13, %v1750_v12 }
 0x441   :  { %v1983_v11 = vpop.f32.mrf.mxu0  ;;  %v2024_v18 = vpop.f32.mrf.mxu1 }
 0x442   :  { %16549 = vst [vmem:[#allocation168_spill] sm:$0xff] %v11820_v9  ;;  %v11828_v43 = vadd.f32 %v1983_v11, %v1754_v16  ;;  %v11835_v12 = vadd.f32 %v2024_v18, %v1762_v49 }
 0x443   :  { %v1985_v50 = vpop.f32.mrf.mxu0  ;;  %v2026_v45 = vpop.f32.mrf.mxu1 }
 0x444   :  { %v1766_v50 = vrot.slane %v1745_v59, %v15360_v61  ;;  %16551 = vst [vmem:[#allocation170_spill] sm:$0xff] %v11828_v43  ;;  %16552 = vst [vmem:[#allocation171_spill] sm:$0xff] %v11835_v12 }
 0x445   :  { %v1986_v30 = vpop.f32.mrf.mxu0  ;;  %v2027_v60 = vpop.f32.mrf.mxu1 }
 0x446   :  { %v11824_v30 = vadd.f32 %v2022_v31, %v1758_v28  ;;  %v1774_v60 = vrot.slane %v1745_v59, %v15358_v0 }
 0x448   :  { %16550 = vst [vmem:[#allocation169_spill] sm:$0xff] %v11824_v30 }
 0x44f   :  { %v2063_v51 = vpop.f32.mrf.mxu0  ;;  %v2104_v41 = vpop.f32.mrf.mxu1 }
 0x450   :  { %v11842_v0 = vadd.f32 %v2063_v51, %v1766_v50  ;;  %v11846_v61 = vadd.f32 %v2104_v41, %v1774_v60 }
 0x451   :  { %v2065_v29 = vpop.f32.mrf.mxu0  ;;  %v2106_v17 = vpop.f32.mrf.mxu1 }
 0x452   :  { %16554 = vst [vmem:[#allocation172_spill] sm:$0xff] %v11842_v0  ;;  %16555 = vst [vmem:[#allocation173_spill] sm:$0xff] %v11846_v61 }
 0x453   :  { %v2067_v32 = vpop.f32.mrf.mxu0  ;;  %v2108_v48 = vpop.f32.mrf.mxu1 }
 0x454   :  { %v1770_v48 = vrot.slane %v1745_v59, %v15359_v33 }
 0x455   :  { %v2068_v63 = vpop.f32.mrf.mxu0  ;;  %v2109_v45 = vpop.f32.mrf.mxu1 }
 0x456   :  { %v16553_v63 = vsub.s32 7, %v11550_v14 }
 0x457   :  { %v2181_v32 = vpop.f32.mrf.mxu0  ;;  %v2252_v13 = vpop.f32.mrf.mxu1 }
 0x458   :  { %v11833_v34 = vadd.f32 %v2181_v32, %v11820_v9  ;;  %v1778_v45 = vrot.slane %v1745_v59, %v16553_v63  ;;  %v11840_v31 = vadd.f32 %v2252_v13, %v11824_v30  ;;  %v11850_v9 = vadd.f32 %v2065_v29, %v1770_v48 }
 0x459   :  { %v2183_v28 = vpop.f32.mrf.mxu0  ;;  %v2254_v33 = vpop.f32.mrf.mxu1 }
 0x45a   :  { %v2400_v16 = vadd.f32 %v2183_v28, %v11828_v43  ;;  %v2402_v18 = vadd.f32 %v2254_v33, %v11835_v12  ;;  %16556 = vst [vmem:[#allocation174_spill] sm:$0xff] %v11850_v9  ;;  %v11855_v50 = vadd.f32 %v2106_v17, %v1778_v45 }
 0x45b   :  { %v2323_v49 = vpop.f32.mrf.mxu0  ;;  %v2394_v51 = vpop.f32.mrf.mxu1 }
 0x45c   :  { %v2408_v59 = vmax.f32 %v2400_v16, 0.0  ;;  %v11853_v13 = vadd.f32 %v2323_v49, %v11842_v0  ;;  %16557 = vst [vmem:[#allocation175_spill] sm:$0xff] %v11855_v50  ;;  %v2410_v63 = vmax.f32 %v2402_v18, 0.0  ;;  %v11858_v28 = vadd.f32 %v2394_v51, %v11846_v61 }
 0x45d   :  { %v2325_v41 = vpop.f32.mrf.mxu0  ;;  %v2396_v33 = vpop.f32.mrf.mxu1 }
 0x45e   :  { %v11862_v32 = vadd.f32 %v2325_v41, %v11850_v9  ;;  %v11866_v48 = vadd.f32 %v2396_v33, %v11855_v50 }
 0x45f   :  { %10755 = dma.done.wait [#allocation4 + $0x1], 65536 }
 0x460   :  { %10756 = vsyncadd [#allocation4 + $0x1], 4294901760  ;;  %v11870_v45 = vpack.c.bf16 %v2408_v59, %v2408_v59  ;;  %v11872_v18 = vpack.c.bf16 %v2410_v63, %v2410_v63  ;;  %v2475_v49 = vld [vmem:[#allocation3 + $0x1c0] sm:$0xff]  ;;  %v2585_v27 = vld [vmem:[#allocation3 + $0x530] sm:$0xff]  ;;  %s10775_s12 = smov 5   ;;  %s10776_s13 = smov [#allocation22]  }
 0x461   :  { %v2479_v51 = vld [vmem:[#allocation3 + $0x1e0] sm:$0xff]  ;;  %v2445_v8 = vld [vmem:[#allocation3 + $0xd0] sm:$0xff]  ;;  %s9020_s22 = sshll.u32 %s10776_s13, 4  ;;  %vm9010_vm2 = vcmask 89088   ;;  %vm9012_vm3 = vcmask 130048   ;;  %s9021_s22 = int_to_ptr.vmem [resolvable:$true] %s9020_s22 }
 0x462   :  { %5572 = vmatprep.mubr.bf16.mxu0 %v11870_v45  ;;  %5613 = vmatprep.mubr.bf16.mxu1 %v11872_v18  ;;  %v2603_v41 = vld [vmem:[#allocation3 + $0x5c0] sm:$0xff]  ;;  %v11876_v29 = vcombine.high %v2475_v49, %v2479_v51  ;;  %v11878_v60 = vcombine.low %v2475_v49, %v2479_v51  ;;  %v2573_v3 = vld [vmem:[#allocation3 + $0x4d0] sm:$0xff]  ;;  %s10721_s7 = scalar_lea.vmem %s9021_s22, 128  ;;  %p10726_p5 = scmp.lt.s32.totalorder %s9021_s22, %s9021_s22 }
 0x463   :  { %v2607_v33 = vld [vmem:[#allocation3 + $0x5e0] sm:$0xff]  ;;  %p10722_p4 = scmp.ne.s32.totalorder %s9021_s22, %s10721_s7  ;;  %p10727_p6 = scmp.lt.s32.totalorder %s10721_s7, %s10721_s7 }
 0x464   :  { %16558 = vst [vmem:[#allocation176_spill] sm:$0xff] %v11876_v29  ;;  %16559 = vst [vmem:[#allocation177_spill] sm:$0xff] %v11878_v60  ;;  %v2467_v16 = vld [vmem:[#allocation3 + $0x180] sm:$0xff]  ;;  %v11880_v11 = vcombine.high %v2603_v41, %v2607_v33  ;;  %v11882_v59 = vcombine.low %v2603_v41, %v2607_v33  ;;  %5540 = vmatprep.subr.bf16.mxu0 %v11876_v29 }
 0x465   :  { %v2471_v17 = vld [vmem:[#allocation3 + $0x1a0] sm:$0xff]  ;;  %5541 = vmatpush1.bf16.msra.mxu0 %v11878_v60  ;;  %p10728_p7 = por %p10727_p6, %p10726_p5 }
 0x466   :  { %16560 = vst [vmem:[#allocation178_spill] sm:$0xff] %v11880_v11  ;;  %16561 = vst [vmem:[#allocation179_spill] sm:$0xff] %v11882_v59  ;;  %v11884_v63 = vcombine.high %v2467_v16, %v2471_v17  ;;  %v2595_v61 = vld [vmem:[#allocation3 + $0x580] sm:$0xff]  ;;  %5581 = vmatprep.subr.bf16.mxu1 %v11880_v11  ;;  %v11891_v49 = vcombine.low %v2467_v16, %v2471_v17 }
 0x467   :  { %v2599_v0 = vld [vmem:[#allocation3 + $0x5a0] sm:$0xff]  ;;  %5582 = vmatpush1.bf16.msra.mxu1 %v11882_v59  ;;  %p10729_p8 = pnand %p10728_p7, %p10722_p4 }
 0x468   :  { %16562 = vst [vmem:[#allocation180_spill] sm:$0xff] %v11884_v63  ;;  %v2459_v50 = vld [vmem:[#allocation3 + $0x140] sm:$0xff]  ;;  %v11887_v9 = vcombine.high %v2595_v61, %v2599_v0  ;;  %16564 = vst [vmem:[#allocation182_spill] sm:$0xff] %v11891_v49  ;;  %5542 = vmatprep.subr.bf16.mxu0 %v11884_v63  ;;  %v11895_v51 = vcombine.low %v2595_v61, %v2599_v0 }
 0x469   :  { %v2463_v12 = vld [vmem:[#allocation3 + $0x160] sm:$0xff]  ;;  %5543 = vmatpush1.bf16.msra.mxu0 %v11891_v49 }
 0x46a   :  { %16563 = vst [vmem:[#allocation181_spill] sm:$0xff] %v11887_v9  ;;  %v2587_v43 = vld [vmem:[#allocation3 + $0x540] sm:$0xff]  ;;  %16565 = vst [vmem:[#allocation183_spill] sm:$0xff] %v11895_v51  ;;  %v11897_v41 = vcombine.high %v2459_v50, %v2463_v12  ;;  %5583 = vmatprep.subr.bf16.mxu1 %v11887_v9  ;;  %v11903_v16 = vcombine.low %v2459_v50, %v2463_v12 }
 0x46b   :  { %v2591_v30 = vld [vmem:[#allocation3 + $0x560] sm:$0xff]  ;;  %5584 = vmatpush1.bf16.msra.mxu1 %v11895_v51 }
 0x46c   :  { %16566 = vst [vmem:[#allocation184_spill] sm:$0xff] %v11897_v41  ;;  %v11900_v33 = vcombine.high %v2587_v43, %v2591_v30  ;;  %v2451_v29 = vld [vmem:[#allocation3 + $0x100] sm:$0xff]  ;;  %16568 = vst [vmem:[#allocation186_spill] sm:$0xff] %v11903_v16  ;;  %5544 = vmatprep.subr.bf16.mxu0 %v11897_v41  ;;  %v11907_v61 = vcombine.low %v2587_v43, %v2591_v30 }
 0x46d   :  { %v2455_v7 = vld [vmem:[#allocation3 + $0x120] sm:$0xff]  ;;  %5545 = vmatpush1.bf16.msra.mxu0 %v11903_v16 }
 0x46e   :  { %16567 = vst [vmem:[#allocation185_spill] sm:$0xff] %v11900_v33  ;;  %v2579_v5 = vld [vmem:[#allocation3 + $0x500] sm:$0xff]  ;;  %16569 = vst [vmem:[#allocation187_spill] sm:$0xff] %v11907_v61  ;;  %v11909_v0 = vcombine.high %v2451_v29, %v2455_v7  ;;  %5585 = vmatprep.subr.bf16.mxu1 %v11900_v33  ;;  %v11915_v12 = vcombine.low %v2451_v29, %v2455_v7 }
 0x46f   :  { %v2583_v11 = vld [vmem:[#allocation3 + $0x520] sm:$0xff]  ;;  %5586 = vmatpush1.bf16.msra.mxu1 %v11907_v61 }
 0x470   :  { %16570 = vst [vmem:[#allocation188_spill] sm:$0xff] %v11909_v0  ;;  %v11912_v17 = vcombine.high %v2579_v5, %v2583_v11  ;;  %v2443_v9 = vld [vmem:[#allocation3 + $0xc0] sm:$0xff]  ;;  %16572 = vst [vmem:[#allocation190_spill] sm:$0xff] %v11915_v12  ;;  %5546 = vmatprep.subr.bf16.mxu0 %v11909_v0  ;;  %v11919_v43 = vcombine.low %v2579_v5, %v2583_v11 }
 0x471   :  { %v2447_v63 = vld [vmem:[#allocation3 + $0xe0] sm:$0xff]  ;;  %5547 = vmatpush1.bf16.msra.mxu0 %v11915_v12 }
 0x472   :  { %16571 = vst [vmem:[#allocation189_spill] sm:$0xff] %v11912_v17  ;;  %v2571_v59 = vld [vmem:[#allocation3 + $0x4c0] sm:$0xff]  ;;  %16573 = vst [vmem:[#allocation191_spill] sm:$0xff] %v11919_v43  ;;  %v11921_v30 = vcombine.high %v2443_v9, %v2447_v63  ;;  %5587 = vmatprep.subr.bf16.mxu1 %v11912_v17  ;;  %v11927_v7 = vcombine.low %v2443_v9, %v2447_v63 }
 0x473   :  { %v2575_v60 = vld [vmem:[#allocation3 + $0x4e0] sm:$0xff]  ;;  %5588 = vmatpush1.bf16.msra.mxu1 %v11919_v43 }
 0x474   :  { %16574 = vst [vmem:[#allocation192_spill] sm:$0xff] %v11921_v30  ;;  %v11924_v50 = vcombine.high %v2571_v59, %v2575_v60  ;;  %v2435_v33 = vld [vmem:[#allocation3 + $0x80] sm:$0xff]  ;;  %16576 = vst [vmem:[#allocation194_spill] sm:$0xff] %v11927_v7  ;;  %5548 = vmatprep.subr.bf16.mxu0 %v11921_v30  ;;  %v11931_v5 = vcombine.low %v2571_v59, %v2575_v60 }
 0x475   :  { %v2439_v41 = vld [vmem:[#allocation3 + $0xa0] sm:$0xff]  ;;  %5549 = vmatpush1.bf16.msra.mxu0 %v11927_v7 }
 0x476   :  { %16575 = vst [vmem:[#allocation193_spill] sm:$0xff] %v11924_v50  ;;  %v2563_v51 = vld [vmem:[#allocation3 + $0x480] sm:$0xff]  ;;  %16577 = vst [vmem:[#allocation195_spill] sm:$0xff] %v11931_v5  ;;  %v11933_v11 = vcombine.high %v2435_v33, %v2439_v41  ;;  %5589 = vmatprep.subr.bf16.mxu1 %v11924_v50  ;;  %v11939_v9 = vcombine.low %v2435_v33, %v2439_v41 }
 0x477   :  { %v2567_v49 = vld [vmem:[#allocation3 + $0x4a0] sm:$0xff]  ;;  %5590 = vmatpush1.bf16.msra.mxu1 %v11931_v5 }
 0x478   :  { %16578 = vst [vmem:[#allocation196_spill] sm:$0xff] %v11933_v11  ;;  %v11936_v29 = vcombine.high %v2563_v51, %v2567_v49  ;;  %v2427_v17 = vld [vmem:[#allocation3 + $0x40] sm:$0xff]  ;;  %16580 = vst [vmem:[#allocation198_spill] sm:$0xff] %v11939_v9  ;;  %5550 = vmatprep.subr.bf16.mxu0 %v11933_v11  ;;  %v11943_v60 = vcombine.low %v2563_v51, %v2567_v49 }
 0x479   :  { %v2431_v0 = vld [vmem:[#allocation3 + $0x60] sm:$0xff]  ;;  %5551 = vmatpush1.bf16.msra.mxu0 %v11939_v9 }
 0x47a   :  { %16579 = vst [vmem:[#allocation197_spill] sm:$0xff] %v11936_v29  ;;  %v2555_v61 = vld [vmem:[#allocation3 + $0x440] sm:$0xff]  ;;  %16581 = vst [vmem:[#allocation199_spill] sm:$0xff] %v11943_v60  ;;  %v11945_v59 = vcombine.high %v2427_v17, %v2431_v0  ;;  %5591 = vmatprep.subr.bf16.mxu1 %v11936_v29  ;;  %v11951_v41 = vcombine.low %v2427_v17, %v2431_v0 }
 0x47b   :  { %v2559_v16 = vld [vmem:[#allocation3 + $0x460] sm:$0xff]  ;;  %5592 = vmatpush1.bf16.msra.mxu1 %v11943_v60 }
 0x47c   :  { %16582 = vst [vmem:[#allocation200_spill] sm:$0xff] %v11945_v59  ;;  %v11948_v63 = vcombine.high %v2555_v61, %v2559_v16  ;;  %v2419_v50 = vld [vmem:[#allocation3] sm:$0xff]  ;;  %16584 = vst [vmem:[#allocation202_spill] sm:$0xff] %v11951_v41  ;;  %5552 = vmatprep.subr.bf16.mxu0 %v11945_v59  ;;  %v11955_v49 = vcombine.low %v2555_v61, %v2559_v16 }
 0x47d   :  { %v2423_v30 = vld [vmem:[#allocation3 + $0x20] sm:$0xff]  ;;  %5553 = vmatpush1.bf16.msra.mxu0 %v11951_v41 }
 0x47e   :  { %16583 = vst [vmem:[#allocation201_spill] sm:$0xff] %v11948_v63  ;;  %v2547_v43 = vld [vmem:[#allocation3 + $0x400] sm:$0xff]  ;;  %16585 = vst [vmem:[#allocation203_spill] sm:$0xff] %v11955_v49  ;;  %v11957_v51 = vcombine.high %v2419_v50, %v2423_v30  ;;  %5593 = vmatprep.subr.bf16.mxu1 %v11948_v63  ;;  %v11963_v0 = vcombine.low %v2419_v50, %v2423_v30 }
 0x47f   :  { %v2551_v12 = vld [vmem:[#allocation3 + $0x420] sm:$0xff]  ;;  %5594 = vmatpush1.bf16.msra.mxu1 %v11955_v49 }
 0x480   :  { %16586 = vst [vmem:[#allocation204_spill] sm:$0xff] %v11957_v51  ;;  %v11960_v33 = vcombine.high %v2547_v43, %v2551_v12  ;;  %v2539_v29 = vld [vmem:[#allocation3 + $0x3c0] sm:$0xff]  ;;  %16588 = vst [vmem:[#allocation206_spill] sm:$0xff] %v11963_v0  ;;  %5554 = vmatprep.subr.bf16.mxu0 %v11957_v51  ;;  %v11967_v16 = vcombine.low %v2547_v43, %v2551_v12 }
 0x481   :  { %v2543_v11 = vld [vmem:[#allocation3 + $0x3e0] sm:$0xff]  ;;  %5555 = vmatpush1.bf16.msra.mxu0 %v11963_v0 }
 0x482   :  { %16587 = vst [vmem:[#allocation205_spill] sm:$0xff] %v11960_v33  ;;  %v2667_v5 = vld [vmem:[#allocation3 + $0x7c0] sm:$0xff]  ;;  %16589 = vst [vmem:[#allocation207_spill] sm:$0xff] %v11967_v16  ;;  %v11969_v61 = vcombine.high %v2539_v29, %v2543_v11  ;;  %5595 = vmatprep.subr.bf16.mxu1 %v11960_v33  ;;  %v11975_v30 = vcombine.low %v2539_v29, %v2543_v11 }
 0x483   :  { %v2671_v7 = vld [vmem:[#allocation3 + $0x7e0] sm:$0xff]  ;;  %5596 = vmatpush1.bf16.msra.mxu1 %v11967_v16 }
 0x484   :  { %16590 = vst [vmem:[#allocation208_spill] sm:$0xff] %v11969_v61  ;;  %v11972_v17 = vcombine.high %v2667_v5, %v2671_v7  ;;  %v2531_v63 = vld [vmem:[#allocation3 + $0x380] sm:$0xff]  ;;  %16592 = vst [vmem:[#allocation210_spill] sm:$0xff] %v11975_v30  ;;  %5556 = vmatprep.subr.bf16.mxu0 %v11969_v61  ;;  %v11979_v12 = vcombine.low %v2667_v5, %v2671_v7 }
 0x485   :  { %v2535_v59 = vld [vmem:[#allocation3 + $0x3a0] sm:$0xff]  ;;  %5557 = vmatpush2.bf16.msra.mxu0 %v11975_v30 }
 0x486   :  { %16591 = vst [vmem:[#allocation209_spill] sm:$0xff] %v11972_v17  ;;  %v2659_v60 = vld [vmem:[#allocation3 + $0x780] sm:$0xff]  ;;  %16593 = vst [vmem:[#allocation211_spill] sm:$0xff] %v11979_v12  ;;  %v11981_v43 = vcombine.high %v2531_v63, %v2535_v59  ;;  %5597 = vmatprep.subr.bf16.mxu1 %v11972_v17  ;;  %v11987_v11 = vcombine.low %v2531_v63, %v2535_v59 }
 0x487   :  { %v2663_v9 = vld [vmem:[#allocation3 + $0x7a0] sm:$0xff]  ;;  %5598 = vmatpush2.bf16.msra.mxu1 %v11979_v12 }
 0x488   :  { %16594 = vst [vmem:[#allocation212_spill] sm:$0xff] %v11981_v43  ;;  %v11984_v50 = vcombine.high %v2659_v60, %v2663_v9  ;;  %v2523_v33 = vld [vmem:[#allocation3 + $0x340] sm:$0xff]  ;;  %16596 = vst [vmem:[#allocation214_spill] sm:$0xff] %v11987_v11  ;;  %5558 = vmatprep.subr.bf16.mxu0 %v11981_v43  ;;  %v11991_v7 = vcombine.low %v2659_v60, %v2663_v9 }
 0x489   :  { %v2527_v51 = vld [vmem:[#allocation3 + $0x360] sm:$0xff]  ;;  %5559 = vmatpush2.bf16.msra.mxu0 %v11987_v11 }
 0x48a   :  { %16595 = vst [vmem:[#allocation213_spill] sm:$0xff] %v11984_v50  ;;  %v2651_v49 = vld [vmem:[#allocation3 + $0x740] sm:$0xff]  ;;  %16597 = vst [vmem:[#allocation215_spill] sm:$0xff] %v11991_v7  ;;  %v11993_v5 = vcombine.high %v2523_v33, %v2527_v51  ;;  %5599 = vmatprep.subr.bf16.mxu1 %v11984_v50  ;;  %v11999_v59 = vcombine.low %v2523_v33, %v2527_v51 }
 0x48b   :  { %v2655_v41 = vld [vmem:[#allocation3 + $0x760] sm:$0xff]  ;;  %5600 = vmatpush2.bf16.msra.mxu1 %v11991_v7 }
 0x48c   :  { %16598 = vst [vmem:[#allocation216_spill] sm:$0xff] %v11993_v5  ;;  %v11996_v29 = vcombine.high %v2651_v49, %v2655_v41  ;;  %v2515_v17 = vld [vmem:[#allocation3 + $0x300] sm:$0xff]  ;;  %16600 = vst [vmem:[#allocation218_spill] sm:$0xff] %v11999_v59  ;;  %5560 = vmatprep.subr.bf16.mxu0 %v11993_v5  ;;  %v12003_v9 = vcombine.low %v2651_v49, %v2655_v41 }
 0x48d   :  { %v2519_v61 = vld [vmem:[#allocation3 + $0x320] sm:$0xff]  ;;  %5561 = vmatpush2.bf16.msra.mxu0 %v11999_v59 }
 0x48e   :  { %16599 = vst [vmem:[#allocation217_spill] sm:$0xff] %v11996_v29  ;;  %v2643_v16 = vld [vmem:[#allocation3 + $0x700] sm:$0xff]  ;;  %16601 = vst [vmem:[#allocation219_spill] sm:$0xff] %v12003_v9  ;;  %v12005_v60 = vcombine.high %v2515_v17, %v2519_v61  ;;  %5601 = vmatprep.subr.bf16.mxu1 %v11996_v29  ;;  %v12011_v51 = vcombine.low %v2515_v17, %v2519_v61 }
 0x48f   :  { %v2647_v0 = vld [vmem:[#allocation3 + $0x720] sm:$0xff]  ;;  %5602 = vmatpush2.bf16.msra.mxu1 %v12003_v9 }
 0x490   :  { %16602 = vst [vmem:[#allocation220_spill] sm:$0xff] %v12005_v60  ;;  %v12008_v63 = vcombine.high %v2643_v16, %v2647_v0  ;;  %v2507_v50 = vld [vmem:[#allocation3 + $0x2c0] sm:$0xff]  ;;  %16604 = vst [vmem:[#allocation222_spill] sm:$0xff] %v12011_v51  ;;  %5562 = vmatprep.subr.bf16.mxu0 %v12005_v60  ;;  %v12015_v41 = vcombine.low %v2643_v16, %v2647_v0 }
 0x491   :  { %v2511_v43 = vld [vmem:[#allocation3 + $0x2e0] sm:$0xff]  ;;  %5563 = vmatpush2.bf16.msra.mxu0 %v12011_v51 }
 0x492   :  { %16603 = vst [vmem:[#allocation221_spill] sm:$0xff] %v12008_v63  ;;  %v2635_v12 = vld [vmem:[#allocation3 + $0x6c0] sm:$0xff]  ;;  %16605 = vst [vmem:[#allocation223_spill] sm:$0xff] %v12015_v41  ;;  %v12017_v49 = vcombine.high %v2507_v50, %v2511_v43  ;;  %5603 = vmatprep.subr.bf16.mxu1 %v12008_v63  ;;  %v12023_v61 = vcombine.low %v2507_v50, %v2511_v43 }
 0x493   :  { %v2639_v30 = vld [vmem:[#allocation3 + $0x6e0] sm:$0xff]  ;;  %5604 = vmatpush2.bf16.msra.mxu1 %v12015_v41 }
 0x494   :  { %16606 = vst [vmem:[#allocation224_spill] sm:$0xff] %v12017_v49  ;;  %v12020_v33 = vcombine.high %v2635_v12, %v2639_v30  ;;  %v2499_v29 = vld [vmem:[#allocation3 + $0x280] sm:$0xff]  ;;  %16608 = vst [vmem:[#allocation226_spill] sm:$0xff] %v12023_v61  ;;  %5564 = vmatprep.subr.bf16.mxu0 %v12017_v49  ;;  %v12027_v0 = vcombine.low %v2635_v12, %v2639_v30 }
 0x495   :  { %v2503_v5 = vld [vmem:[#allocation3 + $0x2a0] sm:$0xff]  ;;  %5565 = vmatpush2.bf16.msra.mxu0 %v12023_v61 }
 0x496   :  { %16607 = vst [vmem:[#allocation225_spill] sm:$0xff] %v12020_v33  ;;  %v2627_v7 = vld [vmem:[#allocation3 + $0x680] sm:$0xff]  ;;  %16609 = vst [vmem:[#allocation227_spill] sm:$0xff] %v12027_v0  ;;  %v12029_v16 = vcombine.high %v2499_v29, %v2503_v5  ;;  %5605 = vmatprep.subr.bf16.mxu1 %v12020_v33  ;;  %v12035_v43 = vcombine.low %v2499_v29, %v2503_v5 }
 0x497   :  { %v2631_v11 = vld [vmem:[#allocation3 + $0x6a0] sm:$0xff]  ;;  %5606 = vmatpush2.bf16.msra.mxu1 %v12027_v0 }
 0x498   :  { %16610 = vst [vmem:[#allocation228_spill] sm:$0xff] %v12029_v16  ;;  %v12032_v17 = vcombine.high %v2627_v7, %v2631_v11  ;;  %v2491_v63 = vld [vmem:[#allocation3 + $0x240] sm:$0xff]  ;;  %16612 = vst [vmem:[#allocation230_spill] sm:$0xff] %v12035_v43  ;;  %5566 = vmatprep.subr.bf16.mxu0 %v12029_v16  ;;  %v12039_v30 = vcombine.low %v2627_v7, %v2631_v11 }
 0x499   :  { %v2495_v60 = vld [vmem:[#allocation3 + $0x260] sm:$0xff]  ;;  %5567 = vmatpush2.bf16.msra.mxu0 %v12035_v43 }
 0x49a   :  { %16611 = vst [vmem:[#allocation229_spill] sm:$0xff] %v12032_v17  ;;  %v2619_v9 = vld [vmem:[#allocation3 + $0x640] sm:$0xff]  ;;  %16613 = vst [vmem:[#allocation231_spill] sm:$0xff] %v12039_v30  ;;  %v12041_v12 = vcombine.high %v2491_v63, %v2495_v60  ;;  %5607 = vmatprep.subr.bf16.mxu1 %v12032_v17  ;;  %v12047_v5 = vcombine.low %v2491_v63, %v2495_v60 }
 0x49b   :  { %v2623_v59 = vld [vmem:[#allocation3 + $0x660] sm:$0xff]  ;;  %5608 = vmatpush2.bf16.msra.mxu1 %v12039_v30  ;;  %v16624_v30 = vmax.f32 %v11833_v34, 0.0 }
 0x49c   :  { %16614 = vst [vmem:[#allocation232_spill] sm:$0xff] %v12041_v12  ;;  %v12044_v50 = vcombine.high %v2619_v9, %v2623_v59  ;;  %v2483_v33 = vld [vmem:[#allocation3 + $0x200] sm:$0xff]  ;;  %16616 = vst [vmem:[#allocation234_spill] sm:$0xff] %v12047_v5  ;;  %5568 = vmatprep.subr.bf16.mxu0 %v12041_v12  ;;  %v12051_v11 = vcombine.low %v2619_v9, %v2623_v59 }
 0x49d   :  { %v2487_v49 = vld [vmem:[#allocation3 + $0x220] sm:$0xff]  ;;  %5569 = vmatpush2.bf16.msra.mxu0 %v12047_v5  ;;  %v12073_v5 = vpack.c.bf16 %v16624_v30, %v16624_v30 }
 0x49e   :  { %16615 = vst [vmem:[#allocation233_spill] sm:$0xff] %v12044_v50  ;;  %v2611_v41 = vld [vmem:[#allocation3 + $0x600] sm:$0xff]  ;;  %16617 = vst [vmem:[#allocation235_spill] sm:$0xff] %v12051_v11  ;;  %v12053_v7 = vcombine.high %v2483_v33, %v2487_v49  ;;  %5609 = vmatprep.subr.bf16.mxu1 %v12044_v50  ;;  %v12059_v60 = vcombine.low %v2483_v33, %v2487_v49 }
 0x49f   :  { %v2615_v51 = vld [vmem:[#allocation3 + $0x620] sm:$0xff]  ;;  %5610 = vmatpush2.bf16.msra.mxu1 %v12051_v11 }
 0x4a0   :  { %16618 = vst [vmem:[#allocation236_spill] sm:$0xff] %v12053_v7  ;;  %v12056_v29 = vcombine.high %v2611_v41, %v2615_v51  ;;  %v2731_v17 = vld [vmem:[#allocation3 + $0x9c0] sm:$0xff]  ;;  %16620 = vst [vmem:[#allocation238_spill] sm:$0xff] %v12059_v60  ;;  %5570 = vmatprep.subr.bf16.mxu0 %v12053_v7  ;;  %v12063_v59 = vcombine.low %v2611_v41, %v2615_v51  ;;  %v16625_v51 = vmax.f32 %v11840_v31, 0.0  ;;  %v16630_v31 = vmax.f32 %v11862_v32, 0.0 }
 0x4a1   :  { %v2735_v16 = vld [vmem:[#allocation3 + $0x9e0] sm:$0xff]  ;;  %5571 = vmatpush2.bf16.msra.mxu0 %v12059_v60 }
 0x4a2   :  { %16619 = vst [vmem:[#allocation237_spill] sm:$0xff] %v12056_v29  ;;  %v2859_v0 = vld [vmem:[#allocation3 + $0xdc0] sm:$0xff]  ;;  %16621 = vst [vmem:[#allocation239_spill] sm:$0xff] %v12063_v59  ;;  %v12065_v9 = vcombine.high %v2731_v17, %v2735_v16  ;;  %5611 = vmatprep.subr.bf16.mxu1 %v12056_v29  ;;  %v12079_v41 = vpack.c.bf16 %v16625_v51, %v16625_v51  ;;  %v12081_v7 = vcombine.low %v2731_v17, %v2735_v16 }
 0x4a3   :  { %v2863_v61 = vld [vmem:[#allocation3 + $0xde0] sm:$0xff]  ;;  %5612 = vmatpush2.bf16.msra.mxu1 %v12063_v59  ;;  %v12095_v51 = vpack.c.bf16 %v16630_v31, %v16630_v31 }
 0x4a4   :  { %16622 = vst [vmem:[#allocation240_spill] sm:$0xff] %v12065_v9  ;;  %v12068_v63 = vcombine.high %v2859_v0, %v2863_v61  ;;  %v2723_v50 = vld [vmem:[#allocation3 + $0x980] sm:$0xff]  ;;  %16626 = vst [vmem:[#allocation242_spill] sm:$0xff] %v12081_v7  ;;  %5622 = vmatprep.subr.bf16.mxu0 %v12065_v9  ;;  %v12085_v29 = vcombine.low %v2859_v0, %v2863_v61  ;;  %5573 = vmatmul.mubr.bf16.vlgmr.msra.gmra.mxu0 %v12073_v5  ;;  %v16631_v61 = vmax.f32 %v11866_v48, 0.0 }
 0x4a5   :  { %v2727_v12 = vld [vmem:[#allocation3 + $0x9a0] sm:$0xff]  ;;  %5623 = vmatpush1.bf16.msra.mxu0 %v12081_v7  ;;  %5654 = vmatprep.mubr.bf16.mxu0 %v12095_v51 }
 0x4a6   :  { %16623 = vst [vmem:[#allocation241_spill] sm:$0xff] %v12068_v63  ;;  %v2851_v49 = vld [vmem:[#allocation3 + $0xd80] sm:$0xff]  ;;  %16627 = vst [vmem:[#allocation243_spill] sm:$0xff] %v12085_v29  ;;  %v12087_v34 = vcombine.high %v2723_v50, %v2727_v12  ;;  %5663 = vmatprep.subr.bf16.mxu1 %v12068_v63  ;;  %v12101_v0 = vpack.c.bf16 %v16631_v61, %v16631_v61  ;;  %5614 = vmatmul.mubr.bf16.vlgmr.msra.gmra.mxu1 %v12079_v41 }
 0x4a7   :  { %v2855_v33 = vld [vmem:[#allocation3 + $0xda0] sm:$0xff]  ;;  %v12105_v63 = vcombine.low %v2723_v50, %v2727_v12  ;;  %5664 = vmatpush1.bf16.msra.mxu1 %v12085_v29 }
 0x4a8   :  { %16628 = vst [vmem:[#allocation244_spill] sm:$0xff] %v12087_v34  ;;  %v12090_v30 = vcombine.high %v2851_v49, %v2855_v33  ;;  %v2715_v60 = vld [vmem:[#allocation3 + $0x940] sm:$0xff]  ;;  %5624 = vmatprep.subr.bf16.mxu0 %v12087_v34  ;;  %v12109_v32 = vcombine.low %v2851_v49, %v2855_v33  ;;  %5695 = vmatprep.mubr.bf16.mxu1 %v12101_v0 }
 0x4a9   :  { %v2719_v11 = vld [vmem:[#allocation3 + $0x960] sm:$0xff]  ;;  %16632 = vst [vmem:[#allocation246_spill] sm:$0xff] %v12105_v63  ;;  %5625 = vmatpush1.bf16.msra.mxu0 %v12105_v63 }
 0x4aa   :  { %16629 = vst [vmem:[#allocation245_spill] sm:$0xff] %v12090_v30  ;;  %v2843_v16 = vld [vmem:[#allocation3 + $0xd40] sm:$0xff]  ;;  %16633 = vst [vmem:[#allocation247_spill] sm:$0xff] %v12109_v32  ;;  %v12111_v31 = vcombine.high %v2715_v60, %v2719_v11  ;;  %5665 = vmatprep.subr.bf16.mxu1 %v12090_v30  ;;  %v12119_v12 = vcombine.low %v2715_v60, %v2719_v11 }
 0x4ab   :  { %v2847_v17 = vld [vmem:[#allocation3 + $0xd60] sm:$0xff]  ;;  %5666 = vmatpush1.bf16.msra.mxu1 %v12109_v32 }
 0x4ac   :  { %16634 = vst [vmem:[#allocation248_spill] sm:$0xff] %v12111_v31  ;;  %v12114_v48 = vcombine.high %v2843_v16, %v2847_v17  ;;  %v2707_v61 = vld [vmem:[#allocation3 + $0x900] sm:$0xff]  ;;  %16636 = vst [vmem:[#allocation250_spill] sm:$0xff] %v12119_v12  ;;  %5626 = vmatprep.subr.bf16.mxu0 %v12111_v31  ;;  %v12123_v50 = vcombine.low %v2843_v16, %v2847_v17 }
 0x4ad   :  { %v2711_v9 = vld [vmem:[#allocation3 + $0x920] sm:$0xff]  ;;  %5627 = vmatpush1.bf16.msra.mxu0 %v12119_v12 }
 0x4ae   :  { %16635 = vst [vmem:[#allocation249_spill] sm:$0xff] %v12114_v48  ;;  %v2835_v59 = vld [vmem:[#allocation3 + $0xd00] sm:$0xff]  ;;  %16637 = vst [vmem:[#allocation251_spill] sm:$0xff] %v12123_v50  ;;  %v12125_v49 = vcombine.high %v2707_v61, %v2711_v9  ;;  %5667 = vmatprep.subr.bf16.mxu1 %v12114_v48  ;;  %v12131_v11 = vcombine.low %v2707_v61, %v2711_v9 }
 0x4af   :  { %v2839_v7 = vld [vmem:[#allocation3 + $0xd20] sm:$0xff]  ;;  %5668 = vmatpush1.bf16.msra.mxu1 %v12123_v50 }
 0x4b0   :  { %16638 = vst [vmem:[#allocation252_spill] sm:$0xff] %v12125_v49  ;;  %v12128_v33 = vcombine.high %v2835_v59, %v2839_v7  ;;  %v2699_v30 = vld [vmem:[#allocation3 + $0x8c0] sm:$0xff]  ;;  %16640 = vst [vmem:[#allocation254_spill] sm:$0xff] %v12131_v11  ;;  %5628 = vmatprep.subr.bf16.mxu0 %v12125_v49  ;;  %v12135_v60 = vcombine.low %v2835_v59, %v2839_v7 }
 0x4b1   :  { %v2703_v34 = vld [vmem:[#allocation3 + $0x8e0] sm:$0xff]  ;;  %5629 = vmatpush1.bf16.msra.mxu0 %v12131_v11 }
 0x4b2   :  { %16639 = vst [vmem:[#allocation253_spill] sm:$0xff] %v12128_v33  ;;  %v2827_v29 = vld [vmem:[#allocation3 + $0xcc0] sm:$0xff]  ;;  %16641 = vst [vmem:[#allocation255_spill] sm:$0xff] %v12135_v60  ;;  %v12137_v16 = vcombine.high %v2699_v30, %v2703_v34  ;;  %5669 = vmatprep.subr.bf16.mxu1 %v12128_v33  ;;  %v12143_v9 = vcombine.low %v2699_v30, %v2703_v34 }
 0x4b3   :  { %v2831_v43 = vld [vmem:[#allocation3 + $0xce0] sm:$0xff]  ;;  %5670 = vmatpush1.bf16.msra.mxu1 %v12135_v60 }
 0x4b4   :  { %16642 = vst [vmem:[#allocation256_spill] sm:$0xff] %v12137_v16  ;;  %v12140_v17 = vcombine.high %v2827_v29, %v2831_v43  ;;  %v2691_v48 = vld [vmem:[#allocation3 + $0x880] sm:$0xff]  ;;  %16644 = vst [vmem:[#allocation258_spill] sm:$0xff] %v12143_v9  ;;  %5630 = vmatprep.subr.bf16.mxu0 %v12137_v16  ;;  %v12147_v7 = vcombine.low %v2827_v29, %v2831_v43 }
 0x4b5   :  { %v2695_v31 = vld [vmem:[#allocation3 + $0x8a0] sm:$0xff]  ;;  %5631 = vmatpush1.bf16.msra.mxu0 %v12143_v9 }
 0x4b6   :  { %16643 = vst [vmem:[#allocation257_spill] sm:$0xff] %v12140_v17  ;;  %v2819_v32 = vld [vmem:[#allocation3 + $0xc80] sm:$0xff]  ;;  %16645 = vst [vmem:[#allocation259_spill] sm:$0xff] %v12147_v7  ;;  %v12149_v59 = vcombine.high %v2691_v48, %v2695_v31  ;;  %5671 = vmatprep.subr.bf16.mxu1 %v12140_v17  ;;  %v12155_v34 = vcombine.low %v2691_v48, %v2695_v31 }
 0x4b7   :  { %v2823_v63 = vld [vmem:[#allocation3 + $0xca0] sm:$0xff]  ;;  %5672 = vmatpush1.bf16.msra.mxu1 %v12147_v7 }
 0x4b8   :  { %16646 = vst [vmem:[#allocation260_spill] sm:$0xff] %v12149_v59  ;;  %v12152_v61 = vcombine.high %v2819_v32, %v2823_v63  ;;  %v2683_v33 = vld [vmem:[#allocation3 + $0x840] sm:$0xff]  ;;  %16648 = vst [vmem:[#allocation262_spill] sm:$0xff] %v12155_v34  ;;  %5632 = vmatprep.subr.bf16.mxu0 %v12149_v59  ;;  %v12159_v43 = vcombine.low %v2819_v32, %v2823_v63 }
 0x4b9   :  { %v2687_v49 = vld [vmem:[#allocation3 + $0x860] sm:$0xff]  ;;  %5633 = vmatpush1.bf16.msra.mxu0 %v12155_v34 }
 0x4ba   :  { %16647 = vst [vmem:[#allocation261_spill] sm:$0xff] %v12152_v61  ;;  %v2811_v50 = vld [vmem:[#allocation3 + $0xc40] sm:$0xff]  ;;  %16649 = vst [vmem:[#allocation263_spill] sm:$0xff] %v12159_v43  ;;  %v12161_v29 = vcombine.high %v2683_v33, %v2687_v49  ;;  %5673 = vmatprep.subr.bf16.mxu1 %v12152_v61  ;;  %v12167_v31 = vcombine.low %v2683_v33, %v2687_v49 }
 0x4bb   :  { %v2815_v12 = vld [vmem:[#allocation3 + $0xc60] sm:$0xff]  ;;  %5674 = vmatpush1.bf16.msra.mxu1 %v12159_v43 }
 0x4bc   :  { %16650 = vst [vmem:[#allocation264_spill] sm:$0xff] %v12161_v29  ;;  %v12164_v30 = vcombine.high %v2811_v50, %v2815_v12  ;;  %v2675_v17 = vld [vmem:[#allocation3 + $0x800] sm:$0xff]  ;;  %16652 = vst [vmem:[#allocation266_spill] sm:$0xff] %v12167_v31  ;;  %5634 = vmatprep.subr.bf16.mxu0 %v12161_v29  ;;  %v12171_v63 = vcombine.low %v2811_v50, %v2815_v12 }
 0x4bd   :  { %v2679_v16 = vld [vmem:[#allocation3 + $0x820] sm:$0xff]  ;;  %5635 = vmatpush1.bf16.msra.mxu0 %v12167_v31 }
 0x4be   :  { %16651 = vst [vmem:[#allocation265_spill] sm:$0xff] %v12164_v30  ;;  %v2803_v60 = vld [vmem:[#allocation3 + $0xc00] sm:$0xff]  ;;  %16653 = vst [vmem:[#allocation267_spill] sm:$0xff] %v12171_v63  ;;  %v12173_v32 = vcombine.high %v2675_v17, %v2679_v16  ;;  %5675 = vmatprep.subr.bf16.mxu1 %v12164_v30  ;;  %v12179_v49 = vcombine.low %v2675_v17, %v2679_v16 }
 0x4bf   :  { %v2807_v11 = vld [vmem:[#allocation3 + $0xc20] sm:$0xff]  ;;  %5676 = vmatpush1.bf16.msra.mxu1 %v12171_v63 }
 0x4c0   :  { %16654 = vst [vmem:[#allocation268_spill] sm:$0xff] %v12173_v32  ;;  %v12176_v48 = vcombine.high %v2803_v60, %v2807_v11  ;;  %v2795_v61 = vld [vmem:[#allocation3 + $0xbc0] sm:$0xff]  ;;  %16656 = vst [vmem:[#allocation270_spill] sm:$0xff] %v12179_v49  ;;  %5636 = vmatprep.subr.bf16.mxu0 %v12173_v32  ;;  %v12183_v12 = vcombine.low %v2803_v60, %v2807_v11 }
 0x4c1   :  { %v2799_v59 = vld [vmem:[#allocation3 + $0xbe0] sm:$0xff]  ;;  %5637 = vmatpush1.bf16.msra.mxu0 %v12179_v49 }
 0x4c2   :  { %16655 = vst [vmem:[#allocation269_spill] sm:$0xff] %v12176_v48  ;;  %v2923_v7 = vld [vmem:[#allocation3 + $0xfc0] sm:$0xff]  ;;  %16657 = vst [vmem:[#allocation271_spill] sm:$0xff] %v12183_v12  ;;  %v12185_v50 = vcombine.high %v2795_v61, %v2799_v59  ;;  %5677 = vmatprep.subr.bf16.mxu1 %v12176_v48  ;;  %v12191_v16 = vcombine.low %v2795_v61, %v2799_v59 }
 0x4c3   :  { %v2927_v9 = vld [vmem:[#allocation3 + $0xfe0] sm:$0xff]  ;;  %5678 = vmatpush1.bf16.msra.mxu1 %v12183_v12 }
 0x4c4   :  { %16658 = vst [vmem:[#allocation272_spill] sm:$0xff] %v12185_v50  ;;  %v12188_v33 = vcombine.high %v2923_v7, %v2927_v9  ;;  %v2787_v30 = vld [vmem:[#allocation3 + $0xb80] sm:$0xff]  ;;  %16660 = vst [vmem:[#allocation274_spill] sm:$0xff] %v12191_v16  ;;  %5638 = vmatprep.subr.bf16.mxu0 %v12185_v50  ;;  %v12195_v11 = vcombine.low %v2923_v7, %v2927_v9 }
 0x4c5   :  { %v2791_v29 = vld [vmem:[#allocation3 + $0xba0] sm:$0xff]  ;;  %5639 = vmatpush2.bf16.msra.mxu0 %v12191_v16 }
 0x4c6   :  { %16659 = vst [vmem:[#allocation273_spill] sm:$0xff] %v12188_v33  ;;  %v2915_v43 = vld [vmem:[#allocation3 + $0xf80] sm:$0xff]  ;;  %16661 = vst [vmem:[#allocation275_spill] sm:$0xff] %v12195_v11  ;;  %v12197_v60 = vcombine.high %v2787_v30, %v2791_v29  ;;  %5679 = vmatprep.subr.bf16.mxu1 %v12188_v33  ;;  %v12203_v59 = vcombine.low %v2787_v30, %v2791_v29 }
 0x4c7   :  { %v2919_v34 = vld [vmem:[#allocation3 + $0xfa0] sm:$0xff]  ;;  %5680 = vmatpush2.bf16.msra.mxu1 %v12195_v11 }
 0x4c8   :  { %16662 = vst [vmem:[#allocation276_spill] sm:$0xff] %v12197_v60  ;;  %v12200_v17 = vcombine.high %v2915_v43, %v2919_v34  ;;  %v2779_v48 = vld [vmem:[#allocation3 + $0xb40] sm:$0xff]  ;;  %16664 = vst [vmem:[#allocation278_spill] sm:$0xff] %v12203_v59  ;;  %5640 = vmatprep.subr.bf16.mxu0 %v12197_v60  ;;  %v12207_v9 = vcombine.low %v2915_v43, %v2919_v34 }
 0x4c9   :  { %v2783_v32 = vld [vmem:[#allocation3 + $0xb60] sm:$0xff]  ;;  %5641 = vmatpush2.bf16.msra.mxu0 %v12203_v59 }
 0x4ca   :  { %16663 = vst [vmem:[#allocation277_spill] sm:$0xff] %v12200_v17  ;;  %v2907_v63 = vld [vmem:[#allocation3 + $0xf40] sm:$0xff]  ;;  %16665 = vst [vmem:[#allocation279_spill] sm:$0xff] %v12207_v9  ;;  %v12209_v7 = vcombine.high %v2779_v48, %v2783_v32  ;;  %5681 = vmatprep.subr.bf16.mxu1 %v12200_v17  ;;  %v12215_v29 = vcombine.low %v2779_v48, %v2783_v32 }
 0x4cb   :  { %v2911_v31 = vld [vmem:[#allocation3 + $0xf60] sm:$0xff]  ;;  %5682 = vmatpush2.bf16.msra.mxu1 %v12207_v9 }
 0x4cc   :  { %16666 = vst [vmem:[#allocation280_spill] sm:$0xff] %v12209_v7  ;;  %v12212_v61 = vcombine.high %v2907_v63, %v2911_v31  ;;  %v2771_v33 = vld [vmem:[#allocation3 + $0xb00] sm:$0xff]  ;;  %16668 = vst [vmem:[#allocation282_spill] sm:$0xff] %v12215_v29  ;;  %5642 = vmatprep.subr.bf16.mxu0 %v12209_v7  ;;  %v12219_v34 = vcombine.low %v2907_v63, %v2911_v31 }
 0x4cd   :  { %v2775_v50 = vld [vmem:[#allocation3 + $0xb20] sm:$0xff]  ;;  %5643 = vmatpush2.bf16.msra.mxu0 %v12215_v29 }
 0x4ce   :  { %16667 = vst [vmem:[#allocation281_spill] sm:$0xff] %v12212_v61  ;;  %v2899_v12 = vld [vmem:[#allocation3 + $0xf00] sm:$0xff]  ;;  %16669 = vst [vmem:[#allocation283_spill] sm:$0xff] %v12219_v34  ;;  %v12221_v43 = vcombine.high %v2771_v33, %v2775_v50  ;;  %5683 = vmatprep.subr.bf16.mxu1 %v12212_v61  ;;  %v12227_v32 = vcombine.low %v2771_v33, %v2775_v50 }
 0x4cf   :  { %v2903_v49 = vld [vmem:[#allocation3 + $0xf20] sm:$0xff]  ;;  %5684 = vmatpush2.bf16.msra.mxu1 %v12219_v34 }
 0x4d0   :  { %16670 = vst [vmem:[#allocation284_spill] sm:$0xff] %v12221_v43  ;;  %v12224_v30 = vcombine.high %v2899_v12, %v2903_v49  ;;  %v2763_v17 = vld [vmem:[#allocation3 + $0xac0] sm:$0xff]  ;;  %16672 = vst [vmem:[#allocation286_spill] sm:$0xff] %v12227_v32  ;;  %5644 = vmatprep.subr.bf16.mxu0 %v12221_v43  ;;  %v12231_v31 = vcombine.low %v2899_v12, %v2903_v49 }
 0x4d1   :  { %v2767_v60 = vld [vmem:[#allocation3 + $0xae0] sm:$0xff]  ;;  %5645 = vmatpush2.bf16.msra.mxu0 %v12227_v32 }
 0x4d2   :  { %16671 = vst [vmem:[#allocation285_spill] sm:$0xff] %v12224_v30  ;;  %v2891_v11 = vld [vmem:[#allocation3 + $0xec0] sm:$0xff]  ;;  %16673 = vst [vmem:[#allocation287_spill] sm:$0xff] %v12231_v31  ;;  %v12233_v63 = vcombine.high %v2763_v17, %v2767_v60  ;;  %5685 = vmatprep.subr.bf16.mxu1 %v12224_v30  ;;  %v12239_v50 = vcombine.low %v2763_v17, %v2767_v60 }
 0x4d3   :  { %v2895_v16 = vld [vmem:[#allocation3 + $0xee0] sm:$0xff]  ;;  %5686 = vmatpush2.bf16.msra.mxu1 %v12231_v31 }
 0x4d4   :  { %16674 = vst [vmem:[#allocation288_spill] sm:$0xff] %v12233_v63  ;;  %v12236_v48 = vcombine.high %v2891_v11, %v2895_v16  ;;  %v2755_v61 = vld [vmem:[#allocation3 + $0xa80] sm:$0xff]  ;;  %16676 = vst [vmem:[#allocation290_spill] sm:$0xff] %v12239_v50  ;;  %5646 = vmatprep.subr.bf16.mxu0 %v12233_v63  ;;  %v12243_v49 = vcombine.low %v2891_v11, %v2895_v16 }
 0x4d5   :  { %v2759_v7 = vld [vmem:[#allocation3 + $0xaa0] sm:$0xff]  ;;  %5647 = vmatpush2.bf16.msra.mxu0 %v12239_v50  ;;  %v2608_v50 = vld [vmem:[#allocation3 + $0x5e8] sm:$0xff] }
 0x4d6   :  { %16675 = vst [vmem:[#allocation289_spill] sm:$0xff] %v12236_v48  ;;  %v2883_v9 = vld [vmem:[#allocation3 + $0xe80] sm:$0xff]  ;;  %16677 = vst [vmem:[#allocation291_spill] sm:$0xff] %v12243_v49  ;;  %v12245_v12 = vcombine.high %v2755_v61, %v2759_v7  ;;  %5687 = vmatprep.subr.bf16.mxu1 %v12236_v48  ;;  %v12251_v60 = vcombine.low %v2755_v61, %v2759_v7 }
 0x4d7   :  { %v2887_v59 = vld [vmem:[#allocation3 + $0xea0] sm:$0xff]  ;;  %5688 = vmatpush2.bf16.msra.mxu1 %v12243_v49  ;;  %v2604_v49 = vld [vmem:[#allocation3 + $0x5c8] sm:$0xff] }
 0x4d8   :  { %16678 = vst [vmem:[#allocation292_spill] sm:$0xff] %v12245_v12  ;;  %v12248_v33 = vcombine.high %v2883_v9, %v2887_v59  ;;  %v2747_v30 = vld [vmem:[#allocation3 + $0xa40] sm:$0xff]  ;;  %16680 = vst [vmem:[#allocation294_spill] sm:$0xff] %v12251_v60  ;;  %5648 = vmatprep.subr.bf16.mxu0 %v12245_v12  ;;  %v12255_v16 = vcombine.low %v2883_v9, %v2887_v59  ;;  %v2480_v12 = vld [vmem:[#allocation3 + $0x1e8] sm:$0xff] }
 0x4d9   :  { %v2751_v43 = vld [vmem:[#allocation3 + $0xa60] sm:$0xff]  ;;  %5649 = vmatpush2.bf16.msra.mxu0 %v12251_v60  ;;  %v2576_v60 = vld [vmem:[#allocation3 + $0x4e8] sm:$0xff] }
 0x4da   :  { %16679 = vst [vmem:[#allocation293_spill] sm:$0xff] %v12248_v33  ;;  %v2875_v34 = vld [vmem:[#allocation3 + $0xe40] sm:$0xff]  ;;  %16681 = vst [vmem:[#allocation295_spill] sm:$0xff] %v12255_v16  ;;  %v12257_v11 = vcombine.high %v2747_v30, %v2751_v43  ;;  %5689 = vmatprep.subr.bf16.mxu1 %v12248_v33  ;;  %v12263_v7 = vcombine.low %v2747_v30, %v2751_v43  ;;  %v2476_v33 = vld [vmem:[#allocation3 + $0x1c8] sm:$0xff]  ;;  %v12284_v30 = vcombine.high %v2604_v49, %v2608_v50 }
 0x4db   :  { %v2879_v29 = vld [vmem:[#allocation3 + $0xe60] sm:$0xff]  ;;  %5690 = vmatpush2.bf16.msra.mxu1 %v12255_v16  ;;  %v16692_v16 = vmax.f32 %v11853_v13, 0.0 }
 0x4dc   :  { %16682 = vst [vmem:[#allocation296_spill] sm:$0xff] %v12257_v11  ;;  %v12260_v17 = vcombine.high %v2875_v34, %v2879_v29  ;;  %v2739_v48 = vld [vmem:[#allocation3 + $0xa00] sm:$0xff]  ;;  %16684 = vst [vmem:[#allocation298_spill] sm:$0xff] %v12263_v7  ;;  %5650 = vmatprep.subr.bf16.mxu0 %v12257_v11  ;;  %v12267_v59 = vcombine.low %v2875_v34, %v2879_v29  ;;  %v12281_v34 = vcombine.high %v2476_v33, %v2480_v12  ;;  %v2472_v11 = vld [vmem:[#allocation3 + $0x1a8] sm:$0xff] }
 0x4dd   :  { %v2743_v63 = vld [vmem:[#allocation3 + $0xa20] sm:$0xff]  ;;  %5651 = vmatpush2.bf16.msra.mxu0 %v12263_v7  ;;  %16691 = vst [vmem:[#allocation305_spill] sm:$0xff] %v12284_v30  ;;  %v12289_v7 = vpack.c.bf16 %v16692_v16, %v16692_v16 }
 0x4de   :  { %16683 = vst [vmem:[#allocation297_spill] sm:$0xff] %v12260_v17  ;;  %v2867_v31 = vld [vmem:[#allocation3 + $0xe00] sm:$0xff]  ;;  %16685 = vst [vmem:[#allocation299_spill] sm:$0xff] %v12267_v59  ;;  %v12269_v9 = vcombine.high %v2739_v48, %v2743_v63  ;;  %5691 = vmatprep.subr.bf16.mxu1 %v12260_v17  ;;  %v12275_v43 = vcombine.low %v2739_v48, %v2743_v63  ;;  %v2468_v17 = vld [vmem:[#allocation3 + $0x188] sm:$0xff] }
 0x4df   :  { %v2871_v32 = vld [vmem:[#allocation3 + $0xe20] sm:$0xff]  ;;  %5692 = vmatpush2.bf16.msra.mxu1 %v12267_v59  ;;  %16690 = vst [vmem:[#allocation304_spill] sm:$0xff] %v12281_v34  ;;  %v2596_v63 = vld [vmem:[#allocation3 + $0x588] sm:$0xff]  ;;  %v12303_v13 = vcombine.high %v2468_v17, %v2472_v11 }
 0x4e0   :  { %16686 = vst [vmem:[#allocation300_spill] sm:$0xff] %v12269_v9  ;;  %v12272_v61 = vcombine.high %v2867_v31, %v2871_v32  ;;  %16688 = vst [vmem:[#allocation302_spill] sm:$0xff] %v12275_v43  ;;  %5652 = vmatprep.subr.bf16.mxu0 %v12269_v9  ;;  %v12279_v29 = vcombine.low %v2867_v31, %v2871_v32  ;;  %v2600_v48 = vld [vmem:[#allocation3 + $0x5a8] sm:$0xff]  ;;  %v16693_v32 = vmax.f32 %v11858_v28, 0.0 }
 0x4e1   :  { %5653 = vmatpush2.bf16.msra.mxu0 %v12275_v43  ;;  %v12297_v9 = vcombine.low %v2476_v33, %v2480_v12  ;;  %16696 = vst [vmem:[#allocation308_spill] sm:$0xff] %v12303_v13  ;;  %v12306_v16 = vcombine.high %v2596_v63, %v2600_v48  ;;  %v2460_v43 = vld [vmem:[#allocation3 + $0x148] sm:$0xff]  ;;  %v12311_v12 = vcombine.low %v2468_v17, %v2472_v11 }
 0x4e2   :  { %16687 = vst [vmem:[#allocation301_spill] sm:$0xff] %v12272_v61  ;;  %16689 = vst [vmem:[#allocation303_spill] sm:$0xff] %v12279_v29  ;;  %5693 = vmatprep.subr.bf16.mxu1 %v12272_v61  ;;  %v12295_v31 = vpack.c.bf16 %v16693_v32, %v16693_v32  ;;  %5704 = vmatprep.subr.bf16.mxu0 %v12281_v34  ;;  %v12301_v61 = vcombine.low %v2604_v49, %v2608_v50  ;;  %v2464_v59 = vld [vmem:[#allocation3 + $0x168] sm:$0xff] }
 0x4e3   :  { %16694 = vst [vmem:[#allocation306_spill] sm:$0xff] %v12297_v9  ;;  %5694 = vmatpush2.bf16.msra.mxu1 %v12279_v29  ;;  %16697 = vst [vmem:[#allocation309_spill] sm:$0xff] %v12306_v16  ;;  %v2588_v28 = vld [vmem:[#allocation3 + $0x548] sm:$0xff]  ;;  %v12315_v50 = vcombine.low %v2596_v63, %v2600_v48  ;;  %v12317_v49 = vcombine.high %v2460_v43, %v2464_v59  ;;  %v12325_v11 = vcombine.low %v2460_v43, %v2464_v59 }
 0x4e4   :  { %16695 = vst [vmem:[#allocation307_spill] sm:$0xff] %v12301_v61  ;;  %5745 = vmatprep.subr.bf16.mxu1 %v12284_v30  ;;  %5655 = vmatmul.mubr.bf16.vlgmr.msra.gmra.mxu0 %v12289_v7  ;;  %v2592_v32 = vld [vmem:[#allocation3 + $0x568] sm:$0xff]  ;;  %16698 = vst [vmem:[#allocation310_spill] sm:$0xff] %v12311_v12 }
 0x4e5   :  { %5705 = vmatpush1.bf16.msra.mxu0 %v12297_v9  ;;  %16699 = vst [vmem:[#allocation311_spill] sm:$0xff] %v12315_v50  ;;  %16700 = vst [vmem:[#allocation312_spill] sm:$0xff] %v12317_v49  ;;  %v12320_v33 = vcombine.high %v2588_v28, %v2592_v32  ;;  %v2452_v30 = vld [vmem:[#allocation3 + $0x108] sm:$0xff]  ;;  %5736 = vmatprep.mubr.bf16.mxu0 %v11870_v45  ;;  %v12329_v17 = vcombine.low %v2588_v28, %v2592_v32 }
 0x4e6   :  { %5696 = vmatmul.mubr.bf16.vlgmr.msra.gmra.mxu1 %v12295_v31  ;;  %5706 = vmatprep.subr.bf16.mxu0 %v12303_v13  ;;  %v2456_v34 = vld [vmem:[#allocation3 + $0x128] sm:$0xff]  ;;  %16702 = vst [vmem:[#allocation314_spill] sm:$0xff] %v12325_v11 }
 0x4e7   :  { %5746 = vmatpush1.bf16.msra.mxu1 %v12301_v61  ;;  %16701 = vst [vmem:[#allocation313_spill] sm:$0xff] %v12320_v33  ;;  %v2580_v29 = vld [vmem:[#allocation3 + $0x508] sm:$0xff]  ;;  %5777 = vmatprep.mubr.bf16.mxu1 %v11872_v18  ;;  %16703 = vst [vmem:[#allocation315_spill] sm:$0xff] %v12329_v17  ;;  %v12331_v63 = vcombine.high %v2452_v30, %v2456_v34  ;;  %v12337_v59 = vcombine.low %v2452_v30, %v2456_v34 }
 0x4e8   :  { %5747 = vmatprep.subr.bf16.mxu1 %v12306_v16  ;;  %v2584_v9 = vld [vmem:[#allocation3 + $0x528] sm:$0xff] }
 0x4e9   :  { %5707 = vmatpush1.bf16.msra.mxu0 %v12311_v12  ;;  %16704 = vst [vmem:[#allocation316_spill] sm:$0xff] %v12331_v63  ;;  %v12334_v48 = vcombine.high %v2580_v29, %v2584_v9  ;;  %v2444_v16 = vld [vmem:[#allocation3 + $0xc8] sm:$0xff]  ;;  %16706 = vst [vmem:[#allocation318_spill] sm:$0xff] %v12337_v59  ;;  %v12341_v43 = vcombine.low %v2580_v29, %v2584_v9 }
 0x4ea   :  { %5708 = vmatprep.subr.bf16.mxu0 %v12317_v49  ;;  %v2448_v13 = vld [vmem:[#allocation3 + $0xe8] sm:$0xff] }
 0x4eb   :  { %5748 = vmatpush1.bf16.msra.mxu1 %v12315_v50  ;;  %16705 = vst [vmem:[#allocation317_spill] sm:$0xff] %v12334_v48  ;;  %v2572_v61 = vld [vmem:[#allocation3 + $0x4c8] sm:$0xff]  ;;  %16707 = vst [vmem:[#allocation319_spill] sm:$0xff] %v12341_v43  ;;  %v12343_v28 = vcombine.high %v2444_v16, %v2448_v13  ;;  %v12349_v34 = vcombine.low %v2444_v16, %v2448_v13 }
 0x4ec   :  { %5749 = vmatprep.subr.bf16.mxu1 %v12320_v33  ;;  %v12346_v32 = vcombine.high %v2572_v61, %v2576_v60  ;;  %v2436_v33 = vld [vmem:[#allocation3 + $0x88] sm:$0xff]  ;;  %v12353_v9 = vcombine.low %v2572_v61, %v2576_v60 }
 0x4ed   :  { %5709 = vmatpush1.bf16.msra.mxu0 %v12325_v11  ;;  %16708 = vst [vmem:[#allocation320_spill] sm:$0xff] %v12343_v28  ;;  %v2440_v49 = vld [vmem:[#allocation3 + $0xa8] sm:$0xff]  ;;  %16710 = vst [vmem:[#allocation322_spill] sm:$0xff] %v12349_v34 }
 0x4ee   :  { %5710 = vmatprep.subr.bf16.mxu0 %v12331_v63  ;;  %16709 = vst [vmem:[#allocation321_spill] sm:$0xff] %v12346_v32  ;;  %v2564_v50 = vld [vmem:[#allocation3 + $0x488] sm:$0xff]  ;;  %16711 = vst [vmem:[#allocation323_spill] sm:$0xff] %v12353_v9  ;;  %v12355_v29 = vcombine.high %v2436_v33, %v2440_v49  ;;  %v12361_v13 = vcombine.low %v2436_v33, %v2440_v49 }
 0x4ef   :  { %5750 = vmatpush1.bf16.msra.mxu1 %v12329_v17  ;;  %v2568_v12 = vld [vmem:[#allocation3 + $0x4a8] sm:$0xff] }
 0x4f0   :  { %5751 = vmatprep.subr.bf16.mxu1 %v12334_v48  ;;  %16712 = vst [vmem:[#allocation324_spill] sm:$0xff] %v12355_v29  ;;  %v12358_v30 = vcombine.high %v2564_v50, %v2568_v12  ;;  %v2428_v48 = vld [vmem:[#allocation3 + $0x48] sm:$0xff]  ;;  %16714 = vst [vmem:[#allocation326_spill] sm:$0xff] %v12361_v13  ;;  %v12365_v60 = vcombine.low %v2564_v50, %v2568_v12 }
 0x4f1   :  { %5711 = vmatpush1.bf16.msra.mxu0 %v12337_v59  ;;  %v2432_v63 = vld [vmem:[#allocation3 + $0x68] sm:$0xff] }
 0x4f2   :  { %5712 = vmatprep.subr.bf16.mxu0 %v12343_v28  ;;  %16713 = vst [vmem:[#allocation325_spill] sm:$0xff] %v12358_v30  ;;  %v2556_v17 = vld [vmem:[#allocation3 + $0x448] sm:$0xff]  ;;  %16715 = vst [vmem:[#allocation327_spill] sm:$0xff] %v12365_v60  ;;  %v12367_v61 = vcombine.high %v2428_v48, %v2432_v63  ;;  %v12373_v49 = vcombine.low %v2428_v48, %v2432_v63 }
 0x4f3   :  { %5752 = vmatpush1.bf16.msra.mxu1 %v12341_v43  ;;  %v2560_v11 = vld [vmem:[#allocation3 + $0x468] sm:$0xff] }
 0x4f4   :  { %5753 = vmatprep.subr.bf16.mxu1 %v12346_v32  ;;  %16716 = vst [vmem:[#allocation328_spill] sm:$0xff] %v12367_v61  ;;  %v12370_v16 = vcombine.high %v2556_v17, %v2560_v11  ;;  %v2420_v32 = vld [vmem:[#allocation3 + $0x8] sm:$0xff]  ;;  %16718 = vst [vmem:[#allocation330_spill] sm:$0xff] %v12373_v49  ;;  %v12377_v12 = vcombine.low %v2556_v17, %v2560_v11 }
 0x4f5   :  { %5713 = vmatpush1.bf16.msra.mxu0 %v12349_v34  ;;  %v2424_v28 = vld [vmem:[#allocation3 + $0x28] sm:$0xff] }
 0x4f6   :  { %5714 = vmatprep.subr.bf16.mxu0 %v12355_v29  ;;  %16717 = vst [vmem:[#allocation329_spill] sm:$0xff] %v12370_v16  ;;  %v2548_v43 = vld [vmem:[#allocation3 + $0x408] sm:$0xff]  ;;  %16719 = vst [vmem:[#allocation331_spill] sm:$0xff] %v12377_v12  ;;  %v12379_v50 = vcombine.high %v2420_v32, %v2424_v28  ;;  %v12385_v63 = vcombine.low %v2420_v32, %v2424_v28 }
 0x4f7   :  { %5754 = vmatpush1.bf16.msra.mxu1 %v12353_v9  ;;  %v2552_v59 = vld [vmem:[#allocation3 + $0x428] sm:$0xff] }
 0x4f8   :  { %5755 = vmatprep.subr.bf16.mxu1 %v12358_v30  ;;  %16720 = vst [vmem:[#allocation332_spill] sm:$0xff] %v12379_v50  ;;  %v12382_v33 = vcombine.high %v2548_v43, %v2552_v59  ;;  %v2540_v30 = vld [vmem:[#allocation3 + $0x3c8] sm:$0xff]  ;;  %16722 = vst [vmem:[#allocation334_spill] sm:$0xff] %v12385_v63  ;;  %v12389_v11 = vcombine.low %v2548_v43, %v2552_v59 }
 0x4f9   :  { %5715 = vmatpush1.bf16.msra.mxu0 %v12361_v13  ;;  %v2544_v29 = vld [vmem:[#allocation3 + $0x3e8] sm:$0xff] }
 0x4fa   :  { %5716 = vmatprep.subr.bf16.mxu0 %v12367_v61  ;;  %16721 = vst [vmem:[#allocation333_spill] sm:$0xff] %v12382_v33  ;;  %v2668_v9 = vld [vmem:[#allocation3 + $0x7c8] sm:$0xff]  ;;  %16723 = vst [vmem:[#allocation335_spill] sm:$0xff] %v12389_v11  ;;  %v12391_v17 = vcombine.high %v2540_v30, %v2544_v29  ;;  %v12397_v28 = vcombine.low %v2540_v30, %v2544_v29 }
 0x4fb   :  { %5756 = vmatpush1.bf16.msra.mxu1 %v12365_v60  ;;  %v2672_v34 = vld [vmem:[#allocation3 + $0x7e8] sm:$0xff] }
 0x4fc   :  { %5757 = vmatprep.subr.bf16.mxu1 %v12370_v16  ;;  %16724 = vst [vmem:[#allocation336_spill] sm:$0xff] %v12391_v17  ;;  %v12394_v48 = vcombine.high %v2668_v9, %v2672_v34  ;;  %v2532_v16 = vld [vmem:[#allocation3 + $0x388] sm:$0xff]  ;;  %16726 = vst [vmem:[#allocation338_spill] sm:$0xff] %v12397_v28  ;;  %v12401_v59 = vcombine.low %v2668_v9, %v2672_v34 }
 0x4fd   :  { %5717 = vmatpush1.bf16.msra.mxu0 %v12373_v49  ;;  %v2536_v61 = vld [vmem:[#allocation3 + $0x3a8] sm:$0xff] }
 0x4fe   :  { %5718 = vmatprep.subr.bf16.mxu0 %v12379_v50  ;;  %16725 = vst [vmem:[#allocation337_spill] sm:$0xff] %v12394_v48  ;;  %v2660_v60 = vld [vmem:[#allocation3 + $0x788] sm:$0xff]  ;;  %16727 = vst [vmem:[#allocation339_spill] sm:$0xff] %v12401_v59  ;;  %v12403_v43 = vcombine.high %v2532_v16, %v2536_v61  ;;  %v12409_v29 = vcombine.low %v2532_v16, %v2536_v61 }
 0x4ff   :  { %5758 = vmatpush1.bf16.msra.mxu1 %v12377_v12  ;;  %v2664_v13 = vld [vmem:[#allocation3 + $0x7a8] sm:$0xff] }
 0x500   :  { %5759 = vmatprep.subr.bf16.mxu1 %v12382_v33  ;;  %16728 = vst [vmem:[#allocation340_spill] sm:$0xff] %v12403_v43  ;;  %v12406_v32 = vcombine.high %v2660_v60, %v2664_v13  ;;  %v2524_v33 = vld [vmem:[#allocation3 + $0x348] sm:$0xff]  ;;  %16730 = vst [vmem:[#allocation342_spill] sm:$0xff] %v12409_v29  ;;  %v12413_v34 = vcombine.low %v2660_v60, %v2664_v13 }
 0x501   :  { %5719 = vmatpush1.bf16.msra.mxu0 %v12385_v63  ;;  %v2528_v50 = vld [vmem:[#allocation3 + $0x368] sm:$0xff] }
 0x502   :  { %5720 = vmatprep.subr.bf16.mxu0 %v12391_v17  ;;  %16729 = vst [vmem:[#allocation341_spill] sm:$0xff] %v12406_v32  ;;  %v2652_v12 = vld [vmem:[#allocation3 + $0x748] sm:$0xff]  ;;  %16731 = vst [vmem:[#allocation343_spill] sm:$0xff] %v12413_v34  ;;  %v12415_v9 = vcombine.high %v2524_v33, %v2528_v50  ;;  %v12421_v61 = vcombine.low %v2524_v33, %v2528_v50 }
 0x503   :  { %5760 = vmatpush1.bf16.msra.mxu1 %v12389_v11  ;;  %v2656_v49 = vld [vmem:[#allocation3 + $0x768] sm:$0xff] }
 0x504   :  { %5761 = vmatprep.subr.bf16.mxu1 %v12394_v48  ;;  %16732 = vst [vmem:[#allocation344_spill] sm:$0xff] %v12415_v9  ;;  %v12418_v30 = vcombine.high %v2652_v12, %v2656_v49  ;;  %v2516_v48 = vld [vmem:[#allocation3 + $0x308] sm:$0xff]  ;;  %16734 = vst [vmem:[#allocation346_spill] sm:$0xff] %v12421_v61  ;;  %v12425_v13 = vcombine.low %v2652_v12, %v2656_v49 }
 0x505   :  { %5721 = vmatpush2.bf16.msra.mxu0 %v12397_v28  ;;  %v2520_v17 = vld [vmem:[#allocation3 + $0x328] sm:$0xff] }
 0x506   :  { %5722 = vmatprep.subr.bf16.mxu0 %v12403_v43  ;;  %16733 = vst [vmem:[#allocation345_spill] sm:$0xff] %v12418_v30  ;;  %v2644_v11 = vld [vmem:[#allocation3 + $0x708] sm:$0xff]  ;;  %16735 = vst [vmem:[#allocation347_spill] sm:$0xff] %v12425_v13  ;;  %v12427_v60 = vcombine.high %v2516_v48, %v2520_v17  ;;  %v12433_v50 = vcombine.low %v2516_v48, %v2520_v17 }
 0x507   :  { %5762 = vmatpush2.bf16.msra.mxu1 %v12401_v59  ;;  %v2648_v63 = vld [vmem:[#allocation3 + $0x728] sm:$0xff] }
 0x508   :  { %5763 = vmatprep.subr.bf16.mxu1 %v12406_v32  ;;  %16736 = vst [vmem:[#allocation348_spill] sm:$0xff] %v12427_v60  ;;  %v12430_v16 = vcombine.high %v2644_v11, %v2648_v63  ;;  %v2508_v32 = vld [vmem:[#allocation3 + $0x2c8] sm:$0xff]  ;;  %16738 = vst [vmem:[#allocation350_spill] sm:$0xff] %v12433_v50  ;;  %v12437_v49 = vcombine.low %v2644_v11, %v2648_v63 }
 0x509   :  { %5723 = vmatpush2.bf16.msra.mxu0 %v12409_v29  ;;  %v2512_v43 = vld [vmem:[#allocation3 + $0x2e8] sm:$0xff] }
 0x50a   :  { %5724 = vmatprep.subr.bf16.mxu0 %v12415_v9  ;;  %16737 = vst [vmem:[#allocation349_spill] sm:$0xff] %v12430_v16  ;;  %v2636_v59 = vld [vmem:[#allocation3 + $0x6c8] sm:$0xff]  ;;  %16739 = vst [vmem:[#allocation351_spill] sm:$0xff] %v12437_v49  ;;  %v12439_v12 = vcombine.high %v2508_v32, %v2512_v43  ;;  %v12445_v17 = vcombine.low %v2508_v32, %v2512_v43 }
 0x50b   :  { %5764 = vmatpush2.bf16.msra.mxu1 %v12413_v34  ;;  %v2640_v28 = vld [vmem:[#allocation3 + $0x6e8] sm:$0xff] }
 0x50c   :  { %5765 = vmatprep.subr.bf16.mxu1 %v12418_v30  ;;  %16740 = vst [vmem:[#allocation352_spill] sm:$0xff] %v12439_v12  ;;  %v12442_v33 = vcombine.high %v2636_v59, %v2640_v28  ;;  %v2500_v30 = vld [vmem:[#allocation3 + $0x288] sm:$0xff]  ;;  %16742 = vst [vmem:[#allocation354_spill] sm:$0xff] %v12445_v17  ;;  %v12449_v63 = vcombine.low %v2636_v59, %v2640_v28 }
 0x50d   :  { %5725 = vmatpush2.bf16.msra.mxu0 %v12421_v61  ;;  %v2504_v9 = vld [vmem:[#allocation3 + $0x2a8] sm:$0xff] }
 0x50e   :  { %5726 = vmatprep.subr.bf16.mxu0 %v12427_v60  ;;  %16741 = vst [vmem:[#allocation353_spill] sm:$0xff] %v12442_v33  ;;  %v2628_v34 = vld [vmem:[#allocation3 + $0x688] sm:$0xff]  ;;  %16743 = vst [vmem:[#allocation355_spill] sm:$0xff] %v12449_v63  ;;  %v12451_v11 = vcombine.high %v2500_v30, %v2504_v9  ;;  %v12457_v43 = vcombine.low %v2500_v30, %v2504_v9 }
 0x50f   :  { %5766 = vmatpush2.bf16.msra.mxu1 %v12425_v13  ;;  %v2632_v29 = vld [vmem:[#allocation3 + $0x6a8] sm:$0xff] }
 0x510   :  { %5767 = vmatprep.subr.bf16.mxu1 %v12430_v16  ;;  %16744 = vst [vmem:[#allocation356_spill] sm:$0xff] %v12451_v11  ;;  %v12454_v48 = vcombine.high %v2628_v34, %v2632_v29  ;;  %v2492_v16 = vld [vmem:[#allocation3 + $0x248] sm:$0xff]  ;;  %16746 = vst [vmem:[#allocation358_spill] sm:$0xff] %v12457_v43  ;;  %v12461_v28 = vcombine.low %v2628_v34, %v2632_v29 }
 0x511   :  { %5727 = vmatpush2.bf16.msra.mxu0 %v12433_v50  ;;  %v2496_v60 = vld [vmem:[#allocation3 + $0x268] sm:$0xff] }
 0x512   :  { %5728 = vmatprep.subr.bf16.mxu0 %v12439_v12  ;;  %16745 = vst [vmem:[#allocation357_spill] sm:$0xff] %v12454_v48  ;;  %v2620_v13 = vld [vmem:[#allocation3 + $0x648] sm:$0xff]  ;;  %16747 = vst [vmem:[#allocation359_spill] sm:$0xff] %v12461_v28  ;;  %v12463_v59 = vcombine.high %v2492_v16, %v2496_v60  ;;  %v12469_v9 = vcombine.low %v2492_v16, %v2496_v60 }
 0x513   :  { %5768 = vmatpush2.bf16.msra.mxu1 %v12437_v49  ;;  %v2624_v61 = vld [vmem:[#allocation3 + $0x668] sm:$0xff] }
 0x514   :  { %5769 = vmatprep.subr.bf16.mxu1 %v12442_v33  ;;  %16748 = vst [vmem:[#allocation360_spill] sm:$0xff] %v12463_v59  ;;  %v12466_v32 = vcombine.high %v2620_v13, %v2624_v61  ;;  %v2484_v33 = vld [vmem:[#allocation3 + $0x208] sm:$0xff]  ;;  %16750 = vst [vmem:[#allocation362_spill] sm:$0xff] %v12469_v9  ;;  %v12473_v29 = vcombine.low %v2620_v13, %v2624_v61 }
 0x515   :  { %5729 = vmatpush2.bf16.msra.mxu0 %v12445_v17  ;;  %v2488_v12 = vld [vmem:[#allocation3 + $0x228] sm:$0xff] }
 0x516   :  { %5730 = vmatprep.subr.bf16.mxu0 %v12451_v11  ;;  %16749 = vst [vmem:[#allocation361_spill] sm:$0xff] %v12466_v32  ;;  %v2612_v49 = vld [vmem:[#allocation3 + $0x608] sm:$0xff]  ;;  %16751 = vst [vmem:[#allocation363_spill] sm:$0xff] %v12473_v29  ;;  %v12475_v34 = vcombine.high %v2484_v33, %v2488_v12  ;;  %v12481_v60 = vcombine.low %v2484_v33, %v2488_v12 }
 0x517   :  { %5770 = vmatpush2.bf16.msra.mxu1 %v12449_v63  ;;  %v2616_v50 = vld [vmem:[#allocation3 + $0x628] sm:$0xff] }
 0x518   :  { %5771 = vmatprep.subr.bf16.mxu1 %v12454_v48  ;;  %16752 = vst [vmem:[#allocation364_spill] sm:$0xff] %v12475_v34  ;;  %v12478_v30 = vcombine.high %v2612_v49, %v2616_v50  ;;  %v2732_v48 = vld [vmem:[#allocation3 + $0x9c8] sm:$0xff]  ;;  %16754 = vst [vmem:[#allocation366_spill] sm:$0xff] %v12481_v60  ;;  %v12485_v61 = vcombine.low %v2612_v49, %v2616_v50 }
 0x519   :  { %5731 = vmatpush2.bf16.msra.mxu0 %v12457_v43  ;;  %v2736_v11 = vld [vmem:[#allocation3 + $0x9e8] sm:$0xff] }
 0x51a   :  { %5732 = vmatprep.subr.bf16.mxu0 %v12463_v59  ;;  %16753 = vst [vmem:[#allocation365_spill] sm:$0xff] %v12478_v30  ;;  %v2860_v63 = vld [vmem:[#allocation3 + $0xdc8] sm:$0xff]  ;;  %16755 = vst [vmem:[#allocation367_spill] sm:$0xff] %v12485_v61  ;;  %v12487_v13 = vcombine.high %v2732_v48, %v2736_v11  ;;  %v12493_v12 = vcombine.low %v2732_v48, %v2736_v11 }
 0x51b   :  { %5772 = vmatpush2.bf16.msra.mxu1 %v12461_v28  ;;  %v2864_v17 = vld [vmem:[#allocation3 + $0xde8] sm:$0xff] }
 0x51c   :  { %5773 = vmatprep.subr.bf16.mxu1 %v12466_v32  ;;  %16756 = vst [vmem:[#allocation368_spill] sm:$0xff] %v12487_v13  ;;  %v12490_v16 = vcombine.high %v2860_v63, %v2864_v17  ;;  %v2724_v32 = vld [vmem:[#allocation3 + $0x988] sm:$0xff]  ;;  %16758 = vst [vmem:[#allocation370_spill] sm:$0xff] %v12493_v12  ;;  %v12497_v50 = vcombine.low %v2860_v63, %v2864_v17 }
 0x51d   :  { %5733 = vmatpush2.bf16.msra.mxu0 %v12469_v9  ;;  %v2728_v59 = vld [vmem:[#allocation3 + $0x9a8] sm:$0xff] }
 0x51e   :  { %5734 = vmatprep.subr.bf16.mxu0 %v12475_v34  ;;  %16757 = vst [vmem:[#allocation369_spill] sm:$0xff] %v12490_v16  ;;  %v2852_v28 = vld [vmem:[#allocation3 + $0xd88] sm:$0xff]  ;;  %16759 = vst [vmem:[#allocation371_spill] sm:$0xff] %v12497_v50  ;;  %v12499_v49 = vcombine.high %v2724_v32, %v2728_v59  ;;  %v12507_v11 = vcombine.low %v2724_v32, %v2728_v59 }
 0x51f   :  { %5774 = vmatpush2.bf16.msra.mxu1 %v12473_v29  ;;  %v2856_v43 = vld [vmem:[#allocation3 + $0xda8] sm:$0xff] }
 0x520   :  { %5775 = vmatprep.subr.bf16.mxu1 %v12478_v30  ;;  %16760 = vst [vmem:[#allocation372_spill] sm:$0xff] %v12499_v49  ;;  %v12502_v33 = vcombine.high %v2852_v28, %v2856_v43  ;;  %v2716_v30 = vld [vmem:[#allocation3 + $0x948] sm:$0xff]  ;;  %16762 = vst [vmem:[#allocation374_spill] sm:$0xff] %v12507_v11  ;;  %v12511_v17 = vcombine.low %v2852_v28, %v2856_v43 }
 0x521   :  { %5735 = vmatpush2.bf16.msra.mxu0 %v12481_v60  ;;  %v2720_v34 = vld [vmem:[#allocation3 + $0x968] sm:$0xff] }
 0x522   :  { %5786 = vmatprep.subr.bf16.mxu0 %v12487_v13  ;;  %16761 = vst [vmem:[#allocation373_spill] sm:$0xff] %v12502_v33  ;;  %v2844_v29 = vld [vmem:[#allocation3 + $0xd48] sm:$0xff]  ;;  %16763 = vst [vmem:[#allocation375_spill] sm:$0xff] %v12511_v17  ;;  %v12513_v63 = vcombine.high %v2716_v30, %v2720_v34  ;;  %v12521_v59 = vcombine.low %v2716_v30, %v2720_v34 }
 0x523   :  { %5776 = vmatpush2.bf16.msra.mxu1 %v12485_v61  ;;  %v2848_v60 = vld [vmem:[#allocation3 + $0xd68] sm:$0xff] }
 0x524   :  { %5827 = vmatprep.subr.bf16.mxu1 %v12490_v16  ;;  %5737 = vmatmul.mubr.bf16.vlgmr.msra.gmra.mxu0 %v12073_v5  ;;  %16764 = vst [vmem:[#allocation376_spill] sm:$0xff] %v12513_v63  ;;  %v12516_v48 = vcombine.high %v2844_v29, %v2848_v60  ;;  %v2708_v16 = vld [vmem:[#allocation3 + $0x908] sm:$0xff]  ;;  %16766 = vst [vmem:[#allocation378_spill] sm:$0xff] %v12521_v59  ;;  %v12525_v43 = vcombine.low %v2844_v29, %v2848_v60 }
 0x525   :  { %5787 = vmatpush1.bf16.msra.mxu0 %v12493_v12  ;;  %v2712_v13 = vld [vmem:[#allocation3 + $0x928] sm:$0xff]  ;;  %5818 = vmatprep.mubr.bf16.mxu0 %v12095_v51 }
 0x526   :  { %5778 = vmatmul.mubr.bf16.vlgmr.msra.gmra.mxu1 %v12079_v41  ;;  %5788 = vmatprep.subr.bf16.mxu0 %v12499_v49  ;;  %16765 = vst [vmem:[#allocation377_spill] sm:$0xff] %v12516_v48  ;;  %v2836_v61 = vld [vmem:[#allocation3 + $0xd08] sm:$0xff]  ;;  %16767 = vst [vmem:[#allocation379_spill] sm:$0xff] %v12525_v43  ;;  %v12527_v28 = vcombine.high %v2708_v16, %v2712_v13  ;;  %v12533_v34 = vcombine.low %v2708_v16, %v2712_v13 }
 0x527   :  { %5828 = vmatpush1.bf16.msra.mxu1 %v12497_v50  ;;  %v2840_v12 = vld [vmem:[#allocation3 + $0xd28] sm:$0xff]  ;;  %5859 = vmatprep.mubr.bf16.mxu1 %v12101_v0 }
 0x528   :  { %5829 = vmatprep.subr.bf16.mxu1 %v12502_v33  ;;  %16768 = vst [vmem:[#allocation380_spill] sm:$0xff] %v12527_v28  ;;  %v12530_v32 = vcombine.high %v2836_v61, %v2840_v12  ;;  %v2700_v33 = vld [vmem:[#allocation3 + $0x8c8] sm:$0xff]  ;;  %16770 = vst [vmem:[#allocation382_spill] sm:$0xff] %v12533_v34  ;;  %v12537_v29 = vcombine.low %v2836_v61, %v2840_v12 }
 0x529   :  { %5789 = vmatpush1.bf16.msra.mxu0 %v12507_v11  ;;  %v2704_v49 = vld [vmem:[#allocation3 + $0x8e8] sm:$0xff] }
 0x52a   :  { %5790 = vmatprep.subr.bf16.mxu0 %v12513_v63  ;;  %16769 = vst [vmem:[#allocation381_spill] sm:$0xff] %v12530_v32  ;;  %v2828_v50 = vld [vmem:[#allocation3 + $0xcc8] sm:$0xff]  ;;  %16771 = vst [vmem:[#allocation383_spill] sm:$0xff] %v12537_v29  ;;  %v12539_v30 = vcombine.high %v2700_v33, %v2704_v49  ;;  %v12545_v13 = vcombine.low %v2700_v33, %v2704_v49 }
 0x52b   :  { %5830 = vmatpush1.bf16.msra.mxu1 %v12511_v17  ;;  %v2832_v9 = vld [vmem:[#allocation3 + $0xce8] sm:$0xff] }
 0x52c   :  { %5831 = vmatprep.subr.bf16.mxu1 %v12516_v48  ;;  %16772 = vst [vmem:[#allocation384_spill] sm:$0xff] %v12539_v30  ;;  %v12542_v60 = vcombine.high %v2828_v50, %v2832_v9  ;;  %v2692_v48 = vld [vmem:[#allocation3 + $0x888] sm:$0xff]  ;;  %16774 = vst [vmem:[#allocation386_spill] sm:$0xff] %v12545_v13  ;;  %v12549_v61 = vcombine.low %v2828_v50, %v2832_v9 }
 0x52d   :  { %5791 = vmatpush1.bf16.msra.mxu0 %v12521_v59  ;;  %v2696_v63 = vld [vmem:[#allocation3 + $0x8a8] sm:$0xff] }
 0x52e   :  { %5792 = vmatprep.subr.bf16.mxu0 %v12527_v28  ;;  %16773 = vst [vmem:[#allocation385_spill] sm:$0xff] %v12542_v60  ;;  %v2820_v17 = vld [vmem:[#allocation3 + $0xc88] sm:$0xff]  ;;  %16775 = vst [vmem:[#allocation387_spill] sm:$0xff] %v12549_v61  ;;  %v12551_v16 = vcombine.high %v2692_v48, %v2696_v63  ;;  %v12557_v49 = vcombine.low %v2692_v48, %v2696_v63 }
 0x52f   :  { %5832 = vmatpush1.bf16.msra.mxu1 %v12525_v43  ;;  %v2824_v11 = vld [vmem:[#allocation3 + $0xca8] sm:$0xff] }
 0x530   :  { %5833 = vmatprep.subr.bf16.mxu1 %v12530_v32  ;;  %16776 = vst [vmem:[#allocation388_spill] sm:$0xff] %v12551_v16  ;;  %v12554_v12 = vcombine.high %v2820_v17, %v2824_v11  ;;  %v2684_v32 = vld [vmem:[#allocation3 + $0x848] sm:$0xff]  ;;  %16778 = vst [vmem:[#allocation390_spill] sm:$0xff] %v12557_v49  ;;  %v12561_v9 = vcombine.low %v2820_v17, %v2824_v11 }
 0x531   :  { %5793 = vmatpush1.bf16.msra.mxu0 %v12533_v34  ;;  %v2688_v28 = vld [vmem:[#allocation3 + $0x868] sm:$0xff] }
 0x532   :  { %5794 = vmatprep.subr.bf16.mxu0 %v12539_v30  ;;  %16777 = vst [vmem:[#allocation389_spill] sm:$0xff] %v12554_v12  ;;  %v2812_v43 = vld [vmem:[#allocation3 + $0xc48] sm:$0xff]  ;;  %16779 = vst [vmem:[#allocation391_spill] sm:$0xff] %v12561_v9  ;;  %v12563_v50 = vcombine.high %v2684_v32, %v2688_v28  ;;  %v12569_v63 = vcombine.low %v2684_v32, %v2688_v28 }
 0x533   :  { %5834 = vmatpush1.bf16.msra.mxu1 %v12537_v29  ;;  %v2816_v59 = vld [vmem:[#allocation3 + $0xc68] sm:$0xff] }
 0x534   :  { %5835 = vmatprep.subr.bf16.mxu1 %v12542_v60  ;;  %16780 = vst [vmem:[#allocation392_spill] sm:$0xff] %v12563_v50  ;;  %v12566_v33 = vcombine.high %v2812_v43, %v2816_v59  ;;  %v2676_v60 = vld [vmem:[#allocation3 + $0x808] sm:$0xff]  ;;  %16782 = vst [vmem:[#allocation394_spill] sm:$0xff] %v12569_v63  ;;  %v12573_v11 = vcombine.low %v2812_v43, %v2816_v59 }
 0x535   :  { %5795 = vmatpush1.bf16.msra.mxu0 %v12545_v13  ;;  %v2680_v30 = vld [vmem:[#allocation3 + $0x828] sm:$0xff] }
 0x536   :  { %5796 = vmatprep.subr.bf16.mxu0 %v12551_v16  ;;  %16781 = vst [vmem:[#allocation393_spill] sm:$0xff] %v12566_v33  ;;  %v2804_v29 = vld [vmem:[#allocation3 + $0xc08] sm:$0xff]  ;;  %16783 = vst [vmem:[#allocation395_spill] sm:$0xff] %v12573_v11  ;;  %v12575_v17 = vcombine.high %v2676_v60, %v2680_v30  ;;  %v12581_v28 = vcombine.low %v2676_v60, %v2680_v30 }
 0x537   :  { %5836 = vmatpush1.bf16.msra.mxu1 %v12549_v61  ;;  %v2808_v34 = vld [vmem:[#allocation3 + $0xc28] sm:$0xff] }
 0x538   :  { %5837 = vmatprep.subr.bf16.mxu1 %v12554_v12  ;;  %16784 = vst [vmem:[#allocation396_spill] sm:$0xff] %v12575_v17  ;;  %v12578_v48 = vcombine.high %v2804_v29, %v2808_v34  ;;  %v2796_v12 = vld [vmem:[#allocation3 + $0xbc8] sm:$0xff]  ;;  %16786 = vst [vmem:[#allocation398_spill] sm:$0xff] %v12581_v28  ;;  %v12585_v59 = vcombine.low %v2804_v29, %v2808_v34 }
 0x539   :  { %5797 = vmatpush1.bf16.msra.mxu0 %v12557_v49  ;;  %v2800_v16 = vld [vmem:[#allocation3 + $0xbe8] sm:$0xff] }
 0x53a   :  { %5798 = vmatprep.subr.bf16.mxu0 %v12563_v50  ;;  %16785 = vst [vmem:[#allocation397_spill] sm:$0xff] %v12578_v48  ;;  %v2924_v61 = vld [vmem:[#allocation3 + $0xfc8] sm:$0xff]  ;;  %16787 = vst [vmem:[#allocation399_spill] sm:$0xff] %v12585_v59  ;;  %v12587_v43 = vcombine.high %v2796_v12, %v2800_v16  ;;  %v12593_v30 = vcombine.low %v2796_v12, %v2800_v16 }
 0x53b   :  { %5838 = vmatpush1.bf16.msra.mxu1 %v12561_v9  ;;  %v2928_v13 = vld [vmem:[#allocation3 + $0xfe8] sm:$0xff] }
 0x53c   :  { %5839 = vmatprep.subr.bf16.mxu1 %v12566_v33  ;;  %16788 = vst [vmem:[#allocation400_spill] sm:$0xff] %v12587_v43  ;;  %v12590_v32 = vcombine.high %v2924_v61, %v2928_v13  ;;  %v2788_v33 = vld [vmem:[#allocation3 + $0xb88] sm:$0xff]  ;;  %16790 = vst [vmem:[#allocation402_spill] sm:$0xff] %v12593_v30  ;;  %v12597_v34 = vcombine.low %v2924_v61, %v2928_v13 }
 0x53d   :  { %5799 = vmatpush1.bf16.msra.mxu0 %v12569_v63  ;;  %v2792_v50 = vld [vmem:[#allocation3 + $0xba8] sm:$0xff] }
 0x53e   :  { %5800 = vmatprep.subr.bf16.mxu0 %v12575_v17  ;;  %16789 = vst [vmem:[#allocation401_spill] sm:$0xff] %v12590_v32  ;;  %v2916_v9 = vld [vmem:[#allocation3 + $0xf88] sm:$0xff]  ;;  %16791 = vst [vmem:[#allocation403_spill] sm:$0xff] %v12597_v34  ;;  %v12599_v29 = vcombine.high %v2788_v33, %v2792_v50  ;;  %v12605_v16 = vcombine.low %v2788_v33, %v2792_v50 }
 0x53f   :  { %5840 = vmatpush1.bf16.msra.mxu1 %v12573_v11  ;;  %v2920_v49 = vld [vmem:[#allocation3 + $0xfa8] sm:$0xff] }
 0x540   :  { %5841 = vmatprep.subr.bf16.mxu1 %v12578_v48  ;;  %16792 = vst [vmem:[#allocation404_spill] sm:$0xff] %v12599_v29  ;;  %v12602_v60 = vcombine.high %v2916_v9, %v2920_v49  ;;  %v2780_v48 = vld [vmem:[#allocation3 + $0xb48] sm:$0xff]  ;;  %16794 = vst [vmem:[#allocation406_spill] sm:$0xff] %v12605_v16  ;;  %v12609_v13 = vcombine.low %v2916_v9, %v2920_v49 }
 0x541   :  { %5801 = vmatpush1.bf16.msra.mxu0 %v12581_v28  ;;  %v2784_v17 = vld [vmem:[#allocation3 + $0xb68] sm:$0xff] }
 0x542   :  { %5802 = vmatprep.subr.bf16.mxu0 %v12587_v43  ;;  %16793 = vst [vmem:[#allocation405_spill] sm:$0xff] %v12602_v60  ;;  %v2908_v11 = vld [vmem:[#allocation3 + $0xf48] sm:$0xff]  ;;  %16795 = vst [vmem:[#allocation407_spill] sm:$0xff] %v12609_v13  ;;  %v12611_v61 = vcombine.high %v2780_v48, %v2784_v17  ;;  %v12617_v50 = vcombine.low %v2780_v48, %v2784_v17 }
 0x543   :  { %5842 = vmatpush1.bf16.msra.mxu1 %v12585_v59  ;;  %v2912_v63 = vld [vmem:[#allocation3 + $0xf68] sm:$0xff] }
 0x544   :  { %5843 = vmatprep.subr.bf16.mxu1 %v12590_v32  ;;  %16796 = vst [vmem:[#allocation408_spill] sm:$0xff] %v12611_v61  ;;  %v12614_v12 = vcombine.high %v2908_v11, %v2912_v63  ;;  %v2772_v32 = vld [vmem:[#allocation3 + $0xb08] sm:$0xff]  ;;  %16798 = vst [vmem:[#allocation410_spill] sm:$0xff] %v12617_v50  ;;  %v12621_v49 = vcombine.low %v2908_v11, %v2912_v63 }
 0x545   :  { %5803 = vmatpush2.bf16.msra.mxu0 %v12593_v30  ;;  %v2776_v43 = vld [vmem:[#allocation3 + $0xb28] sm:$0xff] }
 0x546   :  { %5804 = vmatprep.subr.bf16.mxu0 %v12599_v29  ;;  %16797 = vst [vmem:[#allocation409_spill] sm:$0xff] %v12614_v12  ;;  %v2900_v59 = vld [vmem:[#allocation3 + $0xf08] sm:$0xff]  ;;  %16799 = vst [vmem:[#allocation411_spill] sm:$0xff] %v12621_v49  ;;  %v12623_v9 = vcombine.high %v2772_v32, %v2776_v43  ;;  %v12629_v17 = vcombine.low %v2772_v32, %v2776_v43 }
 0x547   :  { %5844 = vmatpush2.bf16.msra.mxu1 %v12597_v34  ;;  %v2904_v28 = vld [vmem:[#allocation3 + $0xf28] sm:$0xff] }
 0x548   :  { %5845 = vmatprep.subr.bf16.mxu1 %v12602_v60  ;;  %16800 = vst [vmem:[#allocation412_spill] sm:$0xff] %v12623_v9  ;;  %v12626_v33 = vcombine.high %v2900_v59, %v2904_v28  ;;  %v2764_v60 = vld [vmem:[#allocation3 + $0xac8] sm:$0xff]  ;;  %16802 = vst [vmem:[#allocation414_spill] sm:$0xff] %v12629_v17  ;;  %v12633_v63 = vcombine.low %v2900_v59, %v2904_v28 }
 0x549   :  { %5805 = vmatpush2.bf16.msra.mxu0 %v12605_v16  ;;  %v2768_v29 = vld [vmem:[#allocation3 + $0xae8] sm:$0xff] }
 0x54a   :  { %5806 = vmatprep.subr.bf16.mxu0 %v12611_v61  ;;  %16801 = vst [vmem:[#allocation413_spill] sm:$0xff] %v12626_v33  ;;  %v2892_v34 = vld [vmem:[#allocation3 + $0xec8] sm:$0xff]  ;;  %16803 = vst [vmem:[#allocation415_spill] sm:$0xff] %v12633_v63  ;;  %v12635_v11 = vcombine.high %v2764_v60, %v2768_v29  ;;  %v12641_v43 = vcombine.low %v2764_v60, %v2768_v29 }
 0x54b   :  { %5846 = vmatpush2.bf16.msra.mxu1 %v12609_v13  ;;  %v2896_v30 = vld [vmem:[#allocation3 + $0xee8] sm:$0xff] }
 0x54c   :  { %5847 = vmatprep.subr.bf16.mxu1 %v12614_v12  ;;  %16804 = vst [vmem:[#allocation416_spill] sm:$0xff] %v12635_v11  ;;  %v12638_v48 = vcombine.high %v2892_v34, %v2896_v30  ;;  %v2756_v12 = vld [vmem:[#allocation3 + $0xa88] sm:$0xff]  ;;  %16806 = vst [vmem:[#allocation418_spill] sm:$0xff] %v12641_v43  ;;  %v12645_v28 = vcombine.low %v2892_v34, %v2896_v30 }
 0x54d   :  { %5807 = vmatpush2.bf16.msra.mxu0 %v12617_v50  ;;  %v2760_v61 = vld [vmem:[#allocation3 + $0xaa8] sm:$0xff] }
 0x54e   :  { %5808 = vmatprep.subr.bf16.mxu0 %v12623_v9  ;;  %16805 = vst [vmem:[#allocation417_spill] sm:$0xff] %v12638_v48  ;;  %v2884_v13 = vld [vmem:[#allocation3 + $0xe88] sm:$0xff]  ;;  %16807 = vst [vmem:[#allocation419_spill] sm:$0xff] %v12645_v28  ;;  %v12647_v59 = vcombine.high %v2756_v12, %v2760_v61  ;;  %v12653_v29 = vcombine.low %v2756_v12, %v2760_v61 }
 0x54f   :  { %5848 = vmatpush2.bf16.msra.mxu1 %v12621_v49  ;;  %v2888_v16 = vld [vmem:[#allocation3 + $0xea8] sm:$0xff] }
 0x550   :  { %5849 = vmatprep.subr.bf16.mxu1 %v12626_v33  ;;  %16808 = vst [vmem:[#allocation420_spill] sm:$0xff] %v12647_v59  ;;  %v12650_v32 = vcombine.high %v2884_v13, %v2888_v16  ;;  %v2748_v33 = vld [vmem:[#allocation3 + $0xa48] sm:$0xff]  ;;  %16810 = vst [vmem:[#allocation422_spill] sm:$0xff] %v12653_v29  ;;  %v12657_v30 = vcombine.low %v2884_v13, %v2888_v16 }
 0x551   :  { %5809 = vmatpush2.bf16.msra.mxu0 %v12629_v17  ;;  %v2752_v9 = vld [vmem:[#allocation3 + $0xa68] sm:$0xff] }
 0x552   :  { %5810 = vmatprep.subr.bf16.mxu0 %v12635_v11  ;;  %16809 = vst [vmem:[#allocation421_spill] sm:$0xff] %v12650_v32  ;;  %v2876_v49 = vld [vmem:[#allocation3 + $0xe48] sm:$0xff]  ;;  %16811 = vst [vmem:[#allocation423_spill] sm:$0xff] %v12657_v30  ;;  %v12659_v34 = vcombine.high %v2748_v33, %v2752_v9  ;;  %v12665_v61 = vcombine.low %v2748_v33, %v2752_v9 }
 0x553   :  { %5850 = vmatpush2.bf16.msra.mxu1 %v12633_v63  ;;  %v2880_v50 = vld [vmem:[#allocation3 + $0xe68] sm:$0xff] }
 0x554   :  { %5851 = vmatprep.subr.bf16.mxu1 %v12638_v48  ;;  %16812 = vst [vmem:[#allocation424_spill] sm:$0xff] %v12659_v34  ;;  %v12662_v60 = vcombine.high %v2876_v49, %v2880_v50  ;;  %v2740_v48 = vld [vmem:[#allocation3 + $0xa08] sm:$0xff]  ;;  %16814 = vst [vmem:[#allocation426_spill] sm:$0xff] %v12665_v61  ;;  %v12669_v16 = vcombine.low %v2876_v49, %v2880_v50 }
 0x555   :  { %5811 = vmatpush2.bf16.msra.mxu0 %v12641_v43  ;;  %v2744_v11 = vld [vmem:[#allocation3 + $0xa28] sm:$0xff]  ;;  %v2609_v43 = vld [vmem:[#allocation3 + $0x5f0] sm:$0xff] }
 0x556   :  { %5812 = vmatprep.subr.bf16.mxu0 %v12647_v59  ;;  %16813 = vst [vmem:[#allocation425_spill] sm:$0xff] %v12662_v60  ;;  %v2868_v63 = vld [vmem:[#allocation3 + $0xe08] sm:$0xff]  ;;  %16815 = vst [vmem:[#allocation427_spill] sm:$0xff] %v12669_v16  ;;  %v12671_v13 = vcombine.high %v2740_v48, %v2744_v11  ;;  %v2481_v59 = vld [vmem:[#allocation3 + $0x1f0] sm:$0xff]  ;;  %v12677_v9 = vcombine.low %v2740_v48, %v2744_v11  ;;  %v12691_v11 = vrot.slane %v11540_v44, %v11553_v47 }
 0x557   :  { %5852 = vmatpush2.bf16.msra.mxu1 %v12645_v28  ;;  %v2872_v17 = vld [vmem:[#allocation3 + $0xe28] sm:$0xff]  ;;  %v2605_v28 = vld [vmem:[#allocation3 + $0x5d0] sm:$0xff] }
 0x558   :  { %5853 = vmatprep.subr.bf16.mxu1 %v12650_v32  ;;  %16816 = vst [vmem:[#allocation428_spill] sm:$0xff] %v12671_v13  ;;  %v12674_v12 = vcombine.high %v2868_v63, %v2872_v17  ;;  %v2477_v32 = vld [vmem:[#allocation3 + $0x1d0] sm:$0xff]  ;;  %16818 = vst [vmem:[#allocation430_spill] sm:$0xff] %v12677_v9  ;;  %v12681_v50 = vcombine.low %v2868_v63, %v2872_v17  ;;  %v12686_v33 = vcombine.high %v2605_v28, %v2609_v43 }
 0x559   :  { %5813 = vmatpush2.bf16.msra.mxu0 %v12653_v29  ;;  %v12683_v49 = vcombine.high %v2477_v32, %v2481_v59  ;;  %v2601_v29 = vld [vmem:[#allocation3 + $0x5b0] sm:$0xff]  ;;  %16822 = vst [vmem:[#allocation434_spill] sm:$0xff] %v12691_v11  ;;  %v12693_v48 = vcombine.low %v2477_v32, %v2481_v59  ;;  %v12697_v17 = vcombine.low %v2605_v28, %v2609_v43 }
 0x55a   :  { %5814 = vmatprep.subr.bf16.mxu0 %v12659_v34  ;;  %16817 = vst [vmem:[#allocation429_spill] sm:$0xff] %v12674_v12  ;;  %16819 = vst [vmem:[#allocation431_spill] sm:$0xff] %v12681_v50  ;;  %v2473_v34 = vld [vmem:[#allocation3 + $0x1b0] sm:$0xff] }
 0x55b   :  { %5854 = vmatpush2.bf16.msra.mxu1 %v12657_v30  ;;  %16820 = vst [vmem:[#allocation432_spill] sm:$0xff] %v12683_v49  ;;  %16821 = vst [vmem:[#allocation433_spill] sm:$0xff] %v12686_v33  ;;  %v2597_v30 = vld [vmem:[#allocation3 + $0x590] sm:$0xff] }
 0x55c   :  { %5855 = vmatprep.subr.bf16.mxu1 %v12662_v60  ;;  %v2469_v60 = vld [vmem:[#allocation3 + $0x190] sm:$0xff]  ;;  %16823 = vst [vmem:[#allocation435_spill] sm:$0xff] %v12693_v48  ;;  %16824 = vst [vmem:[#allocation436_spill] sm:$0xff] %v12697_v17 }
 0x55d   :  { %5815 = vmatpush2.bf16.msra.mxu0 %v12665_v61  ;;  %v12699_v63 = vcombine.high %v2469_v60, %v2473_v34  ;;  %v2589_v47 = vld [vmem:[#allocation3 + $0x550] sm:$0xff]  ;;  %v12708_v43 = vcombine.low %v2469_v60, %v2473_v34 }
 0x55e   :  { %5816 = vmatprep.subr.bf16.mxu0 %v12671_v13  ;;  %v2461_v13 = vld [vmem:[#allocation3 + $0x150] sm:$0xff] }
 0x55f   :  { %5856 = vmatpush2.bf16.msra.mxu1 %v12669_v16  ;;  %16825 = vst [vmem:[#allocation437_spill] sm:$0xff] %v12699_v63  ;;  %v2593_v59 = vld [vmem:[#allocation3 + $0x570] sm:$0xff]  ;;  %16827 = vst [vmem:[#allocation439_spill] sm:$0xff] %v12708_v43 }
 0x560   :  { %5857 = vmatprep.subr.bf16.mxu1 %v12674_v12  ;;  %v12702_v12 = vcombine.high %v2597_v30, %v2601_v29  ;;  %v2453_v34 = vld [vmem:[#allocation3 + $0x110] sm:$0xff] }
 0x561   :  { %5817 = vmatpush2.bf16.msra.mxu0 %v12677_v9  ;;  %v2465_v9 = vld [vmem:[#allocation3 + $0x170] sm:$0xff] }
 0x562   :  { %5868 = vmatprep.subr.bf16.mxu0 %v12683_v49  ;;  %16826 = vst [vmem:[#allocation438_spill] sm:$0xff] %v12702_v12  ;;  %v12716_v49 = vcombine.high %v2461_v13, %v2465_v9  ;;  %v2457_v60 = vld [vmem:[#allocation3 + $0x130] sm:$0xff] }
 0x563   :  { %5858 = vmatpush2.bf16.msra.mxu1 %v12681_v50 }
 0x564   :  { %5909 = vmatprep.subr.bf16.mxu1 %v12686_v33  ;;  %v5574_v16 = vpop.f32.mrf.mxu0  ;;  %5819 = vmatmul.mubr.bf16.vlgmr.msra.gmra.mxu0 %v12289_v7  ;;  %v12714_v33 = vcombine.low %v2597_v30, %v2601_v29  ;;  %16829 = vst [vmem:[#allocation441_spill] sm:$0xff] %v12716_v49  ;;  %v12728_v30 = vcombine.low %v2461_v13, %v2465_v9 }
 0x565   :  { %v5575_v32 = vadd.f32 %v5574_v16, %v12691_v11  ;;  %5869 = vmatpush1.bf16.msra.mxu0 %v12693_v48  ;;  %v12723_v11 = vcombine.high %v2589_v47, %v2593_v59  ;;  %5900 = vmatprep.mubr.bf16.mxu0 %v11870_v45  ;;  %v2581_v48 = vld [vmem:[#allocation3 + $0x510] sm:$0xff]  ;;  %v12740_v13 = vcombine.low %v2453_v34, %v2457_v60 }
 0x566   :  { %v5615_v50 = vpop.f32.mrf.mxu1  ;;  %5860 = vmatmul.mubr.bf16.vlgmr.msra.gmra.mxu1 %v12295_v31  ;;  %v12711_v28 = vpop.f32.mrf.mxu0  ;;  %5870 = vmatprep.subr.bf16.mxu0 %v12699_v63  ;;  %16828 = vst [vmem:[#allocation440_spill] sm:$0xff] %v12714_v33  ;;  %16831 = vst [vmem:[#allocation443_spill] sm:$0xff] %v12728_v30  ;;  %v12744_v9 = vcombine.low %v2581_v48, %v2585_v27 }
 0x567   :  { %5910 = vmatpush1.bf16.msra.mxu1 %v12697_v17  ;;  %v12718_v61 = vadd.f32 %v5615_v50, %v5575_v32  ;;  %16830 = vst [vmem:[#allocation442_spill] sm:$0xff] %v12723_v11  ;;  %5941 = vmatprep.mubr.bf16.mxu1 %v11872_v18  ;;  %v12732_v32 = vcombine.low %v2589_v47, %v2593_v59  ;;  %16835 = vst [vmem:[#allocation447_spill] sm:$0xff] %v12740_v13  ;;  %v2437_v59 = vld [vmem:[#allocation3 + $0x90] sm:$0xff] }
 0x568   :  { %v12720_v16 = vpop.f32.mrf.mxu1  ;;  %5911 = vmatprep.subr.bf16.mxu1 %v12702_v12  ;;  %v5578_v17 = vpop.f32.mrf.mxu0  ;;  %v12734_v12 = vcombine.high %v2453_v34, %v2457_v60  ;;  %16836 = vst [vmem:[#allocation448_spill] sm:$0xff] %v12744_v9 }
 0x569   :  { %5871 = vmatpush1.bf16.msra.mxu0 %v12708_v43  ;;  %16832 = vst [vmem:[#allocation444_spill] sm:$0xff] %v12732_v32  ;;  %v12737_v17 = vcombine.high %v2581_v48, %v2585_v27  ;;  %v2577_v43 = vld [vmem:[#allocation3 + $0x4f0] sm:$0xff] }
 0x56a   :  { %v5619_v29 = vpop.f32.mrf.mxu1  ;;  %v5579_v50 = vpop.f32.mrf.mxu0  ;;  %5872 = vmatprep.subr.bf16.mxu0 %v12716_v49  ;;  %16833 = vst [vmem:[#allocation445_spill] sm:$0xff] %v12734_v12  ;;  %v2569_v49 = vld [vmem:[#allocation3 + $0x4b0] sm:$0xff]  ;;  %v12756_v27 = vcombine.low %v2573_v3, %v2577_v43 }
 0x56b   :  { %5912 = vmatpush1.bf16.msra.mxu1 %v12714_v33  ;;  %16834 = vst [vmem:[#allocation446_spill] sm:$0xff] %v12737_v17  ;;  %v2449_v29 = vld [vmem:[#allocation3 + $0xf0] sm:$0xff] }
 0x56c   :  { %v5620_v63 = vpop.f32.mrf.mxu1  ;;  %5913 = vmatprep.subr.bf16.mxu1 %v12723_v11  ;;  %v12746_v47 = vcombine.high %v2445_v8, %v2449_v29  ;;  %v2441_v50 = vld [vmem:[#allocation3 + $0xb0] sm:$0xff]  ;;  %v12752_v34 = vcombine.low %v2445_v8, %v2449_v29  ;;  %16840 = vst [vmem:[#allocation452_spill] sm:$0xff] %v12756_v27 }
 0x56d   :  { %5873 = vmatpush1.bf16.msra.mxu0 %v12728_v30  ;;  %v12749_v63 = vcombine.high %v2573_v3, %v2577_v43  ;;  %v2565_v11 = vld [vmem:[#allocation3 + $0x490] sm:$0xff]  ;;  %v12758_v48 = vcombine.high %v2437_v59, %v2441_v50  ;;  %v12764_v8 = vcombine.low %v2437_v59, %v2441_v50 }
 0x56e   :  { %5874 = vmatprep.subr.bf16.mxu0 %v12734_v12  ;;  %16837 = vst [vmem:[#allocation449_spill] sm:$0xff] %v12746_v47  ;;  %16839 = vst [vmem:[#allocation451_spill] sm:$0xff] %v12752_v34  ;;  %v12761_v60 = vcombine.high %v2565_v11, %v2569_v49  ;;  %v2433_v12 = vld [vmem:[#allocation3 + $0x70] sm:$0xff]  ;;  %v12768_v3 = vcombine.low %v2565_v11, %v2569_v49 }
 0x56f   :  { %5914 = vmatpush1.bf16.msra.mxu1 %v12732_v32  ;;  %16838 = vst [vmem:[#allocation450_spill] sm:$0xff] %v12749_v63  ;;  %16841 = vst [vmem:[#allocation453_spill] sm:$0xff] %v12758_v48  ;;  %v2557_v32 = vld [vmem:[#allocation3 + $0x450] sm:$0xff] }
 0x570   :  { %5915 = vmatprep.subr.bf16.mxu1 %v12737_v17  ;;  %16842 = vst [vmem:[#allocation454_spill] sm:$0xff] %v12761_v60  ;;  %v2429_v17 = vld [vmem:[#allocation3 + $0x50] sm:$0xff]  ;;  %16843 = vst [vmem:[#allocation455_spill] sm:$0xff] %v12764_v8 }
 0x571   :  { %5875 = vmatpush1.bf16.msra.mxu0 %v12740_v13  ;;  %v2561_v30 = vld [vmem:[#allocation3 + $0x470] sm:$0xff]  ;;  %16844 = vst [vmem:[#allocation456_spill] sm:$0xff] %v12768_v3  ;;  %v12770_v43 = vcombine.high %v2429_v17, %v2433_v12  ;;  %v12776_v59 = vcombine.low %v2429_v17, %v2433_v12 }
 0x572   :  { %5876 = vmatprep.subr.bf16.mxu0 %v12746_v47  ;;  %v12773_v29 = vcombine.high %v2557_v32, %v2561_v30  ;;  %v2425_v47 = vld [vmem:[#allocation3 + $0x30] sm:$0xff]  ;;  %v12780_v49 = vcombine.low %v2557_v32, %v2561_v30 }
 0x573   :  { %5916 = vmatpush1.bf16.msra.mxu1 %v12744_v9  ;;  %16845 = vst [vmem:[#allocation457_spill] sm:$0xff] %v12770_v43  ;;  %v2549_v9 = vld [vmem:[#allocation3 + $0x410] sm:$0xff]  ;;  %16847 = vst [vmem:[#allocation459_spill] sm:$0xff] %v12776_v59 }
 0x574   :  { %5917 = vmatprep.subr.bf16.mxu1 %v12749_v63  ;;  %16846 = vst [vmem:[#allocation458_spill] sm:$0xff] %v12773_v29  ;;  %v2421_v63 = vld [vmem:[#allocation3 + $0x10] sm:$0xff]  ;;  %16848 = vst [vmem:[#allocation460_spill] sm:$0xff] %v12780_v49 }
 0x575   :  { %5877 = vmatpush1.bf16.msra.mxu0 %v12752_v34  ;;  %v2553_v13 = vld [vmem:[#allocation3 + $0x430] sm:$0xff]  ;;  %v12782_v11 = vcombine.high %v2421_v63, %v2425_v47  ;;  %v12788_v12 = vcombine.low %v2421_v63, %v2425_v47 }
 0x576   :  { %5878 = vmatprep.subr.bf16.mxu0 %v12758_v48  ;;  %v12785_v50 = vcombine.high %v2549_v9, %v2553_v13  ;;  %v2545_v48 = vld [vmem:[#allocation3 + $0x3f0] sm:$0xff]  ;;  %v12792_v30 = vcombine.low %v2549_v9, %v2553_v13 }
 0x577   :  { %5918 = vmatpush1.bf16.msra.mxu1 %v12756_v27  ;;  %16849 = vst [vmem:[#allocation461_spill] sm:$0xff] %v12782_v11  ;;  %v2669_v27 = vld [vmem:[#allocation3 + $0x7d0] sm:$0xff]  ;;  %16851 = vst [vmem:[#allocation463_spill] sm:$0xff] %v12788_v12 }
 0x578   :  { %5919 = vmatprep.subr.bf16.mxu1 %v12761_v60  ;;  %16850 = vst [vmem:[#allocation462_spill] sm:$0xff] %v12785_v50  ;;  %v2541_v60 = vld [vmem:[#allocation3 + $0x3d0] sm:$0xff]  ;;  %16852 = vst [vmem:[#allocation464_spill] sm:$0xff] %v12792_v30 }
 0x579   :  { %5879 = vmatpush1.bf16.msra.mxu0 %v12764_v8  ;;  %v2673_v34 = vld [vmem:[#allocation3 + $0x7f0] sm:$0xff]  ;;  %v12794_v32 = vcombine.high %v2541_v60, %v2545_v48  ;;  %v12800_v47 = vcombine.low %v2541_v60, %v2545_v48 }
 0x57a   :  { %5880 = vmatprep.subr.bf16.mxu0 %v12770_v43  ;;  %v12797_v17 = vcombine.high %v2669_v27, %v2673_v34  ;;  %v2537_v43 = vld [vmem:[#allocation3 + $0x3b0] sm:$0xff]  ;;  %v12804_v13 = vcombine.low %v2669_v27, %v2673_v34 }
 0x57b   :  { %5920 = vmatpush1.bf16.msra.mxu1 %v12768_v3  ;;  %16853 = vst [vmem:[#allocation465_spill] sm:$0xff] %v12794_v32  ;;  %v2661_v3 = vld [vmem:[#allocation3 + $0x790] sm:$0xff]  ;;  %16855 = vst [vmem:[#allocation467_spill] sm:$0xff] %v12800_v47 }
 0x57c   :  { %5921 = vmatprep.subr.bf16.mxu1 %v12773_v29  ;;  %16854 = vst [vmem:[#allocation466_spill] sm:$0xff] %v12797_v17  ;;  %v2533_v29 = vld [vmem:[#allocation3 + $0x390] sm:$0xff]  ;;  %16856 = vst [vmem:[#allocation468_spill] sm:$0xff] %v12804_v13 }
 0x57d   :  { %5881 = vmatpush1.bf16.msra.mxu0 %v12776_v59  ;;  %v2665_v8 = vld [vmem:[#allocation3 + $0x7b0] sm:$0xff]  ;;  %v12806_v9 = vcombine.high %v2533_v29, %v2537_v43  ;;  %v12812_v48 = vcombine.low %v2533_v29, %v2537_v43 }
 0x57e   :  { %5882 = vmatprep.subr.bf16.mxu0 %v12782_v11  ;;  %v12809_v63 = vcombine.high %v2661_v3, %v2665_v8  ;;  %v2529_v11 = vld [vmem:[#allocation3 + $0x370] sm:$0xff]  ;;  %v12816_v34 = vcombine.low %v2661_v3, %v2665_v8 }
 0x57f   :  { %5922 = vmatpush1.bf16.msra.mxu1 %v12780_v49  ;;  %16857 = vst [vmem:[#allocation469_spill] sm:$0xff] %v12806_v9  ;;  %v2653_v49 = vld [vmem:[#allocation3 + $0x750] sm:$0xff]  ;;  %16859 = vst [vmem:[#allocation471_spill] sm:$0xff] %v12812_v48 }
 0x580   :  { %5923 = vmatprep.subr.bf16.mxu1 %v12785_v50  ;;  %16858 = vst [vmem:[#allocation470_spill] sm:$0xff] %v12809_v63  ;;  %v2525_v50 = vld [vmem:[#allocation3 + $0x350] sm:$0xff]  ;;  %16860 = vst [vmem:[#allocation472_spill] sm:$0xff] %v12816_v34 }
 0x581   :  { %5883 = vmatpush1.bf16.msra.mxu0 %v12788_v12  ;;  %v2657_v59 = vld [vmem:[#allocation3 + $0x770] sm:$0xff]  ;;  %v12818_v27 = vcombine.high %v2525_v50, %v2529_v11  ;;  %v12824_v43 = vcombine.low %v2525_v50, %v2529_v11 }
 0x582   :  { %5884 = vmatprep.subr.bf16.mxu0 %v12794_v32  ;;  %v12821_v60 = vcombine.high %v2653_v49, %v2657_v59  ;;  %v2521_v32 = vld [vmem:[#allocation3 + $0x330] sm:$0xff]  ;;  %v12828_v8 = vcombine.low %v2653_v49, %v2657_v59 }
 0x583   :  { %5924 = vmatpush1.bf16.msra.mxu1 %v12792_v30  ;;  %16861 = vst [vmem:[#allocation473_spill] sm:$0xff] %v12818_v27  ;;  %v2645_v30 = vld [vmem:[#allocation3 + $0x710] sm:$0xff]  ;;  %16863 = vst [vmem:[#allocation475_spill] sm:$0xff] %v12824_v43 }
 0x584   :  { %5925 = vmatprep.subr.bf16.mxu1 %v12797_v17  ;;  %16862 = vst [vmem:[#allocation474_spill] sm:$0xff] %v12821_v60  ;;  %v2517_v17 = vld [vmem:[#allocation3 + $0x310] sm:$0xff]  ;;  %16864 = vst [vmem:[#allocation476_spill] sm:$0xff] %v12828_v8 }
 0x585   :  { %5885 = vmatpush2.bf16.msra.mxu0 %v12800_v47  ;;  %v2649_v12 = vld [vmem:[#allocation3 + $0x730] sm:$0xff]  ;;  %v12830_v3 = vcombine.high %v2517_v17, %v2521_v32  ;;  %v12836_v11 = vcombine.low %v2517_v17, %v2521_v32 }
 0x586   :  { %5886 = vmatprep.subr.bf16.mxu0 %v12806_v9  ;;  %v12833_v29 = vcombine.high %v2645_v30, %v2649_v12  ;;  %v2513_v9 = vld [vmem:[#allocation3 + $0x2f0] sm:$0xff]  ;;  %v12840_v59 = vcombine.low %v2645_v30, %v2649_v12 }
 0x587   :  { %5926 = vmatpush2.bf16.msra.mxu1 %v12804_v13  ;;  %16865 = vst [vmem:[#allocation477_spill] sm:$0xff] %v12830_v3  ;;  %v2637_v13 = vld [vmem:[#allocation3 + $0x6d0] sm:$0xff]  ;;  %16867 = vst [vmem:[#allocation479_spill] sm:$0xff] %v12836_v11 }
 0x588   :  { %5927 = vmatprep.subr.bf16.mxu1 %v12809_v63  ;;  %16866 = vst [vmem:[#allocation478_spill] sm:$0xff] %v12833_v29  ;;  %v2509_v63 = vld [vmem:[#allocation3 + $0x2d0] sm:$0xff]  ;;  %16868 = vst [vmem:[#allocation480_spill] sm:$0xff] %v12840_v59 }
 0x589   :  { %5887 = vmatpush2.bf16.msra.mxu0 %v12812_v48  ;;  %v2641_v47 = vld [vmem:[#allocation3 + $0x6f0] sm:$0xff]  ;;  %v12842_v49 = vcombine.high %v2509_v63, %v2513_v9  ;;  %v12848_v32 = vcombine.low %v2509_v63, %v2513_v9 }
 0x58a   :  { %5888 = vmatprep.subr.bf16.mxu0 %v12818_v27  ;;  %v12845_v50 = vcombine.high %v2637_v13, %v2641_v47  ;;  %v2505_v27 = vld [vmem:[#allocation3 + $0x2b0] sm:$0xff]  ;;  %v12852_v12 = vcombine.low %v2637_v13, %v2641_v47 }
 0x58b   :  { %5928 = vmatpush2.bf16.msra.mxu1 %v12816_v34  ;;  %16869 = vst [vmem:[#allocation481_spill] sm:$0xff] %v12842_v49  ;;  %v2629_v34 = vld [vmem:[#allocation3 + $0x690] sm:$0xff]  ;;  %16871 = vst [vmem:[#allocation483_spill] sm:$0xff] %v12848_v32 }
 0x58c   :  { %5929 = vmatprep.subr.bf16.mxu1 %v12821_v60  ;;  %16870 = vst [vmem:[#allocation482_spill] sm:$0xff] %v12845_v50  ;;  %v2501_v60 = vld [vmem:[#allocation3 + $0x290] sm:$0xff]  ;;  %16872 = vst [vmem:[#allocation484_spill] sm:$0xff] %v12852_v12 }
 0x58d   :  { %5889 = vmatpush2.bf16.msra.mxu0 %v12824_v43  ;;  %v2633_v48 = vld [vmem:[#allocation3 + $0x6b0] sm:$0xff]  ;;  %v12854_v30 = vcombine.high %v2501_v60, %v2505_v27  ;;  %v12860_v9 = vcombine.low %v2501_v60, %v2505_v27 }
 0x58e   :  { %5890 = vmatprep.subr.bf16.mxu0 %v12830_v3  ;;  %v12857_v17 = vcombine.high %v2629_v34, %v2633_v48  ;;  %v2497_v3 = vld [vmem:[#allocation3 + $0x270] sm:$0xff]  ;;  %v12864_v47 = vcombine.low %v2629_v34, %v2633_v48 }
 0x58f   :  { %5930 = vmatpush2.bf16.msra.mxu1 %v12828_v8  ;;  %16873 = vst [vmem:[#allocation485_spill] sm:$0xff] %v12854_v30  ;;  %v2621_v8 = vld [vmem:[#allocation3 + $0x650] sm:$0xff]  ;;  %16875 = vst [vmem:[#allocation487_spill] sm:$0xff] %v12860_v9 }
 0x590   :  { %5931 = vmatprep.subr.bf16.mxu1 %v12833_v29  ;;  %16874 = vst [vmem:[#allocation486_spill] sm:$0xff] %v12857_v17  ;;  %v2493_v29 = vld [vmem:[#allocation3 + $0x250] sm:$0xff]  ;;  %16876 = vst [vmem:[#allocation488_spill] sm:$0xff] %v12864_v47 }
 0x591   :  { %5891 = vmatpush2.bf16.msra.mxu0 %v12836_v11  ;;  %v2625_v43 = vld [vmem:[#allocation3 + $0x670] sm:$0xff]  ;;  %v12866_v13 = vcombine.high %v2493_v29, %v2497_v3  ;;  %v12872_v27 = vcombine.low %v2493_v29, %v2497_v3  ;;  %v12885_v3 = vrot.slane %v11540_v44, %v11559_v62 }
 0x592   :  { %5892 = vmatprep.subr.bf16.mxu0 %v12842_v49  ;;  %v12869_v63 = vcombine.high %v2621_v8, %v2625_v43  ;;  %v2489_v49 = vld [vmem:[#allocation3 + $0x230] sm:$0xff]  ;;  %v12876_v48 = vcombine.low %v2621_v8, %v2625_v43 }
 0x593   :  { %5932 = vmatpush2.bf16.msra.mxu1 %v12840_v59  ;;  %16877 = vst [vmem:[#allocation489_spill] sm:$0xff] %v12866_v13  ;;  %v2613_v59 = vld [vmem:[#allocation3 + $0x610] sm:$0xff]  ;;  %16879 = vst [vmem:[#allocation491_spill] sm:$0xff] %v12872_v27 }
 0x594   :  { %5933 = vmatprep.subr.bf16.mxu1 %v12845_v50  ;;  %16878 = vst [vmem:[#allocation490_spill] sm:$0xff] %v12869_v63  ;;  %v2485_v50 = vld [vmem:[#allocation3 + $0x210] sm:$0xff]  ;;  %16880 = vst [vmem:[#allocation492_spill] sm:$0xff] %v12876_v48 }
 0x595   :  { %5893 = vmatpush2.bf16.msra.mxu0 %v12848_v32  ;;  %v2617_v11 = vld [vmem:[#allocation3 + $0x630] sm:$0xff]  ;;  %v12878_v34 = vcombine.high %v2485_v50, %v2489_v49  ;;  %v12888_v29 = vcombine.low %v2485_v50, %v2489_v49  ;;  %v5577_v49 = vadd.f32 %v12711_v28, %v12885_v3 }
 0x596   :  { %5894 = vmatprep.subr.bf16.mxu0 %v12854_v30  ;;  %v12881_v60 = vcombine.high %v2613_v59, %v2617_v11  ;;  %v2737_v30 = vld [vmem:[#allocation3 + $0x9f0] sm:$0xff]  ;;  %v12892_v43 = vcombine.low %v2613_v59, %v2617_v11 }
 0x597   :  { %5934 = vmatpush2.bf16.msra.mxu1 %v12852_v12  ;;  %16881 = vst [vmem:[#allocation493_spill] sm:$0xff] %v12878_v34  ;;  %v2861_v12 = vld [vmem:[#allocation3 + $0xdd0] sm:$0xff]  ;;  %16883 = vst [vmem:[#allocation495_spill] sm:$0xff] %v12888_v29 }
 0x598   :  { %5935 = vmatprep.subr.bf16.mxu1 %v12857_v17  ;;  %16882 = vst [vmem:[#allocation494_spill] sm:$0xff] %v12881_v60  ;;  %v2733_v17 = vld [vmem:[#allocation3 + $0x9d0] sm:$0xff]  ;;  %16884 = vst [vmem:[#allocation496_spill] sm:$0xff] %v12892_v43 }
 0x599   :  { %5895 = vmatpush2.bf16.msra.mxu0 %v12860_v9  ;;  %v2865_v32 = vld [vmem:[#allocation3 + $0xdf0] sm:$0xff]  ;;  %v12894_v8 = vcombine.high %v2733_v17, %v2737_v30  ;;  %v12902_v50 = vcombine.low %v2733_v17, %v2737_v30  ;;  %v5618_v17 = vadd.f32 %v12720_v16, %v5577_v49 }
 0x59a   :  { %5896 = vmatprep.subr.bf16.mxu0 %v12866_v13  ;;  %v2725_v13 = vld [vmem:[#allocation3 + $0x990] sm:$0xff]  ;;  %v12906_v11 = vcombine.low %v2861_v12, %v2865_v32 }
 0x59b   :  { %5936 = vmatpush2.bf16.msra.mxu1 %v12864_v47  ;;  %16885 = vst [vmem:[#allocation497_spill] sm:$0xff] %v12894_v8  ;;  %v2729_v47 = vld [vmem:[#allocation3 + $0x9b0] sm:$0xff]  ;;  %16887 = vst [vmem:[#allocation499_spill] sm:$0xff] %v12902_v50 }
 0x59c   :  { %5937 = vmatprep.subr.bf16.mxu1 %v12869_v63  ;;  %v12897_v63 = vcombine.high %v2861_v12, %v2865_v32  ;;  %v2853_v62 = vld [vmem:[#allocation3 + $0xd90] sm:$0xff]  ;;  %16888 = vst [vmem:[#allocation500_spill] sm:$0xff] %v12906_v11  ;;  %v12908_v59 = vcombine.high %v2725_v13, %v2729_v47  ;;  %v12918_v32 = vcombine.low %v2725_v13, %v2729_v47 }
 0x59d   :  { %5897 = vmatpush2.bf16.msra.mxu0 %v12872_v27  ;;  %v2857_v9 = vld [vmem:[#allocation3 + $0xdb0] sm:$0xff] }
 0x59e   :  { %5898 = vmatprep.subr.bf16.mxu0 %v12878_v34  ;;  %16886 = vst [vmem:[#allocation498_spill] sm:$0xff] %v12897_v63  ;;  %v2717_v34 = vld [vmem:[#allocation3 + $0x950] sm:$0xff]  ;;  %16890 = vst [vmem:[#allocation502_spill] sm:$0xff] %v12918_v32 }
 0x59f   :  { %5938 = vmatpush2.bf16.msra.mxu1 %v12876_v48  ;;  %v2721_v48 = vld [vmem:[#allocation3 + $0x970] sm:$0xff] }
 0x5a0   :  { %5939 = vmatprep.subr.bf16.mxu1 %v12881_v60  ;;  %v12911_v60 = vcombine.high %v2853_v62, %v2857_v9  ;;  %v2845_v28 = vld [vmem:[#allocation3 + $0xd50] sm:$0xff] }
 0x5a1   :  { %5899 = vmatpush2.bf16.msra.mxu0 %v12888_v29  ;;  %v2849_v30 = vld [vmem:[#allocation3 + $0xd70] sm:$0xff]  ;;  %v12924_v29 = vcombine.high %v2717_v34, %v2721_v48 }
 0x5a2   :  { %5950 = vmatprep.subr.bf16.mxu0 %v12894_v8  ;;  %16889 = vst [vmem:[#allocation501_spill] sm:$0xff] %v12911_v60  ;;  %v2709_v49 = vld [vmem:[#allocation3 + $0x910] sm:$0xff] }
 0x5a3   :  { %5940 = vmatpush2.bf16.msra.mxu1 %v12892_v43  ;;  %16892 = vst [vmem:[#allocation504_spill] sm:$0xff] %v12924_v29  ;;  %v2713_v47 = vld [vmem:[#allocation3 + $0x930] sm:$0xff] }
 0x5a4   :  { %5991 = vmatprep.subr.bf16.mxu1 %v12897_v63  ;;  %v5656_v27 = vpop.f32.mrf.mxu0  ;;  %5901 = vmatmul.mubr.bf16.vlgmr.msra.gmra.mxu0 %v12073_v5  ;;  %v12922_v63 = vcombine.low %v2853_v62, %v2857_v9 }
 0x5a5   :  { %v5657_v43 = vadd.f32 %v5656_v27, %v12718_v61  ;;  %5951 = vmatpush1.bf16.msra.mxu0 %v12902_v50  ;;  %v12929_v27 = vcombine.high %v2845_v28, %v2849_v30  ;;  %5982 = vmatprep.mubr.bf16.mxu0 %v12095_v51  ;;  %v2841_v50 = vld [vmem:[#allocation3 + $0xd30] sm:$0xff] }
 0x5a6   :  { %v5697_v8 = vpop.f32.mrf.mxu1  ;;  %5942 = vmatmul.mubr.bf16.vlgmr.msra.gmra.mxu1 %v12079_v41  ;;  %v5658_v12 = vpop.f32.mrf.mxu0  ;;  %5952 = vmatprep.subr.bf16.mxu0 %v12908_v59  ;;  %16891 = vst [vmem:[#allocation503_spill] sm:$0xff] %v12922_v63 }
 0x5a7   :  { %5992 = vmatpush1.bf16.msra.mxu1 %v12906_v11  ;;  %v12926_v33 = vadd.f32 %v5697_v8, %v5657_v43  ;;  %v5659_v16 = vadd.f32 %v5658_v12, %v5618_v17  ;;  %16893 = vst [vmem:[#allocation505_spill] sm:$0xff] %v12929_v27  ;;  %v2837_v11 = vld [vmem:[#allocation3 + $0xd10] sm:$0xff]  ;;  %6023 = vmatprep.mubr.bf16.mxu1 %v12101_v0 }
 0x5a8   :  { %v5699_v61 = vpop.f32.mrf.mxu1  ;;  %5993 = vmatprep.subr.bf16.mxu1 %v12911_v60  ;;  %v5660_v13 = vpop.f32.mrf.mxu0  ;;  %v12936_v43 = vcombine.low %v2717_v34, %v2721_v48  ;;  %v12940_v17 = vcombine.low %v2845_v28, %v2849_v30  ;;  %v12942_v12 = vcombine.high %v2709_v49, %v2713_v47  ;;  %v12945_v60 = vcombine.high %v2837_v11, %v2841_v50 }
 0x5a9   :  { %v12933_v9 = vadd.f32 %v5699_v61, %v5659_v16  ;;  %5953 = vmatpush1.bf16.msra.mxu0 %v12918_v32  ;;  %v2701_v16 = vld [vmem:[#allocation3 + $0x8d0] sm:$0xff]  ;;  %v12948_v48 = vcombine.low %v2709_v49, %v2713_v47  ;;  %v12952_v34 = vcombine.low %v2837_v11, %v2841_v50 }
 0x5aa   :  { %v5701_v62 = vpop.f32.mrf.mxu1  ;;  %16894 = vst [vmem:[#allocation506_spill] sm:$0xff] %v12936_v43  ;;  %v5661_v8 = vpop.f32.mrf.mxu0  ;;  %5954 = vmatprep.subr.bf16.mxu0 %v12924_v29  ;;  %16895 = vst [vmem:[#allocation507_spill] sm:$0xff] %v12940_v17  ;;  %v2705_v61 = vld [vmem:[#allocation3 + $0x8f0] sm:$0xff] }
 0x5ab   :  { %5994 = vmatpush1.bf16.msra.mxu1 %v12922_v63  ;;  %16896 = vst [vmem:[#allocation508_spill] sm:$0xff] %v12942_v12  ;;  %16897 = vst [vmem:[#allocation509_spill] sm:$0xff] %v12945_v60  ;;  %v2829_v62 = vld [vmem:[#allocation3 + $0xcd0] sm:$0xff]  ;;  %v12954_v28 = vcombine.high %v2701_v16, %v2705_v61  ;;  %v12960_v49 = vcombine.low %v2701_v16, %v2705_v61 }
 0x5ac   :  { %v5702_v13 = vpop.f32.mrf.mxu1  ;;  %5995 = vmatprep.subr.bf16.mxu1 %v12929_v27  ;;  %v2833_v32 = vld [vmem:[#allocation3 + $0xcf0] sm:$0xff]  ;;  %16898 = vst [vmem:[#allocation510_spill] sm:$0xff] %v12948_v48  ;;  %16899 = vst [vmem:[#allocation511_spill] sm:$0xff] %v12952_v34 }
 0x5ad   :  { %5955 = vmatpush1.bf16.msra.mxu0 %v12936_v43  ;;  %16900 = vst [vmem:[#allocation512_spill] sm:$0xff] %v12954_v28  ;;  %v12957_v30 = vcombine.high %v2829_v62, %v2833_v32  ;;  %v2693_v8 = vld [vmem:[#allocation3 + $0x890] sm:$0xff]  ;;  %16902 = vst [vmem:[#allocation514_spill] sm:$0xff] %v12960_v49  ;;  %v12964_v50 = vcombine.low %v2829_v62, %v2833_v32 }
 0x5ae   :  { %5956 = vmatprep.subr.bf16.mxu0 %v12942_v12  ;;  %v2697_v13 = vld [vmem:[#allocation3 + $0x8b0] sm:$0xff] }
 0x5af   :  { %5996 = vmatpush1.bf16.msra.mxu1 %v12940_v17  ;;  %16901 = vst [vmem:[#allocation513_spill] sm:$0xff] %v12957_v30  ;;  %v2821_v27 = vld [vmem:[#allocation3 + $0xc90] sm:$0xff]  ;;  %16903 = vst [vmem:[#allocation515_spill] sm:$0xff] %v12964_v50  ;;  %v12966_v11 = vcombine.high %v2693_v8, %v2697_v13  ;;  %v12972_v16 = vcombine.low %v2693_v8, %v2697_v13 }
 0x5b0   :  { %5997 = vmatprep.subr.bf16.mxu1 %v12945_v60  ;;  %v2825_v29 = vld [vmem:[#allocation3 + $0xcb0] sm:$0xff] }
 0x5b1   :  { %5957 = vmatpush1.bf16.msra.mxu0 %v12948_v48  ;;  %16904 = vst [vmem:[#allocation516_spill] sm:$0xff] %v12966_v11  ;;  %v12969_v47 = vcombine.high %v2821_v27, %v2825_v29  ;;  %v2685_v60 = vld [vmem:[#allocation3 + $0x850] sm:$0xff]  ;;  %16906 = vst [vmem:[#allocation518_spill] sm:$0xff] %v12972_v16  ;;  %v12976_v32 = vcombine.low %v2821_v27, %v2825_v29 }
 0x5b2   :  { %5958 = vmatprep.subr.bf16.mxu0 %v12954_v28  ;;  %v2689_v12 = vld [vmem:[#allocation3 + $0x870] sm:$0xff] }
 0x5b3   :  { %5998 = vmatpush1.bf16.msra.mxu1 %v12952_v34  ;;  %16905 = vst [vmem:[#allocation517_spill] sm:$0xff] %v12969_v47  ;;  %v2813_v17 = vld [vmem:[#allocation3 + $0xc50] sm:$0xff]  ;;  %16907 = vst [vmem:[#allocation519_spill] sm:$0xff] %v12976_v32  ;;  %v12978_v61 = vcombine.high %v2685_v60, %v2689_v12  ;;  %v12984_v8 = vcombine.low %v2685_v60, %v2689_v12 }
 0x5b4   :  { %5999 = vmatprep.subr.bf16.mxu1 %v12957_v30  ;;  %v2817_v43 = vld [vmem:[#allocation3 + $0xc70] sm:$0xff] }
 0x5b5   :  { %5959 = vmatpush1.bf16.msra.mxu0 %v12960_v49  ;;  %16908 = vst [vmem:[#allocation520_spill] sm:$0xff] %v12978_v61  ;;  %v12981_v62 = vcombine.high %v2813_v17, %v2817_v43  ;;  %v2677_v30 = vld [vmem:[#allocation3 + $0x810] sm:$0xff]  ;;  %16910 = vst [vmem:[#allocation522_spill] sm:$0xff] %v12984_v8  ;;  %v12988_v29 = vcombine.low %v2813_v17, %v2817_v43 }
 0x5b6   :  { %5960 = vmatprep.subr.bf16.mxu0 %v12966_v11  ;;  %v2681_v28 = vld [vmem:[#allocation3 + $0x830] sm:$0xff] }
 0x5b7   :  { %6000 = vmatpush1.bf16.msra.mxu1 %v12964_v50  ;;  %16909 = vst [vmem:[#allocation521_spill] sm:$0xff] %v12981_v62  ;;  %v2805_v34 = vld [vmem:[#allocation3 + $0xc10] sm:$0xff]  ;;  %16911 = vst [vmem:[#allocation523_spill] sm:$0xff] %v12988_v29  ;;  %v12990_v27 = vcombine.high %v2677_v30, %v2681_v28  ;;  %v12996_v60 = vcombine.low %v2677_v30, %v2681_v28 }
 0x5b8   :  { %6001 = vmatprep.subr.bf16.mxu1 %v12969_v47  ;;  %v2809_v48 = vld [vmem:[#allocation3 + $0xc30] sm:$0xff] }
 0x5b9   :  { %5961 = vmatpush1.bf16.msra.mxu0 %v12972_v16  ;;  %16912 = vst [vmem:[#allocation524_spill] sm:$0xff] %v12990_v27  ;;  %v12993_v13 = vcombine.high %v2805_v34, %v2809_v48  ;;  %v2797_v47 = vld [vmem:[#allocation3 + $0xbd0] sm:$0xff]  ;;  %16914 = vst [vmem:[#allocation526_spill] sm:$0xff] %v12996_v60  ;;  %v13000_v43 = vcombine.low %v2805_v34, %v2809_v48 }
 0x5ba   :  { %5962 = vmatprep.subr.bf16.mxu0 %v12978_v61  ;;  %v2801_v11 = vld [vmem:[#allocation3 + $0xbf0] sm:$0xff] }
 0x5bb   :  { %6002 = vmatpush1.bf16.msra.mxu1 %v12976_v32  ;;  %16913 = vst [vmem:[#allocation525_spill] sm:$0xff] %v12993_v13  ;;  %v2925_v50 = vld [vmem:[#allocation3 + $0xfd0] sm:$0xff]  ;;  %16915 = vst [vmem:[#allocation527_spill] sm:$0xff] %v13000_v43  ;;  %v13002_v17 = vcombine.high %v2797_v47, %v2801_v11  ;;  %v13008_v28 = vcombine.low %v2797_v47, %v2801_v11 }
 0x5bc   :  { %6003 = vmatprep.subr.bf16.mxu1 %v12981_v62  ;;  %v2929_v49 = vld [vmem:[#allocation3 + $0xff0] sm:$0xff] }
 0x5bd   :  { %5963 = vmatpush1.bf16.msra.mxu0 %v12984_v8  ;;  %16916 = vst [vmem:[#allocation528_spill] sm:$0xff] %v13002_v17  ;;  %v13005_v12 = vcombine.high %v2925_v50, %v2929_v49  ;;  %v2789_v62 = vld [vmem:[#allocation3 + $0xb90] sm:$0xff]  ;;  %16918 = vst [vmem:[#allocation530_spill] sm:$0xff] %v13008_v28  ;;  %v13012_v48 = vcombine.low %v2925_v50, %v2929_v49 }
 0x5be   :  { %5964 = vmatprep.subr.bf16.mxu0 %v12990_v27  ;;  %v2793_v61 = vld [vmem:[#allocation3 + $0xbb0] sm:$0xff] }
 0x5bf   :  { %6004 = vmatpush1.bf16.msra.mxu1 %v12988_v29  ;;  %16917 = vst [vmem:[#allocation529_spill] sm:$0xff] %v13005_v12  ;;  %v2917_v32 = vld [vmem:[#allocation3 + $0xf90] sm:$0xff]  ;;  %16919 = vst [vmem:[#allocation531_spill] sm:$0xff] %v13012_v48  ;;  %v13014_v34 = vcombine.high %v2789_v62, %v2793_v61  ;;  %v13020_v11 = vcombine.low %v2789_v62, %v2793_v61 }
 0x5c0   :  { %6005 = vmatprep.subr.bf16.mxu1 %v12993_v13  ;;  %v2921_v16 = vld [vmem:[#allocation3 + $0xfb0] sm:$0xff] }
 0x5c1   :  { %5965 = vmatpush1.bf16.msra.mxu0 %v12996_v60  ;;  %16920 = vst [vmem:[#allocation532_spill] sm:$0xff] %v13014_v34  ;;  %v13017_v30 = vcombine.high %v2917_v32, %v2921_v16  ;;  %v2781_v13 = vld [vmem:[#allocation3 + $0xb50] sm:$0xff]  ;;  %16922 = vst [vmem:[#allocation534_spill] sm:$0xff] %v13020_v11  ;;  %v13024_v49 = vcombine.low %v2917_v32, %v2921_v16 }
 0x5c2   :  { %5966 = vmatprep.subr.bf16.mxu0 %v13002_v17  ;;  %v2785_v27 = vld [vmem:[#allocation3 + $0xb70] sm:$0xff] }
 0x5c3   :  { %6006 = vmatpush1.bf16.msra.mxu1 %v13000_v43  ;;  %16921 = vst [vmem:[#allocation533_spill] sm:$0xff] %v13017_v30  ;;  %v2909_v29 = vld [vmem:[#allocation3 + $0xf50] sm:$0xff]  ;;  %16923 = vst [vmem:[#allocation535_spill] sm:$0xff] %v13024_v49  ;;  %v13026_v50 = vcombine.high %v2781_v13, %v2785_v27  ;;  %v13032_v61 = vcombine.low %v2781_v13, %v2785_v27 }
 0x5c4   :  { %6007 = vmatprep.subr.bf16.mxu1 %v13005_v12  ;;  %v2913_v8 = vld [vmem:[#allocation3 + $0xf70] sm:$0xff] }
 0x5c5   :  { %5967 = vmatpush2.bf16.msra.mxu0 %v13008_v28  ;;  %16924 = vst [vmem:[#allocation536_spill] sm:$0xff] %v13026_v50  ;;  %v13029_v47 = vcombine.high %v2909_v29, %v2913_v8  ;;  %v2773_v12 = vld [vmem:[#allocation3 + $0xb10] sm:$0xff]  ;;  %16926 = vst [vmem:[#allocation538_spill] sm:$0xff] %v13032_v61  ;;  %v13036_v16 = vcombine.low %v2909_v29, %v2913_v8 }
 0x5c6   :  { %5968 = vmatprep.subr.bf16.mxu0 %v13014_v34  ;;  %v2777_v17 = vld [vmem:[#allocation3 + $0xb30] sm:$0xff] }
 0x5c7   :  { %6008 = vmatpush2.bf16.msra.mxu1 %v13012_v48  ;;  %16925 = vst [vmem:[#allocation537_spill] sm:$0xff] %v13029_v47  ;;  %v2901_v43 = vld [vmem:[#allocation3 + $0xf10] sm:$0xff]  ;;  %16927 = vst [vmem:[#allocation539_spill] sm:$0xff] %v13036_v16  ;;  %v13038_v32 = vcombine.high %v2773_v12, %v2777_v17  ;;  %v13044_v27 = vcombine.low %v2773_v12, %v2777_v17 }
 0x5c8   :  { %6009 = vmatprep.subr.bf16.mxu1 %v13017_v30  ;;  %v2905_v60 = vld [vmem:[#allocation3 + $0xf30] sm:$0xff] }
 0x5c9   :  { %5969 = vmatpush2.bf16.msra.mxu0 %v13020_v11  ;;  %16928 = vst [vmem:[#allocation540_spill] sm:$0xff] %v13038_v32  ;;  %v13041_v62 = vcombine.high %v2901_v43, %v2905_v60  ;;  %v2765_v30 = vld [vmem:[#allocation3 + $0xad0] sm:$0xff]  ;;  %16930 = vst [vmem:[#allocation542_spill] sm:$0xff] %v13044_v27  ;;  %v13048_v8 = vcombine.low %v2901_v43, %v2905_v60 }
 0x5ca   :  { %5970 = vmatprep.subr.bf16.mxu0 %v13026_v50  ;;  %v2769_v34 = vld [vmem:[#allocation3 + $0xaf0] sm:$0xff] }
 0x5cb   :  { %6010 = vmatpush2.bf16.msra.mxu1 %v13024_v49  ;;  %16929 = vst [vmem:[#allocation541_spill] sm:$0xff] %v13041_v62  ;;  %v2893_v48 = vld [vmem:[#allocation3 + $0xed0] sm:$0xff]  ;;  %16931 = vst [vmem:[#allocation543_spill] sm:$0xff] %v13048_v8  ;;  %v13050_v29 = vcombine.high %v2765_v30, %v2769_v34  ;;  %v13056_v17 = vcombine.low %v2765_v30, %v2769_v34 }
 0x5cc   :  { %6011 = vmatprep.subr.bf16.mxu1 %v13029_v47  ;;  %v2897_v28 = vld [vmem:[#allocation3 + $0xef0] sm:$0xff] }
 0x5cd   :  { %5971 = vmatpush2.bf16.msra.mxu0 %v13032_v61  ;;  %16932 = vst [vmem:[#allocation544_spill] sm:$0xff] %v13050_v29  ;;  %v13053_v13 = vcombine.high %v2893_v48, %v2897_v28  ;;  %v2757_v47 = vld [vmem:[#allocation3 + $0xa90] sm:$0xff]  ;;  %16934 = vst [vmem:[#allocation546_spill] sm:$0xff] %v13056_v17  ;;  %v13060_v60 = vcombine.low %v2893_v48, %v2897_v28 }
 0x5ce   :  { %5972 = vmatprep.subr.bf16.mxu0 %v13038_v32  ;;  %v2761_v50 = vld [vmem:[#allocation3 + $0xab0] sm:$0xff] }
 0x5cf   :  { %6012 = vmatpush2.bf16.msra.mxu1 %v13036_v16  ;;  %16933 = vst [vmem:[#allocation545_spill] sm:$0xff] %v13053_v13  ;;  %v2885_v49 = vld [vmem:[#allocation3 + $0xe90] sm:$0xff]  ;;  %16935 = vst [vmem:[#allocation547_spill] sm:$0xff] %v13060_v60  ;;  %v13062_v43 = vcombine.high %v2757_v47, %v2761_v50  ;;  %v13068_v34 = vcombine.low %v2757_v47, %v2761_v50 }
 0x5d0   :  { %6013 = vmatprep.subr.bf16.mxu1 %v13041_v62  ;;  %v2889_v11 = vld [vmem:[#allocation3 + $0xeb0] sm:$0xff] }
 0x5d1   :  { %5973 = vmatpush2.bf16.msra.mxu0 %v13044_v27  ;;  %16936 = vst [vmem:[#allocation548_spill] sm:$0xff] %v13062_v43  ;;  %v13065_v12 = vcombine.high %v2885_v49, %v2889_v11  ;;  %v2749_v62 = vld [vmem:[#allocation3 + $0xa50] sm:$0xff]  ;;  %16938 = vst [vmem:[#allocation550_spill] sm:$0xff] %v13068_v34  ;;  %v13072_v28 = vcombine.low %v2885_v49, %v2889_v11 }
 0x5d2   :  { %5974 = vmatprep.subr.bf16.mxu0 %v13050_v29  ;;  %v2753_v32 = vld [vmem:[#allocation3 + $0xa70] sm:$0xff] }
 0x5d3   :  { %6014 = vmatpush2.bf16.msra.mxu1 %v13048_v8  ;;  %16937 = vst [vmem:[#allocation549_spill] sm:$0xff] %v13065_v12  ;;  %v2877_v16 = vld [vmem:[#allocation3 + $0xe50] sm:$0xff]  ;;  %16939 = vst [vmem:[#allocation551_spill] sm:$0xff] %v13072_v28  ;;  %v13074_v48 = vcombine.high %v2749_v62, %v2753_v32  ;;  %v13080_v50 = vcombine.low %v2749_v62, %v2753_v32 }
 0x5d4   :  { %6015 = vmatprep.subr.bf16.mxu1 %v13053_v13  ;;  %v2881_v61 = vld [vmem:[#allocation3 + $0xe70] sm:$0xff] }
 0x5d5   :  { %5975 = vmatpush2.bf16.msra.mxu0 %v13056_v17  ;;  %16940 = vst [vmem:[#allocation552_spill] sm:$0xff] %v13074_v48  ;;  %v13077_v30 = vcombine.high %v2877_v16, %v2881_v61  ;;  %v2741_v13 = vld [vmem:[#allocation3 + $0xa10] sm:$0xff]  ;;  %16942 = vst [vmem:[#allocation554_spill] sm:$0xff] %v13080_v50  ;;  %v13084_v11 = vcombine.low %v2877_v16, %v2881_v61  ;;  %v2610_v17 = vld [vmem:[#allocation3 + $0x5f8] sm:$0xff] }
 0x5d6   :  { %5976 = vmatprep.subr.bf16.mxu0 %v13062_v43  ;;  %v2745_v29 = vld [vmem:[#allocation3 + $0xa30] sm:$0xff]  ;;  %v2482_v43 = vld [vmem:[#allocation3 + $0x1f8] sm:$0xff] }
 0x5d7   :  { %6016 = vmatpush2.bf16.msra.mxu1 %v13060_v60  ;;  %16941 = vst [vmem:[#allocation553_spill] sm:$0xff] %v13077_v30  ;;  %v2869_v8 = vld [vmem:[#allocation3 + $0xe10] sm:$0xff]  ;;  %16943 = vst [vmem:[#allocation555_spill] sm:$0xff] %v13084_v11  ;;  %v13086_v49 = vcombine.high %v2741_v13, %v2745_v29  ;;  %v2606_v60 = vld [vmem:[#allocation3 + $0x5d8] sm:$0xff]  ;;  %v13092_v32 = vcombine.low %v2741_v13, %v2745_v29  ;;  %v13106_v29 = vrot.slane %v11540_v44, %v11556_v46 }
 0x5d8   :  { %6017 = vmatprep.subr.bf16.mxu1 %v13065_v12  ;;  %v2873_v27 = vld [vmem:[#allocation3 + $0xe30] sm:$0xff]  ;;  %v2478_v12 = vld [vmem:[#allocation3 + $0x1d8] sm:$0xff]  ;;  %v13101_v62 = vcombine.high %v2606_v60, %v2610_v17 }
 0x5d9   :  { %5977 = vmatpush2.bf16.msra.mxu0 %v13068_v34  ;;  %16944 = vst [vmem:[#allocation556_spill] sm:$0xff] %v13086_v49  ;;  %v13089_v47 = vcombine.high %v2869_v8, %v2873_v27  ;;  %16946 = vst [vmem:[#allocation558_spill] sm:$0xff] %v13092_v32  ;;  %v13096_v61 = vcombine.low %v2869_v8, %v2873_v27  ;;  %v13098_v16 = vcombine.high %v2478_v12, %v2482_v43  ;;  %v2602_v34 = vld [vmem:[#allocation3 + $0x5b8] sm:$0xff] }
 0x5da   :  { %5978 = vmatprep.subr.bf16.mxu0 %v13074_v48  ;;  %16949 = vst [vmem:[#allocation561_spill] sm:$0xff] %v13101_v62  ;;  %v2474_v48 = vld [vmem:[#allocation3 + $0x1b8] sm:$0xff]  ;;  %16950 = vst [vmem:[#allocation562_spill] sm:$0xff] %v13106_v29  ;;  %v13108_v13 = vcombine.low %v2478_v12, %v2482_v43  ;;  %v13112_v27 = vcombine.low %v2606_v60, %v2610_v17 }
 0x5db   :  { %6018 = vmatpush2.bf16.msra.mxu1 %v13072_v28  ;;  %16945 = vst [vmem:[#allocation557_spill] sm:$0xff] %v13089_v47  ;;  %16947 = vst [vmem:[#allocation559_spill] sm:$0xff] %v13096_v61  ;;  %v2598_v28 = vld [vmem:[#allocation3 + $0x598] sm:$0xff] }
 0x5dc   :  { %6019 = vmatprep.subr.bf16.mxu1 %v13077_v30  ;;  %16948 = vst [vmem:[#allocation560_spill] sm:$0xff] %v13098_v16  ;;  %v2470_v30 = vld [vmem:[#allocation3 + $0x198] sm:$0xff]  ;;  %16951 = vst [vmem:[#allocation563_spill] sm:$0xff] %v13108_v13 }
 0x5dd   :  { %5979 = vmatpush2.bf16.msra.mxu0 %v13080_v50  ;;  %16952 = vst [vmem:[#allocation564_spill] sm:$0xff] %v13112_v27  ;;  %v13114_v8 = vcombine.high %v2470_v30, %v2474_v48  ;;  %v2462_v46 = vld [vmem:[#allocation3 + $0x158] sm:$0xff] }
 0x5de   :  { %5980 = vmatprep.subr.bf16.mxu0 %v13086_v49  ;;  %v2466_v49 = vld [vmem:[#allocation3 + $0x178] sm:$0xff] }
 0x5df   :  { %6020 = vmatpush2.bf16.msra.mxu1 %v13084_v11  ;;  %16953 = vst [vmem:[#allocation565_spill] sm:$0xff] %v13114_v8  ;;  %v2590_v12 = vld [vmem:[#allocation3 + $0x558] sm:$0xff]  ;;  %v13133_v11 = vcombine.high %v2462_v46, %v2466_v49 }
 0x5e0   :  { %6021 = vmatprep.subr.bf16.mxu1 %v13089_v47  ;;  %v13119_v47 = vrot.slane %v11540_v44, %v11562_v15 }
 0x5e1   :  { %5981 = vmatpush2.bf16.msra.mxu0 %v13092_v32  ;;  %v13121_v32 = vcombine.high %v2598_v28, %v2602_v34  ;;  %16957 = vst [vmem:[#allocation569_spill] sm:$0xff] %v13133_v11 }
 0x5e2   :  { %6032 = vmatprep.subr.bf16.mxu0 %v13098_v16  ;;  %16954 = vst [vmem:[#allocation566_spill] sm:$0xff] %v13119_v47  ;;  %v13131_v16 = vcombine.low %v2598_v28, %v2602_v34 }
 0x5e3   :  { %6022 = vmatpush2.bf16.msra.mxu1 %v13096_v61  ;;  %16955 = vst [vmem:[#allocation567_spill] sm:$0xff] %v13121_v32  ;;  %v2594_v61 = vld [vmem:[#allocation3 + $0x578] sm:$0xff] }
 0x5e4   :  { %6073 = vmatprep.subr.bf16.mxu1 %v13101_v62  ;;  %v5738_v43 = vpop.f32.mrf.mxu0  ;;  %5983 = vmatmul.mubr.bf16.vlgmr.msra.gmra.mxu0 %v12289_v7  ;;  %v13127_v62 = vcombine.low %v2470_v30, %v2474_v48  ;;  %v13139_v63 = vcombine.high %v2590_v12, %v2594_v61  ;;  %v2454_v48 = vld [vmem:[#allocation3 + $0x118] sm:$0xff] }
 0x5e5   :  { %v5739_v17 = vadd.f32 %v5738_v43, %v13106_v29  ;;  %6033 = vmatpush1.bf16.msra.mxu0 %v13108_v13  ;;  %v2458_v30 = vld [vmem:[#allocation3 + $0x138] sm:$0xff]  ;;  %6064 = vmatprep.mubr.bf16.mxu0 %v11870_v45 }
 0x5e6   :  { %v5779_v60 = vpop.f32.mrf.mxu1  ;;  %6024 = vmatmul.mubr.bf16.vlgmr.msra.gmra.mxu1 %v12295_v31  ;;  %16956 = vst [vmem:[#allocation568_spill] sm:$0xff] %v13127_v62  ;;  %v5740_v15 = vpop.f32.mrf.mxu0  ;;  %6034 = vmatprep.subr.bf16.mxu0 %v13114_v8  ;;  %16958 = vst [vmem:[#allocation570_spill] sm:$0xff] %v13139_v63  ;;  %v2582_v13 = vld [vmem:[#allocation3 + $0x518] sm:$0xff]  ;;  %v13152_v45 = vcombine.high %v2454_v48, %v2458_v30 }
 0x5e7   :  { %6074 = vmatpush1.bf16.msra.mxu1 %v13112_v27  ;;  %v13135_v50 = vadd.f32 %v5779_v60, %v5739_v17  ;;  %v5741_v43 = vadd.f32 %v5740_v15, %v13119_v47  ;;  %v2586_v8 = vld [vmem:[#allocation3 + $0x538] sm:$0xff]  ;;  %6105 = vmatprep.mubr.bf16.mxu1 %v11872_v18  ;;  %v13146_v17 = vcombine.low %v2462_v46, %v2466_v49 }
 0x5e8   :  { %v5781_v29 = vpop.f32.mrf.mxu1  ;;  %6075 = vmatprep.subr.bf16.mxu1 %v13121_v32  ;;  %v5742_v27 = vpop.f32.mrf.mxu0  ;;  %v13150_v15 = vcombine.low %v2590_v12, %v2594_v61  ;;  %16961 = vst [vmem:[#allocation573_spill] sm:$0xff] %v13152_v45  ;;  %v13155_v18 = vcombine.high %v2582_v13, %v2586_v8  ;;  %v13158_v49 = vcombine.low %v2454_v48, %v2458_v30 }
 0x5e9   :  { %v13143_v34 = vadd.f32 %v5781_v29, %v5741_v43  ;;  %6035 = vmatpush1.bf16.msra.mxu0 %v13127_v62  ;;  %16959 = vst [vmem:[#allocation571_spill] sm:$0xff] %v13146_v17  ;;  %v2446_v29 = vld [vmem:[#allocation3 + $0xd8] sm:$0xff]  ;;  %v13162_v61 = vcombine.low %v2582_v13, %v2586_v8 }
 0x5ea   :  { %v5783_v28 = vpop.f32.mrf.mxu1  ;;  %v5743_v60 = vpop.f32.mrf.mxu0  ;;  %6036 = vmatprep.subr.bf16.mxu0 %v13133_v11  ;;  %16960 = vst [vmem:[#allocation572_spill] sm:$0xff] %v13150_v15  ;;  %16962 = vst [vmem:[#allocation574_spill] sm:$0xff] %v13155_v18  ;;  %v2450_v43 = vld [vmem:[#allocation3 + $0xf8] sm:$0xff] }
 0x5eb   :  { %6076 = vmatpush1.bf16.msra.mxu1 %v13131_v16  ;;  %v2574_v28 = vld [vmem:[#allocation3 + $0x4d8] sm:$0xff]  ;;  %16963 = vst [vmem:[#allocation575_spill] sm:$0xff] %v13158_v49  ;;  %16964 = vst [vmem:[#allocation576_spill] sm:$0xff] %v13162_v61  ;;  %v13164_v46 = vcombine.high %v2446_v29, %v2450_v43  ;;  %v13170_v48 = vcombine.low %v2446_v29, %v2450_v43 }
 0x5ec   :  { %v5784_v27 = vpop.f32.mrf.mxu1  ;;  %6077 = vmatprep.subr.bf16.mxu1 %v13139_v63  ;;  %v2578_v62 = vld [vmem:[#allocation3 + $0x4f8] sm:$0xff] }
 0x5ed   :  { %6037 = vmatpush1.bf16.msra.mxu0 %v13146_v17  ;;  %16965 = vst [vmem:[#allocation577_spill] sm:$0xff] %v13164_v46  ;;  %v13167_v12 = vcombine.high %v2574_v28, %v2578_v62  ;;  %v2438_v60 = vld [vmem:[#allocation3 + $0x98] sm:$0xff]  ;;  %16967 = vst [vmem:[#allocation579_spill] sm:$0xff] %v13170_v48  ;;  %v13174_v13 = vcombine.low %v2574_v28, %v2578_v62 }
 0x5ee   :  { %6038 = vmatprep.subr.bf16.mxu0 %v13152_v45  ;;  %v2442_v27 = vld [vmem:[#allocation3 + $0xb8] sm:$0xff] }
 0x5ef   :  { %6078 = vmatpush1.bf16.msra.mxu1 %v13150_v15  ;;  %16966 = vst [vmem:[#allocation578_spill] sm:$0xff] %v13167_v12  ;;  %v2566_v63 = vld [vmem:[#allocation3 + $0x498] sm:$0xff]  ;;  %16968 = vst [vmem:[#allocation580_spill] sm:$0xff] %v13174_v13  ;;  %v13176_v8 = vcombine.high %v2438_v60, %v2442_v27  ;;  %v13182_v29 = vcombine.low %v2438_v60, %v2442_v27 }
 0x5f0   :  { %6079 = vmatprep.subr.bf16.mxu1 %v13155_v18  ;;  %v2570_v11 = vld [vmem:[#allocation3 + $0x4b8] sm:$0xff] }
 0x5f1   :  { %6039 = vmatpush1.bf16.msra.mxu0 %v13158_v49  ;;  %16969 = vst [vmem:[#allocation581_spill] sm:$0xff] %v13176_v8  ;;  %v13179_v30 = vcombine.high %v2566_v63, %v2570_v11  ;;  %v2430_v18 = vld [vmem:[#allocation3 + $0x58] sm:$0xff]  ;;  %16971 = vst [vmem:[#allocation583_spill] sm:$0xff] %v13182_v29  ;;  %v13186_v62 = vcombine.low %v2566_v63, %v2570_v11 }
 0x5f2   :  { %6040 = vmatprep.subr.bf16.mxu0 %v13164_v46  ;;  %v2434_v45 = vld [vmem:[#allocation3 + $0x78] sm:$0xff] }
 0x5f3   :  { %6080 = vmatpush1.bf16.msra.mxu1 %v13162_v61  ;;  %16970 = vst [vmem:[#allocation582_spill] sm:$0xff] %v13179_v30  ;;  %v2558_v15 = vld [vmem:[#allocation3 + $0x458] sm:$0xff]  ;;  %16972 = vst [vmem:[#allocation584_spill] sm:$0xff] %v13186_v62  ;;  %v13188_v43 = vcombine.high %v2430_v18, %v2434_v45  ;;  %v13194_v60 = vcombine.low %v2430_v18, %v2434_v45 }
 0x5f4   :  { %6081 = vmatprep.subr.bf16.mxu1 %v13167_v12  ;;  %v2562_v17 = vld [vmem:[#allocation3 + $0x478] sm:$0xff] }
 0x5f5   :  { %6041 = vmatpush1.bf16.msra.mxu0 %v13170_v48  ;;  %16973 = vst [vmem:[#allocation585_spill] sm:$0xff] %v13188_v43  ;;  %v13191_v28 = vcombine.high %v2558_v15, %v2562_v17  ;;  %v2422_v12 = vld [vmem:[#allocation3 + $0x18] sm:$0xff]  ;;  %16975 = vst [vmem:[#allocation587_spill] sm:$0xff] %v13194_v60  ;;  %v13198_v63 = vcombine.low %v2558_v15, %v2562_v17 }
 0x5f6   :  { %6042 = vmatprep.subr.bf16.mxu0 %v13176_v8  ;;  %v2426_v46 = vld [vmem:[#allocation3 + $0x38] sm:$0xff] }
 0x5f7   :  { %6082 = vmatpush1.bf16.msra.mxu1 %v13174_v13  ;;  %16974 = vst [vmem:[#allocation586_spill] sm:$0xff] %v13191_v28  ;;  %v2550_v61 = vld [vmem:[#allocation3 + $0x418] sm:$0xff]  ;;  %16976 = vst [vmem:[#allocation588_spill] sm:$0xff] %v13198_v63  ;;  %v13200_v11 = vcombine.high %v2422_v12, %v2426_v46  ;;  %v13206_v45 = vcombine.low %v2422_v12, %v2426_v46 }
 0x5f8   :  { %6083 = vmatprep.subr.bf16.mxu1 %v13179_v30  ;;  %v2554_v49 = vld [vmem:[#allocation3 + $0x438] sm:$0xff] }
 0x5f9   :  { %6043 = vmatpush1.bf16.msra.mxu0 %v13182_v29  ;;  %16977 = vst [vmem:[#allocation589_spill] sm:$0xff] %v13200_v11  ;;  %v13203_v27 = vcombine.high %v2550_v61, %v2554_v49  ;;  %v2542_v30 = vld [vmem:[#allocation3 + $0x3d8] sm:$0xff]  ;;  %16979 = vst [vmem:[#allocation591_spill] sm:$0xff] %v13206_v45  ;;  %v13210_v17 = vcombine.low %v2550_v61, %v2554_v49 }
 0x5fa   :  { %6044 = vmatprep.subr.bf16.mxu0 %v13188_v43  ;;  %v2546_v8 = vld [vmem:[#allocation3 + $0x3f8] sm:$0xff] }
 0x5fb   :  { %6084 = vmatpush1.bf16.msra.mxu1 %v13186_v62  ;;  %16978 = vst [vmem:[#allocation590_spill] sm:$0xff] %v13203_v27  ;;  %v2670_v13 = vld [vmem:[#allocation3 + $0x7d8] sm:$0xff]  ;;  %16980 = vst [vmem:[#allocation592_spill] sm:$0xff] %v13210_v17  ;;  %v13212_v15 = vcombine.high %v2542_v30, %v2546_v8  ;;  %v13218_v46 = vcombine.low %v2542_v30, %v2546_v8 }
 0x5fc   :  { %6085 = vmatprep.subr.bf16.mxu1 %v13191_v28  ;;  %v2674_v48 = vld [vmem:[#allocation3 + $0x7f8] sm:$0xff] }
 0x5fd   :  { %6045 = vmatpush1.bf16.msra.mxu0 %v13194_v60  ;;  %16981 = vst [vmem:[#allocation593_spill] sm:$0xff] %v13212_v15  ;;  %v13215_v18 = vcombine.high %v2670_v13, %v2674_v48  ;;  %v2534_v28 = vld [vmem:[#allocation3 + $0x398] sm:$0xff]  ;;  %16983 = vst [vmem:[#allocation595_spill] sm:$0xff] %v13218_v46  ;;  %v13222_v49 = vcombine.low %v2670_v13, %v2674_v48 }
 0x5fe   :  { %6046 = vmatprep.subr.bf16.mxu0 %v13200_v11  ;;  %v2538_v43 = vld [vmem:[#allocation3 + $0x3b8] sm:$0xff] }
 0x5ff   :  { %6086 = vmatpush1.bf16.msra.mxu1 %v13198_v63  ;;  %16982 = vst [vmem:[#allocation594_spill] sm:$0xff] %v13215_v18  ;;  %v2662_v62 = vld [vmem:[#allocation3 + $0x798] sm:$0xff]  ;;  %16984 = vst [vmem:[#allocation596_spill] sm:$0xff] %v13222_v49  ;;  %v13224_v61 = vcombine.high %v2534_v28, %v2538_v43  ;;  %v13230_v8 = vcombine.low %v2534_v28, %v2538_v43 }
 0x600   :  { %6087 = vmatprep.subr.bf16.mxu1 %v13203_v27  ;;  %v2666_v29 = vld [vmem:[#allocation3 + $0x7b8] sm:$0xff] }
 0x601   :  { %6047 = vmatpush1.bf16.msra.mxu0 %v13206_v45  ;;  %16985 = vst [vmem:[#allocation597_spill] sm:$0xff] %v13224_v61  ;;  %v13227_v12 = vcombine.high %v2662_v62, %v2666_v29  ;;  %v2526_v27 = vld [vmem:[#allocation3 + $0x358] sm:$0xff]  ;;  %16987 = vst [vmem:[#allocation599_spill] sm:$0xff] %v13230_v8  ;;  %v13234_v48 = vcombine.low %v2662_v62, %v2666_v29 }
 0x602   :  { %6048 = vmatprep.subr.bf16.mxu0 %v13212_v15  ;;  %v2530_v11 = vld [vmem:[#allocation3 + $0x378] sm:$0xff] }
 0x603   :  { %6088 = vmatpush1.bf16.msra.mxu1 %v13210_v17  ;;  %16986 = vst [vmem:[#allocation598_spill] sm:$0xff] %v13227_v12  ;;  %v2654_v63 = vld [vmem:[#allocation3 + $0x758] sm:$0xff]  ;;  %16988 = vst [vmem:[#allocation600_spill] sm:$0xff] %v13234_v48  ;;  %v13236_v13 = vcombine.high %v2526_v27, %v2530_v11  ;;  %v13242_v43 = vcombine.low %v2526_v27, %v2530_v11 }
 0x604   :  { %6089 = vmatprep.subr.bf16.mxu1 %v13215_v18  ;;  %v2658_v60 = vld [vmem:[#allocation3 + $0x778] sm:$0xff] }
 0x605   :  { %6049 = vmatpush2.bf16.msra.mxu0 %v13218_v46  ;;  %16989 = vst [vmem:[#allocation601_spill] sm:$0xff] %v13236_v13  ;;  %v13239_v30 = vcombine.high %v2654_v63, %v2658_v60  ;;  %v2518_v18 = vld [vmem:[#allocation3 + $0x318] sm:$0xff]  ;;  %16991 = vst [vmem:[#allocation603_spill] sm:$0xff] %v13242_v43  ;;  %v13246_v29 = vcombine.low %v2654_v63, %v2658_v60 }
 0x606   :  { %6050 = vmatprep.subr.bf16.mxu0 %v13224_v61  ;;  %v2522_v15 = vld [vmem:[#allocation3 + $0x338] sm:$0xff] }
 0x607   :  { %6090 = vmatpush2.bf16.msra.mxu1 %v13222_v49  ;;  %16990 = vst [vmem:[#allocation602_spill] sm:$0xff] %v13239_v30  ;;  %v2646_v17 = vld [vmem:[#allocation3 + $0x718] sm:$0xff]  ;;  %16992 = vst [vmem:[#allocation604_spill] sm:$0xff] %v13246_v29  ;;  %v13248_v62 = vcombine.high %v2518_v18, %v2522_v15  ;;  %v13254_v11 = vcombine.low %v2518_v18, %v2522_v15 }
 0x608   :  { %6091 = vmatprep.subr.bf16.mxu1 %v13227_v12  ;;  %v2650_v45 = vld [vmem:[#allocation3 + $0x738] sm:$0xff] }
 0x609   :  { %6051 = vmatpush2.bf16.msra.mxu0 %v13230_v8  ;;  %16993 = vst [vmem:[#allocation605_spill] sm:$0xff] %v13248_v62  ;;  %v13251_v28 = vcombine.high %v2646_v17, %v2650_v45  ;;  %v2510_v12 = vld [vmem:[#allocation3 + $0x2d8] sm:$0xff]  ;;  %16995 = vst [vmem:[#allocation607_spill] sm:$0xff] %v13254_v11  ;;  %v13258_v60 = vcombine.low %v2646_v17, %v2650_v45 }
 0x60a   :  { %6052 = vmatprep.subr.bf16.mxu0 %v13236_v13  ;;  %v2514_v61 = vld [vmem:[#allocation3 + $0x2f8] sm:$0xff] }
 0x60b   :  { %6092 = vmatpush2.bf16.msra.mxu1 %v13234_v48  ;;  %16994 = vst [vmem:[#allocation606_spill] sm:$0xff] %v13251_v28  ;;  %v2638_v49 = vld [vmem:[#allocation3 + $0x6d8] sm:$0xff]  ;;  %16996 = vst [vmem:[#allocation608_spill] sm:$0xff] %v13258_v60  ;;  %v13260_v63 = vcombine.high %v2510_v12, %v2514_v61  ;;  %v13266_v15 = vcombine.low %v2510_v12, %v2514_v61 }
 0x60c   :  { %6093 = vmatprep.subr.bf16.mxu1 %v13239_v30  ;;  %v2642_v46 = vld [vmem:[#allocation3 + $0x6f8] sm:$0xff] }
 0x60d   :  { %6053 = vmatpush2.bf16.msra.mxu0 %v13242_v43  ;;  %16997 = vst [vmem:[#allocation609_spill] sm:$0xff] %v13260_v63  ;;  %v13263_v27 = vcombine.high %v2638_v49, %v2642_v46  ;;  %v2502_v30 = vld [vmem:[#allocation3 + $0x298] sm:$0xff]  ;;  %16999 = vst [vmem:[#allocation611_spill] sm:$0xff] %v13266_v15  ;;  %v13270_v45 = vcombine.low %v2638_v49, %v2642_v46 }
 0x60e   :  { %6054 = vmatprep.subr.bf16.mxu0 %v13248_v62  ;;  %v2506_v13 = vld [vmem:[#allocation3 + $0x2b8] sm:$0xff] }
 0x60f   :  { %6094 = vmatpush2.bf16.msra.mxu1 %v13246_v29  ;;  %16998 = vst [vmem:[#allocation610_spill] sm:$0xff] %v13263_v27  ;;  %v2630_v48 = vld [vmem:[#allocation3 + $0x698] sm:$0xff]  ;;  %17000 = vst [vmem:[#allocation612_spill] sm:$0xff] %v13270_v45  ;;  %v13272_v17 = vcombine.high %v2502_v30, %v2506_v13  ;;  %v13278_v61 = vcombine.low %v2502_v30, %v2506_v13 }
 0x610   :  { %6095 = vmatprep.subr.bf16.mxu1 %v13251_v28  ;;  %v2634_v8 = vld [vmem:[#allocation3 + $0x6b8] sm:$0xff] }
 0x611   :  { %6055 = vmatpush2.bf16.msra.mxu0 %v13254_v11  ;;  %17001 = vst [vmem:[#allocation613_spill] sm:$0xff] %v13272_v17  ;;  %v13275_v18 = vcombine.high %v2630_v48, %v2634_v8  ;;  %v2494_v28 = vld [vmem:[#allocation3 + $0x258] sm:$0xff]  ;;  %17003 = vst [vmem:[#allocation615_spill] sm:$0xff] %v13278_v61  ;;  %v13282_v46 = vcombine.low %v2630_v48, %v2634_v8 }
 0x612   :  { %6056 = vmatprep.subr.bf16.mxu0 %v13260_v63  ;;  %v2498_v62 = vld [vmem:[#allocation3 + $0x278] sm:$0xff] }
 0x613   :  { %6096 = vmatpush2.bf16.msra.mxu1 %v13258_v60  ;;  %17002 = vst [vmem:[#allocation614_spill] sm:$0xff] %v13275_v18  ;;  %v2622_v29 = vld [vmem:[#allocation3 + $0x658] sm:$0xff]  ;;  %17004 = vst [vmem:[#allocation616_spill] sm:$0xff] %v13282_v46  ;;  %v13284_v49 = vcombine.high %v2494_v28, %v2498_v62  ;;  %v13290_v13 = vcombine.low %v2494_v28, %v2498_v62 }
 0x614   :  { %6097 = vmatprep.subr.bf16.mxu1 %v13263_v27  ;;  %v2626_v43 = vld [vmem:[#allocation3 + $0x678] sm:$0xff] }
 0x615   :  { %6057 = vmatpush2.bf16.msra.mxu0 %v13266_v15  ;;  %17005 = vst [vmem:[#allocation617_spill] sm:$0xff] %v13284_v49  ;;  %v13287_v12 = vcombine.high %v2622_v29, %v2626_v43  ;;  %v2486_v27 = vld [vmem:[#allocation3 + $0x218] sm:$0xff]  ;;  %17007 = vst [vmem:[#allocation619_spill] sm:$0xff] %v13290_v13  ;;  %v13294_v8 = vcombine.low %v2622_v29, %v2626_v43 }
 0x616   :  { %6058 = vmatprep.subr.bf16.mxu0 %v13272_v17  ;;  %v2490_v63 = vld [vmem:[#allocation3 + $0x238] sm:$0xff] }
 0x617   :  { %6098 = vmatpush2.bf16.msra.mxu1 %v13270_v45  ;;  %17006 = vst [vmem:[#allocation618_spill] sm:$0xff] %v13287_v12  ;;  %v2614_v60 = vld [vmem:[#allocation3 + $0x618] sm:$0xff]  ;;  %17008 = vst [vmem:[#allocation620_spill] sm:$0xff] %v13294_v8  ;;  %v13296_v48 = vcombine.high %v2486_v27, %v2490_v63  ;;  %v13302_v62 = vcombine.low %v2486_v27, %v2490_v63 }
 0x618   :  { %6099 = vmatprep.subr.bf16.mxu1 %v13275_v18  ;;  %v2618_v11 = vld [vmem:[#allocation3 + $0x638] sm:$0xff] }
 0x619   :  { %6059 = vmatpush2.bf16.msra.mxu0 %v13278_v61  ;;  %17009 = vst [vmem:[#allocation621_spill] sm:$0xff] %v13296_v48  ;;  %v13299_v30 = vcombine.high %v2614_v60, %v2618_v11  ;;  %v2734_v18 = vld [vmem:[#allocation3 + $0x9d8] sm:$0xff]  ;;  %17011 = vst [vmem:[#allocation623_spill] sm:$0xff] %v13302_v62  ;;  %v13306_v43 = vcombine.low %v2614_v60, %v2618_v11 }
 0x61a   :  { %6060 = vmatprep.subr.bf16.mxu0 %v13284_v49  ;;  %v2738_v17 = vld [vmem:[#allocation3 + $0x9f8] sm:$0xff] }
 0x61b   :  { %6100 = vmatpush2.bf16.msra.mxu1 %v13282_v46  ;;  %17010 = vst [vmem:[#allocation622_spill] sm:$0xff] %v13299_v30  ;;  %v2862_v45 = vld [vmem:[#allocation3 + $0xdd8] sm:$0xff]  ;;  %17012 = vst [vmem:[#allocation624_spill] sm:$0xff] %v13306_v43  ;;  %v13308_v29 = vcombine.high %v2734_v18, %v2738_v17  ;;  %v13314_v63 = vcombine.low %v2734_v18, %v2738_v17 }
 0x61c   :  { %6101 = vmatprep.subr.bf16.mxu1 %v13287_v12  ;;  %v2866_v15 = vld [vmem:[#allocation3 + $0xdf8] sm:$0xff] }
 0x61d   :  { %6061 = vmatpush2.bf16.msra.mxu0 %v13290_v13  ;;  %17013 = vst [vmem:[#allocation625_spill] sm:$0xff] %v13308_v29  ;;  %v13311_v28 = vcombine.high %v2862_v45, %v2866_v15  ;;  %v2726_v12 = vld [vmem:[#allocation3 + $0x998] sm:$0xff]  ;;  %17015 = vst [vmem:[#allocation627_spill] sm:$0xff] %v13314_v63  ;;  %v13318_v11 = vcombine.low %v2862_v45, %v2866_v15 }
 0x61e   :  { %6062 = vmatprep.subr.bf16.mxu0 %v13296_v48  ;;  %v2730_v49 = vld [vmem:[#allocation3 + $0x9b8] sm:$0xff] }
 0x61f   :  { %6102 = vmatpush2.bf16.msra.mxu1 %v13294_v8  ;;  %17014 = vst [vmem:[#allocation626_spill] sm:$0xff] %v13311_v28  ;;  %v2854_v46 = vld [vmem:[#allocation3 + $0xd98] sm:$0xff]  ;;  %17016 = vst [vmem:[#allocation628_spill] sm:$0xff] %v13318_v11  ;;  %v13320_v60 = vcombine.high %v2726_v12, %v2730_v49  ;;  %v13329_v15 = vcombine.low %v2726_v12, %v2730_v49 }
 0x620   :  { %6103 = vmatprep.subr.bf16.mxu1 %v13299_v30  ;;  %v2858_v61 = vld [vmem:[#allocation3 + $0xdb8] sm:$0xff] }
 0x621   :  { %6063 = vmatpush2.bf16.msra.mxu0 %v13302_v62  ;;  %17017 = vst [vmem:[#allocation629_spill] sm:$0xff] %v13320_v60  ;;  %v13323_v27 = vcombine.high %v2854_v46, %v2858_v61  ;;  %v2718_v30 = vld [vmem:[#allocation3 + $0x958] sm:$0xff]  ;;  %17019 = vst [vmem:[#allocation631_spill] sm:$0xff] %v13329_v15 }
 0x622   :  { %6114 = vmatprep.subr.bf16.mxu0 %v13308_v29  ;;  %v2722_v48 = vld [vmem:[#allocation3 + $0x978] sm:$0xff] }
 0x623   :  { %6104 = vmatpush2.bf16.msra.mxu1 %v13306_v43  ;;  %17018 = vst [vmem:[#allocation630_spill] sm:$0xff] %v13323_v27  ;;  %v2846_v62 = vld [vmem:[#allocation3 + $0xd58] sm:$0xff] }
 0x624   :  { %6155 = vmatprep.subr.bf16.mxu1 %v13311_v28  ;;  %v5820_v8 = vpop.f32.mrf.mxu0  ;;  %6065 = vmatmul.mubr.bf16.vlgmr.msra.gmra.mxu0 %v12073_v5  ;;  %v2850_v17 = vld [vmem:[#allocation3 + $0xd78] sm:$0xff]  ;;  %v13335_v28 = vcombine.low %v2854_v46, %v2858_v61  ;;  %v13337_v5 = vcombine.high %v2718_v30, %v2722_v48  ;;  %v13349_v46 = vcombine.low %v2718_v30, %v2722_v48 }
 0x625   :  { %v5821_v18 = vadd.f32 %v5820_v8, %v13135_v50  ;;  %6115 = vmatpush1.bf16.msra.mxu0 %v13314_v63  ;;  %v2710_v49 = vld [vmem:[#allocation3 + $0x918] sm:$0xff]  ;;  %6146 = vmatprep.mubr.bf16.mxu0 %v12095_v51 }
 0x626   :  { %v5861_v43 = vpop.f32.mrf.mxu1  ;;  %6106 = vmatmul.mubr.bf16.vlgmr.msra.gmra.mxu1 %v12079_v41  ;;  %v13332_v45 = vpop.f32.mrf.mxu0  ;;  %6116 = vmatprep.subr.bf16.mxu0 %v13320_v60  ;;  %17020 = vst [vmem:[#allocation632_spill] sm:$0xff] %v13337_v5  ;;  %v13344_v41 = vcombine.high %v2846_v62, %v2850_v17  ;;  %v2714_v12 = vld [vmem:[#allocation3 + $0x938] sm:$0xff]  ;;  %17022 = vst [vmem:[#allocation634_spill] sm:$0xff] %v13349_v46 }
 0x627   :  { %6156 = vmatpush1.bf16.msra.mxu1 %v13318_v11  ;;  %v13339_v29 = vadd.f32 %v5861_v43, %v5821_v18  ;;  %v2838_v11 = vld [vmem:[#allocation3 + $0xd18] sm:$0xff]  ;;  %6187 = vmatprep.mubr.bf16.mxu1 %v12101_v0  ;;  %v13353_v18 = vcombine.low %v2846_v62, %v2850_v17  ;;  %v13361_v48 = vcombine.low %v2710_v49, %v2714_v12 }
 0x628   :  { %v13341_v50 = vpop.f32.mrf.mxu1  ;;  %6157 = vmatprep.subr.bf16.mxu1 %v13323_v27  ;;  %17021 = vst [vmem:[#allocation633_spill] sm:$0xff] %v13344_v41  ;;  %v5824_v8 = vpop.f32.mrf.mxu0  ;;  %v2842_v63 = vld [vmem:[#allocation3 + $0xd38] sm:$0xff]  ;;  %v13355_v27 = vcombine.high %v2710_v49, %v2714_v12 }
 0x629   :  { %6117 = vmatpush1.bf16.msra.mxu0 %v13329_v15  ;;  %17023 = vst [vmem:[#allocation635_spill] sm:$0xff] %v13353_v18  ;;  %v13358_v8 = vcombine.high %v2838_v11, %v2842_v63  ;;  %v2702_v0 = vld [vmem:[#allocation3 + $0x8d8] sm:$0xff]  ;;  %17026 = vst [vmem:[#allocation638_spill] sm:$0xff] %v13361_v48  ;;  %v13365_v30 = vcombine.low %v2838_v11, %v2842_v63 }
 0x62a   :  { %v5865_v61 = vpop.f32.mrf.mxu1  ;;  %v5825_v43 = vpop.f32.mrf.mxu0  ;;  %6118 = vmatprep.subr.bf16.mxu0 %v13337_v5  ;;  %17024 = vst [vmem:[#allocation636_spill] sm:$0xff] %v13355_v27  ;;  %v2830_v60 = vld [vmem:[#allocation3 + $0xcd8] sm:$0xff] }
 0x62b   :  { %6158 = vmatpush1.bf16.msra.mxu1 %v13335_v28  ;;  %17025 = vst [vmem:[#allocation637_spill] sm:$0xff] %v13358_v8  ;;  %v2706_v61 = vld [vmem:[#allocation3 + $0x8f8] sm:$0xff]  ;;  %17027 = vst [vmem:[#allocation639_spill] sm:$0xff] %v13365_v30 }
 0x62c   :  { %v5866_v51 = vpop.f32.mrf.mxu1  ;;  %6159 = vmatprep.subr.bf16.mxu1 %v13344_v41  ;;  %v2834_v15 = vld [vmem:[#allocation3 + $0xcf8] sm:$0xff]  ;;  %v13367_v62 = vcombine.high %v2702_v0, %v2706_v61  ;;  %v13373_v49 = vcombine.low %v2702_v0, %v2706_v61 }
 0x62d   :  { %6119 = vmatpush1.bf16.msra.mxu0 %v13349_v46  ;;  %v13370_v17 = vcombine.high %v2830_v60, %v2834_v15  ;;  %v2694_v43 = vld [vmem:[#allocation3 + $0x898] sm:$0xff]  ;;  %v13377_v63 = vcombine.low %v2830_v60, %v2834_v15 }
 0x62e   :  { %6120 = vmatprep.subr.bf16.mxu0 %v13355_v27  ;;  %17028 = vst [vmem:[#allocation640_spill] sm:$0xff] %v13367_v62  ;;  %v2698_v51 = vld [vmem:[#allocation3 + $0x8b8] sm:$0xff]  ;;  %17030 = vst [vmem:[#allocation642_spill] sm:$0xff] %v13373_v49 }
 0x62f   :  { %6160 = vmatpush1.bf16.msra.mxu1 %v13353_v18  ;;  %17029 = vst [vmem:[#allocation641_spill] sm:$0xff] %v13370_v17  ;;  %v2822_v41 = vld [vmem:[#allocation3 + $0xc98] sm:$0xff]  ;;  %17031 = vst [vmem:[#allocation643_spill] sm:$0xff] %v13377_v63  ;;  %v13379_v11 = vcombine.high %v2694_v43, %v2698_v51  ;;  %v13385_v0 = vcombine.low %v2694_v43, %v2698_v51 }
 0x630   :  { %6161 = vmatprep.subr.bf16.mxu1 %v13358_v8  ;;  %v2826_v5 = vld [vmem:[#allocation3 + $0xcb8] sm:$0xff] }
 0x631   :  { %6121 = vmatpush1.bf16.msra.mxu0 %v13361_v48  ;;  %17032 = vst [vmem:[#allocation644_spill] sm:$0xff] %v13379_v11  ;;  %v13382_v12 = vcombine.high %v2822_v41, %v2826_v5  ;;  %v2686_v8 = vld [vmem:[#allocation3 + $0x858] sm:$0xff]  ;;  %17034 = vst [vmem:[#allocation646_spill] sm:$0xff] %v13385_v0  ;;  %v13389_v60 = vcombine.low %v2822_v41, %v2826_v5 }
 0x632   :  { %6122 = vmatprep.subr.bf16.mxu0 %v13367_v62  ;;  %v2690_v27 = vld [vmem:[#allocation3 + $0x878] sm:$0xff] }
 0x633   :  { %6162 = vmatpush1.bf16.msra.mxu1 %v13365_v30  ;;  %17033 = vst [vmem:[#allocation645_spill] sm:$0xff] %v13382_v12  ;;  %v2814_v18 = vld [vmem:[#allocation3 + $0xc58] sm:$0xff]  ;;  %17035 = vst [vmem:[#allocation647_spill] sm:$0xff] %v13389_v60  ;;  %v13391_v15 = vcombine.high %v2686_v8, %v2690_v27  ;;  %v13397_v43 = vcombine.low %v2686_v8, %v2690_v27 }
 0x634   :  { %6163 = vmatprep.subr.bf16.mxu1 %v13370_v17  ;;  %v2818_v46 = vld [vmem:[#allocation3 + $0xc78] sm:$0xff] }
 0x635   :  { %6123 = vmatpush1.bf16.msra.mxu0 %v13373_v49  ;;  %17036 = vst [vmem:[#allocation648_spill] sm:$0xff] %v13391_v15  ;;  %v13394_v61 = vcombine.high %v2814_v18, %v2818_v46  ;;  %v2678_v17 = vld [vmem:[#allocation3 + $0x818] sm:$0xff]  ;;  %17038 = vst [vmem:[#allocation650_spill] sm:$0xff] %v13397_v43  ;;  %v13401_v5 = vcombine.low %v2814_v18, %v2818_v46 }
 0x636   :  { %6124 = vmatprep.subr.bf16.mxu0 %v13379_v11  ;;  %v2682_v62 = vld [vmem:[#allocation3 + $0x838] sm:$0xff] }
 0x637   :  { %6164 = vmatpush1.bf16.msra.mxu1 %v13377_v63  ;;  %17037 = vst [vmem:[#allocation649_spill] sm:$0xff] %v13394_v61  ;;  %v2806_v30 = vld [vmem:[#allocation3 + $0xc18] sm:$0xff]  ;;  %17039 = vst [vmem:[#allocation651_spill] sm:$0xff] %v13401_v5  ;;  %v13403_v41 = vcombine.high %v2678_v17, %v2682_v62  ;;  %v13409_v27 = vcombine.low %v2678_v17, %v2682_v62 }
 0x638   :  { %6165 = vmatprep.subr.bf16.mxu1 %v13382_v12  ;;  %v2810_v48 = vld [vmem:[#allocation3 + $0xc38] sm:$0xff] }
 0x639   :  { %6125 = vmatpush1.bf16.msra.mxu0 %v13385_v0  ;;  %17040 = vst [vmem:[#allocation652_spill] sm:$0xff] %v13403_v41  ;;  %v13406_v51 = vcombine.high %v2806_v30, %v2810_v48  ;;  %v2798_v12 = vld [vmem:[#allocation3 + $0xbd8] sm:$0xff]  ;;  %17042 = vst [vmem:[#allocation654_spill] sm:$0xff] %v13409_v27  ;;  %v13413_v46 = vcombine.low %v2806_v30, %v2810_v48 }
 0x63a   :  { %6126 = vmatprep.subr.bf16.mxu0 %v13391_v15  ;;  %v2802_v11 = vld [vmem:[#allocation3 + $0xbf8] sm:$0xff] }
 0x63b   :  { %6166 = vmatpush1.bf16.msra.mxu1 %v13389_v60  ;;  %17041 = vst [vmem:[#allocation653_spill] sm:$0xff] %v13406_v51  ;;  %v2926_v63 = vld [vmem:[#allocation3 + $0xfd8] sm:$0xff]  ;;  %17043 = vst [vmem:[#allocation655_spill] sm:$0xff] %v13413_v46  ;;  %v13415_v18 = vcombine.high %v2798_v12, %v2802_v11  ;;  %v13421_v62 = vcombine.low %v2798_v12, %v2802_v11 }
 0x63c   :  { %6167 = vmatprep.subr.bf16.mxu1 %v13394_v61  ;;  %v2930_v49 = vld [vmem:[#allocation3 + $0xff8] sm:$0xff] }
 0x63d   :  { %6127 = vmatpush1.bf16.msra.mxu0 %v13397_v43  ;;  %17044 = vst [vmem:[#allocation656_spill] sm:$0xff] %v13415_v18  ;;  %v13418_v8 = vcombine.high %v2926_v63, %v2930_v49  ;;  %v2790_v61 = vld [vmem:[#allocation3 + $0xb98] sm:$0xff]  ;;  %17046 = vst [vmem:[#allocation658_spill] sm:$0xff] %v13421_v62  ;;  %v13425_v48 = vcombine.low %v2926_v63, %v2930_v49 }
 0x63e   :  { %6128 = vmatprep.subr.bf16.mxu0 %v13403_v41  ;;  %v2794_v15 = vld [vmem:[#allocation3 + $0xbb8] sm:$0xff] }
 0x63f   :  { %6168 = vmatpush1.bf16.msra.mxu1 %v13401_v5  ;;  %17045 = vst [vmem:[#allocation657_spill] sm:$0xff] %v13418_v8  ;;  %v2918_v60 = vld [vmem:[#allocation3 + $0xf98] sm:$0xff]  ;;  %17047 = vst [vmem:[#allocation659_spill] sm:$0xff] %v13425_v48  ;;  %v13427_v30 = vcombine.high %v2790_v61, %v2794_v15  ;;  %v13433_v11 = vcombine.low %v2790_v61, %v2794_v15 }
 0x640   :  { %6169 = vmatprep.subr.bf16.mxu1 %v13406_v51  ;;  %v2922_v0 = vld [vmem:[#allocation3 + $0xfb8] sm:$0xff] }
 0x641   :  { %6129 = vmatpush1.bf16.msra.mxu0 %v13409_v27  ;;  %17048 = vst [vmem:[#allocation660_spill] sm:$0xff] %v13427_v30  ;;  %v13430_v17 = vcombine.high %v2918_v60, %v2922_v0  ;;  %v2782_v51 = vld [vmem:[#allocation3 + $0xb58] sm:$0xff]  ;;  %17050 = vst [vmem:[#allocation662_spill] sm:$0xff] %v13433_v11  ;;  %v13437_v49 = vcombine.low %v2918_v60, %v2922_v0 }
 0x642   :  { %6130 = vmatprep.subr.bf16.mxu0 %v13415_v18  ;;  %v2786_v41 = vld [vmem:[#allocation3 + $0xb78] sm:$0xff] }
 0x643   :  { %6170 = vmatpush1.bf16.msra.mxu1 %v13413_v46  ;;  %17049 = vst [vmem:[#allocation661_spill] sm:$0xff] %v13430_v17  ;;  %v2910_v5 = vld [vmem:[#allocation3 + $0xf58] sm:$0xff]  ;;  %17051 = vst [vmem:[#allocation663_spill] sm:$0xff] %v13437_v49  ;;  %v13439_v63 = vcombine.high %v2782_v51, %v2786_v41  ;;  %v13445_v15 = vcombine.low %v2782_v51, %v2786_v41 }
 0x644   :  { %6171 = vmatprep.subr.bf16.mxu1 %v13418_v8  ;;  %v2914_v43 = vld [vmem:[#allocation3 + $0xf78] sm:$0xff] }
 0x645   :  { %6131 = vmatpush2.bf16.msra.mxu0 %v13421_v62  ;;  %17052 = vst [vmem:[#allocation664_spill] sm:$0xff] %v13439_v63  ;;  %v13442_v12 = vcombine.high %v2910_v5, %v2914_v43  ;;  %v2774_v8 = vld [vmem:[#allocation3 + $0xb18] sm:$0xff]  ;;  %17054 = vst [vmem:[#allocation666_spill] sm:$0xff] %v13445_v15  ;;  %v13449_v0 = vcombine.low %v2910_v5, %v2914_v43 }
 0x646   :  { %6132 = vmatprep.subr.bf16.mxu0 %v13427_v30  ;;  %v2778_v18 = vld [vmem:[#allocation3 + $0xb38] sm:$0xff] }
 0x647   :  { %6172 = vmatpush2.bf16.msra.mxu1 %v13425_v48  ;;  %17053 = vst [vmem:[#allocation665_spill] sm:$0xff] %v13442_v12  ;;  %v2902_v46 = vld [vmem:[#allocation3 + $0xf18] sm:$0xff]  ;;  %17055 = vst [vmem:[#allocation667_spill] sm:$0xff] %v13449_v0  ;;  %v13451_v60 = vcombine.high %v2774_v8, %v2778_v18  ;;  %v13457_v41 = vcombine.low %v2774_v8, %v2778_v18 }
 0x648   :  { %6173 = vmatprep.subr.bf16.mxu1 %v13430_v17  ;;  %v2906_v27 = vld [vmem:[#allocation3 + $0xf38] sm:$0xff] }
 0x649   :  { %6133 = vmatpush2.bf16.msra.mxu0 %v13433_v11  ;;  %17056 = vst [vmem:[#allocation668_spill] sm:$0xff] %v13451_v60  ;;  %v13454_v61 = vcombine.high %v2902_v46, %v2906_v27  ;;  %v2766_v17 = vld [vmem:[#allocation3 + $0xad8] sm:$0xff]  ;;  %17058 = vst [vmem:[#allocation670_spill] sm:$0xff] %v13457_v41  ;;  %v13461_v43 = vcombine.low %v2902_v46, %v2906_v27 }
 0x64a   :  { %6134 = vmatprep.subr.bf16.mxu0 %v13439_v63  ;;  %v2770_v30 = vld [vmem:[#allocation3 + $0xaf8] sm:$0xff] }
 0x64b   :  { %6174 = vmatpush2.bf16.msra.mxu1 %v13437_v49  ;;  %17057 = vst [vmem:[#allocation669_spill] sm:$0xff] %v13454_v61  ;;  %v2894_v48 = vld [vmem:[#allocation3 + $0xed8] sm:$0xff]  ;;  %17059 = vst [vmem:[#allocation671_spill] sm:$0xff] %v13461_v43  ;;  %v13463_v5 = vcombine.high %v2766_v17, %v2770_v30  ;;  %v13469_v18 = vcombine.low %v2766_v17, %v2770_v30 }
 0x64c   :  { %6175 = vmatprep.subr.bf16.mxu1 %v13442_v12  ;;  %v2898_v62 = vld [vmem:[#allocation3 + $0xef8] sm:$0xff] }
 0x64d   :  { %6135 = vmatpush2.bf16.msra.mxu0 %v13445_v15  ;;  %17060 = vst [vmem:[#allocation672_spill] sm:$0xff] %v13463_v5  ;;  %v13466_v51 = vcombine.high %v2894_v48, %v2898_v62  ;;  %v2758_v12 = vld [vmem:[#allocation3 + $0xa98] sm:$0xff]  ;;  %v13473_v27 = vcombine.low %v2894_v48, %v2898_v62 }
 0x64e   :  { %6136 = vmatprep.subr.bf16.mxu0 %v13451_v60  ;;  %v2762_v63 = vld [vmem:[#allocation3 + $0xab8] sm:$0xff] }
 0x64f   :  { %6176 = vmatpush2.bf16.msra.mxu1 %v13449_v0  ;;  %17061 = vst [vmem:[#allocation673_spill] sm:$0xff] %v13466_v51  ;;  %v2886_v49 = vld [vmem:[#allocation3 + $0xe98] sm:$0xff]  ;;  %v13475_v46 = vcombine.high %v2758_v12, %v2762_v63  ;;  %v13481_v30 = vcombine.low %v2758_v12, %v2762_v63 }
 0x650   :  { %6177 = vmatprep.subr.bf16.mxu1 %v13454_v61  ;;  %v2890_v11 = vld [vmem:[#allocation3 + $0xeb8] sm:$0xff] }
 0x651   :  { %6137 = vmatpush2.bf16.msra.mxu0 %v13457_v41  ;;  %v13478_v8 = vcombine.high %v2886_v49, %v2890_v11  ;;  %v2750_v61 = vld [vmem:[#allocation3 + $0xa58] sm:$0xff]  ;;  %17063 = vst [vmem:[#allocation675_spill] sm:$0xff] %v13481_v30  ;;  %v13485_v62 = vcombine.low %v2886_v49, %v2890_v11 }
 0x652   :  { %6138 = vmatprep.subr.bf16.mxu0 %v13463_v5  ;;  %v2754_v60 = vld [vmem:[#allocation3 + $0xa78] sm:$0xff] }
 0x653   :  { %6178 = vmatpush2.bf16.msra.mxu1 %v13461_v43  ;;  %17062 = vst [vmem:[#allocation674_spill] sm:$0xff] %v13478_v8  ;;  %v2878_v0 = vld [vmem:[#allocation3 + $0xe58] sm:$0xff]  ;;  %v13487_v48 = vcombine.high %v2750_v61, %v2754_v60  ;;  %v13493_v63 = vcombine.low %v2750_v61, %v2754_v60 }
 0x654   :  { %6179 = vmatprep.subr.bf16.mxu1 %v13466_v51  ;;  %v2882_v15 = vld [vmem:[#allocation3 + $0xe78] sm:$0xff] }
 0x655   :  { %6139 = vmatpush2.bf16.msra.mxu0 %v13469_v18  ;;  %v13490_v17 = vcombine.high %v2878_v0, %v2882_v15  ;;  %v2742_v51 = vld [vmem:[#allocation3 + $0xa18] sm:$0xff]  ;;  %v13497_v11 = vcombine.low %v2878_v0, %v2882_v15 }
 0x656   :  { %6140 = vmatprep.subr.bf16.mxu0 %v13475_v46  ;;  %v2746_v5 = vld [vmem:[#allocation3 + $0xa38] sm:$0xff] }
 0x657   :  { %6180 = vmatpush2.bf16.msra.mxu1 %v13473_v27  ;;  %v2870_v43 = vld [vmem:[#allocation3 + $0xe18] sm:$0xff]  ;;  %17064 = vst [vmem:[#allocation676_spill] sm:$0xff] %v13497_v11  ;;  %v13499_v49 = vcombine.high %v2742_v51, %v2746_v5 }
 0x658   :  { %6181 = vmatprep.subr.bf16.mxu1 %v13478_v8  ;;  %v2874_v41 = vld [vmem:[#allocation3 + $0xe38] sm:$0xff]  ;;  %v5823_v8 = vadd.f32 %v13332_v45, %v13143_v34  ;;  %v6197_v34 = vmax.f32 %v12933_v9, 0.0 }
 0x659   :  { %6141 = vmatpush2.bf16.msra.mxu0 %v13481_v30  ;;  %17065 = vst [vmem:[#allocation677_spill] sm:$0xff] %v13499_v49  ;;  %v13502_v12 = vcombine.high %v2870_v43, %v2874_v41  ;;  %v13507_v30 = vcombine.low %v2742_v51, %v2746_v5  ;;  %v13511_v60 = vcombine.low %v2870_v43, %v2874_v41  ;;  %v17066_v5 = vld [vmem:[#allocation84_spill] sm:$0xff]  ;;  %v17067_v51 = vld [vmem:[#allocation69_spill] sm:$0xff] }
 0x65a   :  { %6142 = vmatprep.subr.bf16.mxu0 %v13487_v48  ;;  %v5864_v15 = vadd.f32 %v13341_v50, %v5823_v8  ;;  %v17068_v8 = vld [vmem:[#allocation97_spill] sm:$0xff] }
 0x65b   :  { %6182 = vmatpush2.bf16.msra.mxu1 %v13485_v62 }
 0x65c   :  { %6183 = vmatprep.subr.bf16.mxu1 %v13490_v17  ;;  %v6199_v0 = vmax.f32 %v5864_v15, 0.0  ;;  %v17069_v15 = vld [vmem:[#allocation55_spill] sm:$0xff] }
 0x65d   :  { %6143 = vmatpush2.bf16.msra.mxu0 %v13493_v63 }
 0x65e   :  { %6144 = vmatprep.subr.bf16.mxu0 %v13499_v49 }
 0x65f   :  { %6184 = vmatpush2.bf16.msra.mxu1 %v13497_v11 }
 0x660   :  { %6185 = vmatprep.subr.bf16.mxu1 %v13502_v12 }
 0x661   :  { %6145 = vmatpush2.bf16.msra.mxu0 %v13507_v30 }
 0x662   :  { %9827 = vmatprep.subr.mxu0 %v11058_v40 }
 0x663   :  { %6186 = vmatpush2.bf16.msra.mxu1 %v13511_v60 }
 0x664   :  { %9862 = vmatprep.subr.mxu1 %v11218_v26  ;;  %v13520_v45 = vpop.f32.mrf.mxu0  ;;  %6147 = vmatmul.mubr.bf16.vlgmr.msra.gmra.mxu0 %v12289_v7 }
 0x665   :  { %9828 = vmatpush3.msra.mxu0 %v10978_v24  ;;  %6268 = vmatprep.mubr.f32.mxu0 %v6197_v34  ;;  %v17070_v34 = vld [vmem:[#allocation83_spill] sm:$0xff] }
 0x666   :  { %v13523_v61 = vpop.f32.mrf.mxu1  ;;  %6188 = vmatmul.mubr.bf16.vlgmr.msra.gmra.mxu1 %v12295_v31  ;;  %v13528_v50 = vpop.f32.mrf.mxu0  ;;  %9829 = vmatprep.subr.mxu0 %v11053_v39 }
 0x667   :  { %9863 = vmatpush3.msra.mxu1 %v11138_v56  ;;  %6338 = vmatprep.mubr.f32.mxu1 %v6199_v0  ;;  %v17071_v0 = vld [vmem:[#allocation68_spill] sm:$0xff] }
 0x668   :  { %v13530_v41 = vpop.f32.mrf.mxu1  ;;  %9864 = vmatprep.subr.mxu1 %v11213_v58  ;;  %9830 = vmatpush3.msra.mxu0 %v10973_v23  ;;  %v5906_v7 = vpop.f32.mrf.mxu0 }
 0x669   :  { %9865 = vmatpush3.msra.mxu1 %v11133_v55  ;;  %9831 = vmatprep.subr.mxu0 %v11048_v38  ;;  %v17072_v7 = vld [vmem:[#allocation96_spill] sm:$0xff] }
 0x66a   :  { %v5947_v31 = vpop.f32.mrf.mxu1  ;;  %9866 = vmatprep.subr.mxu1 %v11208_v10  ;;  %9832 = vmatpush3.msra.mxu0 %v10968_v22  ;;  %v5907_v9 = vpop.f32.mrf.mxu0 }
 0x66b   :  { %9867 = vmatpush3.msra.mxu1 %v11128_v54  ;;  %9833 = vmatprep.subr.mxu0 %v11043_v37  ;;  %v17073_v31 = vld [vmem:[#allocation54_spill] sm:$0xff] }
 0x66c   :  { %v5948_v43 = vpop.f32.mrf.mxu1  ;;  %9868 = vmatprep.subr.mxu1 %v11203_v42  ;;  %9834 = vmatpush3.msra.mxu0 %v10963_v21  ;;  %v17074_v9 = vld [vmem:[#allocation82_spill] sm:$0xff] }
 0x66d   :  { %9869 = vmatpush3.msra.mxu1 %v11123_v53  ;;  %9835 = vmatprep.subr.mxu0 %v11038_v36  ;;  %v17075_v43 = vld [vmem:[#allocation67_spill] sm:$0xff] }
 0x66e   :  { %9870 = vmatprep.subr.mxu1 %v11198_v25  ;;  %9836 = vmatpush3.msra.mxu0 %v10958_v20 }
 0x66f   :  { %9871 = vmatpush3.msra.mxu1 %v11118_v52  ;;  %9837 = vmatprep.subr.mxu0 %v11033_v35 }
 0x670   :  { %9872 = vmatprep.subr.mxu1 %v11193_v57  ;;  %9838 = vmatpush3.msra.mxu0 %v10953_v19  ;;  %v17076_v19 = vld [vmem:[#allocation95_spill] sm:$0xff] }
 0x671   :  { %9873 = vmatpush3.msra.mxu1 %v17066_v5  ;;  %9839 = vmatprep.subr.mxu0 %v17067_v51  ;;  %v17077_v5 = vld [vmem:[#allocation53_spill] sm:$0xff] }
 0x672   :  { %9874 = vmatprep.subr.mxu1 %v17068_v8  ;;  %9840 = vmatpush3.msra.mxu0 %v17069_v15  ;;  %v17078_v51 = vld [vmem:[#allocation81_spill] sm:$0xff]  ;;  %v17079_v8 = vld [vmem:[#allocation66_spill] sm:$0xff] }
 0x673   :  { %9875 = vmatpush3.msra.mxu1 %v17070_v34  ;;  %9841 = vmatprep.subr.mxu0 %v17071_v0  ;;  %v17080_v15 = vld [vmem:[#allocation94_spill] sm:$0xff]  ;;  %v17081_v34 = vld [vmem:[#allocation52_spill] sm:$0xff] }
 0x674   :  { %9876 = vmatprep.subr.mxu1 %v17072_v7  ;;  %9842 = vmatpush3.msra.mxu0 %v17073_v31  ;;  %v17082_v0 = vld [vmem:[#allocation80_spill] sm:$0xff]  ;;  %v17083_v7 = vld [vmem:[#allocation65_spill] sm:$0xff] }
 0x675   :  { %9877 = vmatpush3.msra.mxu1 %v17074_v9  ;;  %9843 = vmatprep.subr.mxu0 %v17075_v43  ;;  %v17084_v31 = vld [vmem:[#allocation93_spill] sm:$0xff]  ;;  %v17085_v9 = vld [vmem:[#allocation51_spill] sm:$0xff] }
 0x676   :  { %9878 = vmatprep.subr.mxu1 %v17076_v19  ;;  %9844 = vmatpush3.msra.mxu0 %v17077_v5  ;;  %v17086_v43 = vld [vmem:[#allocation79_spill] sm:$0xff]  ;;  %v17087_v19 = vld [vmem:[#allocation64_spill] sm:$0xff] }
 0x677   :  { %9879 = vmatpush3.msra.mxu1 %v17078_v51  ;;  %9845 = vmatprep.subr.mxu0 %v17079_v8  ;;  %v17088_v5 = vld [vmem:[#allocation92_spill] sm:$0xff]  ;;  %v17089_v51 = vld [vmem:[#allocation50_spill] sm:$0xff] }
 0x678   :  { %9880 = vmatprep.subr.mxu1 %v17080_v15  ;;  %9846 = vmatpush3.msra.mxu0 %v17081_v34  ;;  %v17090_v8 = vld [vmem:[#allocation78_spill] sm:$0xff]  ;;  %v17091_v15 = vld [vmem:[#allocation63_spill] sm:$0xff] }
 0x679   :  { %9881 = vmatpush3.msra.mxu1 %v17082_v0  ;;  %9847 = vmatprep.subr.mxu0 %v17083_v7  ;;  %v17092_v34 = vld [vmem:[#allocation91_spill] sm:$0xff]  ;;  %v17093_v0 = vld [vmem:[#allocation49_spill] sm:$0xff] }
 0x67a   :  { %9882 = vmatprep.subr.mxu1 %v17084_v31  ;;  %9848 = vmatpush3.msra.mxu0 %v17085_v9  ;;  %v17094_v7 = vld [vmem:[#allocation77_spill] sm:$0xff]  ;;  %v17095_v31 = vld [vmem:[#allocation62_spill] sm:$0xff] }
 0x67b   :  { %9883 = vmatpush3.msra.mxu1 %v17086_v43  ;;  %9849 = vmatprep.subr.mxu0 %v17087_v19  ;;  %v17096_v9 = vld [vmem:[#allocation90_spill] sm:$0xff]  ;;  %v17097_v43 = vld [vmem:[#allocation48_spill] sm:$0xff] }
 0x67c   :  { %9884 = vmatprep.subr.mxu1 %v17088_v5  ;;  %9850 = vmatpush3.msra.mxu0 %v17089_v51  ;;  %v17098_v19 = vld [vmem:[#allocation76_spill] sm:$0xff]  ;;  %v17099_v5 = vld [vmem:[#allocation61_spill] sm:$0xff] }
 0x67d   :  { %9885 = vmatpush3.msra.mxu1 %v17090_v8  ;;  %9851 = vmatprep.subr.mxu0 %v17091_v15  ;;  %v17100_v51 = vld [vmem:[#allocation89_spill] sm:$0xff]  ;;  %v17101_v8 = vld [vmem:[#allocation47_spill] sm:$0xff] }
 0x67e   :  { %9886 = vmatprep.subr.mxu1 %v17092_v34  ;;  %9852 = vmatpush3.msra.mxu0 %v17093_v0  ;;  %v6196_v34 = vmax.f32 %v12926_v33, 0.0  ;;  %v17102_v15 = vld [vmem:[#allocation75_spill] sm:$0xff]  ;;  %v17103_v0 = vld [vmem:[#allocation60_spill] sm:$0xff] }
 0x67f   :  { %9887 = vmatpush3.msra.mxu1 %v17094_v7  ;;  %9853 = vmatprep.subr.mxu0 %v17095_v31  ;;  %v6198_v31 = vmax.f32 %v13339_v29, 0.0  ;;  %v17104_v7 = vld [vmem:[#allocation88_spill] sm:$0xff] }
 0x680   :  { %9888 = vmatprep.subr.mxu1 %v17096_v9  ;;  %9854 = vmatpush3.msra.mxu0 %v17097_v43  ;;  %v17105_v9 = vld [vmem:[#allocation46_spill] sm:$0xff]  ;;  %v17110_v33 = vld [vmem:[#allocation132_spill] sm:$0xff] }
 0x681   :  { %9889 = vmatpush3.msra.mxu1 %v17098_v19  ;;  %9855 = vmatprep.subr.mxu0 %v17099_v5  ;;  %v17106_v43 = vld [vmem:[#allocation74_spill] sm:$0xff]  ;;  %v17107_v5 = vld [vmem:[#allocation133_spill] sm:$0xff]  ;;  %v17113_v29 = vld [vmem:[#allocation164_spill] sm:$0xff] }
 0x682   :  { %9890 = vmatprep.subr.mxu1 %v17100_v51  ;;  %9856 = vmatpush3.msra.mxu0 %v17101_v8  ;;  %v17108_v51 = vld [vmem:[#allocation117_spill] sm:$0xff]  ;;  %v17174_v19 = vld [vmem:[#allocation134_spill] sm:$0xff] }
 0x683   :  { %9891 = vmatpush3.msra.mxu1 %v17102_v15  ;;  %9857 = vmatprep.subr.mxu0 %v17103_v0  ;;  %v17109_v8 = vld [vmem:[#allocation165_spill] sm:$0xff]  ;;  %v17112_v0 = vld [vmem:[#allocation116_spill] sm:$0xff] }
 0x684   :  { %9892 = vmatprep.subr.mxu1 %v17104_v7  ;;  %9858 = vmatpush3.msra.mxu0 %v17105_v9  ;;  %v17111_v15 = vld [vmem:[#allocation149_spill] sm:$0xff]  ;;  %v17114_v7 = vld [vmem:[#allocation131_spill] sm:$0xff]  ;;  %v17115_v9 = vld [vmem:[#allocation148_spill] sm:$0xff] }
 0x685   :  { %9893 = vmatpush3.msra.mxu1 %v17106_v43  ;;  %6269 = vmatmul.mubr.f32.vlgmr.msra.gmra.mxu0 %v6196_v34  ;;  %v17116_v34 = vld [vmem:[#allocation115_spill] sm:$0xff]  ;;  %v17163_v43 = vld [vmem:[#allocation137_spill] sm:$0xff] }
 0x686   :  { %6339 = vmatmul.mubr.f32.vlgmr.msra.gmra.mxu1 %v6198_v31  ;;  %9897 = vmatprep.subr.mxu0 %v17107_v5  ;;  %v17117_v31 = vld [vmem:[#allocation163_spill] sm:$0xff]  ;;  %v17118_v5 = vld [vmem:[#allocation130_spill] sm:$0xff] }
 0x687   :  { %9898 = vmatpush3.msra.mxu0 %v17108_v51  ;;  %9932 = vmatprep.subr.mxu1 %v17109_v8  ;;  %v17119_v51 = vld [vmem:[#allocation147_spill] sm:$0xff]  ;;  %v17120_v8 = vld [vmem:[#allocation114_spill] sm:$0xff] }
 0x688   :  { %9899 = vmatprep.subr.mxu0 %v17110_v33  ;;  %9933 = vmatpush3.msra.mxu1 %v17111_v15  ;;  %v17121_v33 = vld [vmem:[#allocation162_spill] sm:$0xff]  ;;  %v17122_v15 = vld [vmem:[#allocation129_spill] sm:$0xff] }
 0x689   :  { %9900 = vmatpush3.msra.mxu0 %v17112_v0  ;;  %9934 = vmatprep.subr.mxu1 %v17113_v29  ;;  %v17123_v0 = vld [vmem:[#allocation146_spill] sm:$0xff]  ;;  %v17124_v29 = vld [vmem:[#allocation113_spill] sm:$0xff] }
 0x68a   :  { %9901 = vmatprep.subr.mxu0 %v17114_v7  ;;  %9935 = vmatpush3.msra.mxu1 %v17115_v9  ;;  %v17125_v7 = vld [vmem:[#allocation161_spill] sm:$0xff]  ;;  %v17126_v9 = vld [vmem:[#allocation128_spill] sm:$0xff] }
 0x68b   :  { %9902 = vmatpush3.msra.mxu0 %v17116_v34  ;;  %9936 = vmatprep.subr.mxu1 %v17117_v31  ;;  %v17127_v34 = vld [vmem:[#allocation145_spill] sm:$0xff]  ;;  %v17128_v31 = vld [vmem:[#allocation112_spill] sm:$0xff] }
 0x68c   :  { %9903 = vmatprep.subr.mxu0 %v17118_v5  ;;  %9937 = vmatpush3.msra.mxu1 %v17119_v51  ;;  %v17129_v5 = vld [vmem:[#allocation160_spill] sm:$0xff]  ;;  %v17130_v51 = vld [vmem:[#allocation127_spill] sm:$0xff] }
 0x68d   :  { %9904 = vmatpush3.msra.mxu0 %v17120_v8  ;;  %9938 = vmatprep.subr.mxu1 %v17121_v33  ;;  %v17131_v8 = vld [vmem:[#allocation144_spill] sm:$0xff]  ;;  %v17132_v33 = vld [vmem:[#allocation111_spill] sm:$0xff] }
 0x68e   :  { %9905 = vmatprep.subr.mxu0 %v17122_v15  ;;  %9939 = vmatpush3.msra.mxu1 %v17123_v0  ;;  %v17133_v15 = vld [vmem:[#allocation159_spill] sm:$0xff]  ;;  %v17134_v0 = vld [vmem:[#allocation126_spill] sm:$0xff] }
 0x68f   :  { %9906 = vmatpush3.msra.mxu0 %v17124_v29  ;;  %9940 = vmatprep.subr.mxu1 %v17125_v7  ;;  %v17135_v29 = vld [vmem:[#allocation143_spill] sm:$0xff]  ;;  %v17136_v7 = vld [vmem:[#allocation110_spill] sm:$0xff] }
 0x690   :  { %9907 = vmatprep.subr.mxu0 %v17126_v9  ;;  %9941 = vmatpush3.msra.mxu1 %v17127_v34  ;;  %v17137_v9 = vld [vmem:[#allocation158_spill] sm:$0xff]  ;;  %v17138_v34 = vld [vmem:[#allocation125_spill] sm:$0xff] }
 0x691   :  { %9908 = vmatpush3.msra.mxu0 %v17128_v31  ;;  %9942 = vmatprep.subr.mxu1 %v17129_v5  ;;  %v17139_v31 = vld [vmem:[#allocation142_spill] sm:$0xff]  ;;  %v17140_v5 = vld [vmem:[#allocation109_spill] sm:$0xff] }
 0x692   :  { %9909 = vmatprep.subr.mxu0 %v17130_v51  ;;  %9943 = vmatpush3.msra.mxu1 %v17131_v8  ;;  %v17141_v51 = vld [vmem:[#allocation157_spill] sm:$0xff]  ;;  %v17142_v8 = vld [vmem:[#allocation124_spill] sm:$0xff] }
 0x693   :  { %9910 = vmatpush3.msra.mxu0 %v17132_v33  ;;  %9944 = vmatprep.subr.mxu1 %v17133_v15  ;;  %v17143_v33 = vld [vmem:[#allocation141_spill] sm:$0xff]  ;;  %v17144_v15 = vld [vmem:[#allocation108_spill] sm:$0xff] }
 0x694   :  { %9911 = vmatprep.subr.mxu0 %v17134_v0  ;;  %9945 = vmatpush3.msra.mxu1 %v17135_v29  ;;  %v17145_v0 = vld [vmem:[#allocation156_spill] sm:$0xff]  ;;  %v17146_v29 = vld [vmem:[#allocation123_spill] sm:$0xff] }
 0x695   :  { %9912 = vmatpush3.msra.mxu0 %v17136_v7  ;;  %9946 = vmatprep.subr.mxu1 %v17137_v9  ;;  %v17147_v7 = vld [vmem:[#allocation140_spill] sm:$0xff]  ;;  %v17158_v9 = vld [vmem:[#allocation121_spill] sm:$0xff] }
 0x696   :  { %9913 = vmatprep.subr.mxu0 %v17138_v34  ;;  %9947 = vmatpush3.msra.mxu1 %v17139_v31  ;;  %v17148_v34 = vsub.s32 4, %v11550_v14 }
 0x697   :  { %9914 = vmatpush3.msra.mxu0 %v17140_v5  ;;  %9948 = vmatprep.subr.mxu1 %v17141_v51  ;;  %v17150_v5 = vld [vmem:[#allocation107_spill] sm:$0xff] }
 0x698   :  { %9915 = vmatprep.subr.mxu0 %v17142_v8  ;;  %9949 = vmatpush3.msra.mxu1 %v17143_v33  ;;  %v13638_v31 = vrot.slane %v11540_v44, %v17148_v34  ;;  %v17151_v51 = vld [vmem:[#allocation155_spill] sm:$0xff]  ;;  %v17152_v8 = vld [vmem:[#allocation122_spill] sm:$0xff] }
 0x699   :  { %9916 = vmatpush3.msra.mxu0 %v17144_v15  ;;  %9950 = vmatprep.subr.mxu1 %v17145_v0  ;;  %v17153_v33 = vld [vmem:[#allocation139_spill] sm:$0xff]  ;;  %v17154_v15 = vsub.s32 5, %v11550_v14  ;;  %v17159_v34 = vld [vmem:[#allocation138_spill] sm:$0xff] }
 0x69a   :  { %9917 = vmatprep.subr.mxu0 %v17146_v29  ;;  %9951 = vmatpush3.msra.mxu1 %v17147_v7  ;;  %17149 = vst [vmem:[#allocation678_spill] sm:$0xff] %v13638_v31  ;;  %v17156_v29 = vld [vmem:[#allocation106_spill] sm:$0xff] }
 0x69b   :  { %9918 = vmatpush3.msra.mxu0 %v17150_v5  ;;  %9952 = vmatprep.subr.mxu1 %v17151_v51  ;;  %v13647_v0 = vrot.slane %v11540_v44, %v17154_v15  ;;  %v17157_v7 = vld [vmem:[#allocation154_spill] sm:$0xff]  ;;  %v5903_v51 = vadd.f32 %v13520_v45, %v13638_v31  ;;  %v17160_v5 = vld [vmem:[#allocation105_spill] sm:$0xff] }
 0x69c   :  { %9919 = vmatprep.subr.mxu0 %v17152_v8  ;;  %9953 = vmatpush3.msra.mxu1 %v17153_v33  ;;  %v17161_v8 = vld [vmem:[#allocation153_spill] sm:$0xff]  ;;  %v17162_v33 = vld [vmem:[#allocation120_spill] sm:$0xff]  ;;  %v17170_v31 = vld [vmem:[#allocation118_spill] sm:$0xff] }
 0x69d   :  { %17155 = vst [vmem:[#allocation679_spill] sm:$0xff] %v13647_v0  ;;  %9920 = vmatpush3.msra.mxu0 %v17156_v29  ;;  %9954 = vmatprep.subr.mxu1 %v17157_v7  ;;  %v5905_v15 = vadd.f32 %v13528_v50, %v13647_v0  ;;  %v17164_v29 = vld [vmem:[#allocation104_spill] sm:$0xff]  ;;  %v5944_v45 = vadd.f32 %v13523_v61, %v5903_v51 }
 0x69e   :  { %9921 = vmatprep.subr.mxu0 %v17158_v9  ;;  %9955 = vmatpush3.msra.mxu1 %v17159_v34  ;;  %v17165_v7 = vld [vmem:[#allocation152_spill] sm:$0xff]  ;;  %v17166_v9 = vld [vmem:[#allocation119_spill] sm:$0xff] }
 0x69f   :  { %9922 = vmatpush3.msra.mxu0 %v17160_v5  ;;  %9956 = vmatprep.subr.mxu1 %v17161_v8  ;;  %v17167_v34 = vld [vmem:[#allocation136_spill] sm:$0xff]  ;;  %v17168_v5 = vld [vmem:[#allocation103_spill] sm:$0xff]  ;;  %v5946_v50 = vadd.f32 %v13530_v41, %v5905_v15 }
 0x6a0   :  { %9923 = vmatprep.subr.mxu0 %v17162_v33  ;;  %9957 = vmatpush3.msra.mxu1 %v17163_v43  ;;  %v17169_v8 = vld [vmem:[#allocation151_spill] sm:$0xff] }
 0x6a1   :  { %9924 = vmatpush3.msra.mxu0 %v17164_v29  ;;  %9958 = vmatprep.subr.mxu1 %v17165_v7  ;;  %v17171_v43 = vld [vmem:[#allocation135_spill] sm:$0xff]  ;;  %v17172_v7 = vld [vmem:[#allocation102_spill] sm:$0xff] }
 0x6a2   :  { %9925 = vmatprep.subr.mxu0 %v17166_v9  ;;  %9959 = vmatpush3.msra.mxu1 %v17167_v34  ;;  %v17173_v9 = vld [vmem:[#allocation150_spill] sm:$0xff] }
 0x6a3   :  { %9926 = vmatpush3.msra.mxu0 %v17168_v5  ;;  %9960 = vmatprep.subr.mxu1 %v17169_v8 }
 0x6a4   :  { %v5984_v33 = vpop.f32.mrf.mxu0  ;;  %9927 = vmatprep.subr.mxu0 %v17170_v31  ;;  %9961 = vmatpush3.msra.mxu1 %v17171_v43 }
 0x6a5   :  { %v5985_v29 = vadd.f32 %v5984_v33, %v5944_v45  ;;  %9928 = vmatpush3.msra.mxu0 %v17172_v7  ;;  %9962 = vmatprep.subr.mxu1 %v17173_v9  ;;  %v17175_v9 = vmov 0.0  }
 0x6a6   :  { %v6025_v0 = vpop.f32.mrf.mxu1  ;;  %v5986_v34 = vpop.f32.mrf.mxu0  ;;  %9963 = vmatpush3.msra.mxu1 %v17174_v19  ;;  %6525 = vmatprep.subr.mxu0 %v10886_v2 }
 0x6a7   :  { %v5987_v61 = vadd.f32 %v5986_v34, %v5946_v50  ;;  %6596 = vmatprep.subr.mxu1 %v10890_v4  ;;  %v6026_v31 = vadd.f32 %v6025_v0, %v5985_v29 }
 0x6a8   :  { %v6027_v51 = vpop.f32.mrf.mxu1  ;;  %v5988_v8 = vpop.f32.mrf.mxu0 }
 0x6a9   :  { %v6028_v43 = vadd.f32 %v6027_v51, %v5987_v61  ;;  %v6200_v45 = vmax.f32 %v6026_v31, 0.0  ;;  %v17178_v61 = vsub.s32 7, %v11550_v14 }
 0x6aa   :  { %v6029_v5 = vpop.f32.mrf.mxu1  ;;  %v5989_v41 = vpop.f32.mrf.mxu0 }
 0x6ab   :  { %v6201_v33 = vmax.f32 %v6028_v43, 0.0  ;;  %v17176_v43 = vsub.s32 6, %v11550_v14  ;;  %v13687_v51 = vrot.slane %v11540_v44, %v17178_v61 }
 0x6ac   :  { %v6030_v15 = vpop.f32.mrf.mxu1 }
 0x6ad   :  { %6408 = vmatprep.mubr.f32.mxu0 %v6201_v33  ;;  %v13682_v31 = vrot.slane %v11540_v44, %v17176_v43  ;;  %17179 = vst [vmem:[#allocation681_spill] sm:$0xff] %v13687_v51 }
 0x6ae   :  { %6409 = vmatmul.mubr.f32.vlgmr.msra.gmra.mxu0 %v6200_v45 }
 0x6af   :  { %6526 = vmatpush1.msra.mxu0 %v10884_v1  ;;  %6559 = vmatprep.mubr.f32.mxu0 %v17175_v9  ;;  %17177 = vst [vmem:[#allocation680_spill] sm:$0xff] %v13682_v31 }
 0x6b0   :  { %6667 = vmatprep.subr.mxu0 %v10894_v6 }
 0x6e4   :  { %v6066_v34 = vpop.f32.mrf.mxu0 }
 0x6e5   :  { %v6067_v41 = vadd.f32 %v6066_v34, %v13682_v31  ;;  %v17180_v34 = vld [vmem:[#allocation40_spill] sm:$0xff]  ;;  %v17462_v31 = vld [vmem:[#allocation443_spill] sm:$0xff] }
 0x6e6   :  { %v6107_v50 = vpop.f32.mrf.mxu1  ;;  %v6068_v2 = vpop.f32.mrf.mxu0 }
 0x6e7   :  { %v6069_v33 = vadd.f32 %v6068_v2, %v13687_v51  ;;  %v6108_v15 = vadd.f32 %v6107_v50, %v6067_v41  ;;  %v17181_v2 = vld [vmem:[#allocation45_spill] sm:$0xff] }
 0x6e8   :  { %v6109_v4 = vpop.f32.mrf.mxu1  ;;  %v6070_v0 = vpop.f32.mrf.mxu0 }
 0x6e9   :  { %v6110_v0 = vadd.f32 %v6109_v4, %v6069_v33 }
 0x6ea   :  { %v6111_v8 = vpop.f32.mrf.mxu1  ;;  %v6071_v29 = vpop.f32.mrf.mxu0 }
 0x6ec   :  { %v6112_v5 = vpop.f32.mrf.mxu1 }
 0x724   :  { %v6148_v45 = vpop.f32.mrf.mxu0 }
 0x725   :  { %v6149_v8 = vadd.f32 %v6148_v45, %v6108_v15 }
 0x726   :  { %v6189_v29 = vpop.f32.mrf.mxu1  ;;  %v6150_v5 = vpop.f32.mrf.mxu0 }
 0x727   :  { %v6151_v6 = vadd.f32 %v6150_v5, %v6110_v0  ;;  %v6190_v19 = vadd.f32 %v6189_v29, %v6149_v8  ;;  %v17182_v5 = vld [vmem:[#allocation167_spill] sm:$0xff] }
 0x728   :  { %v6191_v1 = vpop.f32.mrf.mxu1  ;;  %v6152_v43 = vpop.f32.mrf.mxu0 }
 0x729   :  { %v6192_v7 = vadd.f32 %v6191_v1, %v6151_v6  ;;  %v6202_v61 = vmax.f32 %v6190_v19, 0.0 }
 0x72a   :  { %v6193_v57 = vpop.f32.mrf.mxu1  ;;  %v6153_v14 = vpop.f32.mrf.mxu0 }
 0x72b   :  { %v6203_v35 = vmax.f32 %v6192_v7, 0.0  ;;  %v17183_v14 = vld [vmem:[#allocation166_spill] sm:$0xff] }
 0x72c   :  { %v6194_v44 = vpop.f32.mrf.mxu1 }
 0x72d   :  { %6478 = vmatprep.mubr.f32.mxu1 %v6203_v35 }
 0x72e   :  { %6479 = vmatmul.mubr.f32.vlgmr.msra.gmra.mxu1 %v6202_v61  ;;  %v17185_v61 = vld [vmem:[#allocation42_spill] sm:$0xff] }
 0x72f   :  { %6597 = vmatpush1.msra.mxu1 %v17180_v34  ;;  %6630 = vmatprep.mubr.f32.mxu1 %v17175_v9  ;;  %v17459_v34 = vld [vmem:[#allocation440_spill] sm:$0xff] }
 0x730   :  { %6738 = vmatprep.subr.mxu1 %v17181_v2 }
 0x745   :  { %v9859_v4 = vpop.f32.mrf.mxu0 }
 0x746   :  { %v9894_v50 = vpop.f32.mrf.mxu1 }
 0x747   :  { %v9860_v41 = vpop.f32.mrf.mxu0 }
 0x748   :  { %v9895_v15 = vpop.f32.mrf.mxu1  ;;  %v9861_v1 = vadd.f32 %v9860_v41, %v9859_v4  ;;  %v17186_v4 = vld [vmem:[#allocation44_spill] sm:$0xff]  ;;  %v17188_v41 = vld [vmem:[#allocation178_spill] sm:$0xff] }
 0x749   :  { %v9896_v6 = vadd.f32 %v9895_v15, %v9894_v50  ;;  %v17187_v50 = vld [vmem:[#allocation176_spill] sm:$0xff]  ;;  %v17190_v15 = vld [vmem:[#allocation179_spill] sm:$0xff] }
 0x74b   :  { %v6341_v0 = vadd.f32 %v9896_v6, %v9861_v1  ;;  %v17192_v1 = vld [vmem:[#allocation181_spill] sm:$0xff]  ;;  %v17193_v6 = vld [vmem:[#allocation182_spill] sm:$0xff] }
 0x76e   :  { %v9929_v33 = vpop.f32.mrf.mxu0 }
 0x770   :  { %v9930_v45 = vpop.f32.mrf.mxu0 }
 0x771   :  { %v9931_v57 = vadd.f32 %v9930_v45, %v9929_v33  ;;  %v17189_v33 = vld [vmem:[#allocation177_spill] sm:$0xff]  ;;  %v17191_v45 = vld [vmem:[#allocation180_spill] sm:$0xff] }
 0x773   :  { %v6411_v35 = vadd.f32 %v9931_v57, %v6341_v0  ;;  %v17194_v57 = vld [vmem:[#allocation183_spill] sm:$0xff]  ;;  %v17196_v0 = vld [vmem:[#allocation185_spill] sm:$0xff] }
 0x7ee   :  { %v9964_v7 = vpop.f32.mrf.mxu1 }
 0x7f0   :  { %v9965_v19 = vpop.f32.mrf.mxu1 }
 0x7f1   :  { %v9966_v8 = vadd.f32 %v9965_v19, %v9964_v7  ;;  %v17195_v7 = vld [vmem:[#allocation184_spill] sm:$0xff]  ;;  %v17197_v19 = vld [vmem:[#allocation186_spill] sm:$0xff] }
 0x7f3   :  { %v6481_v29 = vadd.f32 %v9966_v8, %v6411_v35  ;;  %v17198_v35 = vld [vmem:[#allocation187_spill] sm:$0xff]  ;;  %v17199_v8 = vld [vmem:[#allocation188_spill] sm:$0xff] }
 0x7f5   :  { %v6484_v43 = vadd.f32 %v6481_v29, %v17182_v5  ;;  %v17200_v29 = vld [vmem:[#allocation189_spill] sm:$0xff]  ;;  %v17202_v5 = vld [vmem:[#allocation191_spill] sm:$0xff] }
 0x7f7   :  { %v13696_v44 = vadd.f32 %v17183_v14, %v6484_v43  ;;  %v17201_v43 = vld [vmem:[#allocation190_spill] sm:$0xff] }
 0x7f9   :  { %17184 = vst [vmem:[#allocation682_spill] sm:$0xff] %v13696_v44  ;;  %9747 = vmatmul.mubr.msk.f32.vlgmr.msra.gmra.mxu0 %vm2111_vm1, %v13696_v44  ;;  %9748 = vmatmul.mubr.msk.f32.vlgmr.msra.gmra.mxu1 %vm2111_vm1, %v13696_v44 }
 0x7fa   :  { %6668 = vmatpush1.msra.mxu0 %v17185_v61  ;;  %6701 = vmatprep.mubr.f32.mxu0 %v17175_v9 }
 0x7fb   :  { %6739 = vmatpush1.msra.mxu1 %v17186_v4  ;;  %6772 = vmatprep.mubr.f32.mxu1 %v17175_v9 }
 0x7fc   :  { %6803 = vmatprep.subr.bf16.mxu0 %v17187_v50  ;;  %6844 = vmatprep.subr.bf16.mxu1 %v17188_v41  ;;  %v17255_v41 = vld [vmem:[#allocation170_spill] sm:$0xff]  ;;  %v17256_v50 = vld [vmem:[#allocation171_spill] sm:$0xff] }
 0x7fd   :  { %9749 = vmatmul.mubr.msk.f32.vlgmr.msra.gmra.mxu0 %vm2111_vm1, %v13696_v44  ;;  %9750 = vmatmul.mubr.msk.f32.vlgmr.msra.gmra.mxu1 %vm2111_vm1, %v13696_v44 }
 0x7fe   :  { %6804 = vmatpush1.bf16.msra.mxu0 %v17189_v33  ;;  %6845 = vmatpush1.bf16.msra.mxu1 %v17190_v15  ;;  %v17254_v15 = vld [vmem:[#allocation169_spill] sm:$0xff] }
 0x7ff   :  { %6805 = vmatprep.subr.bf16.mxu0 %v17191_v45  ;;  %6846 = vmatprep.subr.bf16.mxu1 %v17192_v1  ;;  %v17203_v1 = vld [vmem:[#allocation192_spill] sm:$0xff] }
 0x800   :  { %v17253_v45 = vld [vmem:[#allocation168_spill] sm:$0xff] }
 0x802   :  { %6806 = vmatpush1.bf16.msra.mxu0 %v17193_v6  ;;  %6847 = vmatpush1.bf16.msra.mxu1 %v17194_v57  ;;  %v17204_v6 = vld [vmem:[#allocation193_spill] sm:$0xff]  ;;  %v17205_v57 = vld [vmem:[#allocation194_spill] sm:$0xff] }
 0x803   :  { %6807 = vmatprep.subr.bf16.mxu0 %v17195_v7  ;;  %6848 = vmatprep.subr.bf16.mxu1 %v17196_v0  ;;  %v17206_v7 = vld [vmem:[#allocation195_spill] sm:$0xff]  ;;  %v17207_v0 = vld [vmem:[#allocation196_spill] sm:$0xff] }
 0x806   :  { %6808 = vmatpush1.bf16.msra.mxu0 %v17197_v19  ;;  %6849 = vmatpush1.bf16.msra.mxu1 %v17198_v35  ;;  %v17208_v19 = vld [vmem:[#allocation197_spill] sm:$0xff]  ;;  %v17209_v35 = vld [vmem:[#allocation198_spill] sm:$0xff] }
 0x807   :  { %6809 = vmatprep.subr.bf16.mxu0 %v17199_v8  ;;  %6850 = vmatprep.subr.bf16.mxu1 %v17200_v29  ;;  %v17210_v8 = vld [vmem:[#allocation199_spill] sm:$0xff]  ;;  %v17211_v29 = vld [vmem:[#allocation200_spill] sm:$0xff] }
 0x80a   :  { %6810 = vmatpush1.bf16.msra.mxu0 %v17201_v43  ;;  %6851 = vmatpush1.bf16.msra.mxu1 %v17202_v5  ;;  %v17212_v43 = vld [vmem:[#allocation201_spill] sm:$0xff]  ;;  %v17213_v5 = vld [vmem:[#allocation202_spill] sm:$0xff] }
 0x80b   :  { %6811 = vmatprep.subr.bf16.mxu0 %v17203_v1  ;;  %6852 = vmatprep.subr.bf16.mxu1 %v17204_v6  ;;  %v17214_v1 = vld [vmem:[#allocation203_spill] sm:$0xff]  ;;  %v17215_v6 = vld [vmem:[#allocation204_spill] sm:$0xff] }
 0x80e   :  { %6812 = vmatpush1.bf16.msra.mxu0 %v17205_v57  ;;  %6853 = vmatpush1.bf16.msra.mxu1 %v17206_v7  ;;  %v17216_v57 = vld [vmem:[#allocation205_spill] sm:$0xff]  ;;  %v17217_v7 = vld [vmem:[#allocation206_spill] sm:$0xff] }
 0x80f   :  { %6813 = vmatprep.subr.bf16.mxu0 %v17207_v0  ;;  %6854 = vmatprep.subr.bf16.mxu1 %v17208_v19  ;;  %v17218_v0 = vld [vmem:[#allocation207_spill] sm:$0xff]  ;;  %v17219_v19 = vld [vmem:[#allocation208_spill] sm:$0xff] }
 0x812   :  { %6814 = vmatpush1.bf16.msra.mxu0 %v17209_v35  ;;  %6855 = vmatpush1.bf16.msra.mxu1 %v17210_v8  ;;  %v17220_v35 = vld [vmem:[#allocation209_spill] sm:$0xff]  ;;  %v17221_v8 = vld [vmem:[#allocation210_spill] sm:$0xff] }
 0x813   :  { %6815 = vmatprep.subr.bf16.mxu0 %v17211_v29  ;;  %6856 = vmatprep.subr.bf16.mxu1 %v17212_v43  ;;  %v17222_v29 = vld [vmem:[#allocation211_spill] sm:$0xff]  ;;  %v17223_v43 = vld [vmem:[#allocation212_spill] sm:$0xff] }
 0x816   :  { %6816 = vmatpush1.bf16.msra.mxu0 %v17213_v5  ;;  %6857 = vmatpush1.bf16.msra.mxu1 %v17214_v1  ;;  %v17224_v5 = vld [vmem:[#allocation213_spill] sm:$0xff]  ;;  %v17225_v1 = vld [vmem:[#allocation214_spill] sm:$0xff] }
 0x817   :  { %6817 = vmatprep.subr.bf16.mxu0 %v17215_v6  ;;  %6858 = vmatprep.subr.bf16.mxu1 %v17216_v57  ;;  %v17226_v6 = vld [vmem:[#allocation215_spill] sm:$0xff]  ;;  %v17227_v57 = vld [vmem:[#allocation216_spill] sm:$0xff] }
 0x81a   :  { %6818 = vmatpush1.bf16.msra.mxu0 %v17217_v7  ;;  %6859 = vmatpush1.bf16.msra.mxu1 %v17218_v0  ;;  %v17228_v7 = vld [vmem:[#allocation217_spill] sm:$0xff]  ;;  %v17229_v0 = vld [vmem:[#allocation218_spill] sm:$0xff] }
 0x81b   :  { %6819 = vmatprep.subr.bf16.mxu0 %v17219_v19  ;;  %6860 = vmatprep.subr.bf16.mxu1 %v17220_v35  ;;  %v17230_v19 = vld [vmem:[#allocation219_spill] sm:$0xff]  ;;  %v17231_v35 = vld [vmem:[#allocation220_spill] sm:$0xff] }
 0x81e   :  { %6820 = vmatpush2.bf16.msra.mxu0 %v17221_v8  ;;  %6861 = vmatpush2.bf16.msra.mxu1 %v17222_v29  ;;  %v17232_v8 = vld [vmem:[#allocation221_spill] sm:$0xff]  ;;  %v17233_v29 = vld [vmem:[#allocation222_spill] sm:$0xff] }
 0x81f   :  { %6821 = vmatprep.subr.bf16.mxu0 %v17223_v43  ;;  %6862 = vmatprep.subr.bf16.mxu1 %v17224_v5  ;;  %v17234_v43 = vld [vmem:[#allocation223_spill] sm:$0xff]  ;;  %v17235_v5 = vld [vmem:[#allocation224_spill] sm:$0xff] }
 0x822   :  { %6822 = vmatpush2.bf16.msra.mxu0 %v17225_v1  ;;  %6863 = vmatpush2.bf16.msra.mxu1 %v17226_v6  ;;  %v17236_v1 = vld [vmem:[#allocation225_spill] sm:$0xff]  ;;  %v17237_v6 = vld [vmem:[#allocation226_spill] sm:$0xff] }
 0x823   :  { %6823 = vmatprep.subr.bf16.mxu0 %v17227_v57  ;;  %6864 = vmatprep.subr.bf16.mxu1 %v17228_v7  ;;  %v17238_v57 = vld [vmem:[#allocation227_spill] sm:$0xff]  ;;  %v17239_v7 = vld [vmem:[#allocation228_spill] sm:$0xff] }
 0x826   :  { %6824 = vmatpush2.bf16.msra.mxu0 %v17229_v0  ;;  %6865 = vmatpush2.bf16.msra.mxu1 %v17230_v19  ;;  %v17240_v0 = vld [vmem:[#allocation229_spill] sm:$0xff]  ;;  %v17241_v19 = vld [vmem:[#allocation230_spill] sm:$0xff] }
 0x827   :  { %6825 = vmatprep.subr.bf16.mxu0 %v17231_v35  ;;  %6866 = vmatprep.subr.bf16.mxu1 %v17232_v8  ;;  %v17242_v35 = vld [vmem:[#allocation231_spill] sm:$0xff]  ;;  %v17243_v8 = vld [vmem:[#allocation232_spill] sm:$0xff] }
 0x82a   :  { %6826 = vmatpush2.bf16.msra.mxu0 %v17233_v29  ;;  %6867 = vmatpush2.bf16.msra.mxu1 %v17234_v43  ;;  %v17244_v29 = vld [vmem:[#allocation233_spill] sm:$0xff]  ;;  %v17245_v43 = vld [vmem:[#allocation234_spill] sm:$0xff] }
 0x82b   :  { %6827 = vmatprep.subr.bf16.mxu0 %v17235_v5  ;;  %6868 = vmatprep.subr.bf16.mxu1 %v17236_v1  ;;  %v17246_v5 = vld [vmem:[#allocation235_spill] sm:$0xff]  ;;  %v17247_v1 = vld [vmem:[#allocation236_spill] sm:$0xff] }
 0x82e   :  { %6828 = vmatpush2.bf16.msra.mxu0 %v17237_v6  ;;  %6869 = vmatpush2.bf16.msra.mxu1 %v17238_v57  ;;  %v17248_v6 = vld [vmem:[#allocation237_spill] sm:$0xff]  ;;  %v17249_v57 = vld [vmem:[#allocation238_spill] sm:$0xff] }
 0x82f   :  { %6829 = vmatprep.subr.bf16.mxu0 %v17239_v7  ;;  %6870 = vmatprep.subr.bf16.mxu1 %v17240_v0  ;;  %v17250_v7 = vld [vmem:[#allocation239_spill] sm:$0xff]  ;;  %v17251_v0 = vld [vmem:[#allocation240_spill] sm:$0xff] }
 0x832   :  { %6830 = vmatpush2.bf16.msra.mxu0 %v17241_v19  ;;  %6871 = vmatpush2.bf16.msra.mxu1 %v17242_v35  ;;  %v17252_v19 = vld [vmem:[#allocation241_spill] sm:$0xff] }
 0x833   :  { %6831 = vmatprep.subr.bf16.mxu0 %v17243_v8  ;;  %6872 = vmatprep.subr.bf16.mxu1 %v17244_v29 }
 0x836   :  { %6832 = vmatpush2.bf16.msra.mxu0 %v17245_v43  ;;  %6873 = vmatpush2.bf16.msra.mxu1 %v17246_v5 }
 0x837   :  { %6833 = vmatprep.subr.bf16.mxu0 %v17247_v1  ;;  %6874 = vmatprep.subr.bf16.mxu1 %v17248_v6 }
 0x83a   :  { %6834 = vmatpush2.bf16.msra.mxu0 %v17249_v57  ;;  %6875 = vmatpush2.bf16.msra.mxu1 %v17250_v7 }
 0x83b   :  { %6885 = vmatprep.subr.bf16.mxu0 %v17251_v0  ;;  %6926 = vmatprep.subr.bf16.mxu1 %v17252_v19 }
 0x8b9   :  { %v6561_v35 = vpop.f32.mrf.mxu0  ;;  %v6632_v8 = vpop.f32.mrf.mxu1 }
 0x8ba   :  { %v6779_v29 = vadd.f32 %v6561_v35, %v17253_v45  ;;  %v6781_v43 = vadd.f32 %v6632_v8, %v17254_v15  ;;  %v17257_v8 = vld [vmem:[#allocation174_spill] sm:$0xff]  ;;  %v17258_v45 = vld [vmem:[#allocation175_spill] sm:$0xff] }
 0x8bb   :  { %v6563_v33 = vpop.f32.mrf.mxu0  ;;  %v6634_v5 = vpop.f32.mrf.mxu1 }
 0x8bc   :  { %v6780_v1 = vadd.f32 %v6563_v33, %v17255_v41  ;;  %v6782_v6 = vadd.f32 %v6634_v5, %v17256_v50  ;;  %v6787_v4 = vmax.f32 %v6779_v29, 0.0  ;;  %v6789_v57 = vmax.f32 %v6781_v43, 0.0  ;;  %v17319_v50 = vld [vmem:[#allocation300_spill] sm:$0xff] }
 0x8bd   :  { %v13780_v61 = vpop.f32.mrf.mxu0  ;;  %v13782_v7 = vpop.f32.mrf.mxu1 }
 0x8be   :  { %v6788_v0 = vmax.f32 %v6780_v1, 0.0  ;;  %v6790_v19 = vmax.f32 %v6782_v6, 0.0  ;;  %v13790_v41 = vpack.c.bf16 %v6787_v4, %v6787_v4  ;;  %v13792_v5 = vpack.c.bf16 %v6789_v57, %v6789_v57  ;;  %v17261_v4 = vld [vmem:[#allocation244_spill] sm:$0xff]  ;;  %v17263_v57 = vld [vmem:[#allocation246_spill] sm:$0xff] }
 0x8bf   :  { %v6705_v14 = vpop.f32.mrf.mxu0  ;;  %v6776_v44 = vpop.f32.mrf.mxu1 }
 0x8c0   :  { %v13784_v2 = vpack.c.bf16 %v6788_v0, %v6788_v0  ;;  %v13786_v35 = vpack.c.bf16 %v6790_v19, %v6790_v19  ;;  %v6784_v15 = vadd.f32 %v6705_v14, %v17257_v8  ;;  %v6786_v33 = vadd.f32 %v6776_v44, %v17258_v45  ;;  %v17259_v14 = vld [vmem:[#allocation242_spill] sm:$0xff]  ;;  %v17260_v44 = vld [vmem:[#allocation243_spill] sm:$0xff]  ;;  %v17265_v19 = vld [vmem:[#allocation248_spill] sm:$0xff] }
 0x8c1   :  { %v17264_v0 = vld [vmem:[#allocation247_spill] sm:$0xff]  ;;  %v17273_v45 = vld [vmem:[#allocation256_spill] sm:$0xff] }
 0x8c2   :  { %v6792_v29 = vmax.f32 %v6784_v15, 0.0  ;;  %v6794_v43 = vmax.f32 %v6786_v33, 0.0  ;;  %6835 = vmatprep.mubr.bf16.mxu0 %v13784_v2  ;;  %6876 = vmatprep.mubr.bf16.mxu1 %v13786_v35  ;;  %v17262_v15 = vld [vmem:[#allocation245_spill] sm:$0xff]  ;;  %v17315_v8 = vld [vmem:[#allocation296_spill] sm:$0xff] }
 0x8c3   :  { %6836 = vmatmul.mubr.bf16.vlgmr.msra.gmra.mxu0 %v13790_v41  ;;  %6877 = vmatmul.mubr.bf16.vlgmr.msra.gmra.mxu1 %v13792_v5  ;;  %v17266_v33 = vld [vmem:[#allocation249_spill] sm:$0xff] }
 0x8c4   :  { %v13798_v1 = vpack.c.bf16 %v6792_v29, %v6792_v29  ;;  %v13800_v6 = vpack.c.bf16 %v6794_v43, %v6794_v43  ;;  %6886 = vmatpush1.bf16.msra.mxu0 %v17259_v14  ;;  %6927 = vmatpush1.bf16.msra.mxu1 %v17260_v44  ;;  %v17267_v29 = vld [vmem:[#allocation250_spill] sm:$0xff]  ;;  %v17268_v43 = vld [vmem:[#allocation251_spill] sm:$0xff]  ;;  %v17269_v44 = vld [vmem:[#allocation252_spill] sm:$0xff] }
 0x8c5   :  { %6887 = vmatprep.subr.bf16.mxu0 %v17261_v4  ;;  %6928 = vmatprep.subr.bf16.mxu1 %v17262_v15  ;;  %v17270_v4 = vld [vmem:[#allocation253_spill] sm:$0xff]  ;;  %v17271_v15 = vld [vmem:[#allocation254_spill] sm:$0xff]  ;;  %v17272_v14 = vld [vmem:[#allocation255_spill] sm:$0xff] }
 0x8c6   :  { %6917 = vmatprep.mubr.bf16.mxu0 %v13798_v1  ;;  %6958 = vmatprep.mubr.bf16.mxu1 %v13800_v6 }
 0x8c8   :  { %6888 = vmatpush1.bf16.msra.mxu0 %v17263_v57  ;;  %6929 = vmatpush1.bf16.msra.mxu1 %v17264_v0  ;;  %v17274_v57 = vld [vmem:[#allocation257_spill] sm:$0xff]  ;;  %v17275_v0 = vld [vmem:[#allocation258_spill] sm:$0xff] }
 0x8c9   :  { %6889 = vmatprep.subr.bf16.mxu0 %v17265_v19  ;;  %6930 = vmatprep.subr.bf16.mxu1 %v17266_v33  ;;  %v17276_v19 = vld [vmem:[#allocation259_spill] sm:$0xff]  ;;  %v17277_v33 = vld [vmem:[#allocation260_spill] sm:$0xff] }
 0x8cc   :  { %6890 = vmatpush1.bf16.msra.mxu0 %v17267_v29  ;;  %6931 = vmatpush1.bf16.msra.mxu1 %v17268_v43  ;;  %v17278_v29 = vld [vmem:[#allocation261_spill] sm:$0xff]  ;;  %v17279_v43 = vld [vmem:[#allocation262_spill] sm:$0xff] }
 0x8cd   :  { %6891 = vmatprep.subr.bf16.mxu0 %v17269_v44  ;;  %6932 = vmatprep.subr.bf16.mxu1 %v17270_v4  ;;  %v17280_v44 = vld [vmem:[#allocation263_spill] sm:$0xff]  ;;  %v17281_v4 = vld [vmem:[#allocation264_spill] sm:$0xff] }
 0x8d0   :  { %6892 = vmatpush1.bf16.msra.mxu0 %v17271_v15  ;;  %6933 = vmatpush1.bf16.msra.mxu1 %v17272_v14  ;;  %v17282_v15 = vld [vmem:[#allocation265_spill] sm:$0xff]  ;;  %v17283_v14 = vld [vmem:[#allocation266_spill] sm:$0xff] }
 0x8d1   :  { %6893 = vmatprep.subr.bf16.mxu0 %v17273_v45  ;;  %6934 = vmatprep.subr.bf16.mxu1 %v17274_v57  ;;  %v17284_v45 = vld [vmem:[#allocation267_spill] sm:$0xff]  ;;  %v17285_v57 = vld [vmem:[#allocation268_spill] sm:$0xff] }
 0x8d4   :  { %6894 = vmatpush1.bf16.msra.mxu0 %v17275_v0  ;;  %6935 = vmatpush1.bf16.msra.mxu1 %v17276_v19  ;;  %v17286_v0 = vld [vmem:[#allocation269_spill] sm:$0xff]  ;;  %v17287_v19 = vld [vmem:[#allocation270_spill] sm:$0xff] }
 0x8d5   :  { %6895 = vmatprep.subr.bf16.mxu0 %v17277_v33  ;;  %6936 = vmatprep.subr.bf16.mxu1 %v17278_v29  ;;  %v17288_v33 = vld [vmem:[#allocation271_spill] sm:$0xff]  ;;  %v17289_v29 = vld [vmem:[#allocation272_spill] sm:$0xff] }
 0x8d8   :  { %6896 = vmatpush1.bf16.msra.mxu0 %v17279_v43  ;;  %6937 = vmatpush1.bf16.msra.mxu1 %v17280_v44  ;;  %v17290_v43 = vld [vmem:[#allocation273_spill] sm:$0xff]  ;;  %v17291_v44 = vld [vmem:[#allocation274_spill] sm:$0xff] }
 0x8d9   :  { %6897 = vmatprep.subr.bf16.mxu0 %v17281_v4  ;;  %6938 = vmatprep.subr.bf16.mxu1 %v17282_v15  ;;  %v17292_v4 = vld [vmem:[#allocation275_spill] sm:$0xff]  ;;  %v17293_v15 = vld [vmem:[#allocation276_spill] sm:$0xff] }
 0x8dc   :  { %6898 = vmatpush1.bf16.msra.mxu0 %v17283_v14  ;;  %6939 = vmatpush1.bf16.msra.mxu1 %v17284_v45  ;;  %v17294_v14 = vld [vmem:[#allocation277_spill] sm:$0xff]  ;;  %v17295_v45 = vld [vmem:[#allocation278_spill] sm:$0xff] }
 0x8dd   :  { %6899 = vmatprep.subr.bf16.mxu0 %v17285_v57  ;;  %6940 = vmatprep.subr.bf16.mxu1 %v17286_v0  ;;  %v17296_v57 = vld [vmem:[#allocation279_spill] sm:$0xff]  ;;  %v17297_v0 = vld [vmem:[#allocation280_spill] sm:$0xff] }
 0x8e0   :  { %6900 = vmatpush1.bf16.msra.mxu0 %v17287_v19  ;;  %6941 = vmatpush1.bf16.msra.mxu1 %v17288_v33  ;;  %v17298_v19 = vld [vmem:[#allocation281_spill] sm:$0xff]  ;;  %v17299_v33 = vld [vmem:[#allocation282_spill] sm:$0xff] }
 0x8e1   :  { %6901 = vmatprep.subr.bf16.mxu0 %v17289_v29  ;;  %6942 = vmatprep.subr.bf16.mxu1 %v17290_v43  ;;  %v17300_v29 = vld [vmem:[#allocation283_spill] sm:$0xff]  ;;  %v17301_v43 = vld [vmem:[#allocation284_spill] sm:$0xff] }
 0x8e4   :  { %6902 = vmatpush2.bf16.msra.mxu0 %v17291_v44  ;;  %6943 = vmatpush2.bf16.msra.mxu1 %v17292_v4  ;;  %v17302_v44 = vld [vmem:[#allocation285_spill] sm:$0xff]  ;;  %v17303_v4 = vld [vmem:[#allocation286_spill] sm:$0xff] }
 0x8e5   :  { %6903 = vmatprep.subr.bf16.mxu0 %v17293_v15  ;;  %6944 = vmatprep.subr.bf16.mxu1 %v17294_v14  ;;  %v17304_v15 = vld [vmem:[#allocation287_spill] sm:$0xff]  ;;  %v17305_v14 = vld [vmem:[#allocation288_spill] sm:$0xff] }
 0x8e8   :  { %6904 = vmatpush2.bf16.msra.mxu0 %v17295_v45  ;;  %6945 = vmatpush2.bf16.msra.mxu1 %v17296_v57  ;;  %v17306_v45 = vld [vmem:[#allocation289_spill] sm:$0xff]  ;;  %v17307_v57 = vld [vmem:[#allocation290_spill] sm:$0xff] }
 0x8e9   :  { %6905 = vmatprep.subr.bf16.mxu0 %v17297_v0  ;;  %6946 = vmatprep.subr.bf16.mxu1 %v17298_v19  ;;  %v17308_v0 = vld [vmem:[#allocation291_spill] sm:$0xff]  ;;  %v17309_v19 = vld [vmem:[#allocation292_spill] sm:$0xff] }
 0x8ec   :  { %6906 = vmatpush2.bf16.msra.mxu0 %v17299_v33  ;;  %6947 = vmatpush2.bf16.msra.mxu1 %v17300_v29  ;;  %v17310_v33 = vld [vmem:[#allocation293_spill] sm:$0xff]  ;;  %v17311_v29 = vld [vmem:[#allocation294_spill] sm:$0xff] }
 0x8ed   :  { %6907 = vmatprep.subr.bf16.mxu0 %v17301_v43  ;;  %6948 = vmatprep.subr.bf16.mxu1 %v17302_v44  ;;  %v17312_v43 = vld [vmem:[#allocation295_spill] sm:$0xff]  ;;  %v17313_v44 = vld [vmem:[#allocation172_spill] sm:$0xff] }
 0x8f0   :  { %6908 = vmatpush2.bf16.msra.mxu0 %v17303_v4  ;;  %6949 = vmatpush2.bf16.msra.mxu1 %v17304_v15  ;;  %v6783_v4 = vadd.f32 %v13780_v61, %v17313_v44  ;;  %v17314_v15 = vld [vmem:[#allocation173_spill] sm:$0xff]  ;;  %v17322_v61 = vld [vmem:[#allocation303_spill] sm:$0xff] }
 0x8f1   :  { %6909 = vmatprep.subr.bf16.mxu0 %v17305_v14  ;;  %6950 = vmatprep.subr.bf16.mxu1 %v17306_v45  ;;  %v6785_v14 = vadd.f32 %v13782_v7, %v17314_v15  ;;  %v17316_v45 = vld [vmem:[#allocation297_spill] sm:$0xff] }
 0x8f4   :  { %6910 = vmatpush2.bf16.msra.mxu0 %v17307_v57  ;;  %6951 = vmatpush2.bf16.msra.mxu1 %v17308_v0  ;;  %v17317_v57 = vld [vmem:[#allocation298_spill] sm:$0xff]  ;;  %v17318_v0 = vld [vmem:[#allocation299_spill] sm:$0xff] }
 0x8f5   :  { %6911 = vmatprep.subr.bf16.mxu0 %v17309_v19  ;;  %6952 = vmatprep.subr.bf16.mxu1 %v17310_v33  ;;  %v6791_v19 = vmax.f32 %v6783_v4, 0.0  ;;  %v6793_v33 = vmax.f32 %v6785_v14, 0.0  ;;  %v17325_v14 = vld [vmem:[#allocation306_spill] sm:$0xff]  ;;  %v17326_v4 = vld [vmem:[#allocation307_spill] sm:$0xff] }
 0x8f7   :  { %v13870_v44 = vpack.c.bf16 %v6791_v19, %v6791_v19  ;;  %v13872_v7 = vpack.c.bf16 %v6793_v33, %v6793_v33  ;;  %v17327_v19 = vld [vmem:[#allocation308_spill] sm:$0xff]  ;;  %v17328_v33 = vld [vmem:[#allocation309_spill] sm:$0xff] }
 0x8f8   :  { %6912 = vmatpush2.bf16.msra.mxu0 %v17311_v29  ;;  %6953 = vmatpush2.bf16.msra.mxu1 %v17312_v43  ;;  %v17320_v29 = vld [vmem:[#allocation301_spill] sm:$0xff]  ;;  %v17321_v43 = vld [vmem:[#allocation302_spill] sm:$0xff] }
 0x8f9   :  { %6913 = vmatprep.subr.bf16.mxu0 %v17315_v8  ;;  %6954 = vmatprep.subr.bf16.mxu1 %v17316_v45  ;;  %v17323_v8 = vld [vmem:[#allocation304_spill] sm:$0xff]  ;;  %v17324_v45 = vld [vmem:[#allocation305_spill] sm:$0xff] }
 0x8fc   :  { %6914 = vmatpush2.bf16.msra.mxu0 %v17317_v57  ;;  %6955 = vmatpush2.bf16.msra.mxu1 %v17318_v0  ;;  %v17337_v0 = vld [vmem:[#allocation318_spill] sm:$0xff] }
 0x8fd   :  { %6915 = vmatprep.subr.bf16.mxu0 %v17319_v50  ;;  %6956 = vmatprep.subr.bf16.mxu1 %v17320_v29  ;;  %v17333_v29 = vld [vmem:[#allocation314_spill] sm:$0xff]  ;;  %v17335_v50 = vld [vmem:[#allocation316_spill] sm:$0xff] }
 0x8fe   :  { %v17457_v57 = vld [vmem:[#allocation438_spill] sm:$0xff] }
 0x900   :  { %6916 = vmatpush2.bf16.msra.mxu0 %v17321_v43  ;;  %6957 = vmatpush2.bf16.msra.mxu1 %v17322_v61  ;;  %v17329_v61 = vld [vmem:[#allocation310_spill] sm:$0xff]  ;;  %v17332_v43 = vld [vmem:[#allocation313_spill] sm:$0xff] }
 0x901   :  { %6967 = vmatprep.subr.bf16.mxu0 %v17323_v8  ;;  %7008 = vmatprep.subr.bf16.mxu1 %v17324_v45  ;;  %v17330_v8 = vld [vmem:[#allocation311_spill] sm:$0xff]  ;;  %v17331_v45 = vld [vmem:[#allocation312_spill] sm:$0xff] }
 0x903   :  { %6918 = vmatmul.mubr.bf16.vlgmr.msra.gmra.mxu0 %v13870_v44  ;;  %6959 = vmatmul.mubr.bf16.vlgmr.msra.gmra.mxu1 %v13872_v7 }
 0x904   :  { %6968 = vmatpush1.bf16.msra.mxu0 %v17325_v14  ;;  %6999 = vmatprep.mubr.bf16.mxu0 %v13784_v2  ;;  %v17334_v14 = vld [vmem:[#allocation315_spill] sm:$0xff] }
 0x905   :  { %7009 = vmatpush1.bf16.msra.mxu1 %v17326_v4  ;;  %7040 = vmatprep.mubr.bf16.mxu1 %v13786_v35  ;;  %v17336_v4 = vld [vmem:[#allocation317_spill] sm:$0xff] }
 0x906   :  { %6969 = vmatprep.subr.bf16.mxu0 %v17327_v19  ;;  %7010 = vmatprep.subr.bf16.mxu1 %v17328_v33  ;;  %v17338_v19 = vld [vmem:[#allocation319_spill] sm:$0xff]  ;;  %v17339_v33 = vld [vmem:[#allocation320_spill] sm:$0xff] }
 0x908   :  { %6970 = vmatpush1.bf16.msra.mxu0 %v17329_v61  ;;  %v17340_v61 = vld [vmem:[#allocation321_spill] sm:$0xff] }
 0x909   :  { %7011 = vmatpush1.bf16.msra.mxu1 %v17330_v8  ;;  %6971 = vmatprep.subr.bf16.mxu0 %v17331_v45  ;;  %v17341_v8 = vld [vmem:[#allocation322_spill] sm:$0xff]  ;;  %v17342_v45 = vld [vmem:[#allocation323_spill] sm:$0xff] }
 0x90a   :  { %7012 = vmatprep.subr.bf16.mxu1 %v17332_v43  ;;  %v17343_v43 = vld [vmem:[#allocation324_spill] sm:$0xff] }
 0x90c   :  { %6972 = vmatpush1.bf16.msra.mxu0 %v17333_v29  ;;  %v17344_v29 = vld [vmem:[#allocation325_spill] sm:$0xff] }
 0x90d   :  { %7013 = vmatpush1.bf16.msra.mxu1 %v17334_v14  ;;  %6973 = vmatprep.subr.bf16.mxu0 %v17335_v50  ;;  %v17345_v14 = vld [vmem:[#allocation326_spill] sm:$0xff]  ;;  %v17346_v50 = vld [vmem:[#allocation327_spill] sm:$0xff] }
 0x90e   :  { %7014 = vmatprep.subr.bf16.mxu1 %v17336_v4  ;;  %v17347_v4 = vld [vmem:[#allocation328_spill] sm:$0xff] }
 0x910   :  { %6974 = vmatpush1.bf16.msra.mxu0 %v17337_v0  ;;  %v17348_v0 = vld [vmem:[#allocation329_spill] sm:$0xff] }
 0x911   :  { %7015 = vmatpush1.bf16.msra.mxu1 %v17338_v19  ;;  %6975 = vmatprep.subr.bf16.mxu0 %v17339_v33  ;;  %v17349_v19 = vld [vmem:[#allocation330_spill] sm:$0xff]  ;;  %v17350_v33 = vld [vmem:[#allocation331_spill] sm:$0xff] }
 0x912   :  { %7016 = vmatprep.subr.bf16.mxu1 %v17340_v61  ;;  %v17351_v61 = vld [vmem:[#allocation332_spill] sm:$0xff] }
 0x914   :  { %6976 = vmatpush1.bf16.msra.mxu0 %v17341_v8  ;;  %v17352_v8 = vld [vmem:[#allocation333_spill] sm:$0xff] }
 0x915   :  { %7017 = vmatpush1.bf16.msra.mxu1 %v17342_v45  ;;  %6977 = vmatprep.subr.bf16.mxu0 %v17343_v43  ;;  %v17353_v45 = vld [vmem:[#allocation334_spill] sm:$0xff]  ;;  %v17354_v43 = vld [vmem:[#allocation335_spill] sm:$0xff] }
 0x916   :  { %7018 = vmatprep.subr.bf16.mxu1 %v17344_v29  ;;  %v17355_v29 = vld [vmem:[#allocation336_spill] sm:$0xff] }
 0x918   :  { %6978 = vmatpush1.bf16.msra.mxu0 %v17345_v14  ;;  %v17356_v14 = vld [vmem:[#allocation337_spill] sm:$0xff] }
 0x919   :  { %7019 = vmatpush1.bf16.msra.mxu1 %v17346_v50  ;;  %6979 = vmatprep.subr.bf16.mxu0 %v17347_v4  ;;  %v17357_v50 = vld [vmem:[#allocation338_spill] sm:$0xff]  ;;  %v17358_v4 = vld [vmem:[#allocation339_spill] sm:$0xff] }
 0x91a   :  { %7020 = vmatprep.subr.bf16.mxu1 %v17348_v0  ;;  %v17359_v0 = vld [vmem:[#allocation340_spill] sm:$0xff] }
 0x91c   :  { %6980 = vmatpush1.bf16.msra.mxu0 %v17349_v19  ;;  %v17360_v19 = vld [vmem:[#allocation341_spill] sm:$0xff] }
 0x91d   :  { %7021 = vmatpush1.bf16.msra.mxu1 %v17350_v33  ;;  %6981 = vmatprep.subr.bf16.mxu0 %v17351_v61  ;;  %v17361_v33 = vld [vmem:[#allocation342_spill] sm:$0xff]  ;;  %v17362_v61 = vld [vmem:[#allocation343_spill] sm:$0xff] }
 0x91e   :  { %7022 = vmatprep.subr.bf16.mxu1 %v17352_v8  ;;  %v17363_v8 = vld [vmem:[#allocation344_spill] sm:$0xff] }
 0x920   :  { %6982 = vmatpush1.bf16.msra.mxu0 %v17353_v45  ;;  %v17364_v45 = vld [vmem:[#allocation345_spill] sm:$0xff] }
 0x921   :  { %7023 = vmatpush1.bf16.msra.mxu1 %v17354_v43  ;;  %6983 = vmatprep.subr.bf16.mxu0 %v17355_v29  ;;  %v17365_v43 = vld [vmem:[#allocation346_spill] sm:$0xff]  ;;  %v17366_v29 = vld [vmem:[#allocation347_spill] sm:$0xff] }
 0x922   :  { %7024 = vmatprep.subr.bf16.mxu1 %v17356_v14  ;;  %v17367_v14 = vld [vmem:[#allocation348_spill] sm:$0xff] }
 0x924   :  { %6984 = vmatpush2.bf16.msra.mxu0 %v17357_v50  ;;  %v17368_v50 = vld [vmem:[#allocation349_spill] sm:$0xff] }
 0x925   :  { %7025 = vmatpush2.bf16.msra.mxu1 %v17358_v4  ;;  %6985 = vmatprep.subr.bf16.mxu0 %v17359_v0  ;;  %v17369_v4 = vld [vmem:[#allocation350_spill] sm:$0xff]  ;;  %v17370_v0 = vld [vmem:[#allocation351_spill] sm:$0xff] }
 0x926   :  { %7026 = vmatprep.subr.bf16.mxu1 %v17360_v19  ;;  %v17371_v19 = vld [vmem:[#allocation352_spill] sm:$0xff] }
 0x928   :  { %6986 = vmatpush2.bf16.msra.mxu0 %v17361_v33  ;;  %v17372_v33 = vld [vmem:[#allocation353_spill] sm:$0xff] }
 0x929   :  { %7027 = vmatpush2.bf16.msra.mxu1 %v17362_v61  ;;  %6987 = vmatprep.subr.bf16.mxu0 %v17363_v8  ;;  %v17373_v61 = vld [vmem:[#allocation354_spill] sm:$0xff]  ;;  %v17374_v8 = vld [vmem:[#allocation355_spill] sm:$0xff] }
 0x92a   :  { %7028 = vmatprep.subr.bf16.mxu1 %v17364_v45  ;;  %v17375_v45 = vld [vmem:[#allocation356_spill] sm:$0xff] }
 0x92c   :  { %6988 = vmatpush2.bf16.msra.mxu0 %v17365_v43  ;;  %v17376_v43 = vld [vmem:[#allocation357_spill] sm:$0xff] }
 0x92d   :  { %7029 = vmatpush2.bf16.msra.mxu1 %v17366_v29  ;;  %6989 = vmatprep.subr.bf16.mxu0 %v17367_v14  ;;  %v17377_v29 = vld [vmem:[#allocation358_spill] sm:$0xff]  ;;  %v17378_v14 = vld [vmem:[#allocation359_spill] sm:$0xff] }
 0x92e   :  { %7030 = vmatprep.subr.bf16.mxu1 %v17368_v50  ;;  %v17379_v50 = vld [vmem:[#allocation360_spill] sm:$0xff] }
 0x930   :  { %6990 = vmatpush2.bf16.msra.mxu0 %v17369_v4  ;;  %v17380_v4 = vld [vmem:[#allocation361_spill] sm:$0xff] }
 0x931   :  { %7031 = vmatpush2.bf16.msra.mxu1 %v17370_v0  ;;  %6991 = vmatprep.subr.bf16.mxu0 %v17371_v19  ;;  %v17381_v0 = vld [vmem:[#allocation362_spill] sm:$0xff]  ;;  %v17382_v19 = vld [vmem:[#allocation363_spill] sm:$0xff] }
 0x932   :  { %7032 = vmatprep.subr.bf16.mxu1 %v17372_v33  ;;  %v17383_v33 = vld [vmem:[#allocation364_spill] sm:$0xff] }
 0x934   :  { %6992 = vmatpush2.bf16.msra.mxu0 %v17373_v61  ;;  %v17384_v61 = vld [vmem:[#allocation365_spill] sm:$0xff] }
 0x935   :  { %7033 = vmatpush2.bf16.msra.mxu1 %v17374_v8  ;;  %6993 = vmatprep.subr.bf16.mxu0 %v17375_v45  ;;  %v17385_v8 = vld [vmem:[#allocation366_spill] sm:$0xff]  ;;  %v17386_v45 = vld [vmem:[#allocation367_spill] sm:$0xff] }
 0x936   :  { %7034 = vmatprep.subr.bf16.mxu1 %v17376_v43  ;;  %v17387_v43 = vld [vmem:[#allocation368_spill] sm:$0xff] }
 0x938   :  { %6994 = vmatpush2.bf16.msra.mxu0 %v17377_v29  ;;  %v17388_v29 = vld [vmem:[#allocation369_spill] sm:$0xff] }
 0x939   :  { %7035 = vmatpush2.bf16.msra.mxu1 %v17378_v14  ;;  %6995 = vmatprep.subr.bf16.mxu0 %v17379_v50  ;;  %v17399_v50 = vld [vmem:[#allocation380_spill] sm:$0xff]  ;;  %v17401_v14 = vld [vmem:[#allocation382_spill] sm:$0xff] }
 0x93a   :  { %7036 = vmatprep.subr.bf16.mxu1 %v17380_v4  ;;  %v17389_v4 = vld [vmem:[#allocation370_spill] sm:$0xff] }
 0x93c   :  { %6996 = vmatpush2.bf16.msra.mxu0 %v17381_v0  ;;  %v17397_v0 = vld [vmem:[#allocation378_spill] sm:$0xff] }
 0x93d   :  { %7037 = vmatpush2.bf16.msra.mxu1 %v17382_v19  ;;  %6997 = vmatprep.subr.bf16.mxu0 %v17383_v33  ;;  %v17390_v19 = vld [vmem:[#allocation371_spill] sm:$0xff]  ;;  %v17396_v33 = vld [vmem:[#allocation377_spill] sm:$0xff] }
 0x93e   :  { %7038 = vmatprep.subr.bf16.mxu1 %v17384_v61  ;;  %v17391_v61 = vld [vmem:[#allocation372_spill] sm:$0xff] }
 0x940   :  { %6998 = vmatpush2.bf16.msra.mxu0 %v17385_v8  ;;  %v17392_v8 = vld [vmem:[#allocation373_spill] sm:$0xff] }
 0x941   :  { %7039 = vmatpush2.bf16.msra.mxu1 %v17386_v45  ;;  %7049 = vmatprep.subr.bf16.mxu0 %v17387_v43  ;;  %v17393_v45 = vld [vmem:[#allocation374_spill] sm:$0xff]  ;;  %v17394_v43 = vld [vmem:[#allocation375_spill] sm:$0xff] }
 0x942   :  { %7090 = vmatprep.subr.bf16.mxu1 %v17388_v29  ;;  %v17395_v29 = vld [vmem:[#allocation376_spill] sm:$0xff] }
 0x943   :  { %7000 = vmatmul.mubr.bf16.vlgmr.msra.gmra.mxu0 %v13790_v41 }
 0x944   :  { %7041 = vmatmul.mubr.bf16.vlgmr.msra.gmra.mxu1 %v13792_v5  ;;  %7050 = vmatpush1.bf16.msra.mxu0 %v17389_v4  ;;  %v17398_v4 = vld [vmem:[#allocation379_spill] sm:$0xff] }
 0x945   :  { %7081 = vmatprep.mubr.bf16.mxu0 %v13798_v1  ;;  %7091 = vmatpush1.bf16.msra.mxu1 %v17390_v19  ;;  %v17400_v19 = vld [vmem:[#allocation381_spill] sm:$0xff] }
 0x946   :  { %7122 = vmatprep.mubr.bf16.mxu1 %v13800_v6  ;;  %7051 = vmatprep.subr.bf16.mxu0 %v17391_v61  ;;  %v17402_v61 = vld [vmem:[#allocation383_spill] sm:$0xff] }
 0x947   :  { %7092 = vmatprep.subr.bf16.mxu1 %v17392_v8  ;;  %v17403_v8 = vld [vmem:[#allocation384_spill] sm:$0xff] }
 0x948   :  { %7052 = vmatpush1.bf16.msra.mxu0 %v17393_v45  ;;  %v17404_v45 = vld [vmem:[#allocation385_spill] sm:$0xff] }
 0x949   :  { %7093 = vmatpush1.bf16.msra.mxu1 %v17394_v43  ;;  %7053 = vmatprep.subr.bf16.mxu0 %v17395_v29  ;;  %v17405_v43 = vld [vmem:[#allocation386_spill] sm:$0xff]  ;;  %v17406_v29 = vld [vmem:[#allocation387_spill] sm:$0xff] }
 0x94a   :  { %7094 = vmatprep.subr.bf16.mxu1 %v17396_v33  ;;  %v17407_v33 = vld [vmem:[#allocation388_spill] sm:$0xff] }
 0x94c   :  { %7054 = vmatpush1.bf16.msra.mxu0 %v17397_v0  ;;  %v17408_v0 = vld [vmem:[#allocation389_spill] sm:$0xff] }
 0x94d   :  { %7095 = vmatpush1.bf16.msra.mxu1 %v17398_v4  ;;  %7055 = vmatprep.subr.bf16.mxu0 %v17399_v50  ;;  %v17409_v4 = vld [vmem:[#allocation390_spill] sm:$0xff]  ;;  %v17410_v50 = vld [vmem:[#allocation391_spill] sm:$0xff] }
 0x94e   :  { %7096 = vmatprep.subr.bf16.mxu1 %v17400_v19  ;;  %v17411_v19 = vld [vmem:[#allocation392_spill] sm:$0xff] }
 0x950   :  { %7056 = vmatpush1.bf16.msra.mxu0 %v17401_v14  ;;  %v17412_v14 = vld [vmem:[#allocation393_spill] sm:$0xff] }
 0x951   :  { %7097 = vmatpush1.bf16.msra.mxu1 %v17402_v61  ;;  %7057 = vmatprep.subr.bf16.mxu0 %v17403_v8  ;;  %v17413_v61 = vld [vmem:[#allocation394_spill] sm:$0xff]  ;;  %v17414_v8 = vld [vmem:[#allocation395_spill] sm:$0xff] }
 0x952   :  { %7098 = vmatprep.subr.bf16.mxu1 %v17404_v45  ;;  %v17415_v45 = vld [vmem:[#allocation396_spill] sm:$0xff] }
 0x954   :  { %7058 = vmatpush1.bf16.msra.mxu0 %v17405_v43  ;;  %v17416_v43 = vld [vmem:[#allocation397_spill] sm:$0xff] }
 0x955   :  { %7099 = vmatpush1.bf16.msra.mxu1 %v17406_v29  ;;  %7059 = vmatprep.subr.bf16.mxu0 %v17407_v33  ;;  %v17417_v29 = vld [vmem:[#allocation398_spill] sm:$0xff]  ;;  %v17418_v33 = vld [vmem:[#allocation399_spill] sm:$0xff] }
 0x956   :  { %7100 = vmatprep.subr.bf16.mxu1 %v17408_v0  ;;  %v17419_v0 = vld [vmem:[#allocation400_spill] sm:$0xff] }
 0x958   :  { %7060 = vmatpush1.bf16.msra.mxu0 %v17409_v4  ;;  %v17420_v4 = vld [vmem:[#allocation401_spill] sm:$0xff] }
 0x959   :  { %7101 = vmatpush1.bf16.msra.mxu1 %v17410_v50  ;;  %7061 = vmatprep.subr.bf16.mxu0 %v17411_v19  ;;  %v17421_v50 = vld [vmem:[#allocation402_spill] sm:$0xff]  ;;  %v17422_v19 = vld [vmem:[#allocation403_spill] sm:$0xff] }
 0x95a   :  { %7102 = vmatprep.subr.bf16.mxu1 %v17412_v14  ;;  %v17423_v14 = vld [vmem:[#allocation404_spill] sm:$0xff] }
 0x95c   :  { %7062 = vmatpush1.bf16.msra.mxu0 %v17413_v61  ;;  %v17424_v61 = vld [vmem:[#allocation405_spill] sm:$0xff] }
 0x95d   :  { %7103 = vmatpush1.bf16.msra.mxu1 %v17414_v8  ;;  %7063 = vmatprep.subr.bf16.mxu0 %v17415_v45  ;;  %v17425_v8 = vld [vmem:[#allocation406_spill] sm:$0xff]  ;;  %v17426_v45 = vld [vmem:[#allocation407_spill] sm:$0xff] }
 0x95e   :  { %7104 = vmatprep.subr.bf16.mxu1 %v17416_v43  ;;  %v17427_v43 = vld [vmem:[#allocation408_spill] sm:$0xff] }
 0x960   :  { %7064 = vmatpush1.bf16.msra.mxu0 %v17417_v29  ;;  %v17428_v29 = vld [vmem:[#allocation409_spill] sm:$0xff] }
 0x961   :  { %7105 = vmatpush1.bf16.msra.mxu1 %v17418_v33  ;;  %7065 = vmatprep.subr.bf16.mxu0 %v17419_v0  ;;  %v17429_v33 = vld [vmem:[#allocation410_spill] sm:$0xff]  ;;  %v17430_v0 = vld [vmem:[#allocation411_spill] sm:$0xff] }
 0x962   :  { %7106 = vmatprep.subr.bf16.mxu1 %v17420_v4  ;;  %v17431_v4 = vld [vmem:[#allocation412_spill] sm:$0xff] }
 0x964   :  { %7066 = vmatpush2.bf16.msra.mxu0 %v17421_v50  ;;  %v17432_v50 = vld [vmem:[#allocation413_spill] sm:$0xff] }
 0x965   :  { %7107 = vmatpush2.bf16.msra.mxu1 %v17422_v19  ;;  %7067 = vmatprep.subr.bf16.mxu0 %v17423_v14  ;;  %v17433_v19 = vld [vmem:[#allocation414_spill] sm:$0xff]  ;;  %v17434_v14 = vld [vmem:[#allocation415_spill] sm:$0xff] }
 0x966   :  { %7108 = vmatprep.subr.bf16.mxu1 %v17424_v61  ;;  %v17435_v61 = vld [vmem:[#allocation416_spill] sm:$0xff] }
 0x968   :  { %7068 = vmatpush2.bf16.msra.mxu0 %v17425_v8  ;;  %v17436_v8 = vld [vmem:[#allocation417_spill] sm:$0xff] }
 0x969   :  { %7109 = vmatpush2.bf16.msra.mxu1 %v17426_v45  ;;  %7069 = vmatprep.subr.bf16.mxu0 %v17427_v43  ;;  %v17437_v45 = vld [vmem:[#allocation418_spill] sm:$0xff]  ;;  %v17438_v43 = vld [vmem:[#allocation419_spill] sm:$0xff] }
 0x96a   :  { %7110 = vmatprep.subr.bf16.mxu1 %v17428_v29  ;;  %v17439_v29 = vld [vmem:[#allocation420_spill] sm:$0xff] }
 0x96c   :  { %7070 = vmatpush2.bf16.msra.mxu0 %v17429_v33  ;;  %v17440_v33 = vld [vmem:[#allocation421_spill] sm:$0xff] }
 0x96d   :  { %7111 = vmatpush2.bf16.msra.mxu1 %v17430_v0  ;;  %7071 = vmatprep.subr.bf16.mxu0 %v17431_v4  ;;  %v17441_v0 = vld [vmem:[#allocation422_spill] sm:$0xff]  ;;  %v17442_v4 = vld [vmem:[#allocation423_spill] sm:$0xff] }
 0x96e   :  { %7112 = vmatprep.subr.bf16.mxu1 %v17432_v50  ;;  %v17443_v50 = vld [vmem:[#allocation424_spill] sm:$0xff] }
 0x970   :  { %7072 = vmatpush2.bf16.msra.mxu0 %v17433_v19  ;;  %v17444_v19 = vld [vmem:[#allocation425_spill] sm:$0xff] }
 0x971   :  { %7113 = vmatpush2.bf16.msra.mxu1 %v17434_v14  ;;  %7073 = vmatprep.subr.bf16.mxu0 %v17435_v61  ;;  %v17445_v14 = vld [vmem:[#allocation426_spill] sm:$0xff]  ;;  %v17446_v61 = vld [vmem:[#allocation427_spill] sm:$0xff] }
 0x972   :  { %7114 = vmatprep.subr.bf16.mxu1 %v17436_v8  ;;  %v17447_v8 = vld [vmem:[#allocation428_spill] sm:$0xff] }
 0x974   :  { %7074 = vmatpush2.bf16.msra.mxu0 %v17437_v45  ;;  %v17448_v45 = vld [vmem:[#allocation429_spill] sm:$0xff] }
 0x975   :  { %7115 = vmatpush2.bf16.msra.mxu1 %v17438_v43  ;;  %7075 = vmatprep.subr.bf16.mxu0 %v17439_v29  ;;  %v17449_v43 = vld [vmem:[#allocation430_spill] sm:$0xff]  ;;  %v17450_v29 = vld [vmem:[#allocation431_spill] sm:$0xff] }
 0x976   :  { %7116 = vmatprep.subr.bf16.mxu1 %v17440_v33  ;;  %v17451_v33 = vld [vmem:[#allocation432_spill] sm:$0xff] }
 0x978   :  { %7076 = vmatpush2.bf16.msra.mxu0 %v17441_v0  ;;  %v17452_v0 = vld [vmem:[#allocation433_spill] sm:$0xff] }
 0x979   :  { %7117 = vmatpush2.bf16.msra.mxu1 %v17442_v4  ;;  %7077 = vmatprep.subr.bf16.mxu0 %v17443_v50  ;;  %v17454_v4 = vld [vmem:[#allocation435_spill] sm:$0xff] }
 0x97a   :  { %7118 = vmatprep.subr.bf16.mxu1 %v17444_v19 }
 0x97c   :  { %7078 = vmatpush2.bf16.msra.mxu0 %v17445_v14  ;;  %v17453_v14 = vld [vmem:[#allocation434_spill] sm:$0xff] }
 0x97d   :  { %7119 = vmatpush2.bf16.msra.mxu1 %v17446_v61  ;;  %7079 = vmatprep.subr.bf16.mxu0 %v17447_v8 }
 0x97e   :  { %7120 = vmatprep.subr.bf16.mxu1 %v17448_v45  ;;  %v17455_v45 = vld [vmem:[#allocation436_spill] sm:$0xff] }
 0x980   :  { %7080 = vmatpush2.bf16.msra.mxu0 %v17449_v43 }
 0x981   :  { %7121 = vmatpush2.bf16.msra.mxu1 %v17450_v29  ;;  %7131 = vmatprep.subr.bf16.mxu0 %v17451_v33  ;;  %v17456_v33 = vld [vmem:[#allocation437_spill] sm:$0xff] }
 0x982   :  { %7172 = vmatprep.subr.bf16.mxu1 %v17452_v0 }
 0x983   :  { %7082 = vmatmul.mubr.bf16.vlgmr.msra.gmra.mxu0 %v13870_v44  ;;  %v6837_v50 = vpop.f32.mrf.mxu0  ;;  %v6878_v19 = vpop.f32.mrf.mxu1 }
 0x984   :  { %7123 = vmatmul.mubr.bf16.vlgmr.msra.gmra.mxu1 %v13872_v7  ;;  %v6838_v61 = vadd.f32 %v6837_v50, %v17453_v14  ;;  %7132 = vmatpush1.bf16.msra.mxu0 %v17454_v4  ;;  %v17458_v4 = vld [vmem:[#allocation439_spill] sm:$0xff] }
 0x985   :  { %7163 = vmatprep.mubr.bf16.mxu0 %v13784_v2  ;;  %7173 = vmatpush1.bf16.msra.mxu1 %v17455_v45  ;;  %v6839_v43 = vpop.f32.mrf.mxu0  ;;  %v6880_v29 = vpop.f32.mrf.mxu1 }
 0x986   :  { %v14018_v8 = vadd.f32 %v6878_v19, %v6838_v61  ;;  %7204 = vmatprep.mubr.bf16.mxu1 %v13786_v35  ;;  %v6840_v0 = vadd.f32 %v6839_v43, %v12885_v3  ;;  %7133 = vmatprep.subr.bf16.mxu0 %v17456_v33  ;;  %v17460_v61 = vld [vmem:[#allocation441_spill] sm:$0xff]  ;;  %v17461_v19 = vld [vmem:[#allocation442_spill] sm:$0xff]  ;;  %v17463_v43 = vld [vmem:[#allocation444_spill] sm:$0xff] }
 0x987   :  { %7174 = vmatprep.subr.bf16.mxu1 %v17457_v57  ;;  %v6841_v15 = vpop.f32.mrf.mxu0  ;;  %v6882_v50 = vpop.f32.mrf.mxu1  ;;  %v17464_v33 = vld [vmem:[#allocation445_spill] sm:$0xff]  ;;  %v17525_v57 = vld [vmem:[#allocation506_spill] sm:$0xff] }
 0x988   :  { %v14024_v14 = vadd.f32 %v6880_v29, %v6840_v0  ;;  %7134 = vmatpush1.bf16.msra.mxu0 %v17458_v4  ;;  %v17465_v15 = vld [vmem:[#allocation446_spill] sm:$0xff]  ;;  %v17466_v0 = vld [vmem:[#allocation447_spill] sm:$0xff]  ;;  %v17467_v29 = vld [vmem:[#allocation448_spill] sm:$0xff] }
 0x989   :  { %7175 = vmatpush1.bf16.msra.mxu1 %v17459_v34  ;;  %v6842_v45 = vpop.f32.mrf.mxu0  ;;  %v6883_v51 = vpop.f32.mrf.mxu1  ;;  %7135 = vmatprep.subr.bf16.mxu0 %v17460_v61  ;;  %v17468_v50 = vld [vmem:[#allocation449_spill] sm:$0xff]  ;;  %v17471_v61 = vld [vmem:[#allocation452_spill] sm:$0xff]  ;;  %v17522_v34 = vld [vmem:[#allocation503_spill] sm:$0xff] }
 0x98a   :  { %7176 = vmatprep.subr.bf16.mxu1 %v17461_v19  ;;  %v17469_v45 = vld [vmem:[#allocation450_spill] sm:$0xff]  ;;  %v17470_v51 = vld [vmem:[#allocation451_spill] sm:$0xff]  ;;  %v17472_v19 = vld [vmem:[#allocation453_spill] sm:$0xff] }
 0x98c   :  { %7136 = vmatpush1.bf16.msra.mxu0 %v17462_v31  ;;  %v17473_v31 = vld [vmem:[#allocation454_spill] sm:$0xff] }
 0x98d   :  { %7177 = vmatpush1.bf16.msra.mxu1 %v17463_v43  ;;  %7137 = vmatprep.subr.bf16.mxu0 %v17464_v33  ;;  %v17474_v43 = vld [vmem:[#allocation455_spill] sm:$0xff]  ;;  %v17475_v33 = vld [vmem:[#allocation456_spill] sm:$0xff] }
 0x98e   :  { %7178 = vmatprep.subr.bf16.mxu1 %v17465_v15  ;;  %v17476_v15 = vld [vmem:[#allocation457_spill] sm:$0xff] }
 0x990   :  { %7138 = vmatpush1.bf16.msra.mxu0 %v17466_v0  ;;  %v17477_v0 = vld [vmem:[#allocation458_spill] sm:$0xff] }
 0x991   :  { %7179 = vmatpush1.bf16.msra.mxu1 %v17467_v29  ;;  %7139 = vmatprep.subr.bf16.mxu0 %v17468_v50  ;;  %v17478_v29 = vld [vmem:[#allocation459_spill] sm:$0xff]  ;;  %v17479_v50 = vld [vmem:[#allocation460_spill] sm:$0xff] }
 0x992   :  { %7180 = vmatprep.subr.bf16.mxu1 %v17469_v45  ;;  %v17480_v45 = vld [vmem:[#allocation461_spill] sm:$0xff] }
 0x994   :  { %7140 = vmatpush1.bf16.msra.mxu0 %v17470_v51  ;;  %v17481_v51 = vld [vmem:[#allocation462_spill] sm:$0xff] }
 0x995   :  { %7181 = vmatpush1.bf16.msra.mxu1 %v17471_v61  ;;  %7141 = vmatprep.subr.bf16.mxu0 %v17472_v19  ;;  %v17482_v61 = vld [vmem:[#allocation463_spill] sm:$0xff]  ;;  %v17483_v19 = vld [vmem:[#allocation464_spill] sm:$0xff] }
 0x996   :  { %7182 = vmatprep.subr.bf16.mxu1 %v17473_v31  ;;  %v17484_v31 = vld [vmem:[#allocation465_spill] sm:$0xff] }
 0x998   :  { %7142 = vmatpush1.bf16.msra.mxu0 %v17474_v43  ;;  %v17485_v43 = vld [vmem:[#allocation466_spill] sm:$0xff] }
 0x999   :  { %7183 = vmatpush1.bf16.msra.mxu1 %v17475_v33  ;;  %7143 = vmatprep.subr.bf16.mxu0 %v17476_v15  ;;  %v17486_v33 = vld [vmem:[#allocation467_spill] sm:$0xff]  ;;  %v17487_v15 = vld [vmem:[#allocation468_spill] sm:$0xff] }
 0x99a   :  { %7184 = vmatprep.subr.bf16.mxu1 %v17477_v0  ;;  %v17488_v0 = vld [vmem:[#allocation469_spill] sm:$0xff] }
 0x99c   :  { %7144 = vmatpush1.bf16.msra.mxu0 %v17478_v29  ;;  %v17489_v29 = vld [vmem:[#allocation470_spill] sm:$0xff] }
 0x99d   :  { %7185 = vmatpush1.bf16.msra.mxu1 %v17479_v50  ;;  %7145 = vmatprep.subr.bf16.mxu0 %v17480_v45  ;;  %v17490_v50 = vld [vmem:[#allocation471_spill] sm:$0xff]  ;;  %v17491_v45 = vld [vmem:[#allocation472_spill] sm:$0xff] }
 0x99e   :  { %7186 = vmatprep.subr.bf16.mxu1 %v17481_v51  ;;  %v17492_v51 = vld [vmem:[#allocation473_spill] sm:$0xff] }
 0x9a0   :  { %7146 = vmatpush1.bf16.msra.mxu0 %v17482_v61  ;;  %v17493_v61 = vld [vmem:[#allocation474_spill] sm:$0xff] }
 0x9a1   :  { %7187 = vmatpush1.bf16.msra.mxu1 %v17483_v19  ;;  %7147 = vmatprep.subr.bf16.mxu0 %v17484_v31  ;;  %v17494_v19 = vld [vmem:[#allocation475_spill] sm:$0xff]  ;;  %v17495_v31 = vld [vmem:[#allocation476_spill] sm:$0xff] }
 0x9a2   :  { %7188 = vmatprep.subr.bf16.mxu1 %v17485_v43  ;;  %v17496_v43 = vld [vmem:[#allocation477_spill] sm:$0xff] }
 0x9a4   :  { %7148 = vmatpush2.bf16.msra.mxu0 %v17486_v33  ;;  %v17497_v33 = vld [vmem:[#allocation478_spill] sm:$0xff] }
 0x9a5   :  { %7189 = vmatpush2.bf16.msra.mxu1 %v17487_v15  ;;  %7149 = vmatprep.subr.bf16.mxu0 %v17488_v0  ;;  %v17498_v15 = vld [vmem:[#allocation479_spill] sm:$0xff]  ;;  %v17499_v0 = vld [vmem:[#allocation480_spill] sm:$0xff] }
 0x9a6   :  { %7190 = vmatprep.subr.bf16.mxu1 %v17489_v29  ;;  %v17500_v29 = vld [vmem:[#allocation481_spill] sm:$0xff] }
 0x9a8   :  { %7150 = vmatpush2.bf16.msra.mxu0 %v17490_v50  ;;  %v17501_v50 = vld [vmem:[#allocation482_spill] sm:$0xff] }
 0x9a9   :  { %7191 = vmatpush2.bf16.msra.mxu1 %v17491_v45  ;;  %7151 = vmatprep.subr.bf16.mxu0 %v17492_v51  ;;  %v17502_v45 = vld [vmem:[#allocation483_spill] sm:$0xff]  ;;  %v17503_v51 = vld [vmem:[#allocation484_spill] sm:$0xff] }
 0x9aa   :  { %7192 = vmatprep.subr.bf16.mxu1 %v17493_v61  ;;  %v17504_v61 = vld [vmem:[#allocation485_spill] sm:$0xff] }
 0x9ac   :  { %7152 = vmatpush2.bf16.msra.mxu0 %v17494_v19  ;;  %v17505_v19 = vld [vmem:[#allocation486_spill] sm:$0xff] }
 0x9ad   :  { %7193 = vmatpush2.bf16.msra.mxu1 %v17495_v31  ;;  %7153 = vmatprep.subr.bf16.mxu0 %v17496_v43  ;;  %v17506_v31 = vld [vmem:[#allocation487_spill] sm:$0xff]  ;;  %v17507_v43 = vld [vmem:[#allocation488_spill] sm:$0xff] }
 0x9ae   :  { %7194 = vmatprep.subr.bf16.mxu1 %v17497_v33  ;;  %v17508_v33 = vld [vmem:[#allocation489_spill] sm:$0xff] }
 0x9b0   :  { %7154 = vmatpush2.bf16.msra.mxu0 %v17498_v15  ;;  %v17509_v15 = vld [vmem:[#allocation490_spill] sm:$0xff] }
 0x9b1   :  { %7195 = vmatpush2.bf16.msra.mxu1 %v17499_v0  ;;  %7155 = vmatprep.subr.bf16.mxu0 %v17500_v29  ;;  %v17510_v0 = vld [vmem:[#allocation491_spill] sm:$0xff]  ;;  %v17511_v29 = vld [vmem:[#allocation492_spill] sm:$0xff] }
 0x9b2   :  { %7196 = vmatprep.subr.bf16.mxu1 %v17501_v50  ;;  %v17512_v50 = vld [vmem:[#allocation493_spill] sm:$0xff] }
 0x9b4   :  { %7156 = vmatpush2.bf16.msra.mxu0 %v17502_v45  ;;  %v17513_v45 = vld [vmem:[#allocation494_spill] sm:$0xff] }
 0x9b5   :  { %7197 = vmatpush2.bf16.msra.mxu1 %v17503_v51  ;;  %7157 = vmatprep.subr.bf16.mxu0 %v17504_v61  ;;  %v17514_v51 = vld [vmem:[#allocation495_spill] sm:$0xff]  ;;  %v17515_v61 = vld [vmem:[#allocation496_spill] sm:$0xff] }
 0x9b6   :  { %7198 = vmatprep.subr.bf16.mxu1 %v17505_v19  ;;  %v17516_v19 = vld [vmem:[#allocation497_spill] sm:$0xff] }
 0x9b8   :  { %7158 = vmatpush2.bf16.msra.mxu0 %v17506_v31  ;;  %v17517_v31 = vld [vmem:[#allocation498_spill] sm:$0xff] }
 0x9b9   :  { %7199 = vmatpush2.bf16.msra.mxu1 %v17507_v43  ;;  %7159 = vmatprep.subr.bf16.mxu0 %v17508_v33 }
 0x9ba   :  { %7200 = vmatprep.subr.bf16.mxu1 %v17509_v15 }
 0x9bc   :  { %7160 = vmatpush2.bf16.msra.mxu0 %v17510_v0 }
 0x9bd   :  { %7201 = vmatpush2.bf16.msra.mxu1 %v17511_v29  ;;  %7161 = vmatprep.subr.bf16.mxu0 %v17512_v50  ;;  %v17518_v29 = vld [vmem:[#allocation499_spill] sm:$0xff] }
 0x9be   :  { %7202 = vmatprep.subr.bf16.mxu1 %v17513_v45  ;;  %v17519_v45 = vld [vmem:[#allocation500_spill] sm:$0xff] }
 0x9c0   :  { %7162 = vmatpush2.bf16.msra.mxu0 %v17514_v51 }
 0x9c1   :  { %7203 = vmatpush2.bf16.msra.mxu1 %v17515_v61  ;;  %7213 = vmatprep.subr.bf16.mxu0 %v17516_v19 }
 0x9c2   :  { %7254 = vmatprep.subr.bf16.mxu1 %v17517_v31 }
 0x9c3   :  { %v6919_v43 = vpop.f32.mrf.mxu0  ;;  %v6960_v33 = vpop.f32.mrf.mxu1  ;;  %7164 = vmatmul.mubr.bf16.vlgmr.msra.gmra.mxu0 %v13790_v41 }
 0x9c4   :  { %v6920_v0 = vadd.f32 %v6919_v43, %v14018_v8  ;;  %7205 = vmatmul.mubr.bf16.vlgmr.msra.gmra.mxu1 %v13792_v5  ;;  %7214 = vmatpush1.bf16.msra.mxu0 %v17518_v29  ;;  %v17520_v43 = vld [vmem:[#allocation501_spill] sm:$0xff]  ;;  %v17521_v29 = vld [vmem:[#allocation502_spill] sm:$0xff] }
 0x9c5   :  { %7245 = vmatprep.mubr.bf16.mxu0 %v13798_v1  ;;  %7255 = vmatpush1.bf16.msra.mxu1 %v17519_v45  ;;  %v6921_v51 = vpop.f32.mrf.mxu0  ;;  %v6962_v61 = vpop.f32.mrf.mxu1 }
 0x9c6   :  { %v14092_v50 = vadd.f32 %v6960_v33, %v6920_v0  ;;  %7286 = vmatprep.mubr.bf16.mxu1 %v13800_v6  ;;  %v6922_v31 = vadd.f32 %v6921_v51, %v14024_v14  ;;  %7215 = vmatprep.subr.bf16.mxu0 %v12908_v59  ;;  %v17523_v33 = vld [vmem:[#allocation504_spill] sm:$0xff]  ;;  %v17524_v0 = vld [vmem:[#allocation505_spill] sm:$0xff]  ;;  %v17526_v14 = vld [vmem:[#allocation507_spill] sm:$0xff] }
 0x9c7   :  { %v6923_v19 = vpop.f32.mrf.mxu0  ;;  %v6964_v8 = vpop.f32.mrf.mxu1  ;;  %7256 = vmatprep.subr.bf16.mxu1 %v17520_v43  ;;  %v17528_v51 = vld [vmem:[#allocation509_spill] sm:$0xff] }
 0x9c8   :  { %v14098_v15 = vadd.f32 %v6962_v61, %v6922_v31  ;;  %7216 = vmatpush1.bf16.msra.mxu0 %v17521_v29  ;;  %v17527_v19 = vld [vmem:[#allocation508_spill] sm:$0xff]  ;;  %v17529_v31 = vld [vmem:[#allocation510_spill] sm:$0xff]  ;;  %v17530_v61 = vld [vmem:[#allocation511_spill] sm:$0xff] }
 0x9c9   :  { %7257 = vmatpush1.bf16.msra.mxu1 %v17522_v34  ;;  %v6924_v45 = vpop.f32.mrf.mxu0  ;;  %v6965_v4 = vpop.f32.mrf.mxu1  ;;  %7217 = vmatprep.subr.bf16.mxu0 %v17523_v33  ;;  %v17531_v8 = vld [vmem:[#allocation512_spill] sm:$0xff]  ;;  %v17534_v33 = vld [vmem:[#allocation515_spill] sm:$0xff] }
 0x9ca   :  { %7258 = vmatprep.subr.bf16.mxu1 %v17524_v0  ;;  %v17532_v45 = vld [vmem:[#allocation513_spill] sm:$0xff]  ;;  %v17533_v4 = vld [vmem:[#allocation514_spill] sm:$0xff]  ;;  %v17535_v0 = vld [vmem:[#allocation516_spill] sm:$0xff] }
 0x9cb   :  { %v17585_v34 = vld [vmem:[#allocation568_spill] sm:$0xff] }
 0x9cc   :  { %7218 = vmatpush1.bf16.msra.mxu0 %v17525_v57  ;;  %v17536_v57 = vld [vmem:[#allocation517_spill] sm:$0xff] }
 0x9cd   :  { %7259 = vmatpush1.bf16.msra.mxu1 %v17526_v14  ;;  %7219 = vmatprep.subr.bf16.mxu0 %v17527_v19  ;;  %v17537_v14 = vld [vmem:[#allocation518_spill] sm:$0xff]  ;;  %v17538_v19 = vld [vmem:[#allocation519_spill] sm:$0xff] }
 0x9ce   :  { %7260 = vmatprep.subr.bf16.mxu1 %v17528_v51  ;;  %v17539_v51 = vld [vmem:[#allocation520_spill] sm:$0xff] }
 0x9d0   :  { %7220 = vmatpush1.bf16.msra.mxu0 %v17529_v31  ;;  %v17540_v31 = vld [vmem:[#allocation521_spill] sm:$0xff] }
 0x9d1   :  { %7261 = vmatpush1.bf16.msra.mxu1 %v17530_v61  ;;  %7221 = vmatprep.subr.bf16.mxu0 %v17531_v8  ;;  %v17541_v61 = vld [vmem:[#allocation522_spill] sm:$0xff]  ;;  %v17542_v8 = vld [vmem:[#allocation523_spill] sm:$0xff] }
 0x9d2   :  { %7262 = vmatprep.subr.bf16.mxu1 %v17532_v45  ;;  %v17543_v45 = vld [vmem:[#allocation524_spill] sm:$0xff] }
 0x9d4   :  { %7222 = vmatpush1.bf16.msra.mxu0 %v17533_v4  ;;  %v17544_v4 = vld [vmem:[#allocation525_spill] sm:$0xff] }
 0x9d5   :  { %7263 = vmatpush1.bf16.msra.mxu1 %v17534_v33  ;;  %7223 = vmatprep.subr.bf16.mxu0 %v17535_v0  ;;  %v17545_v33 = vld [vmem:[#allocation526_spill] sm:$0xff]  ;;  %v17546_v0 = vld [vmem:[#allocation527_spill] sm:$0xff] }
 0x9d6   :  { %7264 = vmatprep.subr.bf16.mxu1 %v17536_v57  ;;  %v17547_v57 = vld [vmem:[#allocation528_spill] sm:$0xff] }
 0x9d8   :  { %7224 = vmatpush1.bf16.msra.mxu0 %v17537_v14  ;;  %v17548_v14 = vld [vmem:[#allocation529_spill] sm:$0xff] }
 0x9d9   :  { %7265 = vmatpush1.bf16.msra.mxu1 %v17538_v19  ;;  %7225 = vmatprep.subr.bf16.mxu0 %v17539_v51  ;;  %v17549_v19 = vld [vmem:[#allocation530_spill] sm:$0xff]  ;;  %v17550_v51 = vld [vmem:[#allocation531_spill] sm:$0xff] }
 0x9da   :  { %7266 = vmatprep.subr.bf16.mxu1 %v17540_v31  ;;  %v17551_v31 = vld [vmem:[#allocation532_spill] sm:$0xff] }
 0x9dc   :  { %7226 = vmatpush1.bf16.msra.mxu0 %v17541_v61  ;;  %v17552_v61 = vld [vmem:[#allocation533_spill] sm:$0xff] }
 0x9dd   :  { %7267 = vmatpush1.bf16.msra.mxu1 %v17542_v8  ;;  %7227 = vmatprep.subr.bf16.mxu0 %v17543_v45  ;;  %v17553_v8 = vld [vmem:[#allocation534_spill] sm:$0xff]  ;;  %v17554_v45 = vld [vmem:[#allocation535_spill] sm:$0xff] }
 0x9de   :  { %7268 = vmatprep.subr.bf16.mxu1 %v17544_v4  ;;  %v17555_v4 = vld [vmem:[#allocation536_spill] sm:$0xff] }
 0x9e0   :  { %7228 = vmatpush1.bf16.msra.mxu0 %v17545_v33  ;;  %v17556_v33 = vld [vmem:[#allocation537_spill] sm:$0xff] }
 0x9e1   :  { %7269 = vmatpush1.bf16.msra.mxu1 %v17546_v0  ;;  %7229 = vmatprep.subr.bf16.mxu0 %v17547_v57  ;;  %v17557_v0 = vld [vmem:[#allocation538_spill] sm:$0xff]  ;;  %v17558_v57 = vld [vmem:[#allocation539_spill] sm:$0xff] }
 0x9e2   :  { %7270 = vmatprep.subr.bf16.mxu1 %v17548_v14  ;;  %v17559_v14 = vld [vmem:[#allocation540_spill] sm:$0xff] }
 0x9e4   :  { %7230 = vmatpush2.bf16.msra.mxu0 %v17549_v19  ;;  %v17560_v19 = vld [vmem:[#allocation541_spill] sm:$0xff] }
 0x9e5   :  { %7271 = vmatpush2.bf16.msra.mxu1 %v17550_v51  ;;  %7231 = vmatprep.subr.bf16.mxu0 %v17551_v31  ;;  %v17561_v51 = vld [vmem:[#allocation542_spill] sm:$0xff]  ;;  %v17562_v31 = vld [vmem:[#allocation543_spill] sm:$0xff] }
 0x9e6   :  { %7272 = vmatprep.subr.bf16.mxu1 %v17552_v61  ;;  %v17563_v61 = vld [vmem:[#allocation544_spill] sm:$0xff] }
 0x9e8   :  { %7232 = vmatpush2.bf16.msra.mxu0 %v17553_v8  ;;  %v17564_v8 = vld [vmem:[#allocation545_spill] sm:$0xff] }
 0x9e9   :  { %7273 = vmatpush2.bf16.msra.mxu1 %v17554_v45  ;;  %7233 = vmatprep.subr.bf16.mxu0 %v17555_v4  ;;  %v17565_v45 = vld [vmem:[#allocation546_spill] sm:$0xff]  ;;  %v17566_v4 = vld [vmem:[#allocation547_spill] sm:$0xff] }
 0x9ea   :  { %7274 = vmatprep.subr.bf16.mxu1 %v17556_v33  ;;  %v17567_v33 = vld [vmem:[#allocation548_spill] sm:$0xff] }
 0x9ec   :  { %7234 = vmatpush2.bf16.msra.mxu0 %v17557_v0  ;;  %v17568_v0 = vld [vmem:[#allocation549_spill] sm:$0xff] }
 0x9ed   :  { %7275 = vmatpush2.bf16.msra.mxu1 %v17558_v57  ;;  %7235 = vmatprep.subr.bf16.mxu0 %v17559_v14  ;;  %v17569_v57 = vld [vmem:[#allocation550_spill] sm:$0xff]  ;;  %v17570_v14 = vld [vmem:[#allocation551_spill] sm:$0xff] }
 0x9ee   :  { %7276 = vmatprep.subr.bf16.mxu1 %v17560_v19  ;;  %v17571_v19 = vld [vmem:[#allocation552_spill] sm:$0xff] }
 0x9f0   :  { %7236 = vmatpush2.bf16.msra.mxu0 %v17561_v51  ;;  %v17572_v51 = vld [vmem:[#allocation553_spill] sm:$0xff] }
 0x9f1   :  { %7277 = vmatpush2.bf16.msra.mxu1 %v17562_v31  ;;  %7237 = vmatprep.subr.bf16.mxu0 %v17563_v61  ;;  %v17573_v31 = vld [vmem:[#allocation554_spill] sm:$0xff]  ;;  %v17574_v61 = vld [vmem:[#allocation555_spill] sm:$0xff] }
 0x9f2   :  { %7278 = vmatprep.subr.bf16.mxu1 %v17564_v8  ;;  %v17575_v8 = vld [vmem:[#allocation556_spill] sm:$0xff] }
 0x9f4   :  { %7238 = vmatpush2.bf16.msra.mxu0 %v17565_v45  ;;  %v17576_v45 = vld [vmem:[#allocation557_spill] sm:$0xff] }
 0x9f5   :  { %7279 = vmatpush2.bf16.msra.mxu1 %v17566_v4  ;;  %7239 = vmatprep.subr.bf16.mxu0 %v17567_v33  ;;  %v17577_v4 = vld [vmem:[#allocation558_spill] sm:$0xff]  ;;  %v17578_v33 = vld [vmem:[#allocation559_spill] sm:$0xff] }
 0x9f6   :  { %7280 = vmatprep.subr.bf16.mxu1 %v17568_v0  ;;  %v17579_v0 = vld [vmem:[#allocation560_spill] sm:$0xff] }
 0x9f8   :  { %7240 = vmatpush2.bf16.msra.mxu0 %v17569_v57  ;;  %v17580_v57 = vld [vmem:[#allocation561_spill] sm:$0xff] }
 0x9f9   :  { %7281 = vmatpush2.bf16.msra.mxu1 %v17570_v14  ;;  %7241 = vmatprep.subr.bf16.mxu0 %v17571_v19 }
 0x9fa   :  { %7282 = vmatprep.subr.bf16.mxu1 %v17572_v51  ;;  %v17581_v51 = vld [vmem:[#allocation562_spill] sm:$0xff] }
 0x9fc   :  { %7242 = vmatpush2.bf16.msra.mxu0 %v17573_v31 }
 0x9fd   :  { %7283 = vmatpush2.bf16.msra.mxu1 %v17574_v61  ;;  %7243 = vmatprep.subr.bf16.mxu0 %v17575_v8  ;;  %v17582_v61 = vld [vmem:[#allocation563_spill] sm:$0xff]  ;;  %v17584_v8 = vld [vmem:[#allocation565_spill] sm:$0xff] }
 0x9fe   :  { %7284 = vmatprep.subr.bf16.mxu1 %v17576_v45  ;;  %v17583_v45 = vld [vmem:[#allocation564_spill] sm:$0xff] }
 0xa00   :  { %7244 = vmatpush2.bf16.msra.mxu0 %v17577_v4 }
 0xa01   :  { %7285 = vmatpush2.bf16.msra.mxu1 %v17578_v33  ;;  %7295 = vmatprep.subr.bf16.mxu0 %v17579_v0 }
 0xa02   :  { %7336 = vmatprep.subr.bf16.mxu1 %v17580_v57 }
 0xa03   :  { %v7001_v14 = vpop.f32.mrf.mxu0  ;;  %7246 = vmatmul.mubr.bf16.vlgmr.msra.gmra.mxu0 %v13870_v44 }
 0xa04   :  { %v7002_v19 = vadd.f32 %v7001_v14, %v17581_v51  ;;  %v7042_v31 = vpop.f32.mrf.mxu1  ;;  %7287 = vmatmul.mubr.bf16.vlgmr.msra.gmra.mxu1 %v13872_v7  ;;  %7296 = vmatpush1.bf16.msra.mxu0 %v17582_v61 }
 0xa05   :  { %7327 = vmatprep.mubr.bf16.mxu0 %v13784_v2  ;;  %7337 = vmatpush1.bf16.msra.mxu1 %v17583_v45  ;;  %v7003_v4 = vpop.f32.mrf.mxu0 }
 0xa06   :  { %v14166_v33 = vadd.f32 %v7042_v31, %v7002_v19  ;;  %7368 = vmatprep.mubr.bf16.mxu1 %v13786_v35  ;;  %v7004_v57 = vadd.f32 %v7003_v4, %v13119_v47  ;;  %v7044_v0 = vpop.f32.mrf.mxu1  ;;  %7297 = vmatprep.subr.bf16.mxu0 %v17584_v8  ;;  %v17586_v19 = vld [vmem:[#allocation569_spill] sm:$0xff]  ;;  %v17587_v35 = vld [vmem:[#allocation570_spill] sm:$0xff]  ;;  %v17588_v4 = vld [vmem:[#allocation571_spill] sm:$0xff] }
 0xa07   :  { %v7005_v14 = vpop.f32.mrf.mxu0  ;;  %7338 = vmatprep.subr.bf16.mxu1 %v13121_v32  ;;  %v17589_v47 = vld [vmem:[#allocation572_spill] sm:$0xff]  ;;  %v17591_v32 = vld [vmem:[#allocation574_spill] sm:$0xff] }
 0xa08   :  { %v14172_v51 = vadd.f32 %v7044_v0, %v7004_v57  ;;  %v7046_v61 = vpop.f32.mrf.mxu1  ;;  %7298 = vmatpush1.bf16.msra.mxu0 %v17585_v34  ;;  %v17590_v14 = vld [vmem:[#allocation573_spill] sm:$0xff]  ;;  %v17592_v57 = vld [vmem:[#allocation575_spill] sm:$0xff]  ;;  %v17593_v0 = vld [vmem:[#allocation576_spill] sm:$0xff] }
 0xa09   :  { %7339 = vmatpush1.bf16.msra.mxu1 %v13131_v16  ;;  %v7006_v2 = vpop.f32.mrf.mxu0  ;;  %7299 = vmatprep.subr.bf16.mxu0 %v17586_v19  ;;  %v17594_v61 = vld [vmem:[#allocation577_spill] sm:$0xff]  ;;  %v17596_v19 = vld [vmem:[#allocation579_spill] sm:$0xff] }
 0xa0a   :  { %v7047_v31 = vpop.f32.mrf.mxu1  ;;  %7340 = vmatprep.subr.bf16.mxu1 %v17587_v35  ;;  %v17595_v2 = vld [vmem:[#allocation578_spill] sm:$0xff]  ;;  %v17598_v35 = vld [vmem:[#allocation581_spill] sm:$0xff] }
 0xa0b   :  { %v17597_v31 = vld [vmem:[#allocation580_spill] sm:$0xff] }
 0xa0c   :  { %7300 = vmatpush1.bf16.msra.mxu0 %v17588_v4  ;;  %v17599_v4 = vld [vmem:[#allocation582_spill] sm:$0xff] }
 0xa0d   :  { %7341 = vmatpush1.bf16.msra.mxu1 %v17589_v47  ;;  %7301 = vmatprep.subr.bf16.mxu0 %v17590_v14  ;;  %v17600_v47 = vld [vmem:[#allocation583_spill] sm:$0xff]  ;;  %v17601_v14 = vld [vmem:[#allocation584_spill] sm:$0xff] }
 0xa0e   :  { %7342 = vmatprep.subr.bf16.mxu1 %v17591_v32  ;;  %v17602_v32 = vld [vmem:[#allocation585_spill] sm:$0xff] }
 0xa10   :  { %7302 = vmatpush1.bf16.msra.mxu0 %v17592_v57  ;;  %v17603_v57 = vld [vmem:[#allocation586_spill] sm:$0xff] }
 0xa11   :  { %7343 = vmatpush1.bf16.msra.mxu1 %v17593_v0  ;;  %7303 = vmatprep.subr.bf16.mxu0 %v17594_v61  ;;  %v17604_v0 = vld [vmem:[#allocation587_spill] sm:$0xff]  ;;  %v17605_v61 = vld [vmem:[#allocation588_spill] sm:$0xff] }
 0xa12   :  { %7344 = vmatprep.subr.bf16.mxu1 %v17595_v2  ;;  %v17606_v2 = vld [vmem:[#allocation589_spill] sm:$0xff] }
 0xa14   :  { %7304 = vmatpush1.bf16.msra.mxu0 %v17596_v19  ;;  %v17607_v19 = vld [vmem:[#allocation590_spill] sm:$0xff] }
 0xa15   :  { %7345 = vmatpush1.bf16.msra.mxu1 %v17597_v31  ;;  %7305 = vmatprep.subr.bf16.mxu0 %v17598_v35  ;;  %v17608_v31 = vld [vmem:[#allocation591_spill] sm:$0xff]  ;;  %v17609_v35 = vld [vmem:[#allocation592_spill] sm:$0xff] }
 0xa16   :  { %7346 = vmatprep.subr.bf16.mxu1 %v17599_v4  ;;  %v17610_v4 = vld [vmem:[#allocation593_spill] sm:$0xff] }
 0xa18   :  { %7306 = vmatpush1.bf16.msra.mxu0 %v17600_v47  ;;  %v17611_v47 = vld [vmem:[#allocation594_spill] sm:$0xff] }
 0xa19   :  { %7347 = vmatpush1.bf16.msra.mxu1 %v17601_v14  ;;  %7307 = vmatprep.subr.bf16.mxu0 %v17602_v32  ;;  %v17612_v14 = vld [vmem:[#allocation595_spill] sm:$0xff]  ;;  %v17613_v32 = vld [vmem:[#allocation596_spill] sm:$0xff] }
 0xa1a   :  { %7348 = vmatprep.subr.bf16.mxu1 %v17603_v57  ;;  %v17614_v57 = vld [vmem:[#allocation597_spill] sm:$0xff] }
 0xa1c   :  { %7308 = vmatpush1.bf16.msra.mxu0 %v17604_v0  ;;  %v17615_v0 = vld [vmem:[#allocation598_spill] sm:$0xff] }
 0xa1d   :  { %7349 = vmatpush1.bf16.msra.mxu1 %v17605_v61  ;;  %7309 = vmatprep.subr.bf16.mxu0 %v17606_v2  ;;  %v17616_v61 = vld [vmem:[#allocation599_spill] sm:$0xff]  ;;  %v17617_v2 = vld [vmem:[#allocation600_spill] sm:$0xff] }
 0xa1e   :  { %7350 = vmatprep.subr.bf16.mxu1 %v17607_v19  ;;  %v17618_v19 = vld [vmem:[#allocation601_spill] sm:$0xff] }
 0xa20   :  { %7310 = vmatpush1.bf16.msra.mxu0 %v17608_v31  ;;  %v17619_v31 = vld [vmem:[#allocation602_spill] sm:$0xff] }
 0xa21   :  { %7351 = vmatpush1.bf16.msra.mxu1 %v17609_v35  ;;  %7311 = vmatprep.subr.bf16.mxu0 %v17610_v4  ;;  %v17620_v35 = vld [vmem:[#allocation603_spill] sm:$0xff]  ;;  %v17621_v4 = vld [vmem:[#allocation604_spill] sm:$0xff] }
 0xa22   :  { %7352 = vmatprep.subr.bf16.mxu1 %v17611_v47  ;;  %v17622_v47 = vld [vmem:[#allocation605_spill] sm:$0xff] }
 0xa24   :  { %7312 = vmatpush2.bf16.msra.mxu0 %v17612_v14  ;;  %v17623_v14 = vld [vmem:[#allocation606_spill] sm:$0xff] }
 0xa25   :  { %7353 = vmatpush2.bf16.msra.mxu1 %v17613_v32  ;;  %7313 = vmatprep.subr.bf16.mxu0 %v17614_v57  ;;  %v17624_v32 = vld [vmem:[#allocation607_spill] sm:$0xff]  ;;  %v17625_v57 = vld [vmem:[#allocation608_spill] sm:$0xff] }
 0xa26   :  { %7354 = vmatprep.subr.bf16.mxu1 %v17615_v0  ;;  %v17626_v0 = vld [vmem:[#allocation609_spill] sm:$0xff] }
 0xa28   :  { %7314 = vmatpush2.bf16.msra.mxu0 %v17616_v61  ;;  %v17627_v61 = vld [vmem:[#allocation610_spill] sm:$0xff] }
 0xa29   :  { %7355 = vmatpush2.bf16.msra.mxu1 %v17617_v2  ;;  %7315 = vmatprep.subr.bf16.mxu0 %v17618_v19  ;;  %v17628_v2 = vld [vmem:[#allocation611_spill] sm:$0xff]  ;;  %v17629_v19 = vld [vmem:[#allocation612_spill] sm:$0xff] }
 0xa2a   :  { %7356 = vmatprep.subr.bf16.mxu1 %v17619_v31  ;;  %v17630_v31 = vld [vmem:[#allocation613_spill] sm:$0xff] }
 0xa2c   :  { %7316 = vmatpush2.bf16.msra.mxu0 %v17620_v35  ;;  %v17631_v35 = vld [vmem:[#allocation614_spill] sm:$0xff] }
 0xa2d   :  { %7357 = vmatpush2.bf16.msra.mxu1 %v17621_v4  ;;  %7317 = vmatprep.subr.bf16.mxu0 %v17622_v47  ;;  %v17632_v4 = vld [vmem:[#allocation615_spill] sm:$0xff]  ;;  %v17633_v47 = vld [vmem:[#allocation616_spill] sm:$0xff] }
 0xa2e   :  { %7358 = vmatprep.subr.bf16.mxu1 %v17623_v14  ;;  %v17634_v14 = vld [vmem:[#allocation617_spill] sm:$0xff] }
 0xa30   :  { %7318 = vmatpush2.bf16.msra.mxu0 %v17624_v32  ;;  %v17635_v32 = vld [vmem:[#allocation618_spill] sm:$0xff] }
 0xa31   :  { %7359 = vmatpush2.bf16.msra.mxu1 %v17625_v57  ;;  %7319 = vmatprep.subr.bf16.mxu0 %v17626_v0  ;;  %v17636_v0 = vld [vmem:[#allocation620_spill] sm:$0xff] }
 0xa32   :  { %7360 = vmatprep.subr.bf16.mxu1 %v17627_v61  ;;  %v17637_v61 = vld [vmem:[#allocation621_spill] sm:$0xff] }
 0xa34   :  { %7320 = vmatpush2.bf16.msra.mxu0 %v17628_v2  ;;  %v17638_v2 = vld [vmem:[#allocation622_spill] sm:$0xff] }
 0xa35   :  { %7361 = vmatpush2.bf16.msra.mxu1 %v17629_v19  ;;  %7321 = vmatprep.subr.bf16.mxu0 %v17630_v31  ;;  %v17639_v19 = vld [vmem:[#allocation623_spill] sm:$0xff]  ;;  %v17640_v31 = vld [vmem:[#allocation624_spill] sm:$0xff] }
 0xa36   :  { %7362 = vmatprep.subr.bf16.mxu1 %v17631_v35  ;;  %v17641_v35 = vld [vmem:[#allocation625_spill] sm:$0xff] }
 0xa38   :  { %7322 = vmatpush2.bf16.msra.mxu0 %v17632_v4  ;;  %v17642_v4 = vld [vmem:[#allocation626_spill] sm:$0xff] }
 0xa39   :  { %7363 = vmatpush2.bf16.msra.mxu1 %v17633_v47  ;;  %7323 = vmatprep.subr.bf16.mxu0 %v17634_v14 }
 0xa3a   :  { %7364 = vmatprep.subr.bf16.mxu1 %v17635_v32 }
 0xa3c   :  { %7324 = vmatpush2.bf16.msra.mxu0 %v13290_v13 }
 0xa3d   :  { %7365 = vmatpush2.bf16.msra.mxu1 %v17636_v0  ;;  %7325 = vmatprep.subr.bf16.mxu0 %v17637_v61  ;;  %v17643_v0 = vld [vmem:[#allocation627_spill] sm:$0xff]  ;;  %v17652_v61 = vld [vmem:[#allocation636_spill] sm:$0xff] }
 0xa3e   :  { %7366 = vmatprep.subr.bf16.mxu1 %v17638_v2  ;;  %v17644_v2 = vld [vmem:[#allocation628_spill] sm:$0xff] }
 0xa40   :  { %7326 = vmatpush2.bf16.msra.mxu0 %v17639_v19 }
 0xa41   :  { %7367 = vmatpush2.bf16.msra.mxu1 %v17640_v31  ;;  %7377 = vmatprep.subr.bf16.mxu0 %v17641_v35  ;;  %v17645_v35 = vld [vmem:[#allocation629_spill] sm:$0xff] }
 0xa42   :  { %7418 = vmatprep.subr.bf16.mxu1 %v17642_v4 }
 0xa43   :  { %v7083_v47 = vpop.f32.mrf.mxu0  ;;  %7328 = vmatmul.mubr.bf16.vlgmr.msra.gmra.mxu0 %v13790_v41 }
 0xa44   :  { %v7084_v32 = vadd.f32 %v7083_v47, %v14166_v33  ;;  %v7124_v13 = vpop.f32.mrf.mxu1  ;;  %7369 = vmatmul.mubr.bf16.vlgmr.msra.gmra.mxu1 %v13792_v5  ;;  %7378 = vmatpush1.bf16.msra.mxu0 %v17643_v0  ;;  %v17646_v47 = vld [vmem:[#allocation630_spill] sm:$0xff]  ;;  %v17647_v5 = vld [vmem:[#allocation631_spill] sm:$0xff]  ;;  %v17648_v0 = vld [vmem:[#allocation632_spill] sm:$0xff] }
 0xa45   :  { %7409 = vmatprep.mubr.bf16.mxu0 %v13798_v1  ;;  %7419 = vmatpush1.bf16.msra.mxu1 %v17644_v2  ;;  %v7085_v19 = vpop.f32.mrf.mxu0 }
 0xa46   :  { %v14240_v31 = vadd.f32 %v7124_v13, %v7084_v32  ;;  %7450 = vmatprep.mubr.bf16.mxu1 %v13800_v6  ;;  %v14243_v4 = vpop.f32.mrf.mxu1  ;;  %7379 = vmatprep.subr.bf16.mxu0 %v17645_v35  ;;  %v17649_v32 = vld [vmem:[#allocation633_spill] sm:$0xff]  ;;  %v17650_v13 = vld [vmem:[#allocation634_spill] sm:$0xff]  ;;  %v17651_v6 = vld [vmem:[#allocation635_spill] sm:$0xff] }
 0xa47   :  { %v7087_v41 = vpop.f32.mrf.mxu0  ;;  %7420 = vmatprep.subr.bf16.mxu1 %v17646_v47  ;;  %v17654_v47 = vld [vmem:[#allocation638_spill] sm:$0xff] }
 0xa48   :  { %v7128_v33 = vpop.f32.mrf.mxu1  ;;  %7380 = vmatpush1.bf16.msra.mxu0 %v17647_v5  ;;  %v17653_v41 = vld [vmem:[#allocation637_spill] sm:$0xff]  ;;  %v17656_v5 = vld [vmem:[#allocation640_spill] sm:$0xff] }
 0xa49   :  { %7421 = vmatpush1.bf16.msra.mxu1 %v13335_v28  ;;  %v7088_v1 = vpop.f32.mrf.mxu0  ;;  %7381 = vmatprep.subr.bf16.mxu0 %v17648_v0  ;;  %v17655_v33 = vld [vmem:[#allocation639_spill] sm:$0xff]  ;;  %v17658_v0 = vld [vmem:[#allocation642_spill] sm:$0xff] }
 0xa4a   :  { %v7129_v2 = vpop.f32.mrf.mxu1  ;;  %7422 = vmatprep.subr.bf16.mxu1 %v17649_v32  ;;  %v17657_v1 = vld [vmem:[#allocation641_spill] sm:$0xff]  ;;  %v17660_v32 = vld [vmem:[#allocation644_spill] sm:$0xff] }
 0xa4b   :  { %v17659_v2 = vld [vmem:[#allocation643_spill] sm:$0xff] }
 0xa4c   :  { %7382 = vmatpush1.bf16.msra.mxu0 %v17650_v13  ;;  %v17661_v13 = vld [vmem:[#allocation645_spill] sm:$0xff] }
 0xa4d   :  { %7423 = vmatpush1.bf16.msra.mxu1 %v17651_v6  ;;  %7383 = vmatprep.subr.bf16.mxu0 %v17652_v61  ;;  %v17662_v6 = vld [vmem:[#allocation646_spill] sm:$0xff]  ;;  %v17663_v61 = vld [vmem:[#allocation647_spill] sm:$0xff] }
 0xa4e   :  { %7424 = vmatprep.subr.bf16.mxu1 %v17653_v41  ;;  %v17664_v41 = vld [vmem:[#allocation648_spill] sm:$0xff] }
 0xa50   :  { %7384 = vmatpush1.bf16.msra.mxu0 %v17654_v47  ;;  %v17665_v47 = vld [vmem:[#allocation649_spill] sm:$0xff] }
 0xa51   :  { %7425 = vmatpush1.bf16.msra.mxu1 %v17655_v33  ;;  %7385 = vmatprep.subr.bf16.mxu0 %v17656_v5  ;;  %v17666_v33 = vld [vmem:[#allocation650_spill] sm:$0xff]  ;;  %v17667_v5 = vld [vmem:[#allocation651_spill] sm:$0xff] }
 0xa52   :  { %7426 = vmatprep.subr.bf16.mxu1 %v17657_v1  ;;  %v17668_v1 = vld [vmem:[#allocation652_spill] sm:$0xff] }
 0xa54   :  { %7386 = vmatpush1.bf16.msra.mxu0 %v17658_v0  ;;  %v17669_v0 = vld [vmem:[#allocation653_spill] sm:$0xff] }
 0xa55   :  { %7427 = vmatpush1.bf16.msra.mxu1 %v17659_v2  ;;  %7387 = vmatprep.subr.bf16.mxu0 %v17660_v32  ;;  %v17670_v2 = vld [vmem:[#allocation654_spill] sm:$0xff]  ;;  %v17671_v32 = vld [vmem:[#allocation655_spill] sm:$0xff] }
 0xa56   :  { %7428 = vmatprep.subr.bf16.mxu1 %v17661_v13  ;;  %v17672_v13 = vld [vmem:[#allocation656_spill] sm:$0xff] }
 0xa58   :  { %7388 = vmatpush1.bf16.msra.mxu0 %v17662_v6  ;;  %v17673_v6 = vld [vmem:[#allocation657_spill] sm:$0xff] }
 0xa59   :  { %7429 = vmatpush1.bf16.msra.mxu1 %v17663_v61  ;;  %7389 = vmatprep.subr.bf16.mxu0 %v17664_v41  ;;  %v17674_v61 = vld [vmem:[#allocation658_spill] sm:$0xff]  ;;  %v17675_v41 = vld [vmem:[#allocation659_spill] sm:$0xff] }
 0xa5a   :  { %7430 = vmatprep.subr.bf16.mxu1 %v17665_v47  ;;  %v17676_v47 = vld [vmem:[#allocation660_spill] sm:$0xff] }
 0xa5c   :  { %7390 = vmatpush1.bf16.msra.mxu0 %v17666_v33  ;;  %v17677_v33 = vld [vmem:[#allocation661_spill] sm:$0xff] }
 0xa5d   :  { %7431 = vmatpush1.bf16.msra.mxu1 %v17667_v5  ;;  %7391 = vmatprep.subr.bf16.mxu0 %v17668_v1  ;;  %v17678_v5 = vld [vmem:[#allocation662_spill] sm:$0xff]  ;;  %v17679_v1 = vld [vmem:[#allocation663_spill] sm:$0xff] }
 0xa5e   :  { %7432 = vmatprep.subr.bf16.mxu1 %v17669_v0  ;;  %v17680_v0 = vld [vmem:[#allocation664_spill] sm:$0xff] }
 0xa60   :  { %7392 = vmatpush1.bf16.msra.mxu0 %v17670_v2  ;;  %v17681_v2 = vld [vmem:[#allocation665_spill] sm:$0xff] }
 0xa61   :  { %7433 = vmatpush1.bf16.msra.mxu1 %v17671_v32  ;;  %7393 = vmatprep.subr.bf16.mxu0 %v17672_v13  ;;  %v17682_v32 = vld [vmem:[#allocation666_spill] sm:$0xff]  ;;  %v17683_v13 = vld [vmem:[#allocation667_spill] sm:$0xff] }
 0xa62   :  { %7434 = vmatprep.subr.bf16.mxu1 %v17673_v6  ;;  %v17684_v6 = vld [vmem:[#allocation668_spill] sm:$0xff] }
 0xa64   :  { %7394 = vmatpush2.bf16.msra.mxu0 %v17674_v61  ;;  %v17685_v61 = vld [vmem:[#allocation669_spill] sm:$0xff] }
 0xa65   :  { %7435 = vmatpush2.bf16.msra.mxu1 %v17675_v41  ;;  %7395 = vmatprep.subr.bf16.mxu0 %v17676_v47  ;;  %v17686_v41 = vld [vmem:[#allocation670_spill] sm:$0xff]  ;;  %v17687_v47 = vld [vmem:[#allocation671_spill] sm:$0xff] }
 0xa66   :  { %7436 = vmatprep.subr.bf16.mxu1 %v17677_v33  ;;  %v17688_v33 = vld [vmem:[#allocation672_spill] sm:$0xff] }
 0xa68   :  { %7396 = vmatpush2.bf16.msra.mxu0 %v17678_v5  ;;  %v17689_v5 = vld [vmem:[#allocation673_spill] sm:$0xff] }
 0xa69   :  { %7437 = vmatpush2.bf16.msra.mxu1 %v17679_v1  ;;  %7397 = vmatprep.subr.bf16.mxu0 %v17680_v0 }
 0xa6a   :  { %7438 = vmatprep.subr.bf16.mxu1 %v17681_v2 }
 0xa6c   :  { %7398 = vmatpush2.bf16.msra.mxu0 %v17682_v32  ;;  %v17690_v32 = vld [vmem:[#allocation674_spill] sm:$0xff] }
 0xa6d   :  { %7439 = vmatpush2.bf16.msra.mxu1 %v17683_v13  ;;  %7399 = vmatprep.subr.bf16.mxu0 %v17684_v6  ;;  %v17691_v13 = vld [vmem:[#allocation675_spill] sm:$0xff] }
 0xa6e   :  { %7440 = vmatprep.subr.bf16.mxu1 %v17685_v61 }
 0xa70   :  { %7400 = vmatpush2.bf16.msra.mxu0 %v17686_v41 }
 0xa71   :  { %7441 = vmatpush2.bf16.msra.mxu1 %v17687_v47  ;;  %7401 = vmatprep.subr.bf16.mxu0 %v17688_v33  ;;  %v7086_v33 = vadd.f32 %v7085_v19, %v14172_v51  ;;  %v7460_v51 = vmax.f32 %v14098_v15, 0.0 }
 0xa72   :  { %7442 = vmatprep.subr.bf16.mxu1 %v17689_v5 }
 0xa74   :  { %7402 = vmatpush2.bf16.msra.mxu0 %v13469_v18 }
 0xa75   :  { %7443 = vmatpush2.bf16.msra.mxu1 %v13473_v27  ;;  %7403 = vmatprep.subr.bf16.mxu0 %v13475_v46 }
 0xa76   :  { %7444 = vmatprep.subr.bf16.mxu1 %v17690_v32  ;;  %v7127_v32 = vadd.f32 %v14243_v4, %v7086_v33 }
 0xa78   :  { %7404 = vmatpush2.bf16.msra.mxu0 %v17691_v13 }
 0xa79   :  { %7445 = vmatpush2.bf16.msra.mxu1 %v13485_v62  ;;  %7405 = vmatprep.subr.bf16.mxu0 %v13487_v48 }
 0xa7a   :  { %7446 = vmatprep.subr.bf16.mxu1 %v13490_v17 }
 0xa7c   :  { %7406 = vmatpush2.bf16.msra.mxu0 %v13493_v63 }
 0xa7d   :  { %7447 = vmatpush2.bf16.msra.mxu1 %v13497_v11  ;;  %7407 = vmatprep.subr.bf16.mxu0 %v13499_v49  ;;  %v7462_v11 = vmax.f32 %v7127_v32, 0.0  ;;  %v17692_v32 = vld [vmem:[#allocation70_spill] sm:$0xff] }
 0xa7e   :  { %7448 = vmatprep.subr.bf16.mxu1 %v13502_v12 }
 0xa80   :  { %7408 = vmatpush2.bf16.msra.mxu0 %v13507_v30 }
 0xa81   :  { %7449 = vmatpush2.bf16.msra.mxu1 %v13511_v60  ;;  %9967 = vmatprep.subr.mxu0 %v11058_v40 }
 0xa82   :  { %10002 = vmatprep.subr.mxu1 %v11218_v26 }
 0xa83   :  { %v14310_v19 = vpop.f32.mrf.mxu0  ;;  %7410 = vmatmul.mubr.bf16.vlgmr.msra.gmra.mxu0 %v13870_v44 }
 0xa84   :  { %v14313_v49 = vpop.f32.mrf.mxu1  ;;  %7451 = vmatmul.mubr.bf16.vlgmr.msra.gmra.mxu1 %v13872_v7  ;;  %9968 = vmatpush3.msra.mxu0 %v10978_v24 }
 0xa85   :  { %7531 = vmatprep.mubr.f32.mxu0 %v7460_v51  ;;  %10003 = vmatpush3.msra.mxu1 %v11138_v56  ;;  %v14318_v4 = vpop.f32.mrf.mxu0  ;;  %v17693_v51 = vld [vmem:[#allocation98_spill] sm:$0xff] }
 0xa86   :  { %7601 = vmatprep.mubr.f32.mxu1 %v7462_v11  ;;  %v14320_v33 = vpop.f32.mrf.mxu1  ;;  %9969 = vmatprep.subr.mxu0 %v11053_v39 }
 0xa87   :  { %10004 = vmatprep.subr.mxu1 %v11213_v58  ;;  %9970 = vmatpush3.msra.mxu0 %v10973_v23  ;;  %v7169_v44 = vpop.f32.mrf.mxu0 }
 0xa88   :  { %10005 = vmatpush3.msra.mxu1 %v11133_v55  ;;  %v7210_v7 = vpop.f32.mrf.mxu1  ;;  %9971 = vmatprep.subr.mxu0 %v11048_v38  ;;  %v17694_v44 = vld [vmem:[#allocation56_spill] sm:$0xff] }
 0xa89   :  { %10006 = vmatprep.subr.mxu1 %v11208_v10  ;;  %9972 = vmatpush3.msra.mxu0 %v10968_v22  ;;  %v7170_v15 = vpop.f32.mrf.mxu0  ;;  %v17695_v7 = vld [vmem:[#allocation84_spill] sm:$0xff] }
 0xa8a   :  { %10007 = vmatpush3.msra.mxu1 %v11128_v54  ;;  %v7211_v11 = vpop.f32.mrf.mxu1  ;;  %9973 = vmatprep.subr.mxu0 %v11043_v37  ;;  %v17696_v15 = vld [vmem:[#allocation69_spill] sm:$0xff] }
 0xa8b   :  { %10008 = vmatprep.subr.mxu1 %v11203_v42  ;;  %9974 = vmatpush3.msra.mxu0 %v10963_v21  ;;  %v17697_v11 = vld [vmem:[#allocation97_spill] sm:$0xff] }
 0xa8c   :  { %10009 = vmatpush3.msra.mxu1 %v11123_v53  ;;  %9975 = vmatprep.subr.mxu0 %v11038_v36  ;;  %v17698_v53 = vld [vmem:[#allocation55_spill] sm:$0xff] }
 0xa8d   :  { %10010 = vmatprep.subr.mxu1 %v11198_v25  ;;  %9976 = vmatpush3.msra.mxu0 %v10958_v20  ;;  %v17699_v36 = vld [vmem:[#allocation83_spill] sm:$0xff]  ;;  %v17700_v25 = vld [vmem:[#allocation68_spill] sm:$0xff] }
 0xa8e   :  { %10011 = vmatpush3.msra.mxu1 %v11118_v52  ;;  %9977 = vmatprep.subr.mxu0 %v17692_v32  ;;  %v17701_v20 = vld [vmem:[#allocation96_spill] sm:$0xff]  ;;  %v17702_v52 = vld [vmem:[#allocation54_spill] sm:$0xff] }
 0xa8f   :  { %10012 = vmatprep.subr.mxu1 %v17693_v51  ;;  %9978 = vmatpush3.msra.mxu0 %v17694_v44  ;;  %v17703_v32 = vld [vmem:[#allocation82_spill] sm:$0xff]  ;;  %v17704_v51 = vld [vmem:[#allocation67_spill] sm:$0xff] }
 0xa90   :  { %10013 = vmatpush3.msra.mxu1 %v17695_v7  ;;  %9979 = vmatprep.subr.mxu0 %v17696_v15  ;;  %v17705_v44 = vld [vmem:[#allocation95_spill] sm:$0xff]  ;;  %v17706_v7 = vld [vmem:[#allocation53_spill] sm:$0xff] }
 0xa91   :  { %10014 = vmatprep.subr.mxu1 %v17697_v11  ;;  %9980 = vmatpush3.msra.mxu0 %v17698_v53  ;;  %v17707_v15 = vld [vmem:[#allocation81_spill] sm:$0xff]  ;;  %v17708_v11 = vld [vmem:[#allocation66_spill] sm:$0xff] }
 0xa92   :  { %10015 = vmatpush3.msra.mxu1 %v17699_v36  ;;  %9981 = vmatprep.subr.mxu0 %v17700_v25  ;;  %v17709_v53 = vld [vmem:[#allocation94_spill] sm:$0xff]  ;;  %v17710_v36 = vld [vmem:[#allocation52_spill] sm:$0xff] }
 0xa93   :  { %10016 = vmatprep.subr.mxu1 %v17701_v20  ;;  %9982 = vmatpush3.msra.mxu0 %v17702_v52  ;;  %v17711_v25 = vld [vmem:[#allocation80_spill] sm:$0xff]  ;;  %v17712_v20 = vld [vmem:[#allocation65_spill] sm:$0xff] }
 0xa94   :  { %10017 = vmatpush3.msra.mxu1 %v17703_v32  ;;  %9983 = vmatprep.subr.mxu0 %v17704_v51  ;;  %v17713_v52 = vld [vmem:[#allocation93_spill] sm:$0xff]  ;;  %v17714_v32 = vld [vmem:[#allocation51_spill] sm:$0xff] }
 0xa95   :  { %10018 = vmatprep.subr.mxu1 %v17705_v44  ;;  %9984 = vmatpush3.msra.mxu0 %v17706_v7  ;;  %v17715_v51 = vld [vmem:[#allocation79_spill] sm:$0xff]  ;;  %v17716_v44 = vld [vmem:[#allocation64_spill] sm:$0xff] }
 0xa96   :  { %10019 = vmatpush3.msra.mxu1 %v17707_v15  ;;  %9985 = vmatprep.subr.mxu0 %v17708_v11  ;;  %v17717_v7 = vld [vmem:[#allocation92_spill] sm:$0xff]  ;;  %v17718_v15 = vld [vmem:[#allocation50_spill] sm:$0xff] }
 0xa97   :  { %10020 = vmatprep.subr.mxu1 %v17709_v53  ;;  %9986 = vmatpush3.msra.mxu0 %v17710_v36  ;;  %v17719_v11 = vld [vmem:[#allocation78_spill] sm:$0xff]  ;;  %v17720_v53 = vld [vmem:[#allocation63_spill] sm:$0xff] }
 0xa98   :  { %10021 = vmatpush3.msra.mxu1 %v17711_v25  ;;  %9987 = vmatprep.subr.mxu0 %v17712_v20  ;;  %v17721_v36 = vld [vmem:[#allocation91_spill] sm:$0xff]  ;;  %v17722_v25 = vld [vmem:[#allocation49_spill] sm:$0xff] }
 0xa99   :  { %10022 = vmatprep.subr.mxu1 %v17713_v52  ;;  %9988 = vmatpush3.msra.mxu0 %v17714_v32  ;;  %v17723_v20 = vld [vmem:[#allocation77_spill] sm:$0xff]  ;;  %v17724_v52 = vld [vmem:[#allocation62_spill] sm:$0xff] }
 0xa9a   :  { %10023 = vmatpush3.msra.mxu1 %v17715_v51  ;;  %9989 = vmatprep.subr.mxu0 %v17716_v44  ;;  %v17725_v32 = vld [vmem:[#allocation90_spill] sm:$0xff]  ;;  %v17726_v51 = vld [vmem:[#allocation48_spill] sm:$0xff] }
 0xa9b   :  { %10024 = vmatprep.subr.mxu1 %v17717_v7  ;;  %9990 = vmatpush3.msra.mxu0 %v17718_v15  ;;  %v17727_v44 = vld [vmem:[#allocation76_spill] sm:$0xff]  ;;  %v17728_v7 = vld [vmem:[#allocation61_spill] sm:$0xff] }
 0xa9c   :  { %10025 = vmatpush3.msra.mxu1 %v17719_v11  ;;  %9991 = vmatprep.subr.mxu0 %v17720_v53  ;;  %v17729_v15 = vld [vmem:[#allocation89_spill] sm:$0xff]  ;;  %v17730_v11 = vld [vmem:[#allocation47_spill] sm:$0xff] }
 0xa9d   :  { %10026 = vmatprep.subr.mxu1 %v17721_v36  ;;  %9992 = vmatpush3.msra.mxu0 %v17722_v25  ;;  %v7459_v36 = vmax.f32 %v14092_v50, 0.0  ;;  %v17731_v53 = vld [vmem:[#allocation75_spill] sm:$0xff]  ;;  %v17732_v25 = vld [vmem:[#allocation60_spill] sm:$0xff] }
 0xa9e   :  { %10027 = vmatpush3.msra.mxu1 %v17723_v20  ;;  %9993 = vmatprep.subr.mxu0 %v17724_v52  ;;  %v7461_v52 = vmax.f32 %v14240_v31, 0.0  ;;  %v17733_v20 = vld [vmem:[#allocation88_spill] sm:$0xff] }
 0xa9f   :  { %10028 = vmatprep.subr.mxu1 %v17725_v32  ;;  %9994 = vmatpush3.msra.mxu0 %v17726_v51  ;;  %v17734_v32 = vld [vmem:[#allocation46_spill] sm:$0xff]  ;;  %v17739_v50 = vld [vmem:[#allocation132_spill] sm:$0xff] }
 0xaa0   :  { %10029 = vmatpush3.msra.mxu1 %v17727_v44  ;;  %9995 = vmatprep.subr.mxu0 %v17728_v7  ;;  %v17735_v51 = vld [vmem:[#allocation74_spill] sm:$0xff]  ;;  %v17736_v7 = vld [vmem:[#allocation133_spill] sm:$0xff]  ;;  %v17742_v31 = vld [vmem:[#allocation164_spill] sm:$0xff] }
 0xaa1   :  { %10030 = vmatprep.subr.mxu1 %v17729_v15  ;;  %9996 = vmatpush3.msra.mxu0 %v17730_v11  ;;  %v17737_v15 = vld [vmem:[#allocation117_spill] sm:$0xff]  ;;  %v17801_v44 = vld [vmem:[#allocation134_spill] sm:$0xff] }
 0xaa2   :  { %10031 = vmatpush3.msra.mxu1 %v17731_v53  ;;  %9997 = vmatprep.subr.mxu0 %v17732_v25  ;;  %v17738_v11 = vld [vmem:[#allocation165_spill] sm:$0xff]  ;;  %v17741_v25 = vld [vmem:[#allocation116_spill] sm:$0xff] }
 0xaa3   :  { %10032 = vmatprep.subr.mxu1 %v17733_v20  ;;  %9998 = vmatpush3.msra.mxu0 %v17734_v32  ;;  %v17740_v53 = vld [vmem:[#allocation149_spill] sm:$0xff]  ;;  %v17743_v20 = vld [vmem:[#allocation131_spill] sm:$0xff]  ;;  %v17744_v32 = vld [vmem:[#allocation148_spill] sm:$0xff] }
 0xaa4   :  { %10033 = vmatpush3.msra.mxu1 %v17735_v51  ;;  %7532 = vmatmul.mubr.f32.vlgmr.msra.gmra.mxu0 %v7459_v36  ;;  %v17745_v36 = vld [vmem:[#allocation115_spill] sm:$0xff]  ;;  %v17791_v51 = vld [vmem:[#allocation104_spill] sm:$0xff] }
 0xaa5   :  { %7602 = vmatmul.mubr.f32.vlgmr.msra.gmra.mxu1 %v7461_v52  ;;  %10037 = vmatprep.subr.mxu0 %v17736_v7  ;;  %v17746_v52 = vld [vmem:[#allocation163_spill] sm:$0xff]  ;;  %v17747_v7 = vld [vmem:[#allocation130_spill] sm:$0xff] }
 0xaa6   :  { %10038 = vmatpush3.msra.mxu0 %v17737_v15  ;;  %10072 = vmatprep.subr.mxu1 %v17738_v11  ;;  %v17748_v15 = vld [vmem:[#allocation147_spill] sm:$0xff]  ;;  %v17749_v11 = vld [vmem:[#allocation114_spill] sm:$0xff] }
 0xaa7   :  { %10039 = vmatprep.subr.mxu0 %v17739_v50  ;;  %10073 = vmatpush3.msra.mxu1 %v17740_v53  ;;  %v17750_v50 = vld [vmem:[#allocation162_spill] sm:$0xff]  ;;  %v17751_v53 = vld [vmem:[#allocation129_spill] sm:$0xff] }
 0xaa8   :  { %10040 = vmatpush3.msra.mxu0 %v17741_v25  ;;  %10074 = vmatprep.subr.mxu1 %v17742_v31  ;;  %v17752_v25 = vld [vmem:[#allocation146_spill] sm:$0xff]  ;;  %v17753_v31 = vld [vmem:[#allocation113_spill] sm:$0xff] }
 0xaa9   :  { %10041 = vmatprep.subr.mxu0 %v17743_v20  ;;  %10075 = vmatpush3.msra.mxu1 %v17744_v32  ;;  %v17754_v20 = vld [vmem:[#allocation161_spill] sm:$0xff]  ;;  %v17755_v32 = vld [vmem:[#allocation128_spill] sm:$0xff] }
 0xaaa   :  { %10042 = vmatpush3.msra.mxu0 %v17745_v36  ;;  %10076 = vmatprep.subr.mxu1 %v17746_v52  ;;  %v17756_v36 = vld [vmem:[#allocation145_spill] sm:$0xff]  ;;  %v17757_v52 = vld [vmem:[#allocation112_spill] sm:$0xff] }
 0xaab   :  { %10043 = vmatprep.subr.mxu0 %v17747_v7  ;;  %10077 = vmatpush3.msra.mxu1 %v17748_v15  ;;  %v17758_v7 = vld [vmem:[#allocation160_spill] sm:$0xff]  ;;  %v17759_v15 = vld [vmem:[#allocation127_spill] sm:$0xff] }
 0xaac   :  { %10044 = vmatpush3.msra.mxu0 %v17749_v11  ;;  %10078 = vmatprep.subr.mxu1 %v17750_v50  ;;  %v17760_v11 = vld [vmem:[#allocation144_spill] sm:$0xff]  ;;  %v17761_v50 = vld [vmem:[#allocation111_spill] sm:$0xff] }
 0xaad   :  { %10045 = vmatprep.subr.mxu0 %v17751_v53  ;;  %10079 = vmatpush3.msra.mxu1 %v17752_v25  ;;  %v17762_v53 = vld [vmem:[#allocation159_spill] sm:$0xff]  ;;  %v17763_v25 = vld [vmem:[#allocation126_spill] sm:$0xff] }
 0xaae   :  { %10046 = vmatpush3.msra.mxu0 %v17753_v31  ;;  %10080 = vmatprep.subr.mxu1 %v17754_v20  ;;  %v17764_v31 = vld [vmem:[#allocation143_spill] sm:$0xff]  ;;  %v17765_v20 = vld [vmem:[#allocation110_spill] sm:$0xff] }
 0xaaf   :  { %10047 = vmatprep.subr.mxu0 %v17755_v32  ;;  %10081 = vmatpush3.msra.mxu1 %v17756_v36  ;;  %v17766_v32 = vld [vmem:[#allocation158_spill] sm:$0xff]  ;;  %v17767_v36 = vld [vmem:[#allocation125_spill] sm:$0xff] }
 0xab0   :  { %10048 = vmatpush3.msra.mxu0 %v17757_v52  ;;  %10082 = vmatprep.subr.mxu1 %v17758_v7  ;;  %v17768_v52 = vld [vmem:[#allocation142_spill] sm:$0xff]  ;;  %v17769_v7 = vld [vmem:[#allocation109_spill] sm:$0xff] }
 0xab1   :  { %10049 = vmatprep.subr.mxu0 %v17759_v15  ;;  %10083 = vmatpush3.msra.mxu1 %v17760_v11  ;;  %v17770_v15 = vld [vmem:[#allocation157_spill] sm:$0xff]  ;;  %v17771_v11 = vld [vmem:[#allocation124_spill] sm:$0xff] }
 0xab2   :  { %10050 = vmatpush3.msra.mxu0 %v17761_v50  ;;  %10084 = vmatprep.subr.mxu1 %v17762_v53  ;;  %v17772_v50 = vld [vmem:[#allocation141_spill] sm:$0xff]  ;;  %v17773_v53 = vld [vmem:[#allocation108_spill] sm:$0xff] }
 0xab3   :  { %10051 = vmatprep.subr.mxu0 %v17763_v25  ;;  %10085 = vmatpush3.msra.mxu1 %v17764_v31  ;;  %v17774_v25 = vld [vmem:[#allocation156_spill] sm:$0xff]  ;;  %v17775_v31 = vld [vmem:[#allocation123_spill] sm:$0xff] }
 0xab4   :  { %10052 = vmatpush3.msra.mxu0 %v17765_v20  ;;  %10086 = vmatprep.subr.mxu1 %v17766_v32  ;;  %v17776_v20 = vld [vmem:[#allocation140_spill] sm:$0xff]  ;;  %v17777_v32 = vld [vmem:[#allocation107_spill] sm:$0xff] }
 0xab5   :  { %10053 = vmatprep.subr.mxu0 %v17767_v36  ;;  %10087 = vmatpush3.msra.mxu1 %v17768_v52  ;;  %v17778_v36 = vld [vmem:[#allocation155_spill] sm:$0xff]  ;;  %v17779_v52 = vld [vmem:[#allocation122_spill] sm:$0xff] }
 0xab6   :  { %10054 = vmatpush3.msra.mxu0 %v17769_v7  ;;  %10088 = vmatprep.subr.mxu1 %v17770_v15  ;;  %v17780_v7 = vld [vmem:[#allocation139_spill] sm:$0xff]  ;;  %v17781_v15 = vld [vmem:[#allocation106_spill] sm:$0xff] }
 0xab7   :  { %10055 = vmatprep.subr.mxu0 %v17771_v11  ;;  %10089 = vmatpush3.msra.mxu1 %v17772_v50  ;;  %v17782_v11 = vld [vmem:[#allocation154_spill] sm:$0xff]  ;;  %v17783_v50 = vld [vmem:[#allocation121_spill] sm:$0xff] }
 0xab8   :  { %10056 = vmatpush3.msra.mxu0 %v17773_v53  ;;  %10090 = vmatprep.subr.mxu1 %v17774_v25  ;;  %v17784_v53 = vld [vmem:[#allocation138_spill] sm:$0xff] }
 0xab9   :  { %10057 = vmatprep.subr.mxu0 %v17775_v31  ;;  %10091 = vmatpush3.msra.mxu1 %v17776_v20  ;;  %v17785_v25 = vld [vmem:[#allocation678_spill] sm:$0xff]  ;;  %v17786_v20 = vld [vmem:[#allocation105_spill] sm:$0xff] }
 0xaba   :  { %10058 = vmatpush3.msra.mxu0 %v17777_v32  ;;  %10092 = vmatprep.subr.mxu1 %v17778_v36  ;;  %v7166_v31 = vadd.f32 %v14310_v19, %v17785_v25  ;;  %v17787_v32 = vld [vmem:[#allocation153_spill] sm:$0xff]  ;;  %v17788_v36 = vld [vmem:[#allocation120_spill] sm:$0xff]  ;;  %v17797_v25 = vld [vmem:[#allocation118_spill] sm:$0xff] }
 0xabb   :  { %10059 = vmatprep.subr.mxu0 %v17779_v52  ;;  %10093 = vmatpush3.msra.mxu1 %v17780_v7  ;;  %v17789_v52 = vld [vmem:[#allocation137_spill] sm:$0xff]  ;;  %v17790_v7 = vld [vmem:[#allocation679_spill] sm:$0xff] }
 0xabc   :  { %10060 = vmatpush3.msra.mxu0 %v17781_v15  ;;  %10094 = vmatprep.subr.mxu1 %v17782_v11  ;;  %v7168_v15 = vadd.f32 %v14318_v4, %v17790_v7  ;;  %v17792_v11 = vld [vmem:[#allocation152_spill] sm:$0xff]  ;;  %v7207_v19 = vadd.f32 %v14313_v49, %v7166_v31  ;;  %v17802_v49 = vld [vmem:[#allocation39_spill] sm:$0xff] }
 0xabd   :  { %10061 = vmatprep.subr.mxu0 %v17783_v50  ;;  %10095 = vmatpush3.msra.mxu1 %v17784_v53  ;;  %v17793_v50 = vld [vmem:[#allocation119_spill] sm:$0xff]  ;;  %v17794_v53 = vld [vmem:[#allocation136_spill] sm:$0xff] }
 0xabe   :  { %10062 = vmatpush3.msra.mxu0 %v17786_v20  ;;  %10096 = vmatprep.subr.mxu1 %v17787_v32  ;;  %v17795_v20 = vld [vmem:[#allocation103_spill] sm:$0xff]  ;;  %v7209_v4 = vadd.f32 %v14320_v33, %v7168_v15 }
 0xabf   :  { %10063 = vmatprep.subr.mxu0 %v17788_v36  ;;  %10097 = vmatpush3.msra.mxu1 %v17789_v52  ;;  %v17796_v32 = vld [vmem:[#allocation151_spill] sm:$0xff] }
 0xac0   :  { %10064 = vmatpush3.msra.mxu0 %v17791_v51  ;;  %10098 = vmatprep.subr.mxu1 %v17792_v11  ;;  %v17798_v52 = vld [vmem:[#allocation135_spill] sm:$0xff]  ;;  %v17799_v11 = vld [vmem:[#allocation102_spill] sm:$0xff] }
 0xac1   :  { %10065 = vmatprep.subr.mxu0 %v17793_v50  ;;  %10099 = vmatpush3.msra.mxu1 %v17794_v53  ;;  %v17800_v50 = vld [vmem:[#allocation150_spill] sm:$0xff] }
 0xac2   :  { %10066 = vmatpush3.msra.mxu0 %v17795_v20  ;;  %10100 = vmatprep.subr.mxu1 %v17796_v32  ;;  %v17803_v20 = vld [vmem:[#allocation41_spill] sm:$0xff] }
 0xac3   :  { %v7247_v36 = vpop.f32.mrf.mxu0  ;;  %10067 = vmatprep.subr.mxu0 %v17797_v25  ;;  %10101 = vmatpush3.msra.mxu1 %v17798_v52 }
 0xac4   :  { %v7248_v51 = vadd.f32 %v7247_v36, %v7207_v19  ;;  %v7288_v7 = vpop.f32.mrf.mxu1  ;;  %10068 = vmatpush3.msra.mxu0 %v17799_v11  ;;  %10102 = vmatprep.subr.mxu1 %v17800_v50  ;;  %v17804_v50 = vld [vmem:[#allocation38_spill] sm:$0xff] }
 0xac5   :  { %v7249_v53 = vpop.f32.mrf.mxu0  ;;  %10103 = vmatpush3.msra.mxu1 %v17801_v44  ;;  %7782 = vmatprep.subr.mxu0 %v17802_v49  ;;  %v17805_v44 = vld [vmem:[#allocation43_spill] sm:$0xff] }
 0xac6   :  { %v7250_v31 = vadd.f32 %v7249_v53, %v7209_v4  ;;  %v7290_v32 = vpop.f32.mrf.mxu1  ;;  %7853 = vmatprep.subr.mxu1 %v17803_v20  ;;  %v7289_v25 = vadd.f32 %v7288_v7, %v7248_v51  ;;  %v17806_v7 = vld [vmem:[#allocation680_spill] sm:$0xff] }
 0xac7   :  { %v7251_v21 = vpop.f32.mrf.mxu0 }
 0xac8   :  { %v7291_v52 = vadd.f32 %v7290_v32, %v7250_v31  ;;  %v7292_v42 = vpop.f32.mrf.mxu1  ;;  %v7463_v19 = vmax.f32 %v7289_v25, 0.0  ;;  %v17807_v31 = vld [vmem:[#allocation681_spill] sm:$0xff] }
 0xac9   :  { %v7252_v33 = vpop.f32.mrf.mxu0 }
 0xaca   :  { %v7464_v15 = vmax.f32 %v7291_v52, 0.0  ;;  %v7293_v36 = vpop.f32.mrf.mxu1 }
 0xacc   :  { %7671 = vmatprep.mubr.f32.mxu0 %v7464_v15 }
 0xacd   :  { %7672 = vmatmul.mubr.f32.vlgmr.msra.gmra.mxu0 %v7463_v19 }
 0xace   :  { %7783 = vmatpush1.msra.mxu0 %v17804_v50  ;;  %7816 = vmatprep.mubr.f32.mxu0 %v17175_v9 }
 0xacf   :  { %7924 = vmatprep.subr.mxu0 %v17805_v44 }
 0xb03   :  { %v7329_v53 = vpop.f32.mrf.mxu0 }
 0xb04   :  { %v7370_v4 = vpop.f32.mrf.mxu1  ;;  %v7330_v52 = vadd.f32 %v7329_v53, %v17806_v7  ;;  %v17808_v53 = vld [vmem:[#allocation40_spill] sm:$0xff] }
 0xb05   :  { %v7331_v49 = vpop.f32.mrf.mxu0 }
 0xb06   :  { %v7372_v20 = vpop.f32.mrf.mxu1  ;;  %v7332_v25 = vadd.f32 %v7331_v49, %v17807_v31  ;;  %v7371_v33 = vadd.f32 %v7370_v4, %v7330_v52  ;;  %v17809_v4 = vld [vmem:[#allocation45_spill] sm:$0xff]  ;;  %v18090_v31 = vld [vmem:[#allocation443_spill] sm:$0xff] }
 0xb07   :  { %v7333_v51 = vpop.f32.mrf.mxu0 }
 0xb08   :  { %v7374_v21 = vpop.f32.mrf.mxu1  ;;  %v7373_v36 = vadd.f32 %v7372_v20, %v7332_v25 }
 0xb09   :  { %v7334_v32 = vpop.f32.mrf.mxu0 }
 0xb0a   :  { %v7375_v42 = vpop.f32.mrf.mxu1 }
 0xb43   :  { %v7411_v15 = vpop.f32.mrf.mxu0 }
 0xb44   :  { %v7412_v50 = vadd.f32 %v7411_v15, %v7371_v33  ;;  %v7452_v19 = vpop.f32.mrf.mxu1 }
 0xb45   :  { %v7413_v11 = vpop.f32.mrf.mxu0 }
 0xb46   :  { %v7414_v37 = vadd.f32 %v7413_v11, %v7373_v36  ;;  %v7454_v44 = vpop.f32.mrf.mxu1  ;;  %v7453_v54 = vadd.f32 %v7452_v19, %v7412_v50 }
 0xb47   :  { %v7415_v22 = vpop.f32.mrf.mxu0 }
 0xb48   :  { %v7455_v10 = vadd.f32 %v7454_v44, %v7414_v37  ;;  %v7456_v38 = vpop.f32.mrf.mxu1  ;;  %v7465_v42 = vmax.f32 %v7453_v54, 0.0  ;;  %v17810_v44 = vld [vmem:[#allocation682_spill] sm:$0xff] }
 0xb49   :  { %v7416_v51 = vpop.f32.mrf.mxu0 }
 0xb4a   :  { %v7466_v21 = vmax.f32 %v7455_v10, 0.0  ;;  %v7457_v32 = vpop.f32.mrf.mxu1 }
 0xb4c   :  { %7741 = vmatprep.mubr.f32.mxu1 %v7466_v21  ;;  %v17811_v21 = vld [vmem:[#allocation166_spill] sm:$0xff] }
 0xb4d   :  { %7742 = vmatmul.mubr.f32.vlgmr.msra.gmra.mxu1 %v7465_v42  ;;  %v17813_v42 = vld [vmem:[#allocation42_spill] sm:$0xff] }
 0xb4e   :  { %7854 = vmatpush1.msra.mxu1 %v17808_v53  ;;  %7887 = vmatprep.mubr.f32.mxu1 %v17175_v9  ;;  %v17814_v53 = vld [vmem:[#allocation44_spill] sm:$0xff] }
 0xb4f   :  { %7995 = vmatprep.subr.mxu1 %v17809_v4  ;;  %v17815_v4 = vld [vmem:[#allocation176_spill] sm:$0xff] }
 0xb64   :  { %v9999_v49 = vpop.f32.mrf.mxu0 }
 0xb65   :  { %v10034_v20 = vpop.f32.mrf.mxu1 }
 0xb66   :  { %v10000_v11 = vpop.f32.mrf.mxu0 }
 0xb67   :  { %v10035_v25 = vpop.f32.mrf.mxu1  ;;  %v10001_v37 = vadd.f32 %v10000_v11, %v9999_v49  ;;  %v17816_v49 = vld [vmem:[#allocation178_spill] sm:$0xff]  ;;  %v17818_v11 = vld [vmem:[#allocation179_spill] sm:$0xff] }
 0xb68   :  { %v10036_v38 = vadd.f32 %v10035_v25, %v10034_v20  ;;  %v17817_v20 = vld [vmem:[#allocation177_spill] sm:$0xff] }
 0xb69   :  { %v17820_v25 = vld [vmem:[#allocation181_spill] sm:$0xff] }
 0xb6a   :  { %v7604_v15 = vadd.f32 %v10036_v38, %v10001_v37  ;;  %v17823_v37 = vld [vmem:[#allocation184_spill] sm:$0xff]  ;;  %v17824_v38 = vld [vmem:[#allocation185_spill] sm:$0xff] }
 0xb8d   :  { %v10069_v52 = vpop.f32.mrf.mxu0 }
 0xb8f   :  { %v10070_v22 = vpop.f32.mrf.mxu0 }
 0xb90   :  { %v10071_v33 = vadd.f32 %v10070_v22, %v10069_v52  ;;  %v17819_v52 = vld [vmem:[#allocation180_spill] sm:$0xff]  ;;  %v17821_v22 = vld [vmem:[#allocation182_spill] sm:$0xff] }
 0xb92   :  { %v7674_v36 = vadd.f32 %v10071_v33, %v7604_v15  ;;  %v17825_v33 = vld [vmem:[#allocation186_spill] sm:$0xff]  ;;  %v17827_v15 = vld [vmem:[#allocation188_spill] sm:$0xff] }
 0xc0d   :  { %v10104_v10 = vpop.f32.mrf.mxu1 }
 0xc0f   :  { %v10105_v54 = vpop.f32.mrf.mxu1 }
 0xc10   :  { %v10106_v50 = vadd.f32 %v10105_v54, %v10104_v10  ;;  %v17826_v10 = vld [vmem:[#allocation187_spill] sm:$0xff]  ;;  %v17828_v54 = vld [vmem:[#allocation189_spill] sm:$0xff] }
 0xc12   :  { %v7744_v19 = vadd.f32 %v10106_v50, %v7674_v36  ;;  %v17829_v36 = vld [vmem:[#allocation190_spill] sm:$0xff]  ;;  %v17830_v50 = vld [vmem:[#allocation191_spill] sm:$0xff] }
 0xc14   :  { %v7747_v51 = vadd.f32 %v7744_v19, %v17810_v44  ;;  %v17831_v19 = vld [vmem:[#allocation192_spill] sm:$0xff]  ;;  %v17832_v44 = vld [vmem:[#allocation193_spill] sm:$0xff] }
 0xc16   :  { %v14466_v32 = vadd.f32 %v17811_v21, %v7747_v51  ;;  %v17833_v51 = vld [vmem:[#allocation194_spill] sm:$0xff]  ;;  %v18087_v21 = vld [vmem:[#allocation440_spill] sm:$0xff] }
 0xc18   :  { %17812 = vst [vmem:[#allocation501_spill] sm:$0xff] %v14466_v32  ;;  %9751 = vmatmul.mubr.msk.f32.vlgmr.msra.gmra.mxu0 %vm2111_vm1, %v14466_v32  ;;  %9752 = vmatmul.mubr.msk.f32.vlgmr.msra.gmra.mxu1 %vm2111_vm1, %v14466_v32 }
 0xc19   :  { %7925 = vmatpush1.msra.mxu0 %v17813_v42  ;;  %7958 = vmatprep.mubr.f32.mxu0 %v17175_v9  ;;  %v17834_v42 = vld [vmem:[#allocation195_spill] sm:$0xff] }
 0xc1a   :  { %7996 = vmatpush1.msra.mxu1 %v17814_v53  ;;  %8029 = vmatprep.mubr.f32.mxu1 %v17175_v9  ;;  %v17822_v9 = vld [vmem:[#allocation183_spill] sm:$0xff]  ;;  %v17835_v53 = vld [vmem:[#allocation196_spill] sm:$0xff] }
 0xc1b   :  { %8060 = vmatprep.subr.bf16.mxu0 %v17815_v4  ;;  %8101 = vmatprep.subr.bf16.mxu1 %v17816_v49  ;;  %v17836_v4 = vld [vmem:[#allocation197_spill] sm:$0xff]  ;;  %v17837_v49 = vld [vmem:[#allocation198_spill] sm:$0xff] }
 0xc1c   :  { %9753 = vmatmul.mubr.msk.f32.vlgmr.msra.gmra.mxu0 %vm2111_vm1, %v14466_v32  ;;  %9754 = vmatmul.mubr.msk.f32.vlgmr.msra.gmra.mxu1 %vm2111_vm1, %v14466_v32 }
 0xc1d   :  { %8061 = vmatpush1.bf16.msra.mxu0 %v17817_v20  ;;  %8102 = vmatpush1.bf16.msra.mxu1 %v17818_v11  ;;  %v17838_v20 = vld [vmem:[#allocation199_spill] sm:$0xff]  ;;  %v17839_v11 = vld [vmem:[#allocation200_spill] sm:$0xff] }
 0xc1e   :  { %8062 = vmatprep.subr.bf16.mxu0 %v17819_v52  ;;  %8103 = vmatprep.subr.bf16.mxu1 %v17820_v25  ;;  %v17840_v52 = vld [vmem:[#allocation201_spill] sm:$0xff]  ;;  %v17841_v25 = vld [vmem:[#allocation202_spill] sm:$0xff] }
 0xc21   :  { %8063 = vmatpush1.bf16.msra.mxu0 %v17821_v22  ;;  %8104 = vmatpush1.bf16.msra.mxu1 %v17822_v9  ;;  %v17842_v22 = vld [vmem:[#allocation203_spill] sm:$0xff]  ;;  %v17843_v9 = vld [vmem:[#allocation204_spill] sm:$0xff] }
 0xc22   :  { %8064 = vmatprep.subr.bf16.mxu0 %v17823_v37  ;;  %8105 = vmatprep.subr.bf16.mxu1 %v17824_v38  ;;  %v17844_v37 = vld [vmem:[#allocation205_spill] sm:$0xff]  ;;  %v17845_v38 = vld [vmem:[#allocation206_spill] sm:$0xff] }
 0xc25   :  { %8065 = vmatpush1.bf16.msra.mxu0 %v17825_v33  ;;  %8106 = vmatpush1.bf16.msra.mxu1 %v17826_v10  ;;  %v17846_v33 = vld [vmem:[#allocation207_spill] sm:$0xff]  ;;  %v17847_v10 = vld [vmem:[#allocation208_spill] sm:$0xff] }
 0xc26   :  { %8066 = vmatprep.subr.bf16.mxu0 %v17827_v15  ;;  %8107 = vmatprep.subr.bf16.mxu1 %v17828_v54  ;;  %v17848_v15 = vld [vmem:[#allocation209_spill] sm:$0xff]  ;;  %v17849_v54 = vld [vmem:[#allocation210_spill] sm:$0xff] }
 0xc29   :  { %8067 = vmatpush1.bf16.msra.mxu0 %v17829_v36  ;;  %8108 = vmatpush1.bf16.msra.mxu1 %v17830_v50  ;;  %v17850_v36 = vld [vmem:[#allocation211_spill] sm:$0xff]  ;;  %v17851_v50 = vld [vmem:[#allocation212_spill] sm:$0xff] }
 0xc2a   :  { %8068 = vmatprep.subr.bf16.mxu0 %v17831_v19  ;;  %8109 = vmatprep.subr.bf16.mxu1 %v17832_v44  ;;  %v17852_v19 = vld [vmem:[#allocation213_spill] sm:$0xff]  ;;  %v17853_v44 = vld [vmem:[#allocation214_spill] sm:$0xff] }
 0xc2d   :  { %8069 = vmatpush1.bf16.msra.mxu0 %v17833_v51  ;;  %8110 = vmatpush1.bf16.msra.mxu1 %v17834_v42  ;;  %v17854_v51 = vld [vmem:[#allocation215_spill] sm:$0xff]  ;;  %v17855_v42 = vld [vmem:[#allocation216_spill] sm:$0xff] }
 0xc2e   :  { %8070 = vmatprep.subr.bf16.mxu0 %v17835_v53  ;;  %8111 = vmatprep.subr.bf16.mxu1 %v17836_v4  ;;  %v17856_v53 = vld [vmem:[#allocation217_spill] sm:$0xff]  ;;  %v17857_v4 = vld [vmem:[#allocation218_spill] sm:$0xff] }
 0xc31   :  { %8071 = vmatpush1.bf16.msra.mxu0 %v17837_v49  ;;  %8112 = vmatpush1.bf16.msra.mxu1 %v17838_v20  ;;  %v17858_v49 = vld [vmem:[#allocation219_spill] sm:$0xff]  ;;  %v17859_v20 = vld [vmem:[#allocation220_spill] sm:$0xff] }
 0xc32   :  { %8072 = vmatprep.subr.bf16.mxu0 %v17839_v11  ;;  %8113 = vmatprep.subr.bf16.mxu1 %v17840_v52  ;;  %v17860_v11 = vld [vmem:[#allocation221_spill] sm:$0xff]  ;;  %v17861_v52 = vld [vmem:[#allocation222_spill] sm:$0xff] }
 0xc35   :  { %8073 = vmatpush1.bf16.msra.mxu0 %v17841_v25  ;;  %8114 = vmatpush1.bf16.msra.mxu1 %v17842_v22  ;;  %v17862_v25 = vld [vmem:[#allocation223_spill] sm:$0xff]  ;;  %v17863_v22 = vld [vmem:[#allocation224_spill] sm:$0xff] }
 0xc36   :  { %8074 = vmatprep.subr.bf16.mxu0 %v17843_v9  ;;  %8115 = vmatprep.subr.bf16.mxu1 %v17844_v37  ;;  %v17864_v9 = vld [vmem:[#allocation225_spill] sm:$0xff]  ;;  %v17865_v37 = vld [vmem:[#allocation226_spill] sm:$0xff] }
 0xc39   :  { %8075 = vmatpush1.bf16.msra.mxu0 %v17845_v38  ;;  %8116 = vmatpush1.bf16.msra.mxu1 %v17846_v33  ;;  %v17866_v38 = vld [vmem:[#allocation227_spill] sm:$0xff]  ;;  %v17867_v33 = vld [vmem:[#allocation228_spill] sm:$0xff] }
 0xc3a   :  { %8076 = vmatprep.subr.bf16.mxu0 %v17847_v10  ;;  %8117 = vmatprep.subr.bf16.mxu1 %v17848_v15  ;;  %v17868_v10 = vld [vmem:[#allocation229_spill] sm:$0xff]  ;;  %v17869_v15 = vld [vmem:[#allocation230_spill] sm:$0xff] }
 0xc3d   :  { %8077 = vmatpush2.bf16.msra.mxu0 %v17849_v54  ;;  %8118 = vmatpush2.bf16.msra.mxu1 %v17850_v36  ;;  %v17870_v54 = vld [vmem:[#allocation231_spill] sm:$0xff]  ;;  %v17871_v36 = vld [vmem:[#allocation232_spill] sm:$0xff] }
 0xc3e   :  { %8078 = vmatprep.subr.bf16.mxu0 %v17851_v50  ;;  %8119 = vmatprep.subr.bf16.mxu1 %v17852_v19  ;;  %v17872_v50 = vld [vmem:[#allocation233_spill] sm:$0xff]  ;;  %v17873_v19 = vld [vmem:[#allocation234_spill] sm:$0xff] }
 0xc41   :  { %8079 = vmatpush2.bf16.msra.mxu0 %v17853_v44  ;;  %8120 = vmatpush2.bf16.msra.mxu1 %v17854_v51  ;;  %v17874_v44 = vld [vmem:[#allocation235_spill] sm:$0xff]  ;;  %v17875_v51 = vld [vmem:[#allocation236_spill] sm:$0xff] }
 0xc42   :  { %8080 = vmatprep.subr.bf16.mxu0 %v17855_v42  ;;  %8121 = vmatprep.subr.bf16.mxu1 %v17856_v53  ;;  %v17876_v42 = vld [vmem:[#allocation237_spill] sm:$0xff]  ;;  %v17877_v53 = vld [vmem:[#allocation238_spill] sm:$0xff] }
 0xc45   :  { %8081 = vmatpush2.bf16.msra.mxu0 %v17857_v4  ;;  %8122 = vmatpush2.bf16.msra.mxu1 %v17858_v49  ;;  %v17878_v4 = vld [vmem:[#allocation239_spill] sm:$0xff]  ;;  %v17879_v49 = vld [vmem:[#allocation240_spill] sm:$0xff] }
 0xc46   :  { %8082 = vmatprep.subr.bf16.mxu0 %v17859_v20  ;;  %8123 = vmatprep.subr.bf16.mxu1 %v17860_v11  ;;  %v17880_v20 = vld [vmem:[#allocation241_spill] sm:$0xff] }
 0xc49   :  { %8083 = vmatpush2.bf16.msra.mxu0 %v17861_v52  ;;  %8124 = vmatpush2.bf16.msra.mxu1 %v17862_v25  ;;  %v17881_v25 = vld [vmem:[#allocation168_spill] sm:$0xff] }
 0xc4a   :  { %8084 = vmatprep.subr.bf16.mxu0 %v17863_v22  ;;  %8125 = vmatprep.subr.bf16.mxu1 %v17864_v9  ;;  %v17882_v9 = vld [vmem:[#allocation169_spill] sm:$0xff] }
 0xc4d   :  { %8085 = vmatpush2.bf16.msra.mxu0 %v17865_v37  ;;  %8126 = vmatpush2.bf16.msra.mxu1 %v17866_v38 }
 0xc4e   :  { %8086 = vmatprep.subr.bf16.mxu0 %v17867_v33  ;;  %8127 = vmatprep.subr.bf16.mxu1 %v17868_v10  ;;  %v17883_v10 = vld [vmem:[#allocation170_spill] sm:$0xff] }
 0xc51   :  { %8087 = vmatpush2.bf16.msra.mxu0 %v17869_v15  ;;  %8128 = vmatpush2.bf16.msra.mxu1 %v17870_v54  ;;  %v17884_v54 = vld [vmem:[#allocation171_spill] sm:$0xff] }
 0xc52   :  { %8088 = vmatprep.subr.bf16.mxu0 %v17871_v36  ;;  %8129 = vmatprep.subr.bf16.mxu1 %v17872_v50 }
 0xc55   :  { %8089 = vmatpush2.bf16.msra.mxu0 %v17873_v19  ;;  %8130 = vmatpush2.bf16.msra.mxu1 %v17874_v44 }
 0xc56   :  { %8090 = vmatprep.subr.bf16.mxu0 %v17875_v51  ;;  %8131 = vmatprep.subr.bf16.mxu1 %v17876_v42 }
 0xc59   :  { %8091 = vmatpush2.bf16.msra.mxu0 %v17877_v53  ;;  %8132 = vmatpush2.bf16.msra.mxu1 %v17878_v4 }
 0xc5a   :  { %8142 = vmatprep.subr.bf16.mxu0 %v17879_v49  ;;  %8183 = vmatprep.subr.bf16.mxu1 %v17880_v20 }
 0xcd8   :  { %v7818_v11 = vpop.f32.mrf.mxu0  ;;  %v7889_v52 = vpop.f32.mrf.mxu1 }
 0xcd9   :  { %v8036_v22 = vadd.f32 %v7818_v11, %v17881_v25  ;;  %v8038_v37 = vadd.f32 %v7889_v52, %v17882_v9  ;;  %v17885_v52 = vld [vmem:[#allocation174_spill] sm:$0xff]  ;;  %v17886_v9 = vld [vmem:[#allocation175_spill] sm:$0xff] }
 0xcda   :  { %v7820_v38 = vpop.f32.mrf.mxu0  ;;  %v7891_v33 = vpop.f32.mrf.mxu1 }
 0xcdb   :  { %v8037_v15 = vadd.f32 %v7820_v38, %v17883_v10  ;;  %v8039_v36 = vadd.f32 %v7891_v33, %v17884_v54  ;;  %v8044_v50 = vmax.f32 %v8036_v22, 0.0  ;;  %v8046_v19 = vmax.f32 %v8038_v37, 0.0 }
 0xcdc   :  { %v14550_v44 = vpop.f32.mrf.mxu0  ;;  %v14552_v51 = vpop.f32.mrf.mxu1 }
 0xcdd   :  { %v8045_v42 = vmax.f32 %v8037_v15, 0.0  ;;  %v8047_v53 = vmax.f32 %v8039_v36, 0.0  ;;  %v14560_v10 = vpack.c.bf16 %v8044_v50, %v8044_v50  ;;  %v14562_v22 = vpack.c.bf16 %v8046_v19, %v8046_v19  ;;  %v17887_v36 = vld [vmem:[#allocation242_spill] sm:$0xff]  ;;  %v17888_v50 = vld [vmem:[#allocation243_spill] sm:$0xff]  ;;  %v17889_v19 = vld [vmem:[#allocation244_spill] sm:$0xff] }
 0xcde   :  { %v7962_v4 = vpop.f32.mrf.mxu0  ;;  %v8033_v49 = vpop.f32.mrf.mxu1 }
 0xcdf   :  { %v14554_v20 = vpack.c.bf16 %v8045_v42, %v8045_v42  ;;  %v14556_v11 = vpack.c.bf16 %v8047_v53, %v8047_v53  ;;  %v8041_v25 = vadd.f32 %v7962_v4, %v17885_v52  ;;  %v8043_v38 = vadd.f32 %v8033_v49, %v17886_v9  ;;  %v17890_v42 = vld [vmem:[#allocation245_spill] sm:$0xff]  ;;  %v17891_v53 = vld [vmem:[#allocation246_spill] sm:$0xff]  ;;  %v17892_v4 = vld [vmem:[#allocation247_spill] sm:$0xff] }
 0xce0   :  { %v17893_v49 = vld [vmem:[#allocation248_spill] sm:$0xff]  ;;  %v17894_v52 = vld [vmem:[#allocation249_spill] sm:$0xff]  ;;  %v17896_v9 = vld [vmem:[#allocation251_spill] sm:$0xff] }
 0xce1   :  { %v8049_v37 = vmax.f32 %v8041_v25, 0.0  ;;  %v8051_v33 = vmax.f32 %v8043_v38, 0.0  ;;  %8092 = vmatprep.mubr.bf16.mxu0 %v14554_v20  ;;  %8133 = vmatprep.mubr.bf16.mxu1 %v14556_v11  ;;  %v17895_v25 = vld [vmem:[#allocation250_spill] sm:$0xff]  ;;  %v17897_v38 = vld [vmem:[#allocation252_spill] sm:$0xff] }
 0xce2   :  { %8093 = vmatmul.mubr.bf16.vlgmr.msra.gmra.mxu0 %v14560_v10  ;;  %8134 = vmatmul.mubr.bf16.vlgmr.msra.gmra.mxu1 %v14562_v22 }
 0xce3   :  { %v14568_v15 = vpack.c.bf16 %v8049_v37, %v8049_v37  ;;  %v14570_v54 = vpack.c.bf16 %v8051_v33, %v8051_v33  ;;  %8143 = vmatpush1.bf16.msra.mxu0 %v17887_v36  ;;  %8184 = vmatpush1.bf16.msra.mxu1 %v17888_v50  ;;  %v17898_v37 = vld [vmem:[#allocation253_spill] sm:$0xff]  ;;  %v17899_v33 = vld [vmem:[#allocation254_spill] sm:$0xff]  ;;  %v17900_v36 = vld [vmem:[#allocation255_spill] sm:$0xff] }
 0xce4   :  { %8144 = vmatprep.subr.bf16.mxu0 %v17889_v19  ;;  %8185 = vmatprep.subr.bf16.mxu1 %v17890_v42  ;;  %v17901_v50 = vld [vmem:[#allocation256_spill] sm:$0xff]  ;;  %v17902_v19 = vld [vmem:[#allocation257_spill] sm:$0xff]  ;;  %v17903_v42 = vld [vmem:[#allocation258_spill] sm:$0xff] }
 0xce5   :  { %8174 = vmatprep.mubr.bf16.mxu0 %v14568_v15  ;;  %8215 = vmatprep.mubr.bf16.mxu1 %v14570_v54 }
 0xce7   :  { %8145 = vmatpush1.bf16.msra.mxu0 %v17891_v53  ;;  %8186 = vmatpush1.bf16.msra.mxu1 %v17892_v4  ;;  %v17904_v53 = vld [vmem:[#allocation259_spill] sm:$0xff]  ;;  %v17905_v4 = vld [vmem:[#allocation260_spill] sm:$0xff] }
 0xce8   :  { %8146 = vmatprep.subr.bf16.mxu0 %v17893_v49  ;;  %8187 = vmatprep.subr.bf16.mxu1 %v17894_v52  ;;  %v17906_v49 = vld [vmem:[#allocation261_spill] sm:$0xff]  ;;  %v17907_v52 = vld [vmem:[#allocation262_spill] sm:$0xff] }
 0xceb   :  { %8147 = vmatpush1.bf16.msra.mxu0 %v17895_v25  ;;  %8188 = vmatpush1.bf16.msra.mxu1 %v17896_v9  ;;  %v17908_v25 = vld [vmem:[#allocation263_spill] sm:$0xff]  ;;  %v17909_v9 = vld [vmem:[#allocation264_spill] sm:$0xff] }
 0xcec   :  { %8148 = vmatprep.subr.bf16.mxu0 %v17897_v38  ;;  %8189 = vmatprep.subr.bf16.mxu1 %v17898_v37  ;;  %v17910_v38 = vld [vmem:[#allocation265_spill] sm:$0xff]  ;;  %v17911_v37 = vld [vmem:[#allocation266_spill] sm:$0xff] }
 0xcef   :  { %8149 = vmatpush1.bf16.msra.mxu0 %v17899_v33  ;;  %8190 = vmatpush1.bf16.msra.mxu1 %v17900_v36  ;;  %v17912_v33 = vld [vmem:[#allocation267_spill] sm:$0xff]  ;;  %v17913_v36 = vld [vmem:[#allocation268_spill] sm:$0xff] }
 0xcf0   :  { %8150 = vmatprep.subr.bf16.mxu0 %v17901_v50  ;;  %8191 = vmatprep.subr.bf16.mxu1 %v17902_v19  ;;  %v17914_v50 = vld [vmem:[#allocation269_spill] sm:$0xff]  ;;  %v17915_v19 = vld [vmem:[#allocation270_spill] sm:$0xff] }
 0xcf3   :  { %8151 = vmatpush1.bf16.msra.mxu0 %v17903_v42  ;;  %8192 = vmatpush1.bf16.msra.mxu1 %v17904_v53  ;;  %v17916_v42 = vld [vmem:[#allocation271_spill] sm:$0xff]  ;;  %v17917_v53 = vld [vmem:[#allocation272_spill] sm:$0xff] }
 0xcf4   :  { %8152 = vmatprep.subr.bf16.mxu0 %v17905_v4  ;;  %8193 = vmatprep.subr.bf16.mxu1 %v17906_v49  ;;  %v17918_v4 = vld [vmem:[#allocation273_spill] sm:$0xff]  ;;  %v17919_v49 = vld [vmem:[#allocation274_spill] sm:$0xff] }
 0xcf7   :  { %8153 = vmatpush1.bf16.msra.mxu0 %v17907_v52  ;;  %8194 = vmatpush1.bf16.msra.mxu1 %v17908_v25  ;;  %v17920_v52 = vld [vmem:[#allocation275_spill] sm:$0xff]  ;;  %v17921_v25 = vld [vmem:[#allocation276_spill] sm:$0xff] }
 0xcf8   :  { %8154 = vmatprep.subr.bf16.mxu0 %v17909_v9  ;;  %8195 = vmatprep.subr.bf16.mxu1 %v17910_v38  ;;  %v17922_v9 = vld [vmem:[#allocation277_spill] sm:$0xff]  ;;  %v17923_v38 = vld [vmem:[#allocation278_spill] sm:$0xff] }
 0xcfb   :  { %8155 = vmatpush1.bf16.msra.mxu0 %v17911_v37  ;;  %8196 = vmatpush1.bf16.msra.mxu1 %v17912_v33  ;;  %v17924_v37 = vld [vmem:[#allocation279_spill] sm:$0xff]  ;;  %v17925_v33 = vld [vmem:[#allocation280_spill] sm:$0xff] }
 0xcfc   :  { %8156 = vmatprep.subr.bf16.mxu0 %v17913_v36  ;;  %8197 = vmatprep.subr.bf16.mxu1 %v17914_v50  ;;  %v17926_v36 = vld [vmem:[#allocation281_spill] sm:$0xff]  ;;  %v17927_v50 = vld [vmem:[#allocation282_spill] sm:$0xff] }
 0xcff   :  { %8157 = vmatpush1.bf16.msra.mxu0 %v17915_v19  ;;  %8198 = vmatpush1.bf16.msra.mxu1 %v17916_v42  ;;  %v17928_v19 = vld [vmem:[#allocation283_spill] sm:$0xff]  ;;  %v17929_v42 = vld [vmem:[#allocation284_spill] sm:$0xff] }
 0xd00   :  { %8158 = vmatprep.subr.bf16.mxu0 %v17917_v53  ;;  %8199 = vmatprep.subr.bf16.mxu1 %v17918_v4  ;;  %v17930_v53 = vld [vmem:[#allocation285_spill] sm:$0xff]  ;;  %v17931_v4 = vld [vmem:[#allocation286_spill] sm:$0xff] }
 0xd03   :  { %8159 = vmatpush2.bf16.msra.mxu0 %v17919_v49  ;;  %8200 = vmatpush2.bf16.msra.mxu1 %v17920_v52  ;;  %v17932_v49 = vld [vmem:[#allocation287_spill] sm:$0xff]  ;;  %v17933_v52 = vld [vmem:[#allocation288_spill] sm:$0xff] }
 0xd04   :  { %8160 = vmatprep.subr.bf16.mxu0 %v17921_v25  ;;  %8201 = vmatprep.subr.bf16.mxu1 %v17922_v9  ;;  %v17934_v25 = vld [vmem:[#allocation289_spill] sm:$0xff]  ;;  %v17935_v9 = vld [vmem:[#allocation290_spill] sm:$0xff] }
 0xd07   :  { %8161 = vmatpush2.bf16.msra.mxu0 %v17923_v38  ;;  %8202 = vmatpush2.bf16.msra.mxu1 %v17924_v37  ;;  %v17936_v38 = vld [vmem:[#allocation291_spill] sm:$0xff]  ;;  %v17937_v37 = vld [vmem:[#allocation292_spill] sm:$0xff] }
 0xd08   :  { %8162 = vmatprep.subr.bf16.mxu0 %v17925_v33  ;;  %8203 = vmatprep.subr.bf16.mxu1 %v17926_v36  ;;  %v17938_v33 = vld [vmem:[#allocation293_spill] sm:$0xff]  ;;  %v17939_v36 = vld [vmem:[#allocation294_spill] sm:$0xff] }
 0xd0b   :  { %8163 = vmatpush2.bf16.msra.mxu0 %v17927_v50  ;;  %8204 = vmatpush2.bf16.msra.mxu1 %v17928_v19  ;;  %v17940_v50 = vld [vmem:[#allocation295_spill] sm:$0xff]  ;;  %v17941_v19 = vld [vmem:[#allocation172_spill] sm:$0xff] }
 0xd0c   :  { %8164 = vmatprep.subr.bf16.mxu0 %v17929_v42  ;;  %8205 = vmatprep.subr.bf16.mxu1 %v17930_v53  ;;  %v8040_v42 = vadd.f32 %v14550_v44, %v17941_v19  ;;  %v17942_v53 = vld [vmem:[#allocation173_spill] sm:$0xff]  ;;  %v17950_v44 = vld [vmem:[#allocation303_spill] sm:$0xff] }
 0xd0f   :  { %8165 = vmatpush2.bf16.msra.mxu0 %v17931_v4  ;;  %8206 = vmatpush2.bf16.msra.mxu1 %v17932_v49  ;;  %v8042_v4 = vadd.f32 %v14552_v51, %v17942_v53  ;;  %v17943_v49 = vld [vmem:[#allocation296_spill] sm:$0xff] }
 0xd10   :  { %8166 = vmatprep.subr.bf16.mxu0 %v17933_v52  ;;  %8207 = vmatprep.subr.bf16.mxu1 %v17934_v25  ;;  %v17944_v52 = vld [vmem:[#allocation297_spill] sm:$0xff]  ;;  %v17945_v25 = vld [vmem:[#allocation298_spill] sm:$0xff]  ;;  %v17951_v53 = vld [vmem:[#allocation304_spill] sm:$0xff] }
 0xd13   :  { %8167 = vmatpush2.bf16.msra.mxu0 %v17935_v9  ;;  %8208 = vmatpush2.bf16.msra.mxu1 %v17936_v38  ;;  %v17946_v9 = vld [vmem:[#allocation299_spill] sm:$0xff]  ;;  %v8048_v38 = vmax.f32 %v8040_v42, 0.0  ;;  %v17953_v42 = vld [vmem:[#allocation306_spill] sm:$0xff] }
 0xd14   :  { %8168 = vmatprep.subr.bf16.mxu0 %v17937_v37  ;;  %8209 = vmatprep.subr.bf16.mxu1 %v17938_v33  ;;  %v8050_v37 = vmax.f32 %v8042_v4, 0.0  ;;  %v17947_v33 = vld [vmem:[#allocation300_spill] sm:$0xff]  ;;  %v17954_v4 = vld [vmem:[#allocation307_spill] sm:$0xff] }
 0xd15   :  { %v14640_v19 = vpack.c.bf16 %v8048_v38, %v8048_v38  ;;  %v17958_v38 = vld [vmem:[#allocation311_spill] sm:$0xff] }
 0xd16   :  { %v14642_v51 = vpack.c.bf16 %v8050_v37, %v8050_v37  ;;  %v17959_v37 = vld [vmem:[#allocation312_spill] sm:$0xff] }
 0xd17   :  { %8169 = vmatpush2.bf16.msra.mxu0 %v17939_v36  ;;  %8210 = vmatpush2.bf16.msra.mxu1 %v17940_v50  ;;  %v17948_v36 = vld [vmem:[#allocation301_spill] sm:$0xff]  ;;  %v17949_v50 = vld [vmem:[#allocation302_spill] sm:$0xff] }
 0xd18   :  { %8170 = vmatprep.subr.bf16.mxu0 %v17943_v49  ;;  %8211 = vmatprep.subr.bf16.mxu1 %v17944_v52  ;;  %v17952_v49 = vld [vmem:[#allocation305_spill] sm:$0xff]  ;;  %v17955_v52 = vld [vmem:[#allocation308_spill] sm:$0xff] }
 0xd1b   :  { %8171 = vmatpush2.bf16.msra.mxu0 %v17945_v25  ;;  %8212 = vmatpush2.bf16.msra.mxu1 %v17946_v9  ;;  %v17956_v25 = vld [vmem:[#allocation309_spill] sm:$0xff]  ;;  %v17957_v9 = vld [vmem:[#allocation310_spill] sm:$0xff] }
 0xd1c   :  { %8172 = vmatprep.subr.bf16.mxu0 %v17947_v33  ;;  %8213 = vmatprep.subr.bf16.mxu1 %v17948_v36  ;;  %v17960_v33 = vld [vmem:[#allocation313_spill] sm:$0xff]  ;;  %v17961_v36 = vld [vmem:[#allocation314_spill] sm:$0xff] }
 0xd1f   :  { %8173 = vmatpush2.bf16.msra.mxu0 %v17949_v50  ;;  %8214 = vmatpush2.bf16.msra.mxu1 %v17950_v44  ;;  %v17962_v50 = vld [vmem:[#allocation315_spill] sm:$0xff]  ;;  %v17963_v44 = vld [vmem:[#allocation316_spill] sm:$0xff] }
 0xd20   :  { %8224 = vmatprep.subr.bf16.mxu0 %v17951_v53  ;;  %8265 = vmatprep.subr.bf16.mxu1 %v17952_v49  ;;  %v17964_v53 = vld [vmem:[#allocation317_spill] sm:$0xff]  ;;  %v17965_v49 = vld [vmem:[#allocation318_spill] sm:$0xff] }
 0xd22   :  { %8175 = vmatmul.mubr.bf16.vlgmr.msra.gmra.mxu0 %v14640_v19  ;;  %8216 = vmatmul.mubr.bf16.vlgmr.msra.gmra.mxu1 %v14642_v51 }
 0xd23   :  { %8225 = vmatpush1.bf16.msra.mxu0 %v17953_v42  ;;  %8256 = vmatprep.mubr.bf16.mxu0 %v14554_v20  ;;  %v17966_v42 = vld [vmem:[#allocation319_spill] sm:$0xff] }
 0xd24   :  { %8266 = vmatpush1.bf16.msra.mxu1 %v17954_v4  ;;  %8297 = vmatprep.mubr.bf16.mxu1 %v14556_v11  ;;  %v17967_v4 = vld [vmem:[#allocation320_spill] sm:$0xff] }
 0xd25   :  { %8226 = vmatprep.subr.bf16.mxu0 %v17955_v52  ;;  %8267 = vmatprep.subr.bf16.mxu1 %v17956_v25  ;;  %v17968_v52 = vld [vmem:[#allocation321_spill] sm:$0xff]  ;;  %v17969_v25 = vld [vmem:[#allocation322_spill] sm:$0xff] }
 0xd27   :  { %8227 = vmatpush1.bf16.msra.mxu0 %v17957_v9  ;;  %v17970_v9 = vld [vmem:[#allocation323_spill] sm:$0xff] }
 0xd28   :  { %8268 = vmatpush1.bf16.msra.mxu1 %v17958_v38  ;;  %8228 = vmatprep.subr.bf16.mxu0 %v17959_v37  ;;  %v17971_v38 = vld [vmem:[#allocation324_spill] sm:$0xff]  ;;  %v17972_v37 = vld [vmem:[#allocation325_spill] sm:$0xff] }
 0xd29   :  { %8269 = vmatprep.subr.bf16.mxu1 %v17960_v33  ;;  %v17973_v33 = vld [vmem:[#allocation326_spill] sm:$0xff] }
 0xd2b   :  { %8229 = vmatpush1.bf16.msra.mxu0 %v17961_v36  ;;  %v17974_v36 = vld [vmem:[#allocation327_spill] sm:$0xff] }
 0xd2c   :  { %8270 = vmatpush1.bf16.msra.mxu1 %v17962_v50  ;;  %8230 = vmatprep.subr.bf16.mxu0 %v17963_v44  ;;  %v17975_v50 = vld [vmem:[#allocation328_spill] sm:$0xff]  ;;  %v17976_v44 = vld [vmem:[#allocation329_spill] sm:$0xff] }
 0xd2d   :  { %8271 = vmatprep.subr.bf16.mxu1 %v17964_v53  ;;  %v17977_v53 = vld [vmem:[#allocation330_spill] sm:$0xff] }
 0xd2f   :  { %8231 = vmatpush1.bf16.msra.mxu0 %v17965_v49  ;;  %v17978_v49 = vld [vmem:[#allocation331_spill] sm:$0xff] }
 0xd30   :  { %8272 = vmatpush1.bf16.msra.mxu1 %v17966_v42  ;;  %8232 = vmatprep.subr.bf16.mxu0 %v17967_v4  ;;  %v17979_v42 = vld [vmem:[#allocation332_spill] sm:$0xff]  ;;  %v17980_v4 = vld [vmem:[#allocation333_spill] sm:$0xff] }
 0xd31   :  { %8273 = vmatprep.subr.bf16.mxu1 %v17968_v52  ;;  %v17981_v52 = vld [vmem:[#allocation334_spill] sm:$0xff] }
 0xd33   :  { %8233 = vmatpush1.bf16.msra.mxu0 %v17969_v25  ;;  %v17982_v25 = vld [vmem:[#allocation335_spill] sm:$0xff] }
 0xd34   :  { %8274 = vmatpush1.bf16.msra.mxu1 %v17970_v9  ;;  %8234 = vmatprep.subr.bf16.mxu0 %v17971_v38  ;;  %v17983_v9 = vld [vmem:[#allocation336_spill] sm:$0xff]  ;;  %v17984_v38 = vld [vmem:[#allocation337_spill] sm:$0xff] }
 0xd35   :  { %8275 = vmatprep.subr.bf16.mxu1 %v17972_v37  ;;  %v17985_v37 = vld [vmem:[#allocation338_spill] sm:$0xff] }
 0xd37   :  { %8235 = vmatpush1.bf16.msra.mxu0 %v17973_v33  ;;  %v17986_v33 = vld [vmem:[#allocation339_spill] sm:$0xff] }
 0xd38   :  { %8276 = vmatpush1.bf16.msra.mxu1 %v17974_v36  ;;  %8236 = vmatprep.subr.bf16.mxu0 %v17975_v50  ;;  %v17987_v36 = vld [vmem:[#allocation340_spill] sm:$0xff]  ;;  %v17988_v50 = vld [vmem:[#allocation341_spill] sm:$0xff] }
 0xd39   :  { %8277 = vmatprep.subr.bf16.mxu1 %v17976_v44  ;;  %v17989_v44 = vld [vmem:[#allocation342_spill] sm:$0xff] }
 0xd3b   :  { %8237 = vmatpush1.bf16.msra.mxu0 %v17977_v53  ;;  %v17990_v53 = vld [vmem:[#allocation343_spill] sm:$0xff] }
 0xd3c   :  { %8278 = vmatpush1.bf16.msra.mxu1 %v17978_v49  ;;  %8238 = vmatprep.subr.bf16.mxu0 %v17979_v42  ;;  %v17991_v49 = vld [vmem:[#allocation344_spill] sm:$0xff]  ;;  %v17992_v42 = vld [vmem:[#allocation345_spill] sm:$0xff] }
 0xd3d   :  { %8279 = vmatprep.subr.bf16.mxu1 %v17980_v4  ;;  %v17993_v4 = vld [vmem:[#allocation346_spill] sm:$0xff] }
 0xd3f   :  { %8239 = vmatpush1.bf16.msra.mxu0 %v17981_v52  ;;  %v17994_v52 = vld [vmem:[#allocation347_spill] sm:$0xff] }
 0xd40   :  { %8280 = vmatpush1.bf16.msra.mxu1 %v17982_v25  ;;  %8240 = vmatprep.subr.bf16.mxu0 %v17983_v9  ;;  %v17995_v25 = vld [vmem:[#allocation348_spill] sm:$0xff]  ;;  %v17996_v9 = vld [vmem:[#allocation349_spill] sm:$0xff] }
 0xd41   :  { %8281 = vmatprep.subr.bf16.mxu1 %v17984_v38  ;;  %v17997_v38 = vld [vmem:[#allocation350_spill] sm:$0xff] }
 0xd43   :  { %8241 = vmatpush2.bf16.msra.mxu0 %v17985_v37  ;;  %v17998_v37 = vld [vmem:[#allocation351_spill] sm:$0xff] }
 0xd44   :  { %8282 = vmatpush2.bf16.msra.mxu1 %v17986_v33  ;;  %8242 = vmatprep.subr.bf16.mxu0 %v17987_v36  ;;  %v17999_v33 = vld [vmem:[#allocation352_spill] sm:$0xff]  ;;  %v18000_v36 = vld [vmem:[#allocation353_spill] sm:$0xff] }
 0xd45   :  { %8283 = vmatprep.subr.bf16.mxu1 %v17988_v50  ;;  %v18001_v50 = vld [vmem:[#allocation354_spill] sm:$0xff] }
 0xd47   :  { %8243 = vmatpush2.bf16.msra.mxu0 %v17989_v44  ;;  %v18002_v44 = vld [vmem:[#allocation355_spill] sm:$0xff] }
 0xd48   :  { %8284 = vmatpush2.bf16.msra.mxu1 %v17990_v53  ;;  %8244 = vmatprep.subr.bf16.mxu0 %v17991_v49  ;;  %v18003_v53 = vld [vmem:[#allocation356_spill] sm:$0xff]  ;;  %v18004_v49 = vld [vmem:[#allocation357_spill] sm:$0xff] }
 0xd49   :  { %8285 = vmatprep.subr.bf16.mxu1 %v17992_v42  ;;  %v18005_v42 = vld [vmem:[#allocation358_spill] sm:$0xff] }
 0xd4b   :  { %8245 = vmatpush2.bf16.msra.mxu0 %v17993_v4  ;;  %v18006_v4 = vld [vmem:[#allocation359_spill] sm:$0xff] }
 0xd4c   :  { %8286 = vmatpush2.bf16.msra.mxu1 %v17994_v52  ;;  %8246 = vmatprep.subr.bf16.mxu0 %v17995_v25  ;;  %v18007_v52 = vld [vmem:[#allocation360_spill] sm:$0xff]  ;;  %v18008_v25 = vld [vmem:[#allocation361_spill] sm:$0xff] }
 0xd4d   :  { %8287 = vmatprep.subr.bf16.mxu1 %v17996_v9  ;;  %v18009_v9 = vld [vmem:[#allocation362_spill] sm:$0xff] }
 0xd4f   :  { %8247 = vmatpush2.bf16.msra.mxu0 %v17997_v38  ;;  %v18010_v38 = vld [vmem:[#allocation363_spill] sm:$0xff] }
 0xd50   :  { %8288 = vmatpush2.bf16.msra.mxu1 %v17998_v37  ;;  %8248 = vmatprep.subr.bf16.mxu0 %v17999_v33  ;;  %v18011_v37 = vld [vmem:[#allocation364_spill] sm:$0xff]  ;;  %v18012_v33 = vld [vmem:[#allocation365_spill] sm:$0xff] }
 0xd51   :  { %8289 = vmatprep.subr.bf16.mxu1 %v18000_v36  ;;  %v18013_v36 = vld [vmem:[#allocation366_spill] sm:$0xff] }
 0xd53   :  { %8249 = vmatpush2.bf16.msra.mxu0 %v18001_v50  ;;  %v18014_v50 = vld [vmem:[#allocation367_spill] sm:$0xff] }
 0xd54   :  { %8290 = vmatpush2.bf16.msra.mxu1 %v18002_v44  ;;  %8250 = vmatprep.subr.bf16.mxu0 %v18003_v53  ;;  %v18015_v44 = vld [vmem:[#allocation368_spill] sm:$0xff]  ;;  %v18016_v53 = vld [vmem:[#allocation369_spill] sm:$0xff] }
 0xd55   :  { %8291 = vmatprep.subr.bf16.mxu1 %v18004_v49  ;;  %v18017_v49 = vld [vmem:[#allocation370_spill] sm:$0xff] }
 0xd57   :  { %8251 = vmatpush2.bf16.msra.mxu0 %v18005_v42  ;;  %v18018_v42 = vld [vmem:[#allocation371_spill] sm:$0xff] }
 0xd58   :  { %8292 = vmatpush2.bf16.msra.mxu1 %v18006_v4  ;;  %8252 = vmatprep.subr.bf16.mxu0 %v18007_v52  ;;  %v18019_v4 = vld [vmem:[#allocation372_spill] sm:$0xff]  ;;  %v18020_v52 = vld [vmem:[#allocation373_spill] sm:$0xff] }
 0xd59   :  { %8293 = vmatprep.subr.bf16.mxu1 %v18008_v25  ;;  %v18021_v25 = vld [vmem:[#allocation374_spill] sm:$0xff] }
 0xd5b   :  { %8253 = vmatpush2.bf16.msra.mxu0 %v18009_v9  ;;  %v18022_v9 = vld [vmem:[#allocation375_spill] sm:$0xff] }
 0xd5c   :  { %8294 = vmatpush2.bf16.msra.mxu1 %v18010_v38  ;;  %8254 = vmatprep.subr.bf16.mxu0 %v18011_v37  ;;  %v18023_v38 = vld [vmem:[#allocation376_spill] sm:$0xff]  ;;  %v18024_v37 = vld [vmem:[#allocation377_spill] sm:$0xff] }
 0xd5d   :  { %8295 = vmatprep.subr.bf16.mxu1 %v18012_v33  ;;  %v18025_v33 = vld [vmem:[#allocation378_spill] sm:$0xff] }
 0xd5f   :  { %8255 = vmatpush2.bf16.msra.mxu0 %v18013_v36  ;;  %v18026_v36 = vld [vmem:[#allocation379_spill] sm:$0xff] }
 0xd60   :  { %8296 = vmatpush2.bf16.msra.mxu1 %v18014_v50  ;;  %8306 = vmatprep.subr.bf16.mxu0 %v18015_v44  ;;  %v18027_v50 = vld [vmem:[#allocation380_spill] sm:$0xff]  ;;  %v18028_v44 = vld [vmem:[#allocation381_spill] sm:$0xff] }
 0xd61   :  { %8347 = vmatprep.subr.bf16.mxu1 %v18016_v53  ;;  %v18029_v53 = vld [vmem:[#allocation382_spill] sm:$0xff] }
 0xd62   :  { %8257 = vmatmul.mubr.bf16.vlgmr.msra.gmra.mxu0 %v14560_v10 }
 0xd63   :  { %8298 = vmatmul.mubr.bf16.vlgmr.msra.gmra.mxu1 %v14562_v22  ;;  %8307 = vmatpush1.bf16.msra.mxu0 %v18017_v49  ;;  %v18030_v49 = vld [vmem:[#allocation383_spill] sm:$0xff] }
 0xd64   :  { %8338 = vmatprep.mubr.bf16.mxu0 %v14568_v15  ;;  %8348 = vmatpush1.bf16.msra.mxu1 %v18018_v42  ;;  %v18031_v42 = vld [vmem:[#allocation384_spill] sm:$0xff] }
 0xd65   :  { %8379 = vmatprep.mubr.bf16.mxu1 %v14570_v54  ;;  %8308 = vmatprep.subr.bf16.mxu0 %v18019_v4  ;;  %v18032_v4 = vld [vmem:[#allocation385_spill] sm:$0xff] }
 0xd66   :  { %8349 = vmatprep.subr.bf16.mxu1 %v18020_v52  ;;  %v18033_v52 = vld [vmem:[#allocation386_spill] sm:$0xff] }
 0xd67   :  { %8309 = vmatpush1.bf16.msra.mxu0 %v18021_v25  ;;  %v18034_v25 = vld [vmem:[#allocation387_spill] sm:$0xff] }
 0xd68   :  { %8350 = vmatpush1.bf16.msra.mxu1 %v18022_v9  ;;  %8310 = vmatprep.subr.bf16.mxu0 %v18023_v38  ;;  %v18035_v9 = vld [vmem:[#allocation388_spill] sm:$0xff]  ;;  %v18036_v38 = vld [vmem:[#allocation389_spill] sm:$0xff] }
 0xd69   :  { %8351 = vmatprep.subr.bf16.mxu1 %v18024_v37  ;;  %v18037_v37 = vld [vmem:[#allocation390_spill] sm:$0xff] }
 0xd6b   :  { %8311 = vmatpush1.bf16.msra.mxu0 %v18025_v33  ;;  %v18038_v33 = vld [vmem:[#allocation391_spill] sm:$0xff] }
 0xd6c   :  { %8352 = vmatpush1.bf16.msra.mxu1 %v18026_v36  ;;  %8312 = vmatprep.subr.bf16.mxu0 %v18027_v50  ;;  %v18039_v36 = vld [vmem:[#allocation392_spill] sm:$0xff]  ;;  %v18040_v50 = vld [vmem:[#allocation393_spill] sm:$0xff] }
 0xd6d   :  { %8353 = vmatprep.subr.bf16.mxu1 %v18028_v44  ;;  %v18041_v44 = vld [vmem:[#allocation394_spill] sm:$0xff] }
 0xd6f   :  { %8313 = vmatpush1.bf16.msra.mxu0 %v18029_v53  ;;  %v18042_v53 = vld [vmem:[#allocation395_spill] sm:$0xff] }
 0xd70   :  { %8354 = vmatpush1.bf16.msra.mxu1 %v18030_v49  ;;  %8314 = vmatprep.subr.bf16.mxu0 %v18031_v42  ;;  %v18043_v49 = vld [vmem:[#allocation396_spill] sm:$0xff]  ;;  %v18044_v42 = vld [vmem:[#allocation397_spill] sm:$0xff] }
 0xd71   :  { %8355 = vmatprep.subr.bf16.mxu1 %v18032_v4  ;;  %v18045_v4 = vld [vmem:[#allocation398_spill] sm:$0xff] }
 0xd73   :  { %8315 = vmatpush1.bf16.msra.mxu0 %v18033_v52  ;;  %v18046_v52 = vld [vmem:[#allocation399_spill] sm:$0xff] }
 0xd74   :  { %8356 = vmatpush1.bf16.msra.mxu1 %v18034_v25  ;;  %8316 = vmatprep.subr.bf16.mxu0 %v18035_v9  ;;  %v18047_v25 = vld [vmem:[#allocation400_spill] sm:$0xff]  ;;  %v18048_v9 = vld [vmem:[#allocation401_spill] sm:$0xff] }
 0xd75   :  { %8357 = vmatprep.subr.bf16.mxu1 %v18036_v38  ;;  %v18049_v38 = vld [vmem:[#allocation402_spill] sm:$0xff] }
 0xd77   :  { %8317 = vmatpush1.bf16.msra.mxu0 %v18037_v37  ;;  %v18050_v37 = vld [vmem:[#allocation403_spill] sm:$0xff] }
 0xd78   :  { %8358 = vmatpush1.bf16.msra.mxu1 %v18038_v33  ;;  %8318 = vmatprep.subr.bf16.mxu0 %v18039_v36  ;;  %v18051_v33 = vld [vmem:[#allocation404_spill] sm:$0xff]  ;;  %v18052_v36 = vld [vmem:[#allocation405_spill] sm:$0xff] }
 0xd79   :  { %8359 = vmatprep.subr.bf16.mxu1 %v18040_v50  ;;  %v18053_v50 = vld [vmem:[#allocation406_spill] sm:$0xff] }
 0xd7b   :  { %8319 = vmatpush1.bf16.msra.mxu0 %v18041_v44  ;;  %v18054_v44 = vld [vmem:[#allocation407_spill] sm:$0xff] }
 0xd7c   :  { %8360 = vmatpush1.bf16.msra.mxu1 %v18042_v53  ;;  %8320 = vmatprep.subr.bf16.mxu0 %v18043_v49  ;;  %v18055_v53 = vld [vmem:[#allocation408_spill] sm:$0xff]  ;;  %v18056_v49 = vld [vmem:[#allocation409_spill] sm:$0xff] }
 0xd7d   :  { %8361 = vmatprep.subr.bf16.mxu1 %v18044_v42  ;;  %v18057_v42 = vld [vmem:[#allocation410_spill] sm:$0xff] }
 0xd7f   :  { %8321 = vmatpush1.bf16.msra.mxu0 %v18045_v4  ;;  %v18058_v4 = vld [vmem:[#allocation411_spill] sm:$0xff] }
 0xd80   :  { %8362 = vmatpush1.bf16.msra.mxu1 %v18046_v52  ;;  %8322 = vmatprep.subr.bf16.mxu0 %v18047_v25  ;;  %v18059_v52 = vld [vmem:[#allocation412_spill] sm:$0xff]  ;;  %v18060_v25 = vld [vmem:[#allocation413_spill] sm:$0xff] }
 0xd81   :  { %8363 = vmatprep.subr.bf16.mxu1 %v18048_v9  ;;  %v18061_v9 = vld [vmem:[#allocation414_spill] sm:$0xff] }
 0xd83   :  { %8323 = vmatpush2.bf16.msra.mxu0 %v18049_v38  ;;  %v18062_v38 = vld [vmem:[#allocation415_spill] sm:$0xff] }
 0xd84   :  { %8364 = vmatpush2.bf16.msra.mxu1 %v18050_v37  ;;  %8324 = vmatprep.subr.bf16.mxu0 %v18051_v33  ;;  %v18063_v37 = vld [vmem:[#allocation416_spill] sm:$0xff]  ;;  %v18064_v33 = vld [vmem:[#allocation417_spill] sm:$0xff] }
 0xd85   :  { %8365 = vmatprep.subr.bf16.mxu1 %v18052_v36  ;;  %v18065_v36 = vld [vmem:[#allocation418_spill] sm:$0xff] }
 0xd87   :  { %8325 = vmatpush2.bf16.msra.mxu0 %v18053_v50  ;;  %v18066_v50 = vld [vmem:[#allocation419_spill] sm:$0xff] }
 0xd88   :  { %8366 = vmatpush2.bf16.msra.mxu1 %v18054_v44  ;;  %8326 = vmatprep.subr.bf16.mxu0 %v18055_v53  ;;  %v18067_v44 = vld [vmem:[#allocation420_spill] sm:$0xff]  ;;  %v18068_v53 = vld [vmem:[#allocation421_spill] sm:$0xff] }
 0xd89   :  { %8367 = vmatprep.subr.bf16.mxu1 %v18056_v49  ;;  %v18069_v49 = vld [vmem:[#allocation422_spill] sm:$0xff] }
 0xd8b   :  { %8327 = vmatpush2.bf16.msra.mxu0 %v18057_v42  ;;  %v18070_v42 = vld [vmem:[#allocation423_spill] sm:$0xff] }
 0xd8c   :  { %8368 = vmatpush2.bf16.msra.mxu1 %v18058_v4  ;;  %8328 = vmatprep.subr.bf16.mxu0 %v18059_v52  ;;  %v18071_v4 = vld [vmem:[#allocation424_spill] sm:$0xff]  ;;  %v18072_v52 = vld [vmem:[#allocation425_spill] sm:$0xff] }
 0xd8d   :  { %8369 = vmatprep.subr.bf16.mxu1 %v18060_v25  ;;  %v18073_v25 = vld [vmem:[#allocation426_spill] sm:$0xff] }
 0xd8f   :  { %8329 = vmatpush2.bf16.msra.mxu0 %v18061_v9  ;;  %v18074_v9 = vld [vmem:[#allocation427_spill] sm:$0xff] }
 0xd90   :  { %8370 = vmatpush2.bf16.msra.mxu1 %v18062_v38  ;;  %8330 = vmatprep.subr.bf16.mxu0 %v18063_v37  ;;  %v18075_v38 = vld [vmem:[#allocation428_spill] sm:$0xff]  ;;  %v18076_v37 = vld [vmem:[#allocation429_spill] sm:$0xff] }
 0xd91   :  { %8371 = vmatprep.subr.bf16.mxu1 %v18064_v33  ;;  %v18077_v33 = vld [vmem:[#allocation430_spill] sm:$0xff] }
 0xd93   :  { %8331 = vmatpush2.bf16.msra.mxu0 %v18065_v36  ;;  %v18078_v36 = vld [vmem:[#allocation431_spill] sm:$0xff] }
 0xd94   :  { %8372 = vmatpush2.bf16.msra.mxu1 %v18066_v50  ;;  %8332 = vmatprep.subr.bf16.mxu0 %v18067_v44  ;;  %v18079_v50 = vld [vmem:[#allocation432_spill] sm:$0xff]  ;;  %v18080_v44 = vld [vmem:[#allocation433_spill] sm:$0xff] }
 0xd95   :  { %8373 = vmatprep.subr.bf16.mxu1 %v18068_v53 }
 0xd97   :  { %8333 = vmatpush2.bf16.msra.mxu0 %v18069_v49 }
 0xd98   :  { %8374 = vmatpush2.bf16.msra.mxu1 %v18070_v42  ;;  %8334 = vmatprep.subr.bf16.mxu0 %v18071_v4  ;;  %v18081_v42 = vld [vmem:[#allocation434_spill] sm:$0xff] }
 0xd99   :  { %8375 = vmatprep.subr.bf16.mxu1 %v18072_v52  ;;  %v18082_v52 = vld [vmem:[#allocation435_spill] sm:$0xff] }
 0xd9b   :  { %8335 = vmatpush2.bf16.msra.mxu0 %v18073_v25  ;;  %v18083_v25 = vld [vmem:[#allocation436_spill] sm:$0xff] }
 0xd9c   :  { %8376 = vmatpush2.bf16.msra.mxu1 %v18074_v9  ;;  %8336 = vmatprep.subr.bf16.mxu0 %v18075_v38 }
 0xd9d   :  { %8377 = vmatprep.subr.bf16.mxu1 %v18076_v37 }
 0xd9f   :  { %8337 = vmatpush2.bf16.msra.mxu0 %v18077_v33 }
 0xda0   :  { %8378 = vmatpush2.bf16.msra.mxu1 %v18078_v36  ;;  %8388 = vmatprep.subr.bf16.mxu0 %v18079_v50  ;;  %v18084_v36 = vld [vmem:[#allocation437_spill] sm:$0xff]  ;;  %v18085_v50 = vld [vmem:[#allocation438_spill] sm:$0xff] }
 0xda1   :  { %8429 = vmatprep.subr.bf16.mxu1 %v18080_v44 }
 0xda2   :  { %8339 = vmatmul.mubr.bf16.vlgmr.msra.gmra.mxu0 %v14640_v19  ;;  %v8094_v53 = vpop.f32.mrf.mxu0  ;;  %v8135_v49 = vpop.f32.mrf.mxu1 }
 0xda3   :  { %8380 = vmatmul.mubr.bf16.vlgmr.msra.gmra.mxu1 %v14642_v51  ;;  %v8095_v4 = vadd.f32 %v8094_v53, %v18081_v42  ;;  %8389 = vmatpush1.bf16.msra.mxu0 %v18082_v52  ;;  %v18086_v52 = vld [vmem:[#allocation439_spill] sm:$0xff] }
 0xda4   :  { %8420 = vmatprep.mubr.bf16.mxu0 %v14554_v20  ;;  %8430 = vmatpush1.bf16.msra.mxu1 %v18083_v25  ;;  %v8096_v9 = vpop.f32.mrf.mxu0  ;;  %v8137_v38 = vpop.f32.mrf.mxu1 }
 0xda5   :  { %v14788_v37 = vadd.f32 %v8135_v49, %v8095_v4  ;;  %8461 = vmatprep.mubr.bf16.mxu1 %v14556_v11  ;;  %v8097_v33 = vadd.f32 %v8096_v9, %v12885_v3  ;;  %8390 = vmatprep.subr.bf16.mxu0 %v18084_v36  ;;  %v18088_v49 = vld [vmem:[#allocation441_spill] sm:$0xff]  ;;  %v18089_v4 = vld [vmem:[#allocation442_spill] sm:$0xff]  ;;  %v18091_v3 = vld [vmem:[#allocation444_spill] sm:$0xff] }
 0xda6   :  { %8431 = vmatprep.subr.bf16.mxu1 %v18085_v50  ;;  %v8098_v44 = vpop.f32.mrf.mxu0  ;;  %v8139_v53 = vpop.f32.mrf.mxu1  ;;  %v18092_v9 = vld [vmem:[#allocation445_spill] sm:$0xff]  ;;  %v18093_v36 = vld [vmem:[#allocation446_spill] sm:$0xff] }
 0xda7   :  { %v14794_v42 = vadd.f32 %v8137_v38, %v8097_v33  ;;  %8391 = vmatpush1.bf16.msra.mxu0 %v18086_v52  ;;  %v18094_v38 = vld [vmem:[#allocation447_spill] sm:$0xff]  ;;  %v18095_v33 = vld [vmem:[#allocation448_spill] sm:$0xff]  ;;  %v18096_v50 = vld [vmem:[#allocation449_spill] sm:$0xff] }
 0xda8   :  { %8432 = vmatpush1.bf16.msra.mxu1 %v18087_v21  ;;  %v8099_v25 = vpop.f32.mrf.mxu0  ;;  %v8140_v32 = vpop.f32.mrf.mxu1  ;;  %8392 = vmatprep.subr.bf16.mxu0 %v18088_v49  ;;  %v18097_v21 = vld [vmem:[#allocation450_spill] sm:$0xff]  ;;  %v18099_v44 = vld [vmem:[#allocation452_spill] sm:$0xff]  ;;  %v18100_v53 = vld [vmem:[#allocation453_spill] sm:$0xff] }
 0xda9   :  { %8433 = vmatprep.subr.bf16.mxu1 %v18089_v4  ;;  %v18098_v32 = vld [vmem:[#allocation451_spill] sm:$0xff]  ;;  %v18103_v25 = vld [vmem:[#allocation456_spill] sm:$0xff]  ;;  %v18104_v49 = vld [vmem:[#allocation457_spill] sm:$0xff] }
 0xdaa   :  { %v18102_v52 = vld [vmem:[#allocation455_spill] sm:$0xff]  ;;  %v18105_v4 = vld [vmem:[#allocation458_spill] sm:$0xff] }
 0xdab   :  { %8393 = vmatpush1.bf16.msra.mxu0 %v18090_v31  ;;  %v18101_v31 = vld [vmem:[#allocation454_spill] sm:$0xff] }
 0xdac   :  { %8434 = vmatpush1.bf16.msra.mxu1 %v18091_v3  ;;  %8394 = vmatprep.subr.bf16.mxu0 %v18092_v9  ;;  %v18106_v3 = vld [vmem:[#allocation459_spill] sm:$0xff]  ;;  %v18107_v9 = vld [vmem:[#allocation460_spill] sm:$0xff] }
 0xdad   :  { %8435 = vmatprep.subr.bf16.mxu1 %v18093_v36  ;;  %v18108_v36 = vld [vmem:[#allocation461_spill] sm:$0xff] }
 0xdaf   :  { %8395 = vmatpush1.bf16.msra.mxu0 %v18094_v38  ;;  %v18109_v38 = vld [vmem:[#allocation462_spill] sm:$0xff] }
 0xdb0   :  { %8436 = vmatpush1.bf16.msra.mxu1 %v18095_v33  ;;  %8396 = vmatprep.subr.bf16.mxu0 %v18096_v50  ;;  %v18110_v33 = vld [vmem:[#allocation463_spill] sm:$0xff]  ;;  %v18111_v50 = vld [vmem:[#allocation464_spill] sm:$0xff] }
 0xdb1   :  { %8437 = vmatprep.subr.bf16.mxu1 %v18097_v21  ;;  %v18112_v21 = vld [vmem:[#allocation465_spill] sm:$0xff] }
 0xdb3   :  { %8397 = vmatpush1.bf16.msra.mxu0 %v18098_v32  ;;  %v18113_v32 = vld [vmem:[#allocation466_spill] sm:$0xff] }
 0xdb4   :  { %8438 = vmatpush1.bf16.msra.mxu1 %v18099_v44  ;;  %8398 = vmatprep.subr.bf16.mxu0 %v18100_v53  ;;  %v18114_v44 = vld [vmem:[#allocation467_spill] sm:$0xff]  ;;  %v18115_v53 = vld [vmem:[#allocation468_spill] sm:$0xff] }
 0xdb5   :  { %8439 = vmatprep.subr.bf16.mxu1 %v18101_v31  ;;  %v18116_v31 = vld [vmem:[#allocation469_spill] sm:$0xff] }
 0xdb7   :  { %8399 = vmatpush1.bf16.msra.mxu0 %v18102_v52  ;;  %v18117_v52 = vld [vmem:[#allocation470_spill] sm:$0xff] }
 0xdb8   :  { %8440 = vmatpush1.bf16.msra.mxu1 %v18103_v25  ;;  %8400 = vmatprep.subr.bf16.mxu0 %v18104_v49  ;;  %v18118_v25 = vld [vmem:[#allocation471_spill] sm:$0xff]  ;;  %v18119_v49 = vld [vmem:[#allocation472_spill] sm:$0xff] }
 0xdb9   :  { %8441 = vmatprep.subr.bf16.mxu1 %v18105_v4  ;;  %v18120_v4 = vld [vmem:[#allocation473_spill] sm:$0xff] }
 0xdbb   :  { %8401 = vmatpush1.bf16.msra.mxu0 %v18106_v3  ;;  %v18121_v3 = vld [vmem:[#allocation474_spill] sm:$0xff] }
 0xdbc   :  { %8442 = vmatpush1.bf16.msra.mxu1 %v18107_v9  ;;  %8402 = vmatprep.subr.bf16.mxu0 %v18108_v36  ;;  %v18122_v9 = vld [vmem:[#allocation475_spill] sm:$0xff]  ;;  %v18123_v36 = vld [vmem:[#allocation476_spill] sm:$0xff] }
 0xdbd   :  { %8443 = vmatprep.subr.bf16.mxu1 %v18109_v38  ;;  %v18124_v38 = vld [vmem:[#allocation477_spill] sm:$0xff] }
 0xdbf   :  { %8403 = vmatpush1.bf16.msra.mxu0 %v18110_v33  ;;  %v18125_v33 = vld [vmem:[#allocation478_spill] sm:$0xff] }
 0xdc0   :  { %8444 = vmatpush1.bf16.msra.mxu1 %v18111_v50  ;;  %8404 = vmatprep.subr.bf16.mxu0 %v18112_v21  ;;  %v18126_v50 = vld [vmem:[#allocation479_spill] sm:$0xff]  ;;  %v18127_v21 = vld [vmem:[#allocation480_spill] sm:$0xff] }
 0xdc1   :  { %8445 = vmatprep.subr.bf16.mxu1 %v18113_v32  ;;  %v18128_v32 = vld [vmem:[#allocation481_spill] sm:$0xff] }
 0xdc3   :  { %8405 = vmatpush2.bf16.msra.mxu0 %v18114_v44  ;;  %v18129_v44 = vld [vmem:[#allocation482_spill] sm:$0xff] }
 0xdc4   :  { %8446 = vmatpush2.bf16.msra.mxu1 %v18115_v53  ;;  %8406 = vmatprep.subr.bf16.mxu0 %v18116_v31  ;;  %v18130_v53 = vld [vmem:[#allocation483_spill] sm:$0xff]  ;;  %v18131_v31 = vld [vmem:[#allocation484_spill] sm:$0xff] }
 0xdc5   :  { %8447 = vmatprep.subr.bf16.mxu1 %v18117_v52  ;;  %v18132_v52 = vld [vmem:[#allocation485_spill] sm:$0xff] }
 0xdc7   :  { %8407 = vmatpush2.bf16.msra.mxu0 %v18118_v25  ;;  %v18133_v25 = vld [vmem:[#allocation486_spill] sm:$0xff] }
 0xdc8   :  { %8448 = vmatpush2.bf16.msra.mxu1 %v18119_v49  ;;  %8408 = vmatprep.subr.bf16.mxu0 %v18120_v4  ;;  %v18134_v49 = vld [vmem:[#allocation487_spill] sm:$0xff]  ;;  %v18135_v4 = vld [vmem:[#allocation488_spill] sm:$0xff] }
 0xdc9   :  { %8449 = vmatprep.subr.bf16.mxu1 %v18121_v3  ;;  %v18136_v3 = vld [vmem:[#allocation489_spill] sm:$0xff] }
 0xdcb   :  { %8409 = vmatpush2.bf16.msra.mxu0 %v18122_v9  ;;  %v18137_v9 = vld [vmem:[#allocation490_spill] sm:$0xff] }
 0xdcc   :  { %8450 = vmatpush2.bf16.msra.mxu1 %v18123_v36  ;;  %8410 = vmatprep.subr.bf16.mxu0 %v18124_v38  ;;  %v18138_v36 = vld [vmem:[#allocation491_spill] sm:$0xff]  ;;  %v18139_v38 = vld [vmem:[#allocation492_spill] sm:$0xff] }
 0xdcd   :  { %8451 = vmatprep.subr.bf16.mxu1 %v18125_v33  ;;  %v18140_v33 = vld [vmem:[#allocation493_spill] sm:$0xff] }
 0xdcf   :  { %8411 = vmatpush2.bf16.msra.mxu0 %v18126_v50  ;;  %v18141_v50 = vld [vmem:[#allocation494_spill] sm:$0xff] }
 0xdd0   :  { %8452 = vmatpush2.bf16.msra.mxu1 %v18127_v21  ;;  %8412 = vmatprep.subr.bf16.mxu0 %v18128_v32  ;;  %v18142_v21 = vld [vmem:[#allocation495_spill] sm:$0xff]  ;;  %v18143_v32 = vld [vmem:[#allocation496_spill] sm:$0xff] }
 0xdd1   :  { %8453 = vmatprep.subr.bf16.mxu1 %v18129_v44  ;;  %v18144_v44 = vld [vmem:[#allocation497_spill] sm:$0xff] }
 0xdd3   :  { %8413 = vmatpush2.bf16.msra.mxu0 %v18130_v53  ;;  %v18145_v53 = vld [vmem:[#allocation498_spill] sm:$0xff] }
 0xdd4   :  { %8454 = vmatpush2.bf16.msra.mxu1 %v18131_v31  ;;  %8414 = vmatprep.subr.bf16.mxu0 %v18132_v52 }
 0xdd5   :  { %8455 = vmatprep.subr.bf16.mxu1 %v18133_v25 }
 0xdd7   :  { %8415 = vmatpush2.bf16.msra.mxu0 %v18134_v49  ;;  %v18146_v49 = vld [vmem:[#allocation499_spill] sm:$0xff] }
 0xdd8   :  { %8456 = vmatpush2.bf16.msra.mxu1 %v18135_v4  ;;  %8416 = vmatprep.subr.bf16.mxu0 %v18136_v3  ;;  %v18147_v4 = vld [vmem:[#allocation500_spill] sm:$0xff] }
 0xdd9   :  { %8457 = vmatprep.subr.bf16.mxu1 %v18137_v9 }
 0xddb   :  { %8417 = vmatpush2.bf16.msra.mxu0 %v18138_v36 }
 0xddc   :  { %8458 = vmatpush2.bf16.msra.mxu1 %v18139_v38  ;;  %8418 = vmatprep.subr.bf16.mxu0 %v18140_v33 }
 0xddd   :  { %8459 = vmatprep.subr.bf16.mxu1 %v18141_v50 }
 0xddf   :  { %8419 = vmatpush2.bf16.msra.mxu0 %v18142_v21  ;;  %v18148_v21 = vld [vmem:[#allocation503_spill] sm:$0xff] }
 0xde0   :  { %8460 = vmatpush2.bf16.msra.mxu1 %v18143_v32  ;;  %8470 = vmatprep.subr.bf16.mxu0 %v18144_v44 }
 0xde1   :  { %8511 = vmatprep.subr.bf16.mxu1 %v18145_v53  ;;  %v18149_v53 = vld [vmem:[#allocation504_spill] sm:$0xff] }
 0xde2   :  { %v8176_v31 = vpop.f32.mrf.mxu0  ;;  %v8217_v52 = vpop.f32.mrf.mxu1  ;;  %8421 = vmatmul.mubr.bf16.vlgmr.msra.gmra.mxu0 %v14560_v10 }
 0xde3   :  { %v8177_v25 = vadd.f32 %v8176_v31, %v14788_v37  ;;  %8462 = vmatmul.mubr.bf16.vlgmr.msra.gmra.mxu1 %v14562_v22  ;;  %8471 = vmatpush1.bf16.msra.mxu0 %v18146_v49  ;;  %v18150_v31 = vld [vmem:[#allocation505_spill] sm:$0xff]  ;;  %v18156_v49 = vld [vmem:[#allocation511_spill] sm:$0xff] }
 0xde4   :  { %8502 = vmatprep.mubr.bf16.mxu0 %v14568_v15  ;;  %8512 = vmatpush1.bf16.msra.mxu1 %v18147_v4  ;;  %v8178_v3 = vpop.f32.mrf.mxu0  ;;  %v8219_v9 = vpop.f32.mrf.mxu1  ;;  %v18158_v4 = vld [vmem:[#allocation513_spill] sm:$0xff] }
 0xde5   :  { %v14862_v36 = vadd.f32 %v8217_v52, %v8177_v25  ;;  %8543 = vmatprep.mubr.bf16.mxu1 %v14570_v54  ;;  %v8179_v38 = vadd.f32 %v8178_v3, %v14794_v42  ;;  %8472 = vmatprep.subr.bf16.mxu0 %v12908_v59  ;;  %v18151_v52 = vld [vmem:[#allocation506_spill] sm:$0xff]  ;;  %v18152_v42 = vld [vmem:[#allocation507_spill] sm:$0xff]  ;;  %v18153_v59 = vld [vmem:[#allocation508_spill] sm:$0xff] }
 0xde6   :  { %v8180_v33 = vpop.f32.mrf.mxu0  ;;  %v8221_v37 = vpop.f32.mrf.mxu1  ;;  %8513 = vmatprep.subr.bf16.mxu1 %v17520_v43  ;;  %v18154_v25 = vld [vmem:[#allocation509_spill] sm:$0xff]  ;;  %v18155_v43 = vld [vmem:[#allocation510_spill] sm:$0xff] }
 0xde7   :  { %v14868_v50 = vadd.f32 %v8219_v9, %v8179_v38  ;;  %8473 = vmatpush1.bf16.msra.mxu0 %v17521_v29  ;;  %v18157_v29 = vld [vmem:[#allocation512_spill] sm:$0xff]  ;;  %v18159_v3 = vld [vmem:[#allocation514_spill] sm:$0xff]  ;;  %v18160_v9 = vld [vmem:[#allocation515_spill] sm:$0xff] }
 0xde8   :  { %8514 = vmatpush1.bf16.msra.mxu1 %v18148_v21  ;;  %v8181_v32 = vpop.f32.mrf.mxu0  ;;  %v8222_v44 = vpop.f32.mrf.mxu1  ;;  %8474 = vmatprep.subr.bf16.mxu0 %v18149_v53  ;;  %v18161_v38 = vld [vmem:[#allocation516_spill] sm:$0xff]  ;;  %v18162_v33 = vld [vmem:[#allocation517_spill] sm:$0xff]  ;;  %v18163_v37 = vld [vmem:[#allocation518_spill] sm:$0xff] }
 0xde9   :  { %8515 = vmatprep.subr.bf16.mxu1 %v18150_v31  ;;  %v18164_v21 = vld [vmem:[#allocation519_spill] sm:$0xff]  ;;  %v18165_v32 = vld [vmem:[#allocation520_spill] sm:$0xff]  ;;  %v18166_v44 = vld [vmem:[#allocation521_spill] sm:$0xff] }
 0xdea   :  { %v18167_v53 = vld [vmem:[#allocation522_spill] sm:$0xff]  ;;  %v18168_v31 = vld [vmem:[#allocation523_spill] sm:$0xff] }
 0xdeb   :  { %8475 = vmatpush1.bf16.msra.mxu0 %v18151_v52  ;;  %v18169_v52 = vld [vmem:[#allocation524_spill] sm:$0xff] }
 0xdec   :  { %8516 = vmatpush1.bf16.msra.mxu1 %v18152_v42  ;;  %8476 = vmatprep.subr.bf16.mxu0 %v18153_v59  ;;  %v18170_v42 = vld [vmem:[#allocation525_spill] sm:$0xff]  ;;  %v18171_v59 = vld [vmem:[#allocation526_spill] sm:$0xff] }
 0xded   :  { %8517 = vmatprep.subr.bf16.mxu1 %v18154_v25  ;;  %v18172_v25 = vld [vmem:[#allocation527_spill] sm:$0xff] }
 0xdef   :  { %8477 = vmatpush1.bf16.msra.mxu0 %v18155_v43  ;;  %v18173_v43 = vld [vmem:[#allocation528_spill] sm:$0xff] }
 0xdf0   :  { %8518 = vmatpush1.bf16.msra.mxu1 %v18156_v49  ;;  %8478 = vmatprep.subr.bf16.mxu0 %v18157_v29  ;;  %v18174_v49 = vld [vmem:[#allocation529_spill] sm:$0xff]  ;;  %v18175_v29 = vld [vmem:[#allocation530_spill] sm:$0xff] }
 0xdf1   :  { %8519 = vmatprep.subr.bf16.mxu1 %v18158_v4  ;;  %v18176_v4 = vld [vmem:[#allocation531_spill] sm:$0xff] }
 0xdf3   :  { %8479 = vmatpush1.bf16.msra.mxu0 %v18159_v3  ;;  %v18177_v3 = vld [vmem:[#allocation532_spill] sm:$0xff] }
 0xdf4   :  { %8520 = vmatpush1.bf16.msra.mxu1 %v18160_v9  ;;  %8480 = vmatprep.subr.bf16.mxu0 %v18161_v38  ;;  %v18178_v9 = vld [vmem:[#allocation533_spill] sm:$0xff]  ;;  %v18179_v38 = vld [vmem:[#allocation534_spill] sm:$0xff] }
 0xdf5   :  { %8521 = vmatprep.subr.bf16.mxu1 %v18162_v33  ;;  %v18180_v33 = vld [vmem:[#allocation535_spill] sm:$0xff] }
 0xdf7   :  { %8481 = vmatpush1.bf16.msra.mxu0 %v18163_v37  ;;  %v18181_v37 = vld [vmem:[#allocation536_spill] sm:$0xff] }
 0xdf8   :  { %8522 = vmatpush1.bf16.msra.mxu1 %v18164_v21  ;;  %8482 = vmatprep.subr.bf16.mxu0 %v18165_v32  ;;  %v18182_v21 = vld [vmem:[#allocation537_spill] sm:$0xff]  ;;  %v18183_v32 = vld [vmem:[#allocation538_spill] sm:$0xff] }
 0xdf9   :  { %8523 = vmatprep.subr.bf16.mxu1 %v18166_v44  ;;  %v18184_v44 = vld [vmem:[#allocation539_spill] sm:$0xff] }
 0xdfb   :  { %8483 = vmatpush1.bf16.msra.mxu0 %v18167_v53  ;;  %v18185_v53 = vld [vmem:[#allocation540_spill] sm:$0xff] }
 0xdfc   :  { %8524 = vmatpush1.bf16.msra.mxu1 %v18168_v31  ;;  %8484 = vmatprep.subr.bf16.mxu0 %v18169_v52  ;;  %v18186_v31 = vld [vmem:[#allocation541_spill] sm:$0xff]  ;;  %v18187_v52 = vld [vmem:[#allocation542_spill] sm:$0xff] }
 0xdfd   :  { %8525 = vmatprep.subr.bf16.mxu1 %v18170_v42  ;;  %v18188_v42 = vld [vmem:[#allocation543_spill] sm:$0xff] }
 0xdff   :  { %8485 = vmatpush1.bf16.msra.mxu0 %v18171_v59  ;;  %v18189_v59 = vld [vmem:[#allocation544_spill] sm:$0xff] }
 0xe00   :  { %8526 = vmatpush1.bf16.msra.mxu1 %v18172_v25  ;;  %8486 = vmatprep.subr.bf16.mxu0 %v18173_v43  ;;  %v18190_v25 = vld [vmem:[#allocation545_spill] sm:$0xff]  ;;  %v18191_v43 = vld [vmem:[#allocation546_spill] sm:$0xff] }
 0xe01   :  { %8527 = vmatprep.subr.bf16.mxu1 %v18174_v49  ;;  %v18192_v49 = vld [vmem:[#allocation547_spill] sm:$0xff] }
 0xe03   :  { %8487 = vmatpush2.bf16.msra.mxu0 %v18175_v29  ;;  %v18193_v29 = vld [vmem:[#allocation548_spill] sm:$0xff] }
 0xe04   :  { %8528 = vmatpush2.bf16.msra.mxu1 %v18176_v4  ;;  %8488 = vmatprep.subr.bf16.mxu0 %v18177_v3  ;;  %v18194_v4 = vld [vmem:[#allocation549_spill] sm:$0xff]  ;;  %v18195_v3 = vld [vmem:[#allocation550_spill] sm:$0xff] }
 0xe05   :  { %8529 = vmatprep.subr.bf16.mxu1 %v18178_v9  ;;  %v18196_v9 = vld [vmem:[#allocation551_spill] sm:$0xff] }
 0xe07   :  { %8489 = vmatpush2.bf16.msra.mxu0 %v18179_v38  ;;  %v18197_v38 = vld [vmem:[#allocation552_spill] sm:$0xff] }
 0xe08   :  { %8530 = vmatpush2.bf16.msra.mxu1 %v18180_v33  ;;  %8490 = vmatprep.subr.bf16.mxu0 %v18181_v37  ;;  %v18198_v33 = vld [vmem:[#allocation553_spill] sm:$0xff]  ;;  %v18199_v37 = vld [vmem:[#allocation554_spill] sm:$0xff] }
 0xe09   :  { %8531 = vmatprep.subr.bf16.mxu1 %v18182_v21  ;;  %v18200_v21 = vld [vmem:[#allocation555_spill] sm:$0xff] }
 0xe0b   :  { %8491 = vmatpush2.bf16.msra.mxu0 %v18183_v32  ;;  %v18201_v32 = vld [vmem:[#allocation556_spill] sm:$0xff] }
 0xe0c   :  { %8532 = vmatpush2.bf16.msra.mxu1 %v18184_v44  ;;  %8492 = vmatprep.subr.bf16.mxu0 %v18185_v53  ;;  %v18202_v44 = vld [vmem:[#allocation557_spill] sm:$0xff]  ;;  %v18203_v53 = vld [vmem:[#allocation558_spill] sm:$0xff] }
 0xe0d   :  { %8533 = vmatprep.subr.bf16.mxu1 %v18186_v31  ;;  %v18204_v31 = vld [vmem:[#allocation559_spill] sm:$0xff] }
 0xe0f   :  { %8493 = vmatpush2.bf16.msra.mxu0 %v18187_v52  ;;  %v18205_v52 = vld [vmem:[#allocation560_spill] sm:$0xff] }
 0xe10   :  { %8534 = vmatpush2.bf16.msra.mxu1 %v18188_v42  ;;  %8494 = vmatprep.subr.bf16.mxu0 %v18189_v59  ;;  %v18206_v42 = vld [vmem:[#allocation561_spill] sm:$0xff] }
 0xe11   :  { %8535 = vmatprep.subr.bf16.mxu1 %v18190_v25  ;;  %v18207_v25 = vld [vmem:[#allocation562_spill] sm:$0xff] }
 0xe13   :  { %8495 = vmatpush2.bf16.msra.mxu0 %v18191_v43 }
 0xe14   :  { %8536 = vmatpush2.bf16.msra.mxu1 %v18192_v49  ;;  %8496 = vmatprep.subr.bf16.mxu0 %v18193_v29  ;;  %v18208_v29 = vld [vmem:[#allocation563_spill] sm:$0xff] }
 0xe15   :  { %8537 = vmatprep.subr.bf16.mxu1 %v18194_v4 }
 0xe17   :  { %8497 = vmatpush2.bf16.msra.mxu0 %v18195_v3 }
 0xe18   :  { %8538 = vmatpush2.bf16.msra.mxu1 %v18196_v9  ;;  %8498 = vmatprep.subr.bf16.mxu0 %v18197_v38  ;;  %v18209_v9 = vld [vmem:[#allocation566_spill] sm:$0xff] }
 0xe19   :  { %8539 = vmatprep.subr.bf16.mxu1 %v18198_v33 }
 0xe1b   :  { %8499 = vmatpush2.bf16.msra.mxu0 %v18199_v37 }
 0xe1c   :  { %8540 = vmatpush2.bf16.msra.mxu1 %v18200_v21  ;;  %8500 = vmatprep.subr.bf16.mxu0 %v18201_v32  ;;  %v18210_v21 = vld [vmem:[#allocation567_spill] sm:$0xff] }
 0xe1d   :  { %8541 = vmatprep.subr.bf16.mxu1 %v18202_v44 }
 0xe1f   :  { %8501 = vmatpush2.bf16.msra.mxu0 %v18203_v53 }
 0xe20   :  { %8542 = vmatpush2.bf16.msra.mxu1 %v18204_v31  ;;  %8552 = vmatprep.subr.bf16.mxu0 %v18205_v52  ;;  %v18213_v31 = vld [vmem:[#allocation571_spill] sm:$0xff]  ;;  %v18214_v52 = vld [vmem:[#allocation572_spill] sm:$0xff] }
 0xe21   :  { %8593 = vmatprep.subr.bf16.mxu1 %v18206_v42  ;;  %v18216_v42 = vld [vmem:[#allocation574_spill] sm:$0xff] }
 0xe22   :  { %v8258_v59 = vpop.f32.mrf.mxu0  ;;  %8503 = vmatmul.mubr.bf16.vlgmr.msra.gmra.mxu0 %v14640_v19 }
 0xe23   :  { %v8259_v43 = vadd.f32 %v8258_v59, %v18207_v25  ;;  %v8299_v49 = vpop.f32.mrf.mxu1  ;;  %8544 = vmatmul.mubr.bf16.vlgmr.msra.gmra.mxu1 %v14642_v51  ;;  %8553 = vmatpush1.bf16.msra.mxu0 %v18208_v29  ;;  %v18217_v59 = vld [vmem:[#allocation575_spill] sm:$0xff]  ;;  %v18218_v25 = vld [vmem:[#allocation576_spill] sm:$0xff]  ;;  %v18223_v29 = vld [vmem:[#allocation581_spill] sm:$0xff] }
 0xe24   :  { %8584 = vmatprep.mubr.bf16.mxu0 %v14554_v20  ;;  %8594 = vmatpush1.bf16.msra.mxu1 %v17583_v45  ;;  %v8260_v4 = vpop.f32.mrf.mxu0  ;;  %v18211_v20 = vld [vmem:[#allocation569_spill] sm:$0xff] }
 0xe25   :  { %v14936_v3 = vadd.f32 %v8299_v49, %v8259_v43  ;;  %8625 = vmatprep.mubr.bf16.mxu1 %v14556_v11  ;;  %v8261_v38 = vadd.f32 %v8260_v4, %v18209_v9  ;;  %v8301_v33 = vpop.f32.mrf.mxu1  ;;  %8554 = vmatprep.subr.bf16.mxu0 %v17584_v8  ;;  %v18212_v11 = vld [vmem:[#allocation570_spill] sm:$0xff]  ;;  %v18215_v8 = vld [vmem:[#allocation573_spill] sm:$0xff]  ;;  %v18221_v43 = vld [vmem:[#allocation579_spill] sm:$0xff] }
 0xe26   :  { %v8262_v37 = vpop.f32.mrf.mxu0  ;;  %8595 = vmatprep.subr.bf16.mxu1 %v18210_v21  ;;  %v18222_v49 = vld [vmem:[#allocation580_spill] sm:$0xff]  ;;  %v18224_v4 = vld [vmem:[#allocation582_spill] sm:$0xff]  ;;  %v18225_v9 = vld [vmem:[#allocation583_spill] sm:$0xff] }
 0xe27   :  { %v14942_v32 = vadd.f32 %v8301_v33, %v8261_v38  ;;  %v8303_v44 = vpop.f32.mrf.mxu1  ;;  %8555 = vmatpush1.bf16.msra.mxu0 %v17585_v34  ;;  %v18219_v34 = vld [vmem:[#allocation577_spill] sm:$0xff]  ;;  %v18226_v38 = vld [vmem:[#allocation584_spill] sm:$0xff]  ;;  %v18228_v37 = vld [vmem:[#allocation586_spill] sm:$0xff] }
 0xe28   :  { %8596 = vmatpush1.bf16.msra.mxu1 %v13131_v16  ;;  %v8263_v45 = vpop.f32.mrf.mxu0  ;;  %8556 = vmatprep.subr.bf16.mxu0 %v18211_v20  ;;  %v18220_v16 = vld [vmem:[#allocation578_spill] sm:$0xff]  ;;  %v18227_v33 = vld [vmem:[#allocation585_spill] sm:$0xff]  ;;  %v18229_v21 = vld [vmem:[#allocation587_spill] sm:$0xff] }
 0xe29   :  { %v8304_v53 = vpop.f32.mrf.mxu1  ;;  %8597 = vmatprep.subr.bf16.mxu1 %v18212_v11  ;;  %v18230_v44 = vld [vmem:[#allocation588_spill] sm:$0xff]  ;;  %v18231_v45 = vld [vmem:[#allocation589_spill] sm:$0xff]  ;;  %v18232_v20 = vld [vmem:[#allocation590_spill] sm:$0xff] }
 0xe2a   :  { %v18233_v53 = vld [vmem:[#allocation591_spill] sm:$0xff]  ;;  %v18234_v11 = vld [vmem:[#allocation592_spill] sm:$0xff] }
 0xe2b   :  { %8557 = vmatpush1.bf16.msra.mxu0 %v18213_v31  ;;  %v18235_v31 = vld [vmem:[#allocation593_spill] sm:$0xff] }
 0xe2c   :  { %8598 = vmatpush1.bf16.msra.mxu1 %v18214_v52  ;;  %8558 = vmatprep.subr.bf16.mxu0 %v18215_v8  ;;  %v18236_v52 = vld [vmem:[#allocation594_spill] sm:$0xff]  ;;  %v18237_v8 = vld [vmem:[#allocation595_spill] sm:$0xff] }
 0xe2d   :  { %8599 = vmatprep.subr.bf16.mxu1 %v18216_v42  ;;  %v18238_v42 = vld [vmem:[#allocation596_spill] sm:$0xff] }
 0xe2f   :  { %8559 = vmatpush1.bf16.msra.mxu0 %v18217_v59  ;;  %v18239_v59 = vld [vmem:[#allocation597_spill] sm:$0xff] }
 0xe30   :  { %8600 = vmatpush1.bf16.msra.mxu1 %v18218_v25  ;;  %8560 = vmatprep.subr.bf16.mxu0 %v18219_v34  ;;  %v18240_v25 = vld [vmem:[#allocation598_spill] sm:$0xff]  ;;  %v18241_v34 = vld [vmem:[#allocation599_spill] sm:$0xff] }
 0xe31   :  { %8601 = vmatprep.subr.bf16.mxu1 %v18220_v16  ;;  %v18242_v16 = vld [vmem:[#allocation600_spill] sm:$0xff] }
 0xe33   :  { %8561 = vmatpush1.bf16.msra.mxu0 %v18221_v43  ;;  %v18243_v43 = vld [vmem:[#allocation601_spill] sm:$0xff] }
 0xe34   :  { %8602 = vmatpush1.bf16.msra.mxu1 %v18222_v49  ;;  %8562 = vmatprep.subr.bf16.mxu0 %v18223_v29  ;;  %v18244_v49 = vld [vmem:[#allocation602_spill] sm:$0xff]  ;;  %v18245_v29 = vld [vmem:[#allocation603_spill] sm:$0xff] }
 0xe35   :  { %8603 = vmatprep.subr.bf16.mxu1 %v18224_v4  ;;  %v18246_v4 = vld [vmem:[#allocation604_spill] sm:$0xff] }
 0xe37   :  { %8563 = vmatpush1.bf16.msra.mxu0 %v18225_v9  ;;  %v18247_v9 = vld [vmem:[#allocation605_spill] sm:$0xff] }
 0xe38   :  { %8604 = vmatpush1.bf16.msra.mxu1 %v18226_v38  ;;  %8564 = vmatprep.subr.bf16.mxu0 %v18227_v33  ;;  %v18248_v38 = vld [vmem:[#allocation606_spill] sm:$0xff]  ;;  %v18249_v33 = vld [vmem:[#allocation607_spill] sm:$0xff] }
 0xe39   :  { %8605 = vmatprep.subr.bf16.mxu1 %v18228_v37  ;;  %v18250_v37 = vld [vmem:[#allocation609_spill] sm:$0xff] }
 0xe3b   :  { %8565 = vmatpush1.bf16.msra.mxu0 %v18229_v21  ;;  %v18251_v21 = vld [vmem:[#allocation610_spill] sm:$0xff] }
 0xe3c   :  { %8606 = vmatpush1.bf16.msra.mxu1 %v18230_v44  ;;  %8566 = vmatprep.subr.bf16.mxu0 %v18231_v45  ;;  %v18252_v44 = vld [vmem:[#allocation611_spill] sm:$0xff]  ;;  %v18253_v45 = vld [vmem:[#allocation612_spill] sm:$0xff] }
 0xe3d   :  { %8607 = vmatprep.subr.bf16.mxu1 %v18232_v20  ;;  %v18254_v20 = vld [vmem:[#allocation613_spill] sm:$0xff] }
 0xe3f   :  { %8567 = vmatpush1.bf16.msra.mxu0 %v18233_v53  ;;  %v18255_v53 = vld [vmem:[#allocation614_spill] sm:$0xff] }
 0xe40   :  { %8608 = vmatpush1.bf16.msra.mxu1 %v18234_v11  ;;  %8568 = vmatprep.subr.bf16.mxu0 %v18235_v31  ;;  %v18256_v11 = vld [vmem:[#allocation615_spill] sm:$0xff]  ;;  %v18257_v31 = vld [vmem:[#allocation616_spill] sm:$0xff] }
 0xe41   :  { %8609 = vmatprep.subr.bf16.mxu1 %v18236_v52  ;;  %v18258_v52 = vld [vmem:[#allocation618_spill] sm:$0xff] }
 0xe43   :  { %8569 = vmatpush2.bf16.msra.mxu0 %v18237_v8  ;;  %v18260_v8 = vld [vmem:[#allocation620_spill] sm:$0xff] }
 0xe44   :  { %8610 = vmatpush2.bf16.msra.mxu1 %v18238_v42  ;;  %8570 = vmatprep.subr.bf16.mxu0 %v18239_v59  ;;  %v18261_v42 = vld [vmem:[#allocation621_spill] sm:$0xff]  ;;  %v18262_v59 = vld [vmem:[#allocation622_spill] sm:$0xff] }
 0xe45   :  { %8611 = vmatprep.subr.bf16.mxu1 %v18240_v25  ;;  %v18263_v25 = vld [vmem:[#allocation623_spill] sm:$0xff] }
 0xe47   :  { %8571 = vmatpush2.bf16.msra.mxu0 %v18241_v34  ;;  %v18264_v34 = vld [vmem:[#allocation624_spill] sm:$0xff] }
 0xe48   :  { %8612 = vmatpush2.bf16.msra.mxu1 %v18242_v16  ;;  %8572 = vmatprep.subr.bf16.mxu0 %v18243_v43  ;;  %v18265_v16 = vld [vmem:[#allocation625_spill] sm:$0xff]  ;;  %v18266_v43 = vld [vmem:[#allocation626_spill] sm:$0xff] }
 0xe49   :  { %8613 = vmatprep.subr.bf16.mxu1 %v18244_v49 }
 0xe4b   :  { %8573 = vmatpush2.bf16.msra.mxu0 %v18245_v29 }
 0xe4c   :  { %8614 = vmatpush2.bf16.msra.mxu1 %v18246_v4  ;;  %8574 = vmatprep.subr.bf16.mxu0 %v18247_v9  ;;  %v18267_v4 = vld [vmem:[#allocation627_spill] sm:$0xff]  ;;  %v18268_v9 = vld [vmem:[#allocation628_spill] sm:$0xff] }
 0xe4d   :  { %8615 = vmatprep.subr.bf16.mxu1 %v18248_v38 }
 0xe4f   :  { %8575 = vmatpush2.bf16.msra.mxu0 %v18249_v33 }
 0xe50   :  { %8616 = vmatpush2.bf16.msra.mxu1 %v17625_v57  ;;  %8576 = vmatprep.subr.bf16.mxu0 %v18250_v37  ;;  %v18259_v57 = vld [vmem:[#allocation619_spill] sm:$0xff] }
 0xe51   :  { %8617 = vmatprep.subr.bf16.mxu1 %v18251_v21 }
 0xe53   :  { %8577 = vmatpush2.bf16.msra.mxu0 %v18252_v44  ;;  %v18271_v44 = vld [vmem:[#allocation632_spill] sm:$0xff] }
 0xe54   :  { %8618 = vmatpush2.bf16.msra.mxu1 %v18253_v45  ;;  %8578 = vmatprep.subr.bf16.mxu0 %v18254_v20  ;;  %v18272_v20 = vld [vmem:[#allocation633_spill] sm:$0xff] }
 0xe55   :  { %8619 = vmatprep.subr.bf16.mxu1 %v18255_v53  ;;  %v18273_v53 = vld [vmem:[#allocation634_spill] sm:$0xff] }
 0xe57   :  { %8579 = vmatpush2.bf16.msra.mxu0 %v18256_v11  ;;  %v18275_v11 = vld [vmem:[#allocation636_spill] sm:$0xff] }
 0xe58   :  { %8620 = vmatpush2.bf16.msra.mxu1 %v18257_v31  ;;  %8580 = vmatprep.subr.bf16.mxu0 %v17634_v14  ;;  %v18277_v31 = vld [vmem:[#allocation638_spill] sm:$0xff] }
 0xe59   :  { %8621 = vmatprep.subr.bf16.mxu1 %v18258_v52  ;;  %v18278_v52 = vld [vmem:[#allocation639_spill] sm:$0xff] }
 0xe5b   :  { %8581 = vmatpush2.bf16.msra.mxu0 %v18259_v57  ;;  %v18279_v57 = vld [vmem:[#allocation640_spill] sm:$0xff] }
 0xe5c   :  { %8622 = vmatpush2.bf16.msra.mxu1 %v18260_v8  ;;  %8582 = vmatprep.subr.bf16.mxu0 %v18261_v42  ;;  %v18281_v8 = vld [vmem:[#allocation642_spill] sm:$0xff]  ;;  %v18282_v42 = vld [vmem:[#allocation643_spill] sm:$0xff] }
 0xe5d   :  { %8623 = vmatprep.subr.bf16.mxu1 %v18262_v59  ;;  %v18283_v59 = vld [vmem:[#allocation644_spill] sm:$0xff] }
 0xe5f   :  { %8583 = vmatpush2.bf16.msra.mxu0 %v18263_v25  ;;  %v18284_v25 = vld [vmem:[#allocation645_spill] sm:$0xff] }
 0xe60   :  { %8624 = vmatpush2.bf16.msra.mxu1 %v18264_v34  ;;  %8634 = vmatprep.subr.bf16.mxu0 %v18265_v16  ;;  %v18285_v34 = vld [vmem:[#allocation646_spill] sm:$0xff]  ;;  %v18286_v16 = vld [vmem:[#allocation647_spill] sm:$0xff] }
 0xe61   :  { %8675 = vmatprep.subr.bf16.mxu1 %v18266_v43  ;;  %v18287_v43 = vld [vmem:[#allocation648_spill] sm:$0xff] }
 0xe62   :  { %v8340_v49 = vpop.f32.mrf.mxu0  ;;  %8585 = vmatmul.mubr.bf16.vlgmr.msra.gmra.mxu0 %v14560_v10 }
 0xe63   :  { %v8341_v14 = vadd.f32 %v8340_v49, %v14936_v3  ;;  %v8381_v29 = vpop.f32.mrf.mxu1  ;;  %8626 = vmatmul.mubr.bf16.vlgmr.msra.gmra.mxu1 %v14562_v22  ;;  %8635 = vmatpush1.bf16.msra.mxu0 %v18267_v4  ;;  %v18269_v3 = vld [vmem:[#allocation630_spill] sm:$0xff]  ;;  %v18270_v22 = vld [vmem:[#allocation631_spill] sm:$0xff]  ;;  %v18288_v49 = vld [vmem:[#allocation649_spill] sm:$0xff] }
 0xe64   :  { %8666 = vmatprep.mubr.bf16.mxu0 %v14568_v15  ;;  %8676 = vmatpush1.bf16.msra.mxu1 %v18268_v9  ;;  %v8342_v38 = vpop.f32.mrf.mxu0  ;;  %v18291_v4 = vld [vmem:[#allocation652_spill] sm:$0xff]  ;;  %v18292_v9 = vld [vmem:[#allocation653_spill] sm:$0xff] }
 0xe65   :  { %v15010_v33 = vadd.f32 %v8381_v29, %v8341_v14  ;;  %8707 = vmatprep.mubr.bf16.mxu1 %v14570_v54  ;;  %v15013_v37 = vpop.f32.mrf.mxu1  ;;  %8636 = vmatprep.subr.bf16.mxu0 %v17645_v35  ;;  %v18274_v54 = vld [vmem:[#allocation635_spill] sm:$0xff]  ;;  %v18276_v35 = vld [vmem:[#allocation637_spill] sm:$0xff]  ;;  %v18289_v14 = vld [vmem:[#allocation650_spill] sm:$0xff] }
 0xe66   :  { %v8344_v10 = vpop.f32.mrf.mxu0  ;;  %8677 = vmatprep.subr.bf16.mxu1 %v18269_v3  ;;  %v18290_v29 = vld [vmem:[#allocation651_spill] sm:$0xff] }
 0xe67   :  { %v8385_v21 = vpop.f32.mrf.mxu1  ;;  %8637 = vmatpush1.bf16.msra.mxu0 %v18270_v22  ;;  %v18293_v10 = vld [vmem:[#allocation654_spill] sm:$0xff]  ;;  %v18294_v3 = vld [vmem:[#allocation655_spill] sm:$0xff]  ;;  %v18296_v22 = vld [vmem:[#allocation657_spill] sm:$0xff] }
 0xe68   :  { %8678 = vmatpush1.bf16.msra.mxu1 %v13335_v28  ;;  %v8345_v15 = vpop.f32.mrf.mxu0  ;;  %8638 = vmatprep.subr.bf16.mxu0 %v18271_v44  ;;  %v18280_v28 = vld [vmem:[#allocation641_spill] sm:$0xff]  ;;  %v18295_v21 = vld [vmem:[#allocation656_spill] sm:$0xff]  ;;  %v18298_v44 = vld [vmem:[#allocation659_spill] sm:$0xff] }
 0xe69   :  { %v8386_v45 = vpop.f32.mrf.mxu1  ;;  %8679 = vmatprep.subr.bf16.mxu1 %v18272_v20  ;;  %v18297_v15 = vld [vmem:[#allocation658_spill] sm:$0xff]  ;;  %v18300_v20 = vld [vmem:[#allocation661_spill] sm:$0xff] }
 0xe6a   :  { %v18299_v45 = vld [vmem:[#allocation660_spill] sm:$0xff] }
 0xe6b   :  { %8639 = vmatpush1.bf16.msra.mxu0 %v18273_v53  ;;  %v18301_v53 = vld [vmem:[#allocation662_spill] sm:$0xff] }
 0xe6c   :  { %8680 = vmatpush1.bf16.msra.mxu1 %v18274_v54  ;;  %8640 = vmatprep.subr.bf16.mxu0 %v18275_v11  ;;  %v18302_v54 = vld [vmem:[#allocation666_spill] sm:$0xff]  ;;  %v18303_v11 = vld [vmem:[#allocation667_spill] sm:$0xff] }
 0xe6d   :  { %8681 = vmatprep.subr.bf16.mxu1 %v18276_v35  ;;  %v18304_v35 = vld [vmem:[#allocation672_spill] sm:$0xff] }
 0xe6f   :  { %8641 = vmatpush1.bf16.msra.mxu0 %v18277_v31  ;;  %v18326_v31 = vld [vmem:[#allocation55_spill] sm:$0xff] }
 0xe70   :  { %8682 = vmatpush1.bf16.msra.mxu1 %v18278_v52  ;;  %8642 = vmatprep.subr.bf16.mxu0 %v18279_v57  ;;  %v18327_v52 = vld [vmem:[#allocation83_spill] sm:$0xff]  ;;  %v18328_v57 = vld [vmem:[#allocation68_spill] sm:$0xff] }
 0xe71   :  { %8683 = vmatprep.subr.bf16.mxu1 %v18280_v28  ;;  %v18329_v28 = vld [vmem:[#allocation96_spill] sm:$0xff] }
 0xe73   :  { %8643 = vmatpush1.bf16.msra.mxu0 %v18281_v8  ;;  %v18330_v8 = vld [vmem:[#allocation54_spill] sm:$0xff] }
 0xe74   :  { %8684 = vmatpush1.bf16.msra.mxu1 %v18282_v42  ;;  %8644 = vmatprep.subr.bf16.mxu0 %v18283_v59  ;;  %v18331_v42 = vld [vmem:[#allocation82_spill] sm:$0xff]  ;;  %v18332_v59 = vld [vmem:[#allocation67_spill] sm:$0xff] }
 0xe75   :  { %8685 = vmatprep.subr.bf16.mxu1 %v18284_v25  ;;  %v18333_v25 = vld [vmem:[#allocation95_spill] sm:$0xff] }
 0xe77   :  { %8645 = vmatpush1.bf16.msra.mxu0 %v18285_v34  ;;  %v18334_v34 = vld [vmem:[#allocation53_spill] sm:$0xff] }
 0xe78   :  { %8686 = vmatpush1.bf16.msra.mxu1 %v18286_v16  ;;  %8646 = vmatprep.subr.bf16.mxu0 %v18287_v43  ;;  %v18335_v16 = vld [vmem:[#allocation81_spill] sm:$0xff]  ;;  %v18336_v43 = vld [vmem:[#allocation66_spill] sm:$0xff] }
 0xe79   :  { %8687 = vmatprep.subr.bf16.mxu1 %v18288_v49  ;;  %v18337_v49 = vld [vmem:[#allocation94_spill] sm:$0xff] }
 0xe7b   :  { %8647 = vmatpush1.bf16.msra.mxu0 %v18289_v14  ;;  %v18338_v14 = vld [vmem:[#allocation52_spill] sm:$0xff] }
 0xe7c   :  { %8688 = vmatpush1.bf16.msra.mxu1 %v18290_v29  ;;  %8648 = vmatprep.subr.bf16.mxu0 %v18291_v4  ;;  %v18339_v29 = vld [vmem:[#allocation80_spill] sm:$0xff]  ;;  %v18340_v4 = vld [vmem:[#allocation65_spill] sm:$0xff] }
 0xe7d   :  { %8689 = vmatprep.subr.bf16.mxu1 %v18292_v9  ;;  %v18341_v9 = vld [vmem:[#allocation93_spill] sm:$0xff] }
 0xe7f   :  { %8649 = vmatpush1.bf16.msra.mxu0 %v18293_v10  ;;  %v18342_v10 = vld [vmem:[#allocation51_spill] sm:$0xff] }
 0xe80   :  { %8690 = vmatpush1.bf16.msra.mxu1 %v18294_v3  ;;  %8650 = vmatprep.subr.bf16.mxu0 %v18295_v21  ;;  %v18343_v3 = vld [vmem:[#allocation79_spill] sm:$0xff]  ;;  %v18344_v21 = vld [vmem:[#allocation64_spill] sm:$0xff] }
 0xe81   :  { %8691 = vmatprep.subr.bf16.mxu1 %v18296_v22  ;;  %v18345_v22 = vld [vmem:[#allocation92_spill] sm:$0xff] }
 0xe83   :  { %8651 = vmatpush2.bf16.msra.mxu0 %v18297_v15  ;;  %v18346_v15 = vld [vmem:[#allocation50_spill] sm:$0xff] }
 0xe84   :  { %8692 = vmatpush2.bf16.msra.mxu1 %v18298_v44  ;;  %8652 = vmatprep.subr.bf16.mxu0 %v18299_v45  ;;  %v18347_v44 = vld [vmem:[#allocation78_spill] sm:$0xff]  ;;  %v18348_v45 = vld [vmem:[#allocation63_spill] sm:$0xff] }
 0xe85   :  { %8693 = vmatprep.subr.bf16.mxu1 %v18300_v20  ;;  %v18349_v20 = vld [vmem:[#allocation91_spill] sm:$0xff] }
 0xe87   :  { %8653 = vmatpush2.bf16.msra.mxu0 %v18301_v53  ;;  %v18350_v53 = vld [vmem:[#allocation49_spill] sm:$0xff] }
 0xe88   :  { %8694 = vmatpush2.bf16.msra.mxu1 %v17679_v1  ;;  %8654 = vmatprep.subr.bf16.mxu0 %v17680_v0  ;;  %v18305_v0 = vld [vmem:[#allocation674_spill] sm:$0xff]  ;;  %v18318_v1 = vld [vmem:[#allocation57_spill] sm:$0xff] }
 0xe89   :  { %8695 = vmatprep.subr.bf16.mxu1 %v17681_v2  ;;  %v18319_v2 = vld [vmem:[#allocation85_spill] sm:$0xff] }
 0xe8b   :  { %8655 = vmatpush2.bf16.msra.mxu0 %v18302_v54  ;;  %v18351_v54 = vld [vmem:[#allocation77_spill] sm:$0xff] }
 0xe8c   :  { %8696 = vmatpush2.bf16.msra.mxu1 %v18303_v11  ;;  %8656 = vmatprep.subr.bf16.mxu0 %v17684_v6  ;;  %v18312_v6 = vld [vmem:[#allocation72_spill] sm:$0xff]  ;;  %v18352_v11 = vld [vmem:[#allocation62_spill] sm:$0xff] }
 0xe8d   :  { %8697 = vmatprep.subr.bf16.mxu1 %v17685_v61  ;;  %v8343_v61 = vadd.f32 %v8342_v38, %v14942_v32  ;;  %v18323_v32 = vld [vmem:[#allocation84_spill] sm:$0xff]  ;;  %v18324_v38 = vld [vmem:[#allocation69_spill] sm:$0xff] }
 0xe8f   :  { %8657 = vmatpush2.bf16.msra.mxu0 %v17686_v41  ;;  %v18317_v41 = vld [vmem:[#allocation99_spill] sm:$0xff] }
 0xe90   :  { %8698 = vmatpush2.bf16.msra.mxu1 %v17687_v47  ;;  %8658 = vmatprep.subr.bf16.mxu0 %v18304_v35  ;;  %v18306_v47 = vld [vmem:[#allocation676_spill] sm:$0xff]  ;;  %v18353_v35 = vld [vmem:[#allocation90_spill] sm:$0xff] }
 0xe91   :  { %8699 = vmatprep.subr.bf16.mxu1 %v17689_v5  ;;  %v18311_v5 = vld [vmem:[#allocation87_spill] sm:$0xff] }
 0xe93   :  { %8659 = vmatpush2.bf16.msra.mxu0 %v13469_v18  ;;  %v18307_v18 = vld [vmem:[#allocation677_spill] sm:$0xff] }
 0xe94   :  { %8700 = vmatpush2.bf16.msra.mxu1 %v13473_v27  ;;  %8660 = vmatprep.subr.bf16.mxu0 %v13475_v46  ;;  %v8384_v27 = vadd.f32 %v15013_v37, %v8343_v61  ;;  %v8717_v46 = vmax.f32 %v14868_v50, 0.0  ;;  %v18322_v50 = vld [vmem:[#allocation56_spill] sm:$0xff]  ;;  %v18325_v37 = vld [vmem:[#allocation97_spill] sm:$0xff] }
 0xe95   :  { %8701 = vmatprep.subr.bf16.mxu1 %v18305_v0  ;;  %v18354_v0 = vld [vmem:[#allocation48_spill] sm:$0xff] }
 0xe96   :  { %v18355_v61 = vld [vmem:[#allocation76_spill] sm:$0xff] }
 0xe97   :  { %8661 = vmatpush2.bf16.msra.mxu0 %v17691_v13 }
 0xe98   :  { %8702 = vmatpush2.bf16.msra.mxu1 %v13485_v62  ;;  %8662 = vmatprep.subr.bf16.mxu0 %v13487_v48  ;;  %v8719_v48 = vmax.f32 %v8384_v27, 0.0  ;;  %v18358_v27 = vld [vmem:[#allocation47_spill] sm:$0xff] }
 0xe99   :  { %8703 = vmatprep.subr.bf16.mxu1 %v13490_v17 }
 0xe9b   :  { %8663 = vmatpush2.bf16.msra.mxu0 %v13493_v63 }
 0xe9c   :  { %8704 = vmatpush2.bf16.msra.mxu1 %v18306_v47  ;;  %8664 = vmatprep.subr.bf16.mxu0 %v18307_v18  ;;  %v18356_v47 = vld [vmem:[#allocation61_spill] sm:$0xff] }
 0xe9d   :  { %8705 = vmatprep.subr.bf16.mxu1 %v13502_v12  ;;  %v18308_v12 = vld [vmem:[#allocation73_spill] sm:$0xff] }
 0xe9e   :  { %v18357_v18 = vld [vmem:[#allocation89_spill] sm:$0xff] }
 0xe9f   :  { %8665 = vmatpush2.bf16.msra.mxu0 %v13507_v30 }
 0xea0   :  { %8706 = vmatpush2.bf16.msra.mxu1 %v13511_v60  ;;  %10107 = vmatprep.subr.mxu0 %v11058_v40 }
 0xea1   :  { %10142 = vmatprep.subr.mxu1 %v11218_v26 }
 0xea2   :  { %v15080_v62 = vpop.f32.mrf.mxu0  ;;  %8667 = vmatmul.mubr.bf16.vlgmr.msra.gmra.mxu0 %v14640_v19  ;;  %v18320_v19 = vld [vmem:[#allocation70_spill] sm:$0xff] }
 0xea3   :  { %v15083_v17 = vpop.f32.mrf.mxu1  ;;  %8708 = vmatmul.mubr.bf16.vlgmr.msra.gmra.mxu1 %v14642_v51  ;;  %10108 = vmatpush3.msra.mxu0 %v10978_v24  ;;  %v18309_v24 = vld [vmem:[#allocation101_spill] sm:$0xff]  ;;  %v18321_v51 = vld [vmem:[#allocation98_spill] sm:$0xff] }
 0xea4   :  { %8788 = vmatprep.mubr.f32.mxu0 %v8717_v46  ;;  %10143 = vmatpush3.msra.mxu1 %v11138_v56  ;;  %v15088_v30 = vpop.f32.mrf.mxu0  ;;  %v18310_v56 = vld [vmem:[#allocation59_spill] sm:$0xff]  ;;  %v8716_v46 = vmax.f32 %v14862_v36, 0.0  ;;  %v18367_v36 = vld [vmem:[#allocation132_spill] sm:$0xff] }
 0xea5   :  { %8858 = vmatprep.mubr.f32.mxu1 %v8719_v48  ;;  %v15090_v26 = vpop.f32.mrf.mxu1  ;;  %10109 = vmatprep.subr.mxu0 %v11053_v39  ;;  %v18313_v39 = vld [vmem:[#allocation100_spill] sm:$0xff]  ;;  %v18359_v48 = vld [vmem:[#allocation75_spill] sm:$0xff] }
 0xea6   :  { %10144 = vmatprep.subr.mxu1 %v11213_v58  ;;  %10110 = vmatpush3.msra.mxu0 %v10973_v23  ;;  %v8426_v40 = vpop.f32.mrf.mxu0  ;;  %v18314_v58 = vld [vmem:[#allocation58_spill] sm:$0xff] }
 0xea7   :  { %10145 = vmatpush3.msra.mxu1 %v11133_v55  ;;  %v8467_v63 = vpop.f32.mrf.mxu1  ;;  %10111 = vmatprep.subr.mxu0 %v18308_v12  ;;  %v18315_v23 = vld [vmem:[#allocation86_spill] sm:$0xff]  ;;  %v18316_v55 = vld [vmem:[#allocation71_spill] sm:$0xff]  ;;  %v18360_v40 = vld [vmem:[#allocation60_spill] sm:$0xff] }
 0xea8   :  { %10146 = vmatprep.subr.mxu1 %v18309_v24  ;;  %10112 = vmatpush3.msra.mxu0 %v18310_v56  ;;  %v8427_v60 = vpop.f32.mrf.mxu0  ;;  %v8718_v63 = vmax.f32 %v15010_v33, 0.0  ;;  %v18361_v12 = vld [vmem:[#allocation88_spill] sm:$0xff]  ;;  %v18362_v24 = vld [vmem:[#allocation46_spill] sm:$0xff] }
 0xea9   :  { %10147 = vmatpush3.msra.mxu1 %v18311_v5  ;;  %v8468_v13 = vpop.f32.mrf.mxu1  ;;  %10113 = vmatprep.subr.mxu0 %v18312_v6  ;;  %v18363_v56 = vld [vmem:[#allocation74_spill] sm:$0xff]  ;;  %v18364_v60 = vld [vmem:[#allocation133_spill] sm:$0xff]  ;;  %v18370_v33 = vld [vmem:[#allocation164_spill] sm:$0xff] }
 0xeaa   :  { %10148 = vmatprep.subr.mxu1 %v18313_v39  ;;  %10114 = vmatpush3.msra.mxu0 %v18314_v58  ;;  %v18365_v5 = vld [vmem:[#allocation117_spill] sm:$0xff]  ;;  %v18369_v39 = vld [vmem:[#allocation116_spill] sm:$0xff]  ;;  %v18371_v58 = vld [vmem:[#allocation131_spill] sm:$0xff] }
 0xeab   :  { %10149 = vmatpush3.msra.mxu1 %v18315_v23  ;;  %10115 = vmatprep.subr.mxu0 %v18316_v55  ;;  %v18366_v13 = vld [vmem:[#allocation165_spill] sm:$0xff]  ;;  %v18372_v23 = vld [vmem:[#allocation148_spill] sm:$0xff]  ;;  %v18373_v55 = vld [vmem:[#allocation115_spill] sm:$0xff] }
 0xeac   :  { %10150 = vmatprep.subr.mxu1 %v18317_v41  ;;  %10116 = vmatpush3.msra.mxu0 %v18318_v1  ;;  %v18368_v6 = vld [vmem:[#allocation149_spill] sm:$0xff]  ;;  %v18374_v41 = vld [vmem:[#allocation163_spill] sm:$0xff]  ;;  %v18375_v1 = vld [vmem:[#allocation130_spill] sm:$0xff] }
 0xead   :  { %10151 = vmatpush3.msra.mxu1 %v18319_v2  ;;  %10117 = vmatprep.subr.mxu0 %v18320_v19  ;;  %v18376_v2 = vld [vmem:[#allocation147_spill] sm:$0xff]  ;;  %v18377_v19 = vld [vmem:[#allocation114_spill] sm:$0xff] }
 0xeae   :  { %10152 = vmatprep.subr.mxu1 %v18321_v51  ;;  %10118 = vmatpush3.msra.mxu0 %v18322_v50  ;;  %v18378_v51 = vld [vmem:[#allocation162_spill] sm:$0xff]  ;;  %v18379_v50 = vld [vmem:[#allocation129_spill] sm:$0xff] }
 0xeaf   :  { %10153 = vmatpush3.msra.mxu1 %v18323_v32  ;;  %10119 = vmatprep.subr.mxu0 %v18324_v38  ;;  %v18380_v32 = vld [vmem:[#allocation146_spill] sm:$0xff]  ;;  %v18381_v38 = vld [vmem:[#allocation113_spill] sm:$0xff] }
 0xeb0   :  { %10154 = vmatprep.subr.mxu1 %v18325_v37  ;;  %10120 = vmatpush3.msra.mxu0 %v18326_v31  ;;  %v18382_v37 = vld [vmem:[#allocation161_spill] sm:$0xff]  ;;  %v18383_v31 = vld [vmem:[#allocation128_spill] sm:$0xff] }
 0xeb1   :  { %10155 = vmatpush3.msra.mxu1 %v18327_v52  ;;  %10121 = vmatprep.subr.mxu0 %v18328_v57  ;;  %v18384_v52 = vld [vmem:[#allocation145_spill] sm:$0xff]  ;;  %v18385_v57 = vld [vmem:[#allocation112_spill] sm:$0xff] }
 0xeb2   :  { %10156 = vmatprep.subr.mxu1 %v18329_v28  ;;  %10122 = vmatpush3.msra.mxu0 %v18330_v8  ;;  %v18386_v28 = vld [vmem:[#allocation160_spill] sm:$0xff]  ;;  %v18387_v8 = vld [vmem:[#allocation127_spill] sm:$0xff] }
 0xeb3   :  { %10157 = vmatpush3.msra.mxu1 %v18331_v42  ;;  %10123 = vmatprep.subr.mxu0 %v18332_v59  ;;  %v18388_v42 = vld [vmem:[#allocation144_spill] sm:$0xff]  ;;  %v18389_v59 = vld [vmem:[#allocation111_spill] sm:$0xff] }
 0xeb4   :  { %10158 = vmatprep.subr.mxu1 %v18333_v25  ;;  %10124 = vmatpush3.msra.mxu0 %v18334_v34  ;;  %v18390_v25 = vld [vmem:[#allocation159_spill] sm:$0xff]  ;;  %v18391_v34 = vld [vmem:[#allocation126_spill] sm:$0xff] }
 0xeb5   :  { %10159 = vmatpush3.msra.mxu1 %v18335_v16  ;;  %10125 = vmatprep.subr.mxu0 %v18336_v43  ;;  %v18392_v16 = vld [vmem:[#allocation143_spill] sm:$0xff]  ;;  %v18393_v43 = vld [vmem:[#allocation110_spill] sm:$0xff] }
 0xeb6   :  { %10160 = vmatprep.subr.mxu1 %v18337_v49  ;;  %10126 = vmatpush3.msra.mxu0 %v18338_v14  ;;  %v18394_v49 = vld [vmem:[#allocation158_spill] sm:$0xff]  ;;  %v18395_v14 = vld [vmem:[#allocation125_spill] sm:$0xff] }
 0xeb7   :  { %10161 = vmatpush3.msra.mxu1 %v18339_v29  ;;  %10127 = vmatprep.subr.mxu0 %v18340_v4  ;;  %v18396_v29 = vld [vmem:[#allocation142_spill] sm:$0xff]  ;;  %v18397_v4 = vld [vmem:[#allocation109_spill] sm:$0xff] }
 0xeb8   :  { %10162 = vmatprep.subr.mxu1 %v18341_v9  ;;  %10128 = vmatpush3.msra.mxu0 %v18342_v10  ;;  %v18398_v9 = vld [vmem:[#allocation157_spill] sm:$0xff]  ;;  %v18399_v10 = vld [vmem:[#allocation124_spill] sm:$0xff] }
 0xeb9   :  { %10163 = vmatpush3.msra.mxu1 %v18343_v3  ;;  %10129 = vmatprep.subr.mxu0 %v18344_v21  ;;  %v18400_v3 = vld [vmem:[#allocation141_spill] sm:$0xff]  ;;  %v18401_v21 = vld [vmem:[#allocation108_spill] sm:$0xff] }
 0xeba   :  { %10164 = vmatprep.subr.mxu1 %v18345_v22  ;;  %10130 = vmatpush3.msra.mxu0 %v18346_v15  ;;  %v18402_v22 = vld [vmem:[#allocation156_spill] sm:$0xff]  ;;  %v18403_v15 = vld [vmem:[#allocation123_spill] sm:$0xff] }
 0xebb   :  { %10165 = vmatpush3.msra.mxu1 %v18347_v44  ;;  %10131 = vmatprep.subr.mxu0 %v18348_v45  ;;  %v18404_v44 = vld [vmem:[#allocation140_spill] sm:$0xff]  ;;  %v18405_v45 = vld [vmem:[#allocation107_spill] sm:$0xff] }
 0xebc   :  { %10166 = vmatprep.subr.mxu1 %v18349_v20  ;;  %10132 = vmatpush3.msra.mxu0 %v18350_v53  ;;  %v18406_v20 = vld [vmem:[#allocation155_spill] sm:$0xff]  ;;  %v18407_v53 = vld [vmem:[#allocation122_spill] sm:$0xff] }
 0xebd   :  { %10167 = vmatpush3.msra.mxu1 %v18351_v54  ;;  %10133 = vmatprep.subr.mxu0 %v18352_v11  ;;  %v18408_v54 = vld [vmem:[#allocation139_spill] sm:$0xff]  ;;  %v18409_v11 = vld [vmem:[#allocation106_spill] sm:$0xff] }
 0xebe   :  { %10168 = vmatprep.subr.mxu1 %v18353_v35  ;;  %10134 = vmatpush3.msra.mxu0 %v18354_v0  ;;  %v18410_v35 = vld [vmem:[#allocation154_spill] sm:$0xff]  ;;  %v18411_v0 = vld [vmem:[#allocation121_spill] sm:$0xff] }
 0xebf   :  { %10169 = vmatpush3.msra.mxu1 %v18355_v61  ;;  %10135 = vmatprep.subr.mxu0 %v18356_v47  ;;  %v18412_v61 = vld [vmem:[#allocation138_spill] sm:$0xff] }
 0xec0   :  { %10170 = vmatprep.subr.mxu1 %v18357_v18  ;;  %10136 = vmatpush3.msra.mxu0 %v18358_v27  ;;  %v18413_v47 = vld [vmem:[#allocation678_spill] sm:$0xff]  ;;  %v18414_v27 = vld [vmem:[#allocation105_spill] sm:$0xff] }
 0xec1   :  { %10171 = vmatpush3.msra.mxu1 %v18359_v48  ;;  %10137 = vmatprep.subr.mxu0 %v18360_v40  ;;  %v8423_v18 = vadd.f32 %v15080_v62, %v18413_v47  ;;  %v18416_v48 = vld [vmem:[#allocation120_spill] sm:$0xff]  ;;  %v18417_v40 = vld [vmem:[#allocation137_spill] sm:$0xff] }
 0xec2   :  { %10172 = vmatprep.subr.mxu1 %v18361_v12  ;;  %10138 = vmatpush3.msra.mxu0 %v18362_v24  ;;  %v18419_v24 = vld [vmem:[#allocation104_spill] sm:$0xff] }
 0xec3   :  { %10173 = vmatpush3.msra.mxu1 %v18363_v56  ;;  %8789 = vmatmul.mubr.f32.vlgmr.msra.gmra.mxu0 %v8716_v46  ;;  %v18415_v46 = vld [vmem:[#allocation153_spill] sm:$0xff]  ;;  %v18420_v56 = vld [vmem:[#allocation152_spill] sm:$0xff]  ;;  %v8464_v62 = vadd.f32 %v15083_v17, %v8423_v18 }
 0xec4   :  { %8859 = vmatmul.mubr.f32.vlgmr.msra.gmra.mxu1 %v8718_v63  ;;  %10177 = vmatprep.subr.mxu0 %v18364_v60  ;;  %v18418_v63 = vld [vmem:[#allocation679_spill] sm:$0xff] }
 0xec5   :  { %10178 = vmatpush3.msra.mxu0 %v18365_v5  ;;  %10212 = vmatprep.subr.mxu1 %v18366_v13  ;;  %v8425_v12 = vadd.f32 %v15088_v30, %v18418_v63  ;;  %v18421_v60 = vld [vmem:[#allocation119_spill] sm:$0xff]  ;;  %v18422_v5 = vld [vmem:[#allocation136_spill] sm:$0xff] }
 0xec6   :  { %10179 = vmatprep.subr.mxu0 %v18367_v36  ;;  %10213 = vmatpush3.msra.mxu1 %v18368_v6  ;;  %v18423_v13 = vld [vmem:[#allocation103_spill] sm:$0xff] }
 0xec7   :  { %10180 = vmatpush3.msra.mxu0 %v18369_v39  ;;  %10214 = vmatprep.subr.mxu1 %v18370_v33  ;;  %v18424_v36 = vld [vmem:[#allocation151_spill] sm:$0xff]  ;;  %v18425_v39 = vld [vmem:[#allocation118_spill] sm:$0xff]  ;;  %v8466_v30 = vadd.f32 %v15090_v26, %v8425_v12 }
 0xec8   :  { %10181 = vmatprep.subr.mxu0 %v18371_v58  ;;  %10215 = vmatpush3.msra.mxu1 %v18372_v23  ;;  %v18426_v33 = vld [vmem:[#allocation135_spill] sm:$0xff] }
 0xec9   :  { %10182 = vmatpush3.msra.mxu0 %v18373_v55  ;;  %10216 = vmatprep.subr.mxu1 %v18374_v41  ;;  %v18427_v55 = vld [vmem:[#allocation102_spill] sm:$0xff] }
 0xeca   :  { %10183 = vmatprep.subr.mxu0 %v18375_v1  ;;  %10217 = vmatpush3.msra.mxu1 %v18376_v2  ;;  %v18428_v41 = vld [vmem:[#allocation150_spill] sm:$0xff] }
 0xecb   :  { %10184 = vmatpush3.msra.mxu0 %v18377_v19  ;;  %10218 = vmatprep.subr.mxu1 %v18378_v51  ;;  %v18429_v2 = vld [vmem:[#allocation134_spill] sm:$0xff] }
 0xecc   :  { %10185 = vmatprep.subr.mxu0 %v18379_v50  ;;  %10219 = vmatpush3.msra.mxu1 %v18380_v32 }
 0xecd   :  { %10186 = vmatpush3.msra.mxu0 %v18381_v38  ;;  %10220 = vmatprep.subr.mxu1 %v18382_v37 }
 0xece   :  { %10187 = vmatprep.subr.mxu0 %v18383_v31  ;;  %10221 = vmatpush3.msra.mxu1 %v18384_v52 }
 0xecf   :  { %10188 = vmatpush3.msra.mxu0 %v18385_v57  ;;  %10222 = vmatprep.subr.mxu1 %v18386_v28 }
 0xed0   :  { %10189 = vmatprep.subr.mxu0 %v18387_v8  ;;  %10223 = vmatpush3.msra.mxu1 %v18388_v42 }
 0xed1   :  { %10190 = vmatpush3.msra.mxu0 %v18389_v59  ;;  %10224 = vmatprep.subr.mxu1 %v18390_v25 }
 0xed2   :  { %10191 = vmatprep.subr.mxu0 %v18391_v34  ;;  %10225 = vmatpush3.msra.mxu1 %v18392_v16 }
 0xed3   :  { %10192 = vmatpush3.msra.mxu0 %v18393_v43  ;;  %10226 = vmatprep.subr.mxu1 %v18394_v49  ;;  %v18430_v43 = vld [vmem:[#allocation167_spill] sm:$0xff] }
 0xed4   :  { %10193 = vmatprep.subr.mxu0 %v18395_v14  ;;  %10227 = vmatpush3.msra.mxu1 %v18396_v29  ;;  %v18431_v14 = vld [vmem:[#allocation681_spill] sm:$0xff] }
 0xed5   :  { %10194 = vmatpush3.msra.mxu0 %v18397_v4  ;;  %10228 = vmatprep.subr.mxu1 %v18398_v9 }
 0xed6   :  { %10195 = vmatprep.subr.mxu0 %v18399_v10  ;;  %10229 = vmatpush3.msra.mxu1 %v18400_v3 }
 0xed7   :  { %10196 = vmatpush3.msra.mxu0 %v18401_v21  ;;  %10230 = vmatprep.subr.mxu1 %v18402_v22 }
 0xed8   :  { %10197 = vmatprep.subr.mxu0 %v18403_v15  ;;  %10231 = vmatpush3.msra.mxu1 %v18404_v44 }
 0xed9   :  { %10198 = vmatpush3.msra.mxu0 %v18405_v45  ;;  %10232 = vmatprep.subr.mxu1 %v18406_v20 }
 0xeda   :  { %10199 = vmatprep.subr.mxu0 %v18407_v53  ;;  %10233 = vmatpush3.msra.mxu1 %v18408_v54 }
 0xedb   :  { %10200 = vmatpush3.msra.mxu0 %v18409_v11  ;;  %10234 = vmatprep.subr.mxu1 %v18410_v35 }
 0xedc   :  { %10201 = vmatprep.subr.mxu0 %v18411_v0  ;;  %10235 = vmatpush3.msra.mxu1 %v18412_v61 }
 0xedd   :  { %10202 = vmatpush3.msra.mxu0 %v18414_v27  ;;  %10236 = vmatprep.subr.mxu1 %v18415_v46 }
 0xede   :  { %10203 = vmatprep.subr.mxu0 %v18416_v48  ;;  %10237 = vmatpush3.msra.mxu1 %v18417_v40 }
 0xedf   :  { %10204 = vmatpush3.msra.mxu0 %v18419_v24  ;;  %10238 = vmatprep.subr.mxu1 %v18420_v56 }
 0xee0   :  { %10205 = vmatprep.subr.mxu0 %v18421_v60  ;;  %10239 = vmatpush3.msra.mxu1 %v18422_v5 }
 0xee1   :  { %10206 = vmatpush3.msra.mxu0 %v18423_v13  ;;  %10240 = vmatprep.subr.mxu1 %v18424_v36  ;;  %v18432_v36 = vld [vmem:[#allocation501_spill] sm:$0xff] }
 0xee2   :  { %v8504_v6 = vpop.f32.mrf.mxu0  ;;  %10207 = vmatprep.subr.mxu0 %v18425_v39  ;;  %10241 = vmatpush3.msra.mxu1 %v18426_v33  ;;  %v18433_v33 = vld [vmem:[#allocation166_spill] sm:$0xff] }
 0xee3   :  { %v8505_v58 = vadd.f32 %v8504_v6, %v8464_v62  ;;  %v8545_v23 = vpop.f32.mrf.mxu1  ;;  %10208 = vmatpush3.msra.mxu0 %v18427_v55  ;;  %10242 = vmatprep.subr.mxu1 %v18428_v41 }
 0xee4   :  { %v8506_v1 = vpop.f32.mrf.mxu0  ;;  %10243 = vmatpush3.msra.mxu1 %v18429_v2  ;;  %9006 = vrot.lane.b32.xlu0 %v18430_v43, %s10775_s12 }
 0xee5   :  { %v8507_v17 = vadd.f32 %v8506_v1, %v8466_v30  ;;  %v8547_v19 = vpop.f32.mrf.mxu1  ;;  %v8546_v51 = vadd.f32 %v8545_v23, %v8505_v58 }
 0xee6   :  { %v8508_v50 = vpop.f32.mrf.mxu0 }
 0xee7   :  { %v8548_v32 = vadd.f32 %v8547_v19, %v8507_v17  ;;  %v8549_v38 = vpop.f32.mrf.mxu1  ;;  %v8720_v57 = vmax.f32 %v8546_v51, 0.0 }
 0xee8   :  { %v8509_v37 = vpop.f32.mrf.mxu0 }
 0xee9   :  { %v8721_v31 = vmax.f32 %v8548_v32, 0.0  ;;  %v8550_v52 = vpop.f32.mrf.mxu1 }
 0xeeb   :  { %8928 = vmatprep.mubr.f32.mxu0 %v8721_v31 }
 0xeec   :  { %8929 = vmatmul.mubr.f32.vlgmr.msra.gmra.mxu0 %v8720_v57 }
 0xf22   :  { %v8586_v26 = vpop.f32.mrf.mxu0 }
 0xf23   :  { %v8627_v28 = vpop.f32.mrf.mxu1  ;;  %v8587_v49 = vadd.f32 %v8586_v26, %v17806_v7 }
 0xf24   :  { %v8588_v8 = vpop.f32.mrf.mxu0 }
 0xf25   :  { %v8629_v42 = vpop.f32.mrf.mxu1  ;;  %v8589_v29 = vadd.f32 %v8588_v8, %v18431_v14  ;;  %v8628_v4 = vadd.f32 %v8627_v28, %v8587_v49 }
 0xf26   :  { %v8590_v59 = vpop.f32.mrf.mxu0 }
 0xf27   :  { %v8631_v25 = vpop.f32.mrf.mxu1  ;;  %v8630_v10 = vadd.f32 %v8629_v42, %v8589_v29 }
 0xf28   :  { %v8591_v34 = vpop.f32.mrf.mxu0 }
 0xf29   :  { %v8632_v16 = vpop.f32.mrf.mxu1 }
 0xf56   :  { %v9007_v39 = vpop.permute.xlu0 %9006 }
 0xf62   :  { %v8668_v9 = vpop.f32.mrf.mxu0 }
 0xf63   :  { %v8669_v3 = vadd.f32 %v8668_v9, %v8628_v4  ;;  %v8709_v21 = vpop.f32.mrf.mxu1 }
 0xf64   :  { %v8670_v22 = vpop.f32.mrf.mxu0 }
 0xf65   :  { %v8671_v15 = vadd.f32 %v8670_v22, %v8630_v10  ;;  %v8711_v44 = vpop.f32.mrf.mxu1  ;;  %v8710_v45 = vadd.f32 %v8709_v21, %v8669_v3 }
 0xf66   :  { %v8672_v20 = vpop.f32.mrf.mxu0 }
 0xf67   :  { %v8712_v53 = vadd.f32 %v8711_v44, %v8671_v15  ;;  %v8713_v54 = vpop.f32.mrf.mxu1  ;;  %v8722_v61 = vmax.f32 %v8710_v45, 0.0 }
 0xf68   :  { %v8673_v11 = vpop.f32.mrf.mxu0 }
 0xf69   :  { %v8723_v35 = vmax.f32 %v8712_v53, 0.0  ;;  %v8714_v0 = vpop.f32.mrf.mxu1 }
 0xf6b   :  { %8998 = vmatprep.mubr.f32.mxu1 %v8723_v35 }
 0xf6c   :  { %8999 = vmatmul.mubr.f32.vlgmr.msra.gmra.mxu1 %v8722_v61 }
 0xf83   :  { %v10139_v7 = vpop.f32.mrf.mxu0 }
 0xf84   :  { %v10174_v47 = vpop.f32.mrf.mxu1 }
 0xf85   :  { %v10140_v18 = vpop.f32.mrf.mxu0 }
 0xf86   :  { %v10175_v46 = vpop.f32.mrf.mxu1  ;;  %v10141_v40 = vadd.f32 %v10140_v18, %v10139_v7 }
 0xf87   :  { %v10176_v63 = vadd.f32 %v10175_v46, %v10174_v47 }
 0xf89   :  { %v8861_v56 = vadd.f32 %v10176_v63, %v10141_v40 }
 0xfac   :  { %v10209_v27 = vpop.f32.mrf.mxu0 }
 0xfae   :  { %v10210_v48 = vpop.f32.mrf.mxu0 }
 0xfaf   :  { %v10211_v12 = vadd.f32 %v10210_v48, %v10209_v27 }
 0xfb1   :  { %v8931_v5 = vadd.f32 %v10211_v12, %v8861_v56 }
0x102c   :  { %v10244_v24 = vpop.f32.mrf.mxu1 }
0x102e   :  { %v10245_v60 = vpop.f32.mrf.mxu1 }
0x102f   :  { %v10246_v62 = vadd.f32 %v10245_v60, %v10244_v24 }
0x1031   :  { %v9001_v13 = vadd.f32 %v10246_v62, %v8931_v5 }
0x1033   :  { %v9004_v6 = vadd.f32 %v9001_v13, %v18432_v36 }
0x1035   :  { %v9005_v30 = vadd.f32 %v18433_v33, %v9004_v6 }
0x1037   :  { %v9009_v58 = vsel %vm2111_vm1, %v9005_v30, %v9007_v39 }
0x1038   :  { %v9011_v23 = vsel %vm9010_vm2, %v9009_v58, 0.0 }
0x1039   :  { %9013 = vst.msk [vmem:[#allocation22] sm:$0xff] %vm9012_vm3, %v9011_v23 }
0x103a   :  { %10732 = shalt.err (!%p10729_p8)
}
0x103b   :  { %9023 = dma.vmem_to_hbm [thread:$0]  %s9021_s22, 128, %s15247_s14, [#allocation7]  }
0x103c   :  { %10757 = dma.done.wait [#allocation7], 128  }
0x103d   :  { %10758 = vsyncadd [#allocation7], 4294967168 }
0x103e   :  { %9027 = vsyncpa [#allocation6], 1 }
0x103f   :  { %9028 = vsyncpa [#allocation9], 1 }
0x1040   :  { %9029 = vsyncpa [#allocation12], 1 }
0x1041   :  { %9030 = vsyncpa [#allocation15], 1 }
0x1042   :  { %9031 = vsyncpa [#allocation18], 1 }
0x1043   :  { %9032 = vsyncpa [#allocation21], 1 }
0x1044   :  { %9033 = vsyncpa [#allocation7], 1 }
0x1045   :  { %9034 = vsyncmov [#allocation4] }
0x1048   :  { %s9035_s10 = vpop.sfrf %9034 }
0x1049   :  { %p9755_p9 = scmp.ne.s32.totalorder %s9035_s10, 0 }
0x104b   :  { %9039 = shalt.err (%p9755_p9)  }
0x104c   :  { %9041 = vsyncmov [#allocation4 + $0x1] }
0x104f   :  { %s9042_s24 = vpop.sfrf %9041 }
0x1050   :  { %p9756_p10 = scmp.ne.s32.totalorder %s9042_s24, 0 }
0x1052   :  { %9046 = shalt.err (%p9756_p10)  }

</bundles_post_ra>
